<compile_context>
chip_gen: v7x
topology: tpu7x:2x2x1
jax: 0.10.0
libtpu: 0.0.40
codegen_flags: <defaults>
</compile_context>

<pallas_src>
import jax
import jax.numpy as jnp
from jax import lax
from jax.experimental import pallas as pl
from jax.experimental.pallas import tpu as pltpu

# ---- SimpleCNN dimensions (38x38 input is forced by fc1 = Linear(16*19*19, 64)) ----
B = 2
CIN, COUT = 3, 16
H = W = 38                 # conv output spatial (padding=1, stride=1)
PH = PW = 19               # after 2x2/2 max pool
HIDDEN = 64
FEAT = COUT * PH * PW      # 5776
K9 = 9 * CIN               # 27 im2col rows
POOL = PH * PW             # 361 pooled pixels per (batch, channel)
SEG = 384                  # POOL padded to a multiple of 128 -> lane-aligned slices
BLK = B * SEG              # 768 lanes per pooling-window tap
NCOL = 4 * BLK             # 3072: conv GEMM N dimension (lane dense, 128-aligned)


def _full_spec(shape):
    # one grid step, block == full array
    return pl.BlockSpec(shape, lambda i: (0,) * len(shape))


# ---------------- fused kernel ----------------

def fused_cnn_kernel(cols_ref, wc_ref, bc_ref, b1_ref, w2_ref, b2_ref, w1_hbm,
                     out_ref, conv_buf, w1_vmem, dma_sem):
    # Kick off the fc1 weight DMA (largest transfer, ~1.48 MB) so it overlaps conv+pool.
    w1_copy = pltpu.make_async_copy(w1_hbm, w1_vmem, dma_sem)
    w1_copy.start()

    # conv1 as a lane-dense transposed GEMM: (COUT,27) @ (27,NCOL) -> (COUT,NCOL)
    y = jnp.dot(wc_ref[...], cols_ref[...], preferred_element_type=jnp.float32)
    conv_buf[...] = jnp.maximum(y + bc_ref[...], 0.0)          # bias (COUT,1) + ReLU

    # 2x2/2 max-pool: host ordered columns as (tap, batch, pixel), so the four window
    # taps are contiguous, 128-aligned lane blocks of width BLK.
    pooled = jnp.maximum(
        jnp.maximum(conv_buf[:, 0 * BLK:1 * BLK], conv_buf[:, 1 * BLK:2 * BLK]),
        jnp.maximum(conv_buf[:, 2 * BLK:3 * BLK], conv_buf[:, 3 * BLK:4 * BLK]))
    # pooled: (COUT, B*SEG); lane index = b*SEG + i*19 + j   (SEG tail is padding)

    # fc1 (+bias+ReLU): torch flatten order is c*361 + i*19 + j, which matches w1
    # reshaped to (COUT, 361, HIDDEN); accumulate one small GEMM per conv channel.
    w1_copy.wait()
    h = jnp.zeros((B, HIDDEN), jnp.float32)
    for c in range(COUT):
        x_c = jnp.concatenate(
            [pooled[c:c + 1, b * SEG:b * SEG + POOL] for b in range(B)], axis=0)
        h = h + jnp.dot(x_c, w1_vmem[c], preferred_element_type=jnp.float32)
    h = jnp.maximum(h + b1_ref[...], 0.0)

    # fc2 (N=1) as a VPU multiply + lane reduction (skip a 64x1 MXU pass).
    out_ref[...] = jnp.sum(h * w2_ref[...], axis=-1, keepdims=True) + b2_ref[...]


def fused_cnn_forward(cols_t, wc_t, bc_col, b1_row, w2_row, b2_sq, w1_r):
    return pl.pallas_call(
        fused_cnn_kernel,
        grid=(1,),
        in_specs=[
            _full_spec(cols_t.shape),
            _full_spec(wc_t.shape),
            _full_spec(bc_col.shape),
            _full_spec(b1_row.shape),
            _full_spec(w2_row.shape),
            _full_spec(b2_sq.shape),
            pl.BlockSpec(memory_space=pl.ANY),      # fc1 weight stays in HBM; manual DMA
        ],
        out_specs=_full_spec((B, 1)),
        out_shape=jax.ShapeDtypeStruct((B, 1), jnp.float32),
        scratch_shapes=[
            pltpu.VMEM((COUT, NCOL), jnp.float32),          # conv+ReLU result
            pltpu.VMEM((COUT, POOL, HIDDEN), jnp.float32),  # fc1 weight staging
            pltpu.SemaphoreType.DMA,
        ],
        compiler_params=pltpu.CompilerParams(
            dimension_semantics=("arbitrary",)),
    )(cols_t, wc_t, bc_col, b1_row, w2_row, b2_sq, w1_r)


# ---------------- forward pass (glue + fused kernel) ----------------

@jax.jit
def simple_cnn_forward(x_nchw, w_conv, b_conv, w1, b1, w2, b2):
    # ---- parameter prep (weight-only, tiny) ----
    wc_t = jnp.transpose(w_conv, (0, 2, 3, 1)).reshape(COUT, K9)   # k = (ky*3+kx)*3+ci
    bc_col = b_conv.reshape(COUT, 1)
    w1_r = w1.reshape(COUT, POOL, HIDDEN)      # rows already in torch flatten order
    b1_row = b1.reshape(1, HIDDEN)
    w2_row = w2.reshape(1, HIDDEN)
    b2_sq = b2.reshape(1, 1)

    # ---- im2col glue with a pool/flatten-friendly column ordering ----
    x = jnp.transpose(x_nchw, (0, 2, 3, 1))                        # NCHW -> NHWC
    xp = jnp.pad(x, ((0, 0), (1, 1), (1, 1), (0, 0)))              # padding=1
    patches = [xp[:, ky:ky + H, kx:kx + W, :] for ky in range(3) for kx in range(3)]
    cols = jnp.concatenate(patches, axis=-1)                       # (B, 38, 38, 27)
    cols = cols.reshape(B, PH, 2, PW, 2, K9)                       # (b, i, r, j, s, k)
    cols = jnp.transpose(cols, (5, 2, 4, 0, 1, 3))                 # (k, r, s, b, i, j)
    cols = cols.reshape(K9, 2, 2, B, POOL)
    cols = jnp.pad(cols, ((0, 0), (0, 0), (0, 0), (0, 0), (0, SEG - POOL)))
    cols_t = cols.reshape(K9, NCOL)                                # (27, 3072)

    return fused_cnn_forward(cols_t, wc_t, bc_col, b1_row, w2_row, b2_sq, w1_r)


def reference_forward(x_nchw, w_conv, b_conv, w1, b1, w2, b2):
    # plain-JAX reference of the PyTorch module (numeric self-check)
    y = lax.conv_general_dilated(x_nchw, w_conv, window_strides=(1, 1),
                                 padding=((1, 1), (1, 1)),
                                 dimension_numbers=("NCHW", "OIHW", "NCHW"))
    y = jnp.maximum(y + b_conv[None, :, None, None], 0.0)
    y = lax.reduce_window(y, -jnp.inf, lax.max, (1, 1, 2, 2), (1, 1, 2, 2), "VALID")
    flat = y.reshape(y.shape[0], -1)
    h = jnp.maximum(flat @ w1 + b1, 0.0)
    return h @ w2 + b2


if __name__ == "__main__":
    key = jax.random.PRNGKey(0)
    kx, k1, k2, k3, k4, k5, k6 = jax.random.split(key, 7)

    # deterministic synthetic parameters (shapes per SimpleCNN.__init__)
    w_conv = jax.random.normal(k1, (COUT, CIN, 3, 3), jnp.float32) * 0.1   # conv1.weight
    b_conv = jax.random.normal(k2, (COUT,), jnp.float32) * 0.1             # conv1.bias
    w1 = jax.random.normal(k3, (FEAT, HIDDEN), jnp.float32) * 0.02         # fc1.weight^T
    b1 = jax.random.normal(k4, (HIDDEN,), jnp.float32) * 0.02              # fc1.bias
    w2 = jax.random.normal(k5, (HIDDEN, 1), jnp.float32) * 0.1             # fc2.weight^T
    b2 = jax.random.normal(k6, (1,), jnp.float32) * 0.1                    # fc2.bias

    # input (B, 3, 38, 38): 38x38 is required by fc1 = Linear(16*19*19, 64)
    x = jax.random.normal(kx, (B, CIN, H, W), jnp.float32)

    out = simple_cnn_forward(x, w_conv, b_conv, w1, b1, w2, b2)
    jax.block_until_ready(out)
    assert out.shape == (B, 1) and out.dtype == jnp.float32

    ref = reference_forward(x, w_conv, b_conv, w1, b1, w2, b2)
    err = float(jnp.max(jnp.abs(out - ref)))
    assert err < 1e-2, f"max abs err {err}"
    print("KERNEL_OK")
</pallas_src>

<mosaic_0001>
module attributes {stable_mosaic.version = 11 : i64} {
  func.func @fused_cnn_kernel(%arg0: i32, %arg1: memref<27x3072xf32, #tpu.memory_space<vmem>>, %arg2: memref<16x27xf32, #tpu.memory_space<vmem>>, %arg3: memref<16x1xf32, #tpu.memory_space<vmem>>, %arg4: memref<1x64xf32, #tpu.memory_space<vmem>>, %arg5: memref<1x64xf32, #tpu.memory_space<vmem>>, %arg6: memref<1x1xf32, #tpu.memory_space<vmem>>, %arg7: memref<16x361x64xf32, #tpu.memory_space<any>>, %arg8: memref<2x1xf32, #tpu.memory_space<vmem>>, %arg9: memref<16x3072xf32, #tpu.memory_space<vmem>>, %arg10: memref<16x361x64xf32, #tpu.memory_space<vmem>>, %arg11: memref<!tpu.dma_semaphore, #tpu.memory_space<semaphore_mem>>) attributes {dimension_semantics = [#tpu.dimension_semantics<arbitrary>], iteration_bounds = array<i64: 1>, scalar_prefetch = 0 : i64, scratch_operands = 3 : i64, tpu.core_type = #tpu.core_type<tc>, window_params = [{pipeline_mode = #tpu.pipeline_mode<synchronous>, transform_indices = @transform_0, window_bounds = array<i64: 27, 3072>}, {pipeline_mode = #tpu.pipeline_mode<synchronous>, transform_indices = @transform_1, window_bounds = array<i64: 16, 27>}, {pipeline_mode = #tpu.pipeline_mode<synchronous>, transform_indices = @transform_2, window_bounds = array<i64: 16, 1>}, {pipeline_mode = #tpu.pipeline_mode<synchronous>, transform_indices = @transform_3, window_bounds = array<i64: 1, 64>}, {pipeline_mode = #tpu.pipeline_mode<synchronous>, transform_indices = @transform_4, window_bounds = array<i64: 1, 64>}, {pipeline_mode = #tpu.pipeline_mode<synchronous>, transform_indices = @transform_5, window_bounds = array<i64: 1, 1>}, {}, {pipeline_mode = #tpu.pipeline_mode<synchronous>, transform_indices = @transform_7, window_bounds = array<i64: 2, 1>}]} {
    tpu.enqueue_dma source(%arg7 : memref<16x361x64xf32, #tpu.memory_space<any>>) target(%arg10 : memref<16x361x64xf32, #tpu.memory_space<vmem>>) target_semaphore(%arg11 : memref<!tpu.dma_semaphore, #tpu.memory_space<semaphore_mem>>)
    %c0 = arith.constant 0 : index
    %c0_0 = arith.constant 0 : index
    %0 = vector.load %arg2[%c0, %c0_0] : memref<16x27xf32, #tpu.memory_space<vmem>>, vector<16x27xf32>
    %c0_1 = arith.constant 0 : index
    %c0_2 = arith.constant 0 : index
    %1 = vector.load %arg1[%c0_1, %c0_2] : memref<27x3072xf32, #tpu.memory_space<vmem>>, vector<27x3072xf32>
    %cst = arith.constant dense<0.000000e+00> : vector<16x3072xf32>
    %2 = tpu.matmul %0, %1, %cst {dimension_numbers = #tpu.dot_dimension_numbers<[1], [0], [0], [1], [0, 0, 1, 1], [], []>} : vector<16x27xf32>, vector<27x3072xf32>, vector<16x3072xf32> -> vector<16x3072xf32>
    %c0_3 = arith.constant 0 : index
    %c0_4 = arith.constant 0 : index
    %3 = vector.load %arg3[%c0_3, %c0_4] : memref<16x1xf32, #tpu.memory_space<vmem>>, vector<16x1xf32>
    %4 = vector.broadcast %3 : vector<16x1xf32> to vector<16x3072xf32>
    %5 = arith.addf %2, %4 : vector<16x3072xf32>
    %cst_5 = arith.constant 0.000000e+00 : f32
    %6 = vector.broadcast %cst_5 : f32 to vector<16x3072xf32>
    %7 = arith.maximumf %5, %6 : vector<16x3072xf32>
    %c0_6 = arith.constant 0 : index
    %c0_7 = arith.constant 0 : index
    %8 = vector.load %arg9[%c0_6, %c0_7] : memref<16x3072xf32, #tpu.memory_space<vmem>>, vector<16x3072xf32>
    tpu.vector_store %arg9[%c0_6, %c0_7], %7 {strides = array<i32>} : memref<16x3072xf32, #tpu.memory_space<vmem>>, vector<16x3072xf32>,
    %c0_8 = arith.constant 0 : index
    %c0_9 = arith.constant 0 : index
    %9 = vector.load %arg9[%c0_8, %c0_9] : memref<16x3072xf32, #tpu.memory_space<vmem>>, vector<16x768xf32>
    %c0_10 = arith.constant 0 : index
    %c768 = arith.constant 768 : index
    %10 = vector.load %arg9[%c0_10, %c768] : memref<16x3072xf32, #tpu.memory_space<vmem>>, vector<16x768xf32>
    %11 = arith.maximumf %9, %10 : vector<16x768xf32>
    %c0_11 = arith.constant 0 : index
    %c1536 = arith.constant 1536 : index
    %12 = vector.load %arg9[%c0_11, %c1536] : memref<16x3072xf32, #tpu.memory_space<vmem>>, vector<16x768xf32>
    %c0_12 = arith.constant 0 : index
    %c2304 = arith.constant 2304 : index
    %13 = vector.load %arg9[%c0_12, %c2304] : memref<16x3072xf32, #tpu.memory_space<vmem>>, vector<16x768xf32>
    %14 = arith.maximumf %12, %13 : vector<16x768xf32>
    %15 = arith.maximumf %11, %14 : vector<16x768xf32>
    tpu.wait_dma2 semaphore(%arg11 : memref<!tpu.dma_semaphore, #tpu.memory_space<semaphore_mem>>) src(%arg7 : memref<16x361x64xf32, #tpu.memory_space<any>>) dst(%arg10 : memref<16x361x64xf32, #tpu.memory_space<vmem>>)
    %cst_13 = arith.constant 0.000000e+00 : f32
    %16 = vector.broadcast %cst_13 : f32 to vector<2x64xf32>
    %17 = vector.extract_strided_slice %15 {offsets = [0, 0], sizes = [1, 361], strides = [1, 1]} : vector<16x768xf32> to vector<1x361xf32>
    %18 = vector.extract_strided_slice %15 {offsets = [0, 384], sizes = [1, 361], strides = [1, 1]} : vector<16x768xf32> to vector<1x361xf32>
    %19 = tpu.concatenate %17, %18 in 0 : vector<1x361xf32>, vector<1x361xf32> -> vector<2x361xf32>
    %c0_14 = arith.constant 0 : index
    %c0_15 = arith.constant 0 : index
    %c0_16 = arith.constant 0 : index
    %20 = vector.load %arg10[%c0_14, %c0_15, %c0_16] : memref<16x361x64xf32, #tpu.memory_space<vmem>>, vector<1x361x64xf32>
    %21 = vector.shape_cast %20 : vector<1x361x64xf32> to vector<361x64xf32>
    %cst_17 = arith.constant dense<0.000000e+00> : vector<2x64xf32>
    %22 = tpu.matmul %19, %21, %cst_17 {dimension_numbers = #tpu.dot_dimension_numbers<[1], [0], [0], [1], [0, 0, 1, 1], [], []>} : vector<2x361xf32>, vector<361x64xf32>, vector<2x64xf32> -> vector<2x64xf32>
    %23 = arith.addf %16, %22 : vector<2x64xf32>
    %24 = vector.extract_strided_slice %15 {offsets = [1, 0], sizes = [1, 361], strides = [1, 1]} : vector<16x768xf32> to vector<1x361xf32>
    %25 = vector.extract_strided_slice %15 {offsets = [1, 384], sizes = [1, 361], strides = [1, 1]} : vector<16x768xf32> to vector<1x361xf32>
    %26 = tpu.concatenate %24, %25 in 0 : vector<1x361xf32>, vector<1x361xf32> -> vector<2x361xf32>
    %c1 = arith.constant 1 : index
    %c0_18 = arith.constant 0 : index
    %c0_19 = arith.constant 0 : index
    %27 = vector.load %arg10[%c1, %c0_18, %c0_19] : memref<16x361x64xf32, #tpu.memory_space<vmem>>, vector<1x361x64xf32>
    %28 = vector.shape_cast %27 : vector<1x361x64xf32> to vector<361x64xf32>
    %cst_20 = arith.constant dense<0.000000e+00> : vector<2x64xf32>
    %29 = tpu.matmul %26, %28, %cst_20 {dimension_numbers = #tpu.dot_dimension_numbers<[1], [0], [0], [1], [0, 0, 1, 1], [], []>} : vector<2x361xf32>, vector<361x64xf32>, vector<2x64xf32> -> vector<2x64xf32>
    %30 = arith.addf %23, %29 : vector<2x64xf32>
    %31 = vector.extract_strided_slice %15 {offsets = [2, 0], sizes = [1, 361], strides = [1, 1]} : vector<16x768xf32> to vector<1x361xf32>
    %32 = vector.extract_strided_slice %15 {offsets = [2, 384], sizes = [1, 361], strides = [1, 1]} : vector<16x768xf32> to vector<1x361xf32>
    %33 = tpu.concatenate %31, %32 in 0 : vector<1x361xf32>, vector<1x361xf32> -> vector<2x361xf32>
    %c2 = arith.constant 2 : index
    %c0_21 = arith.constant 0 : index
    %c0_22 = arith.constant 0 : index
    %34 = vector.load %arg10[%c2, %c0_21, %c0_22] : memref<16x361x64xf32, #tpu.memory_space<vmem>>, vector<1x361x64xf32>
    %35 = vector.shape_cast %34 : vector<1x361x64xf32> to vector<361x64xf32>
    %cst_23 = arith.constant dense<0.000000e+00> : vector<2x64xf32>
    %36 = tpu.matmul %33, %35, %cst_23 {dimension_numbers = #tpu.dot_dimension_numbers<[1], [0], [0], [1], [0, 0, 1, 1], [], []>} : vector<2x361xf32>, vector<361x64xf32>, vector<2x64xf32> -> vector<2x64xf32>
    %37 = arith.addf %30, %36 : vector<2x64xf32>
    %38 = vector.extract_strided_slice %15 {offsets = [3, 0], sizes = [1, 361], strides = [1, 1]} : vector<16x768xf32> to vector<1x361xf32>
    %39 = vector.extract_strided_slice %15 {offsets = [3, 384], sizes = [1, 361], strides = [1, 1]} : vector<16x768xf32> to vector<1x361xf32>
    %40 = tpu.concatenate %38, %39 in 0 : vector<1x361xf32>, vector<1x361xf32> -> vector<2x361xf32>
    %c3 = arith.constant 3 : index
    %c0_24 = arith.constant 0 : index
    %c0_25 = arith.constant 0 : index
    %41 = vector.load %arg10[%c3, %c0_24, %c0_25] : memref<16x361x64xf32, #tpu.memory_space<vmem>>, vector<1x361x64xf32>
    %42 = vector.shape_cast %41 : vector<1x361x64xf32> to vector<361x64xf32>
    %cst_26 = arith.constant dense<0.000000e+00> : vector<2x64xf32>
    %43 = tpu.matmul %40, %42, %cst_26 {dimension_numbers = #tpu.dot_dimension_numbers<[1], [0], [0], [1], [0, 0, 1, 1], [], []>} : vector<2x361xf32>, vector<361x64xf32>, vector<2x64xf32> -> vector<2x64xf32>
    %44 = arith.addf %37, %43 : vector<2x64xf32>
    %45 = vector.extract_strided_slice %15 {offsets = [4, 0], sizes = [1, 361], strides = [1, 1]} : vector<16x768xf32> to vector<1x361xf32>
    %46 = vector.extract_strided_slice %15 {offsets = [4, 384], sizes = [1, 361], strides = [1, 1]} : vector<16x768xf32> to vector<1x361xf32>
    %47 = tpu.concatenate %45, %46 in 0 : vector<1x361xf32>, vector<1x361xf32> -> vector<2x361xf32>
    %c4 = arith.constant 4 : index
    %c0_27 = arith.constant 0 : index
    %c0_28 = arith.constant 0 : index
    %48 = vector.load %arg10[%c4, %c0_27, %c0_28] : memref<16x361x64xf32, #tpu.memory_space<vmem>>, vector<1x361x64xf32>
    %49 = vector.shape_cast %48 : vector<1x361x64xf32> to vector<361x64xf32>
    %cst_29 = arith.constant dense<0.000000e+00> : vector<2x64xf32>
    %50 = tpu.matmul %47, %49, %cst_29 {dimension_numbers = #tpu.dot_dimension_numbers<[1], [0], [0], [1], [0, 0, 1, 1], [], []>} : vector<2x361xf32>, vector<361x64xf32>, vector<2x64xf32> -> vector<2x64xf32>
    %51 = arith.addf %44, %50 : vector<2x64xf32>
    %52 = vector.extract_strided_slice %15 {offsets = [5, 0], sizes = [1, 361], strides = [1, 1]} : vector<16x768xf32> to vector<1x361xf32>
    %53 = vector.extract_strided_slice %15 {offsets = [5, 384], sizes = [1, 361], strides = [1, 1]} : vector<16x768xf32> to vector<1x361xf32>
    %54 = tpu.concatenate %52, %53 in 0 : vector<1x361xf32>, vector<1x361xf32> -> vector<2x361xf32>
    %c5 = arith.constant 5 : index
    %c0_30 = arith.constant 0 : index
    %c0_31 = arith.constant 0 : index
    %55 = vector.load %arg10[%c5, %c0_30, %c0_31] : memref<16x361x64xf32, #tpu.memory_space<vmem>>, vector<1x361x64xf32>
    %56 = vector.shape_cast %55 : vector<1x361x64xf32> to vector<361x64xf32>
    %cst_32 = arith.constant dense<0.000000e+00> : vector<2x64xf32>
    %57 = tpu.matmul %54, %56, %cst_32 {dimension_numbers = #tpu.dot_dimension_numbers<[1], [0], [0], [1], [0, 0, 1, 1], [], []>} : vector<2x361xf32>, vector<361x64xf32>, vector<2x64xf32> -> vector<2x64xf32>
    %58 = arith.addf %51, %57 : vector<2x64xf32>
    %59 = vector.extract_strided_slice %15 {offsets = [6, 0], sizes = [1, 361], strides = [1, 1]} : vector<16x768xf32> to vector<1x361xf32>
    %60 = vector.extract_strided_slice %15 {offsets = [6, 384], sizes = [1, 361], strides = [1, 1]} : vector<16x768xf32> to vector<1x361xf32>
    %61 = tpu.concatenate %59, %60 in 0 : vector<1x361xf32>, vector<1x361xf32> -> vector<2x361xf32>
    %c6 = arith.constant 6 : index
    %c0_33 = arith.constant 0 : index
    %c0_34 = arith.constant 0 : index
    %62 = vector.load %arg10[%c6, %c0_33, %c0_34] : memref<16x361x64xf32, #tpu.memory_space<vmem>>, vector<1x361x64xf32>
    %63 = vector.shape_cast %62 : vector<1x361x64xf32> to vector<361x64xf32>
    %cst_35 = arith.constant dense<0.000000e+00> : vector<2x64xf32>
    %64 = tpu.matmul %61, %63, %cst_35 {dimension_numbers = #tpu.dot_dimension_numbers<[1], [0], [0], [1], [0, 0, 1, 1], [], []>} : vector<2x361xf32>, vector<361x64xf32>, vector<2x64xf32> -> vector<2x64xf32>
    %65 = arith.addf %58, %64 : vector<2x64xf32>
    %66 = vector.extract_strided_slice %15 {offsets = [7, 0], sizes = [1, 361], strides = [1, 1]} : vector<16x768xf32> to vector<1x361xf32>
    %67 = vector.extract_strided_slice %15 {offsets = [7, 384], sizes = [1, 361], strides = [1, 1]} : vector<16x768xf32> to vector<1x361xf32>
    %68 = tpu.concatenate %66, %67 in 0 : vector<1x361xf32>, vector<1x361xf32> -> vector<2x361xf32>
    %c7 = arith.constant 7 : index
    %c0_36 = arith.constant 0 : index
    %c0_37 = arith.constant 0 : index
    %69 = vector.load %arg10[%c7, %c0_36, %c0_37] : memref<16x361x64xf32, #tpu.memory_space<vmem>>, vector<1x361x64xf32>
    %70 = vector.shape_cast %69 : vector<1x361x64xf32> to vector<361x64xf32>
    %cst_38 = arith.constant dense<0.000000e+00> : vector<2x64xf32>
    %71 = tpu.matmul %68, %70, %cst_38 {dimension_numbers = #tpu.dot_dimension_numbers<[1], [0], [0], [1], [0, 0, 1, 1], [], []>} : vector<2x361xf32>, vector<361x64xf32>, vector<2x64xf32> -> vector<2x64xf32>
    %72 = arith.addf %65, %71 : vector<2x64xf32>
    %73 = vector.extract_strided_slice %15 {offsets = [8, 0], sizes = [1, 361], strides = [1, 1]} : vector<16x768xf32> to vector<1x361xf32>
    %74 = vector.extract_strided_slice %15 {offsets = [8, 384], sizes = [1, 361], strides = [1, 1]} : vector<16x768xf32> to vector<1x361xf32>
    %75 = tpu.concatenate %73, %74 in 0 : vector<1x361xf32>, vector<1x361xf32> -> vector<2x361xf32>
    %c8 = arith.constant 8 : index
    %c0_39 = arith.constant 0 : index
    %c0_40 = arith.constant 0 : index
    %76 = vector.load %arg10[%c8, %c0_39, %c0_40] : memref<16x361x64xf32, #tpu.memory_space<vmem>>, vector<1x361x64xf32>
    %77 = vector.shape_cast %76 : vector<1x361x64xf32> to vector<361x64xf32>
    %cst_41 = arith.constant dense<0.000000e+00> : vector<2x64xf32>
    %78 = tpu.matmul %75, %77, %cst_41 {dimension_numbers = #tpu.dot_dimension_numbers<[1], [0], [0], [1], [0, 0, 1, 1], [], []>} : vector<2x361xf32>, vector<361x64xf32>, vector<2x64xf32> -> vector<2x64xf32>
    %79 = arith.addf %72, %78 : vector<2x64xf32>
    %80 = vector.extract_strided_slice %15 {offsets = [9, 0], sizes = [1, 361], strides = [1, 1]} : vector<16x768xf32> to vector<1x361xf32>
    %81 = vector.extract_strided_slice %15 {offsets = [9, 384], sizes = [1, 361], strides = [1, 1]} : vector<16x768xf32> to vector<1x361xf32>
    %82 = tpu.concatenate %80, %81 in 0 : vector<1x361xf32>, vector<1x361xf32> -> vector<2x361xf32>
    %c9 = arith.constant 9 : index
    %c0_42 = arith.constant 0 : index
    %c0_43 = arith.constant 0 : index
    %83 = vector.load %arg10[%c9, %c0_42, %c0_43] : memref<16x361x64xf32, #tpu.memory_space<vmem>>, vector<1x361x64xf32>
    %84 = vector.shape_cast %83 : vector<1x361x64xf32> to vector<361x64xf32>
    %cst_44 = arith.constant dense<0.000000e+00> : vector<2x64xf32>
    %85 = tpu.matmul %82, %84, %cst_44 {dimension_numbers = #tpu.dot_dimension_numbers<[1], [0], [0], [1], [0, 0, 1, 1], [], []>} : vector<2x361xf32>, vector<361x64xf32>, vector<2x64xf32> -> vector<2x64xf32>
    %86 = arith.addf %79, %85 : vector<2x64xf32>
    %87 = vector.extract_strided_slice %15 {offsets = [10, 0], sizes = [1, 361], strides = [1, 1]} : vector<16x768xf32> to vector<1x361xf32>
    %88 = vector.extract_strided_slice %15 {offsets = [10, 384], sizes = [1, 361], strides = [1, 1]} : vector<16x768xf32> to vector<1x361xf32>
    %89 = tpu.concatenate %87, %88 in 0 : vector<1x361xf32>, vector<1x361xf32> -> vector<2x361xf32>
    %c10 = arith.constant 10 : index
    %c0_45 = arith.constant 0 : index
    %c0_46 = arith.constant 0 : index
    %90 = vector.load %arg10[%c10, %c0_45, %c0_46] : memref<16x361x64xf32, #tpu.memory_space<vmem>>, vector<1x361x64xf32>
    %91 = vector.shape_cast %90 : vector<1x361x64xf32> to vector<361x64xf32>
    %cst_47 = arith.constant dense<0.000000e+00> : vector<2x64xf32>
    %92 = tpu.matmul %89, %91, %cst_47 {dimension_numbers = #tpu.dot_dimension_numbers<[1], [0], [0], [1], [0, 0, 1, 1], [], []>} : vector<2x361xf32>, vector<361x64xf32>, vector<2x64xf32> -> vector<2x64xf32>
    %93 = arith.addf %86, %92 : vector<2x64xf32>
    %94 = vector.extract_strided_slice %15 {offsets = [11, 0], sizes = [1, 361], strides = [1, 1]} : vector<16x768xf32> to vector<1x361xf32>
    %95 = vector.extract_strided_slice %15 {offsets = [11, 384], sizes = [1, 361], strides = [1, 1]} : vector<16x768xf32> to vector<1x361xf32>
    %96 = tpu.concatenate %94, %95 in 0 : vector<1x361xf32>, vector<1x361xf32> -> vector<2x361xf32>
    %c11 = arith.constant 11 : index
    %c0_48 = arith.constant 0 : index
    %c0_49 = arith.constant 0 : index
    %97 = vector.load %arg10[%c11, %c0_48, %c0_49] : memref<16x361x64xf32, #tpu.memory_space<vmem>>, vector<1x361x64xf32>
    %98 = vector.shape_cast %97 : vector<1x361x64xf32> to vector<361x64xf32>
    %cst_50 = arith.constant dense<0.000000e+00> : vector<2x64xf32>
    %99 = tpu.matmul %96, %98, %cst_50 {dimension_numbers = #tpu.dot_dimension_numbers<[1], [0], [0], [1], [0, 0, 1, 1], [], []>} : vector<2x361xf32>, vector<361x64xf32>, vector<2x64xf32> -> vector<2x64xf32>
    %100 = arith.addf %93, %99 : vector<2x64xf32>
    %101 = vector.extract_strided_slice %15 {offsets = [12, 0], sizes = [1, 361], strides = [1, 1]} : vector<16x768xf32> to vector<1x361xf32>
    %102 = vector.extract_strided_slice %15 {offsets = [12, 384], sizes = [1, 361], strides = [1, 1]} : vector<16x768xf32> to vector<1x361xf32>
    %103 = tpu.concatenate %101, %102 in 0 : vector<1x361xf32>, vector<1x361xf32> -> vector<2x361xf32>
    %c12 = arith.constant 12 : index
    %c0_51 = arith.constant 0 : index
    %c0_52 = arith.constant 0 : index
    %104 = vector.load %arg10[%c12, %c0_51, %c0_52] : memref<16x361x64xf32, #tpu.memory_space<vmem>>, vector<1x361x64xf32>
    %105 = vector.shape_cast %104 : vector<1x361x64xf32> to vector<361x64xf32>
    %cst_53 = arith.constant dense<0.000000e+00> : vector<2x64xf32>
    %106 = tpu.matmul %103, %105, %cst_53 {dimension_numbers = #tpu.dot_dimension_numbers<[1], [0], [0], [1], [0, 0, 1, 1], [], []>} : vector<2x361xf32>, vector<361x64xf32>, vector<2x64xf32> -> vector<2x64xf32>
    %107 = arith.addf %100, %106 : vector<2x64xf32>
    %108 = vector.extract_strided_slice %15 {offsets = [13, 0], sizes = [1, 361], strides = [1, 1]} : vector<16x768xf32> to vector<1x361xf32>
    %109 = vector.extract_strided_slice %15 {offsets = [13, 384], sizes = [1, 361], strides = [1, 1]} : vector<16x768xf32> to vector<1x361xf32>
    %110 = tpu.concatenate %108, %109 in 0 : vector<1x361xf32>, vector<1x361xf32> -> vector<2x361xf32>
    %c13 = arith.constant 13 : index
    %c0_54 = arith.constant 0 : index
    %c0_55 = arith.constant 0 : index
    %111 = vector.load %arg10[%c13, %c0_54, %c0_55] : memref<16x361x64xf32, #tpu.memory_space<vmem>>, vector<1x361x64xf32>
    %112 = vector.shape_cast %111 : vector<1x361x64xf32> to vector<361x64xf32>
    %cst_56 = arith.constant dense<0.000000e+00> : vector<2x64xf32>
    %113 = tpu.matmul %110, %112, %cst_56 {dimension_numbers = #tpu.dot_dimension_numbers<[1], [0], [0], [1], [0, 0, 1, 1], [], []>} : vector<2x361xf32>, vector<361x64xf32>, vector<2x64xf32> -> vector<2x64xf32>
    %114 = arith.addf %107, %113 : vector<2x64xf32>
    %115 = vector.extract_strided_slice %15 {offsets = [14, 0], sizes = [1, 361], strides = [1, 1]} : vector<16x768xf32> to vector<1x361xf32>
    %116 = vector.extract_strided_slice %15 {offsets = [14, 384], sizes = [1, 361], strides = [1, 1]} : vector<16x768xf32> to vector<1x361xf32>
    %117 = tpu.concatenate %115, %116 in 0 : vector<1x361xf32>, vector<1x361xf32> -> vector<2x361xf32>
    %c14 = arith.constant 14 : index
    %c0_57 = arith.constant 0 : index
    %c0_58 = arith.constant 0 : index
    %118 = vector.load %arg10[%c14, %c0_57, %c0_58] : memref<16x361x64xf32, #tpu.memory_space<vmem>>, vector<1x361x64xf32>
    %119 = vector.shape_cast %118 : vector<1x361x64xf32> to vector<361x64xf32>
    %cst_59 = arith.constant dense<0.000000e+00> : vector<2x64xf32>
    %120 = tpu.matmul %117, %119, %cst_59 {dimension_numbers = #tpu.dot_dimension_numbers<[1], [0], [0], [1], [0, 0, 1, 1], [], []>} : vector<2x361xf32>, vector<361x64xf32>, vector<2x64xf32> -> vector<2x64xf32>
    %121 = arith.addf %114, %120 : vector<2x64xf32>
    %122 = vector.extract_strided_slice %15 {offsets = [15, 0], sizes = [1, 361], strides = [1, 1]} : vector<16x768xf32> to vector<1x361xf32>
    %123 = vector.extract_strided_slice %15 {offsets = [15, 384], sizes = [1, 361], strides = [1, 1]} : vector<16x768xf32> to vector<1x361xf32>
    %124 = tpu.concatenate %122, %123 in 0 : vector<1x361xf32>, vector<1x361xf32> -> vector<2x361xf32>
    %c15 = arith.constant 15 : index
    %c0_60 = arith.constant 0 : index
    %c0_61 = arith.constant 0 : index
    %125 = vector.load %arg10[%c15, %c0_60, %c0_61] : memref<16x361x64xf32, #tpu.memory_space<vmem>>, vector<1x361x64xf32>
    %126 = vector.shape_cast %125 : vector<1x361x64xf32> to vector<361x64xf32>
    %cst_62 = arith.constant dense<0.000000e+00> : vector<2x64xf32>
    %127 = tpu.matmul %124, %126, %cst_62 {dimension_numbers = #tpu.dot_dimension_numbers<[1], [0], [0], [1], [0, 0, 1, 1], [], []>} : vector<2x361xf32>, vector<361x64xf32>, vector<2x64xf32> -> vector<2x64xf32>
    %128 = arith.addf %121, %127 : vector<2x64xf32>
    %c0_63 = arith.constant 0 : index
    %c0_64 = arith.constant 0 : index
    %129 = vector.load %arg4[%c0_63, %c0_64] : memref<1x64xf32, #tpu.memory_space<vmem>>, vector<1x64xf32>
    %130 = vector.broadcast %129 : vector<1x64xf32> to vector<2x64xf32>
    %131 = arith.addf %128, %130 : vector<2x64xf32>
    %cst_65 = arith.constant 0.000000e+00 : f32
    %132 = vector.broadcast %cst_65 : f32 to vector<2x64xf32>
    %133 = arith.maximumf %131, %132 : vector<2x64xf32>
    %c0_66 = arith.constant 0 : index
    %c0_67 = arith.constant 0 : index
    %134 = vector.load %arg5[%c0_66, %c0_67] : memref<1x64xf32, #tpu.memory_space<vmem>>, vector<1x64xf32>
    %135 = vector.broadcast %134 : vector<1x64xf32> to vector<2x64xf32>
    %136 = arith.mulf %133, %135 : vector<2x64xf32>
    %cst_68 = arith.constant dense<0.000000e+00> : vector<2xf32>
    %137 = vector.multi_reduction <add>, %136, %cst_68 [1] : vector<2x64xf32> to vector<2xf32>
    %138 = vector.shape_cast %137 : vector<2xf32> to vector<2x1xf32>
    %c0_69 = arith.constant 0 : index
    %c0_70 = arith.constant 0 : index
    %139 = vector.load %arg6[%c0_69, %c0_70] : memref<1x1xf32, #tpu.memory_space<vmem>>, vector<1x1xf32>
    %140 = vector.broadcast %139 : vector<1x1xf32> to vector<2x1xf32>
    %141 = arith.addf %138, %140 : vector<2x1xf32>
    %c0_71 = arith.constant 0 : index
    %c0_72 = arith.constant 0 : index
    %142 = vector.load %arg8[%c0_71, %c0_72] : memref<2x1xf32, #tpu.memory_space<vmem>>, vector<2x1xf32>
    tpu.vector_store %arg8[%c0_71, %c0_72], %141 {strides = array<i32>} : memref<2x1xf32, #tpu.memory_space<vmem>>, vector<2x1xf32>,
    return
  }
  func.func @transform_0(%arg0: i32) -> (i32, i32) {
    %c0_i32 = arith.constant 0 : i32
    %c0_i32_0 = arith.constant 0 : i32
    %c0_i32_1 = arith.constant 0 : i32
    return %c0_i32, %c0_i32_0 : i32, i32
  }
  func.func @transform_1(%arg0: i32) -> (i32, i32) {
    %c0_i32 = arith.constant 0 : i32
    %c0_i32_0 = arith.constant 0 : i32
    %c0_i32_1 = arith.constant 0 : i32
    return %c0_i32, %c0_i32_0 : i32, i32
  }
  func.func @transform_2(%arg0: i32) -> (i32, i32) {
    %c0_i32 = arith.constant 0 : i32
    %c0_i32_0 = arith.constant 0 : i32
    %c0_i32_1 = arith.constant 0 : i32
    return %c0_i32, %c0_i32_0 : i32, i32
  }
  func.func @transform_3(%arg0: i32) -> (i32, i32) {
    %c0_i32 = arith.constant 0 : i32
    %c0_i32_0 = arith.constant 0 : i32
    %c0_i32_1 = arith.constant 0 : i32
    return %c0_i32, %c0_i32_0 : i32, i32
  }
  func.func @transform_4(%arg0: i32) -> (i32, i32) {
    %c0_i32 = arith.constant 0 : i32
    %c0_i32_0 = arith.constant 0 : i32
    %c0_i32_1 = arith.constant 0 : i32
    return %c0_i32, %c0_i32_0 : i32, i32
  }
  func.func @transform_5(%arg0: i32) -> (i32, i32) {
    %c0_i32 = arith.constant 0 : i32
    %c0_i32_0 = arith.constant 0 : i32
    %c0_i32_1 = arith.constant 0 : i32
    return %c0_i32, %c0_i32_0 : i32, i32
  }
  func.func @transform_7(%arg0: i32) -> (i32, i32) {
    %c0_i32 = arith.constant 0 : i32
    %c0_i32_0 = arith.constant 0 : i32
    %c0_i32_1 = arith.constant 0 : i32
    return %c0_i32, %c0_i32_0 : i32, i32
  }
}

</mosaic_0001>

<bundles_post_ra>
// kernel: simple_cnn_forward.1
= control target key start
LH: loop header
LB: loop body
LE: loop exit
PB: predicated region body
PF: predicated region fallthrough
CT: control target
= control target key end

     0   :  { %s11832_s0 = inlined_call_operand.vmem [shape: f32[27,3072], index: 0, kind: input, shape index: {}]   ;;  %s11833_s1 = inlined_call_operand.vmem [shape: f32[16,27], index: 1, kind: input, shape index: {}]   ;;  %s11834_s2 = inlined_call_operand.vmem [shape: f32[16,1], index: 2, kind: input, shape index: {}]   ;;  %s11835_s3 = inlined_call_operand.vmem [shape: f32[1,64], index: 3, kind: input, shape index: {}]   ;;  %s11836_s4 = inlined_call_operand.vmem [shape: f32[1,64], index: 4, kind: input, shape index: {}]   ;;  %s11837_s5 = inlined_call_operand.<no memory space> [shape: f32[1,1], index: 5, kind: input, shape index: {}]   ;;  %s11838_s7 = inlined_call_operand.vmem [shape: f32[2,1], index: 7, kind: output, shape index: {}]   ;;  %s11839_s6 = inlined_call_operand.vmem [shape: f32[16,361,64], index: 6, kind: input, shape index: {}]  }
   0x1   :  { %v12_v0 = vstv %s11837_s5  ;;  %v93_v1 = vld [vmem:[%s11839_s6] sm:$0xff]  ;;  %v95_v2 = vld [vmem:[%s11839_s6 + $0x8] sm:$0xff]  ;;  %v97_v3 = vld [vmem:[%s11839_s6 + $0x10] sm:$0xff] }
   0x2   :  { %13 = vst [vmem:[#allocation5] sm:$0x1] %v12_v0  ;;  %94 = vst [vmem:[#allocation3] sm:$0xff] %v93_v1  ;;  %v99_v4 = vld [vmem:[%s11839_s6 + $0x18] sm:$0xff]  ;;  %v101_v5 = vld [vmem:[%s11839_s6 + $0x20] sm:$0xff] }
   0x3   :  { %96 = vst [vmem:[#allocation3 + $0x8] sm:$0xff] %v95_v2  ;;  %98 = vst [vmem:[#allocation3 + $0x10] sm:$0xff] %v97_v3  ;;  %v103_v6 = vld [vmem:[%s11839_s6 + $0x28] sm:$0xff]  ;;  %v105_v7 = vld [vmem:[%s11839_s6 + $0x30] sm:$0xff] }
   0x4   :  { %100 = vst [vmem:[#allocation3 + $0x18] sm:$0xff] %v99_v4  ;;  %102 = vst [vmem:[#allocation3 + $0x20] sm:$0xff] %v101_v5  ;;  %v107_v8 = vld [vmem:[%s11839_s6 + $0x38] sm:$0xff]  ;;  %v109_v9 = vld [vmem:[%s11839_s6 + $0x40] sm:$0xff] }
   0x5   :  { %104 = vst [vmem:[#allocation3 + $0x28] sm:$0xff] %v103_v6  ;;  %106 = vst [vmem:[#allocation3 + $0x30] sm:$0xff] %v105_v7  ;;  %v111_v10 = vld [vmem:[%s11839_s6 + $0x48] sm:$0xff]  ;;  %v113_v11 = vld [vmem:[%s11839_s6 + $0x50] sm:$0xff] }
   0x6   :  { %108 = vst [vmem:[#allocation3 + $0x38] sm:$0xff] %v107_v8  ;;  %110 = vst [vmem:[#allocation3 + $0x40] sm:$0xff] %v109_v9  ;;  %v115_v12 = vld [vmem:[%s11839_s6 + $0x58] sm:$0xff]  ;;  %v117_v13 = vld [vmem:[%s11839_s6 + $0x60] sm:$0xff] }
   0x7   :  { %112 = vst [vmem:[#allocation3 + $0x48] sm:$0xff] %v111_v10  ;;  %114 = vst [vmem:[#allocation3 + $0x50] sm:$0xff] %v113_v11  ;;  %v119_v14 = vld [vmem:[%s11839_s6 + $0x68] sm:$0xff]  ;;  %v121_v15 = vld [vmem:[%s11839_s6 + $0x70] sm:$0xff] }
   0x8   :  { %116 = vst [vmem:[#allocation3 + $0x58] sm:$0xff] %v115_v12  ;;  %118 = vst [vmem:[#allocation3 + $0x60] sm:$0xff] %v117_v13  ;;  %v123_v16 = vld [vmem:[%s11839_s6 + $0x78] sm:$0xff]  ;;  %v125_v17 = vld [vmem:[%s11839_s6 + $0x80] sm:$0xff] }
   0x9   :  { %120 = vst [vmem:[#allocation3 + $0x68] sm:$0xff] %v119_v14  ;;  %122 = vst [vmem:[#allocation3 + $0x70] sm:$0xff] %v121_v15  ;;  %v127_v18 = vld [vmem:[%s11839_s6 + $0x88] sm:$0xff]  ;;  %v129_v19 = vld [vmem:[%s11839_s6 + $0x90] sm:$0xff] }
   0xa   :  { %124 = vst [vmem:[#allocation3 + $0x78] sm:$0xff] %v123_v16  ;;  %126 = vst [vmem:[#allocation3 + $0x80] sm:$0xff] %v125_v17  ;;  %v131_v20 = vld [vmem:[%s11839_s6 + $0x98] sm:$0xff]  ;;  %v133_v21 = vld [vmem:[%s11839_s6 + $0xa0] sm:$0xff] }
   0xb   :  { %128 = vst [vmem:[#allocation3 + $0x88] sm:$0xff] %v127_v18  ;;  %130 = vst [vmem:[#allocation3 + $0x90] sm:$0xff] %v129_v19  ;;  %v135_v22 = vld [vmem:[%s11839_s6 + $0xa8] sm:$0xff]  ;;  %v137_v23 = vld [vmem:[%s11839_s6 + $0xb0] sm:$0xff] }
   0xc   :  { %132 = vst [vmem:[#allocation3 + $0x98] sm:$0xff] %v131_v20  ;;  %134 = vst [vmem:[#allocation3 + $0xa0] sm:$0xff] %v133_v21  ;;  %v139_v24 = vld [vmem:[%s11839_s6 + $0xb8] sm:$0xff]  ;;  %v141_v25 = vld [vmem:[%s11839_s6 + $0xc0] sm:$0xff] }
   0xd   :  { %136 = vst [vmem:[#allocation3 + $0xa8] sm:$0xff] %v135_v22  ;;  %138 = vst [vmem:[#allocation3 + $0xb0] sm:$0xff] %v137_v23  ;;  %v143_v26 = vld [vmem:[%s11839_s6 + $0xc8] sm:$0xff]  ;;  %v145_v27 = vld [vmem:[%s11839_s6 + $0xd0] sm:$0xff] }
   0xe   :  { %140 = vst [vmem:[#allocation3 + $0xb8] sm:$0xff] %v139_v24  ;;  %142 = vst [vmem:[#allocation3 + $0xc0] sm:$0xff] %v141_v25  ;;  %v147_v28 = vld [vmem:[%s11839_s6 + $0xd8] sm:$0xff]  ;;  %v149_v29 = vld [vmem:[%s11839_s6 + $0xe0] sm:$0xff] }
   0xf   :  { %144 = vst [vmem:[#allocation3 + $0xc8] sm:$0xff] %v143_v26  ;;  %146 = vst [vmem:[#allocation3 + $0xd0] sm:$0xff] %v145_v27  ;;  %v151_v30 = vld [vmem:[%s11839_s6 + $0xe8] sm:$0xff]  ;;  %v153_v31 = vld [vmem:[%s11839_s6 + $0xf0] sm:$0xff] }
  0x10   :  { %148 = vst [vmem:[#allocation3 + $0xd8] sm:$0xff] %v147_v28  ;;  %150 = vst [vmem:[#allocation3 + $0xe0] sm:$0xff] %v149_v29  ;;  %v155_v32 = vld [vmem:[%s11839_s6 + $0xf8] sm:$0xff]  ;;  %v157_v33 = vld [vmem:[%s11839_s6 + $0x100] sm:$0xff] }
  0x11   :  { %152 = vst [vmem:[#allocation3 + $0xe8] sm:$0xff] %v151_v30  ;;  %154 = vst [vmem:[#allocation3 + $0xf0] sm:$0xff] %v153_v31  ;;  %v159_v34 = vld [vmem:[%s11839_s6 + $0x108] sm:$0xff]  ;;  %v161_v35 = vld [vmem:[%s11839_s6 + $0x110] sm:$0xff] }
  0x12   :  { %156 = vst [vmem:[#allocation3 + $0xf8] sm:$0xff] %v155_v32  ;;  %158 = vst [vmem:[#allocation3 + $0x100] sm:$0xff] %v157_v33  ;;  %v163_v36 = vld [vmem:[%s11839_s6 + $0x118] sm:$0xff]  ;;  %v165_v37 = vld [vmem:[%s11839_s6 + $0x120] sm:$0xff] }
  0x13   :  { %160 = vst [vmem:[#allocation3 + $0x108] sm:$0xff] %v159_v34  ;;  %162 = vst [vmem:[#allocation3 + $0x110] sm:$0xff] %v161_v35  ;;  %v167_v38 = vld [vmem:[%s11839_s6 + $0x128] sm:$0xff]  ;;  %v169_v39 = vld [vmem:[%s11839_s6 + $0x130] sm:$0xff] }
  0x14   :  { %164 = vst [vmem:[#allocation3 + $0x118] sm:$0xff] %v163_v36  ;;  %166 = vst [vmem:[#allocation3 + $0x120] sm:$0xff] %v165_v37  ;;  %v171_v40 = vld [vmem:[%s11839_s6 + $0x138] sm:$0xff]  ;;  %v173_v41 = vld [vmem:[%s11839_s6 + $0x140] sm:$0xff] }
  0x15   :  { %168 = vst [vmem:[#allocation3 + $0x128] sm:$0xff] %v167_v38  ;;  %170 = vst [vmem:[#allocation3 + $0x130] sm:$0xff] %v169_v39  ;;  %v175_v42 = vld [vmem:[%s11839_s6 + $0x148] sm:$0xff]  ;;  %v177_v43 = vld [vmem:[%s11839_s6 + $0x150] sm:$0xff] }
  0x16   :  { %172 = vst [vmem:[#allocation3 + $0x138] sm:$0xff] %v171_v40  ;;  %174 = vst [vmem:[#allocation3 + $0x140] sm:$0xff] %v173_v41  ;;  %v179_v44 = vld [vmem:[%s11839_s6 + $0x158] sm:$0xff]  ;;  %v181_v45 = vld [vmem:[%s11839_s6 + $0x160] sm:$0xff] }
  0x17   :  { %176 = vst [vmem:[#allocation3 + $0x148] sm:$0xff] %v175_v42  ;;  %178 = vst [vmem:[#allocation3 + $0x150] sm:$0xff] %v177_v43  ;;  %v183_v46 = vld [vmem:[%s11839_s6 + $0x170] sm:$0xff]  ;;  %v185_v47 = vld [vmem:[%s11839_s6 + $0x178] sm:$0xff] }
  0x18   :  { %180 = vst [vmem:[#allocation3 + $0x158] sm:$0xff] %v179_v44  ;;  %182 = vst [vmem:[#allocation3 + $0x160] sm:$0xff] %v181_v45  ;;  %v187_v48 = vld [vmem:[%s11839_s6 + $0x180] sm:$0xff]  ;;  %v189_v49 = vld [vmem:[%s11839_s6 + $0x188] sm:$0xff] }
  0x19   :  { %184 = vst [vmem:[#allocation3 + $0x170] sm:$0xff] %v183_v46  ;;  %186 = vst [vmem:[#allocation3 + $0x178] sm:$0xff] %v185_v47  ;;  %v191_v50 = vld [vmem:[%s11839_s6 + $0x190] sm:$0xff]  ;;  %v193_v51 = vld [vmem:[%s11839_s6 + $0x198] sm:$0xff] }
  0x1a   :  { %188 = vst [vmem:[#allocation3 + $0x180] sm:$0xff] %v187_v48  ;;  %190 = vst [vmem:[#allocation3 + $0x188] sm:$0xff] %v189_v49  ;;  %v195_v52 = vld [vmem:[%s11839_s6 + $0x1a0] sm:$0xff]  ;;  %v197_v53 = vld [vmem:[%s11839_s6 + $0x1a8] sm:$0xff] }
  0x1b   :  { %192 = vst [vmem:[#allocation3 + $0x190] sm:$0xff] %v191_v50  ;;  %194 = vst [vmem:[#allocation3 + $0x198] sm:$0xff] %v193_v51  ;;  %v199_v54 = vld [vmem:[%s11839_s6 + $0x1b0] sm:$0xff]  ;;  %v201_v55 = vld [vmem:[%s11839_s6 + $0x1b8] sm:$0xff] }
  0x1c   :  { %196 = vst [vmem:[#allocation3 + $0x1a0] sm:$0xff] %v195_v52  ;;  %198 = vst [vmem:[#allocation3 + $0x1a8] sm:$0xff] %v197_v53  ;;  %v203_v56 = vld [vmem:[%s11839_s6 + $0x1c0] sm:$0xff]  ;;  %v205_v57 = vld [vmem:[%s11839_s6 + $0x1c8] sm:$0xff] }
  0x1d   :  { %200 = vst [vmem:[#allocation3 + $0x1b0] sm:$0xff] %v199_v54  ;;  %202 = vst [vmem:[#allocation3 + $0x1b8] sm:$0xff] %v201_v55  ;;  %v207_v58 = vld [vmem:[%s11839_s6 + $0x1d0] sm:$0xff]  ;;  %v209_v59 = vld [vmem:[%s11839_s6 + $0x1d8] sm:$0xff] }
  0x1e   :  { %204 = vst [vmem:[#allocation3 + $0x1c0] sm:$0xff] %v203_v56  ;;  %206 = vst [vmem:[#allocation3 + $0x1c8] sm:$0xff] %v205_v57  ;;  %v211_v60 = vld [vmem:[%s11839_s6 + $0x1e0] sm:$0xff]  ;;  %v213_v61 = vld [vmem:[%s11839_s6 + $0x1e8] sm:$0xff] }
  0x1f   :  { %208 = vst [vmem:[#allocation3 + $0x1d0] sm:$0xff] %v207_v58  ;;  %210 = vst [vmem:[#allocation3 + $0x1d8] sm:$0xff] %v209_v59  ;;  %v215_v62 = vld [vmem:[%s11839_s6 + $0x1f0] sm:$0xff]  ;;  %v217_v63 = vld [vmem:[%s11839_s6 + $0x1f8] sm:$0xff] }
  0x20   :  { %212 = vst [vmem:[#allocation3 + $0x1e0] sm:$0xff] %v211_v60  ;;  %214 = vst [vmem:[#allocation3 + $0x1e8] sm:$0xff] %v213_v61  ;;  %v219_v0 = vld [vmem:[%s11839_s6 + $0x200] sm:$0xff]  ;;  %v221_v1 = vld [vmem:[%s11839_s6 + $0x208] sm:$0xff] }
  0x21   :  { %216 = vst [vmem:[#allocation3 + $0x1f0] sm:$0xff] %v215_v62  ;;  %218 = vst [vmem:[#allocation3 + $0x1f8] sm:$0xff] %v217_v63  ;;  %v223_v2 = vld [vmem:[%s11839_s6 + $0x210] sm:$0xff]  ;;  %v225_v3 = vld [vmem:[%s11839_s6 + $0x218] sm:$0xff] }
  0x22   :  { %220 = vst [vmem:[#allocation3 + $0x200] sm:$0xff] %v219_v0  ;;  %222 = vst [vmem:[#allocation3 + $0x208] sm:$0xff] %v221_v1  ;;  %v227_v4 = vld [vmem:[%s11839_s6 + $0x220] sm:$0xff]  ;;  %v229_v5 = vld [vmem:[%s11839_s6 + $0x228] sm:$0xff] }
  0x23   :  { %224 = vst [vmem:[#allocation3 + $0x210] sm:$0xff] %v223_v2  ;;  %226 = vst [vmem:[#allocation3 + $0x218] sm:$0xff] %v225_v3  ;;  %v231_v6 = vld [vmem:[%s11839_s6 + $0x230] sm:$0xff]  ;;  %v233_v7 = vld [vmem:[%s11839_s6 + $0x238] sm:$0xff] }
  0x24   :  { %228 = vst [vmem:[#allocation3 + $0x220] sm:$0xff] %v227_v4  ;;  %230 = vst [vmem:[#allocation3 + $0x228] sm:$0xff] %v229_v5  ;;  %v235_v8 = vld [vmem:[%s11839_s6 + $0x240] sm:$0xff]  ;;  %v237_v9 = vld [vmem:[%s11839_s6 + $0x248] sm:$0xff] }
  0x25   :  { %232 = vst [vmem:[#allocation3 + $0x230] sm:$0xff] %v231_v6  ;;  %234 = vst [vmem:[#allocation3 + $0x238] sm:$0xff] %v233_v7  ;;  %v239_v10 = vld [vmem:[%s11839_s6 + $0x250] sm:$0xff]  ;;  %v241_v11 = vld [vmem:[%s11839_s6 + $0x258] sm:$0xff] }
  0x26   :  { %236 = vst [vmem:[#allocation3 + $0x240] sm:$0xff] %v235_v8  ;;  %238 = vst [vmem:[#allocation3 + $0x248] sm:$0xff] %v237_v9  ;;  %v243_v12 = vld [vmem:[%s11839_s6 + $0x260] sm:$0xff]  ;;  %v245_v13 = vld [vmem:[%s11839_s6 + $0x268] sm:$0xff] }
  0x27   :  { %240 = vst [vmem:[#allocation3 + $0x250] sm:$0xff] %v239_v10  ;;  %242 = vst [vmem:[#allocation3 + $0x258] sm:$0xff] %v241_v11  ;;  %v247_v14 = vld [vmem:[%s11839_s6 + $0x270] sm:$0xff]  ;;  %v249_v15 = vld [vmem:[%s11839_s6 + $0x278] sm:$0xff] }
  0x28   :  { %244 = vst [vmem:[#allocation3 + $0x260] sm:$0xff] %v243_v12  ;;  %246 = vst [vmem:[#allocation3 + $0x268] sm:$0xff] %v245_v13  ;;  %v251_v16 = vld [vmem:[%s11839_s6 + $0x280] sm:$0xff]  ;;  %v253_v17 = vld [vmem:[%s11839_s6 + $0x288] sm:$0xff] }
  0x29   :  { %248 = vst [vmem:[#allocation3 + $0x270] sm:$0xff] %v247_v14  ;;  %250 = vst [vmem:[#allocation3 + $0x278] sm:$0xff] %v249_v15  ;;  %v255_v18 = vld [vmem:[%s11839_s6 + $0x290] sm:$0xff]  ;;  %v257_v19 = vld [vmem:[%s11839_s6 + $0x298] sm:$0xff] }
  0x2a   :  { %252 = vst [vmem:[#allocation3 + $0x280] sm:$0xff] %v251_v16  ;;  %254 = vst [vmem:[#allocation3 + $0x288] sm:$0xff] %v253_v17  ;;  %v259_v20 = vld [vmem:[%s11839_s6 + $0x2a0] sm:$0xff]  ;;  %v261_v21 = vld [vmem:[%s11839_s6 + $0x2a8] sm:$0xff] }
  0x2b   :  { %256 = vst [vmem:[#allocation3 + $0x290] sm:$0xff] %v255_v18  ;;  %258 = vst [vmem:[#allocation3 + $0x298] sm:$0xff] %v257_v19  ;;  %v263_v22 = vld [vmem:[%s11839_s6 + $0x2b0] sm:$0xff]  ;;  %v265_v23 = vld [vmem:[%s11839_s6 + $0x2b8] sm:$0xff] }
  0x2c   :  { %260 = vst [vmem:[#allocation3 + $0x2a0] sm:$0xff] %v259_v20  ;;  %262 = vst [vmem:[#allocation3 + $0x2a8] sm:$0xff] %v261_v21  ;;  %v267_v24 = vld [vmem:[%s11839_s6 + $0x2c0] sm:$0xff]  ;;  %v269_v25 = vld [vmem:[%s11839_s6 + $0x2c8] sm:$0xff] }
  0x2d   :  { %264 = vst [vmem:[#allocation3 + $0x2b0] sm:$0xff] %v263_v22  ;;  %266 = vst [vmem:[#allocation3 + $0x2b8] sm:$0xff] %v265_v23  ;;  %v271_v26 = vld [vmem:[%s11839_s6 + $0x2d0] sm:$0xff]  ;;  %v273_v27 = vld [vmem:[%s11839_s6 + $0x2e0] sm:$0xff] }
  0x2e   :  { %268 = vst [vmem:[#allocation3 + $0x2c0] sm:$0xff] %v267_v24  ;;  %270 = vst [vmem:[#allocation3 + $0x2c8] sm:$0xff] %v269_v25  ;;  %v275_v28 = vld [vmem:[%s11839_s6 + $0x2e8] sm:$0xff]  ;;  %v277_v29 = vld [vmem:[%s11839_s6 + $0x2f0] sm:$0xff] }
  0x2f   :  { %272 = vst [vmem:[#allocation3 + $0x2d0] sm:$0xff] %v271_v26  ;;  %274 = vst [vmem:[#allocation3 + $0x2e0] sm:$0xff] %v273_v27  ;;  %v279_v30 = vld [vmem:[%s11839_s6 + $0x2f8] sm:$0xff]  ;;  %v281_v31 = vld [vmem:[%s11839_s6 + $0x300] sm:$0xff] }
  0x30   :  { %276 = vst [vmem:[#allocation3 + $0x2e8] sm:$0xff] %v275_v28  ;;  %278 = vst [vmem:[#allocation3 + $0x2f0] sm:$0xff] %v277_v29  ;;  %v283_v32 = vld [vmem:[%s11839_s6 + $0x308] sm:$0xff]  ;;  %v285_v33 = vld [vmem:[%s11839_s6 + $0x310] sm:$0xff] }
  0x31   :  { %280 = vst [vmem:[#allocation3 + $0x2f8] sm:$0xff] %v279_v30  ;;  %282 = vst [vmem:[#allocation3 + $0x300] sm:$0xff] %v281_v31  ;;  %v287_v34 = vld [vmem:[%s11839_s6 + $0x318] sm:$0xff]  ;;  %v289_v35 = vld [vmem:[%s11839_s6 + $0x320] sm:$0xff] }
  0x32   :  { %284 = vst [vmem:[#allocation3 + $0x308] sm:$0xff] %v283_v32  ;;  %286 = vst [vmem:[#allocation3 + $0x310] sm:$0xff] %v285_v33  ;;  %v291_v36 = vld [vmem:[%s11839_s6 + $0x328] sm:$0xff]  ;;  %v293_v37 = vld [vmem:[%s11839_s6 + $0x330] sm:$0xff] }
  0x33   :  { %288 = vst [vmem:[#allocation3 + $0x318] sm:$0xff] %v287_v34  ;;  %290 = vst [vmem:[#allocation3 + $0x320] sm:$0xff] %v289_v35  ;;  %v295_v38 = vld [vmem:[%s11839_s6 + $0x338] sm:$0xff]  ;;  %v297_v39 = vld [vmem:[%s11839_s6 + $0x340] sm:$0xff] }
  0x34   :  { %292 = vst [vmem:[#allocation3 + $0x328] sm:$0xff] %v291_v36  ;;  %294 = vst [vmem:[#allocation3 + $0x330] sm:$0xff] %v293_v37  ;;  %v299_v40 = vld [vmem:[%s11839_s6 + $0x348] sm:$0xff]  ;;  %v301_v41 = vld [vmem:[%s11839_s6 + $0x350] sm:$0xff] }
  0x35   :  { %296 = vst [vmem:[#allocation3 + $0x338] sm:$0xff] %v295_v38  ;;  %298 = vst [vmem:[#allocation3 + $0x340] sm:$0xff] %v297_v39  ;;  %v303_v42 = vld [vmem:[%s11839_s6 + $0x358] sm:$0xff]  ;;  %v305_v43 = vld [vmem:[%s11839_s6 + $0x360] sm:$0xff] }
  0x36   :  { %300 = vst [vmem:[#allocation3 + $0x348] sm:$0xff] %v299_v40  ;;  %302 = vst [vmem:[#allocation3 + $0x350] sm:$0xff] %v301_v41  ;;  %v307_v44 = vld [vmem:[%s11839_s6 + $0x368] sm:$0xff]  ;;  %v309_v45 = vld [vmem:[%s11839_s6 + $0x370] sm:$0xff] }
  0x37   :  { %304 = vst [vmem:[#allocation3 + $0x358] sm:$0xff] %v303_v42  ;;  %306 = vst [vmem:[#allocation3 + $0x360] sm:$0xff] %v305_v43  ;;  %v311_v46 = vld [vmem:[%s11839_s6 + $0x378] sm:$0xff]  ;;  %v313_v47 = vld [vmem:[%s11839_s6 + $0x380] sm:$0xff] }
  0x38   :  { %308 = vst [vmem:[#allocation3 + $0x368] sm:$0xff] %v307_v44  ;;  %310 = vst [vmem:[#allocation3 + $0x370] sm:$0xff] %v309_v45  ;;  %v315_v48 = vld [vmem:[%s11839_s6 + $0x388] sm:$0xff]  ;;  %v317_v49 = vld [vmem:[%s11839_s6 + $0x390] sm:$0xff] }
  0x39   :  { %312 = vst [vmem:[#allocation3 + $0x378] sm:$0xff] %v311_v46  ;;  %314 = vst [vmem:[#allocation3 + $0x380] sm:$0xff] %v313_v47  ;;  %v319_v50 = vld [vmem:[%s11839_s6 + $0x398] sm:$0xff]  ;;  %v321_v51 = vld [vmem:[%s11839_s6 + $0x3a0] sm:$0xff] }
  0x3a   :  { %316 = vst [vmem:[#allocation3 + $0x388] sm:$0xff] %v315_v48  ;;  %318 = vst [vmem:[#allocation3 + $0x390] sm:$0xff] %v317_v49  ;;  %v323_v52 = vld [vmem:[%s11839_s6 + $0x3a8] sm:$0xff]  ;;  %v325_v53 = vld [vmem:[%s11839_s6 + $0x3b0] sm:$0xff] }
  0x3b   :  { %320 = vst [vmem:[#allocation3 + $0x398] sm:$0xff] %v319_v50  ;;  %322 = vst [vmem:[#allocation3 + $0x3a0] sm:$0xff] %v321_v51  ;;  %v327_v54 = vld [vmem:[%s11839_s6 + $0x3b8] sm:$0xff]  ;;  %v329_v55 = vld [vmem:[%s11839_s6 + $0x3c0] sm:$0xff] }
  0x3c   :  { %324 = vst [vmem:[#allocation3 + $0x3a8] sm:$0xff] %v323_v52  ;;  %326 = vst [vmem:[#allocation3 + $0x3b0] sm:$0xff] %v325_v53  ;;  %v331_v56 = vld [vmem:[%s11839_s6 + $0x3c8] sm:$0xff]  ;;  %v333_v57 = vld [vmem:[%s11839_s6 + $0x3d0] sm:$0xff] }
  0x3d   :  { %328 = vst [vmem:[#allocation3 + $0x3b8] sm:$0xff] %v327_v54  ;;  %330 = vst [vmem:[#allocation3 + $0x3c0] sm:$0xff] %v329_v55  ;;  %v335_v58 = vld [vmem:[%s11839_s6 + $0x3d8] sm:$0xff]  ;;  %v337_v59 = vld [vmem:[%s11839_s6 + $0x3e0] sm:$0xff] }
  0x3e   :  { %332 = vst [vmem:[#allocation3 + $0x3c8] sm:$0xff] %v331_v56  ;;  %334 = vst [vmem:[#allocation3 + $0x3d0] sm:$0xff] %v333_v57  ;;  %v339_v60 = vld [vmem:[%s11839_s6 + $0x3e8] sm:$0xff]  ;;  %v341_v61 = vld [vmem:[%s11839_s6 + $0x3f0] sm:$0xff] }
  0x3f   :  { %336 = vst [vmem:[#allocation3 + $0x3d8] sm:$0xff] %v335_v58  ;;  %338 = vst [vmem:[#allocation3 + $0x3e0] sm:$0xff] %v337_v59  ;;  %v343_v62 = vld [vmem:[%s11839_s6 + $0x3f8] sm:$0xff]  ;;  %v345_v63 = vld [vmem:[%s11839_s6 + $0x400] sm:$0xff] }
  0x40   :  { %340 = vst [vmem:[#allocation3 + $0x3e8] sm:$0xff] %v339_v60  ;;  %342 = vst [vmem:[#allocation3 + $0x3f0] sm:$0xff] %v341_v61  ;;  %v347_v0 = vld [vmem:[%s11839_s6 + $0x408] sm:$0xff]  ;;  %v349_v1 = vld [vmem:[%s11839_s6 + $0x410] sm:$0xff] }
  0x41   :  { %344 = vst [vmem:[#allocation3 + $0x3f8] sm:$0xff] %v343_v62  ;;  %346 = vst [vmem:[#allocation3 + $0x400] sm:$0xff] %v345_v63  ;;  %v351_v2 = vld [vmem:[%s11839_s6 + $0x418] sm:$0xff]  ;;  %v353_v3 = vld [vmem:[%s11839_s6 + $0x420] sm:$0xff] }
  0x42   :  { %348 = vst [vmem:[#allocation3 + $0x408] sm:$0xff] %v347_v0  ;;  %350 = vst [vmem:[#allocation3 + $0x410] sm:$0xff] %v349_v1  ;;  %v355_v4 = vld [vmem:[%s11839_s6 + $0x428] sm:$0xff]  ;;  %v357_v5 = vld [vmem:[%s11839_s6 + $0x430] sm:$0xff] }
  0x43   :  { %352 = vst [vmem:[#allocation3 + $0x418] sm:$0xff] %v351_v2  ;;  %354 = vst [vmem:[#allocation3 + $0x420] sm:$0xff] %v353_v3  ;;  %v359_v6 = vld [vmem:[%s11839_s6 + $0x438] sm:$0xff]  ;;  %v361_v7 = vld [vmem:[%s11839_s6 + $0x440] sm:$0xff] }
  0x44   :  { %356 = vst [vmem:[#allocation3 + $0x428] sm:$0xff] %v355_v4  ;;  %358 = vst [vmem:[#allocation3 + $0x430] sm:$0xff] %v357_v5  ;;  %v363_v8 = vld [vmem:[%s11839_s6 + $0x450] sm:$0xff]  ;;  %v365_v9 = vld [vmem:[%s11839_s6 + $0x458] sm:$0xff] }
  0x45   :  { %360 = vst [vmem:[#allocation3 + $0x438] sm:$0xff] %v359_v6  ;;  %362 = vst [vmem:[#allocation3 + $0x440] sm:$0xff] %v361_v7  ;;  %v367_v10 = vld [vmem:[%s11839_s6 + $0x460] sm:$0xff]  ;;  %v369_v11 = vld [vmem:[%s11839_s6 + $0x468] sm:$0xff] }
  0x46   :  { %364 = vst [vmem:[#allocation3 + $0x450] sm:$0xff] %v363_v8  ;;  %366 = vst [vmem:[#allocation3 + $0x458] sm:$0xff] %v365_v9  ;;  %v371_v12 = vld [vmem:[%s11839_s6 + $0x470] sm:$0xff]  ;;  %v373_v13 = vld [vmem:[%s11839_s6 + $0x478] sm:$0xff] }
  0x47   :  { %368 = vst [vmem:[#allocation3 + $0x460] sm:$0xff] %v367_v10  ;;  %370 = vst [vmem:[#allocation3 + $0x468] sm:$0xff] %v369_v11  ;;  %v375_v14 = vld [vmem:[%s11839_s6 + $0x480] sm:$0xff]  ;;  %v377_v15 = vld [vmem:[%s11839_s6 + $0x488] sm:$0xff] }
  0x48   :  { %372 = vst [vmem:[#allocation3 + $0x470] sm:$0xff] %v371_v12  ;;  %374 = vst [vmem:[#allocation3 + $0x478] sm:$0xff] %v373_v13  ;;  %v379_v16 = vld [vmem:[%s11839_s6 + $0x490] sm:$0xff]  ;;  %v381_v17 = vld [vmem:[%s11839_s6 + $0x498] sm:$0xff] }
  0x49   :  { %376 = vst [vmem:[#allocation3 + $0x480] sm:$0xff] %v375_v14  ;;  %378 = vst [vmem:[#allocation3 + $0x488] sm:$0xff] %v377_v15  ;;  %v383_v18 = vld [vmem:[%s11839_s6 + $0x4a0] sm:$0xff]  ;;  %v385_v19 = vld [vmem:[%s11839_s6 + $0x4a8] sm:$0xff] }
  0x4a   :  { %380 = vst [vmem:[#allocation3 + $0x490] sm:$0xff] %v379_v16  ;;  %382 = vst [vmem:[#allocation3 + $0x498] sm:$0xff] %v381_v17  ;;  %v387_v20 = vld [vmem:[%s11839_s6 + $0x4b0] sm:$0xff]  ;;  %v389_v21 = vld [vmem:[%s11839_s6 + $0x4b8] sm:$0xff] }
  0x4b   :  { %384 = vst [vmem:[#allocation3 + $0x4a0] sm:$0xff] %v383_v18  ;;  %386 = vst [vmem:[#allocation3 + $0x4a8] sm:$0xff] %v385_v19  ;;  %v391_v22 = vld [vmem:[%s11839_s6 + $0x4c0] sm:$0xff]  ;;  %v393_v23 = vld [vmem:[%s11839_s6 + $0x4c8] sm:$0xff] }
  0x4c   :  { %388 = vst [vmem:[#allocation3 + $0x4b0] sm:$0xff] %v387_v20  ;;  %390 = vst [vmem:[#allocation3 + $0x4b8] sm:$0xff] %v389_v21  ;;  %v395_v24 = vld [vmem:[%s11839_s6 + $0x4d0] sm:$0xff]  ;;  %v397_v25 = vld [vmem:[%s11839_s6 + $0x4d8] sm:$0xff] }
  0x4d   :  { %392 = vst [vmem:[#allocation3 + $0x4c0] sm:$0xff] %v391_v22  ;;  %394 = vst [vmem:[#allocation3 + $0x4c8] sm:$0xff] %v393_v23  ;;  %v399_v26 = vld [vmem:[%s11839_s6 + $0x4e0] sm:$0xff]  ;;  %v401_v27 = vld [vmem:[%s11839_s6 + $0x4e8] sm:$0xff] }
  0x4e   :  { %396 = vst [vmem:[#allocation3 + $0x4d0] sm:$0xff] %v395_v24  ;;  %398 = vst [vmem:[#allocation3 + $0x4d8] sm:$0xff] %v397_v25  ;;  %v403_v28 = vld [vmem:[%s11839_s6 + $0x4f0] sm:$0xff]  ;;  %v405_v29 = vld [vmem:[%s11839_s6 + $0x4f8] sm:$0xff] }
  0x4f   :  { %400 = vst [vmem:[#allocation3 + $0x4e0] sm:$0xff] %v399_v26  ;;  %402 = vst [vmem:[#allocation3 + $0x4e8] sm:$0xff] %v401_v27  ;;  %v407_v30 = vld [vmem:[%s11839_s6 + $0x500] sm:$0xff]  ;;  %v409_v31 = vld [vmem:[%s11839_s6 + $0x508] sm:$0xff] }
  0x50   :  { %404 = vst [vmem:[#allocation3 + $0x4f0] sm:$0xff] %v403_v28  ;;  %406 = vst [vmem:[#allocation3 + $0x4f8] sm:$0xff] %v405_v29  ;;  %v411_v32 = vld [vmem:[%s11839_s6 + $0x510] sm:$0xff]  ;;  %v413_v33 = vld [vmem:[%s11839_s6 + $0x518] sm:$0xff] }
  0x51   :  { %408 = vst [vmem:[#allocation3 + $0x500] sm:$0xff] %v407_v30  ;;  %410 = vst [vmem:[#allocation3 + $0x508] sm:$0xff] %v409_v31  ;;  %v415_v34 = vld [vmem:[%s11839_s6 + $0x520] sm:$0xff]  ;;  %v417_v35 = vld [vmem:[%s11839_s6 + $0x528] sm:$0xff] }
  0x52   :  { %412 = vst [vmem:[#allocation3 + $0x510] sm:$0xff] %v411_v32  ;;  %414 = vst [vmem:[#allocation3 + $0x518] sm:$0xff] %v413_v33  ;;  %v419_v36 = vld [vmem:[%s11839_s6 + $0x530] sm:$0xff]  ;;  %v421_v37 = vld [vmem:[%s11839_s6 + $0x538] sm:$0xff] }
  0x53   :  { %416 = vst [vmem:[#allocation3 + $0x520] sm:$0xff] %v415_v34  ;;  %418 = vst [vmem:[#allocation3 + $0x528] sm:$0xff] %v417_v35  ;;  %v423_v38 = vld [vmem:[%s11839_s6 + $0x540] sm:$0xff]  ;;  %v425_v39 = vld [vmem:[%s11839_s6 + $0x548] sm:$0xff] }
  0x54   :  { %420 = vst [vmem:[#allocation3 + $0x530] sm:$0xff] %v419_v36  ;;  %422 = vst [vmem:[#allocation3 + $0x538] sm:$0xff] %v421_v37  ;;  %v427_v40 = vld [vmem:[%s11839_s6 + $0x550] sm:$0xff]  ;;  %v429_v41 = vld [vmem:[%s11839_s6 + $0x558] sm:$0xff] }
  0x55   :  { %424 = vst [vmem:[#allocation3 + $0x540] sm:$0xff] %v423_v38  ;;  %426 = vst [vmem:[#allocation3 + $0x548] sm:$0xff] %v425_v39  ;;  %v431_v42 = vld [vmem:[%s11839_s6 + $0x560] sm:$0xff]  ;;  %v433_v43 = vld [vmem:[%s11839_s6 + $0x568] sm:$0xff] }
  0x56   :  { %428 = vst [vmem:[#allocation3 + $0x550] sm:$0xff] %v427_v40  ;;  %430 = vst [vmem:[#allocation3 + $0x558] sm:$0xff] %v429_v41  ;;  %v435_v44 = vld [vmem:[%s11839_s6 + $0x570] sm:$0xff]  ;;  %v437_v45 = vld [vmem:[%s11839_s6 + $0x578] sm:$0xff] }
  0x57   :  { %432 = vst [vmem:[#allocation3 + $0x560] sm:$0xff] %v431_v42  ;;  %434 = vst [vmem:[#allocation3 + $0x568] sm:$0xff] %v433_v43  ;;  %v439_v46 = vld [vmem:[%s11839_s6 + $0x580] sm:$0xff]  ;;  %v441_v47 = vld [vmem:[%s11839_s6 + $0x588] sm:$0xff] }
  0x58   :  { %436 = vst [vmem:[#allocation3 + $0x570] sm:$0xff] %v435_v44  ;;  %438 = vst [vmem:[#allocation3 + $0x578] sm:$0xff] %v437_v45  ;;  %v443_v48 = vld [vmem:[%s11839_s6 + $0x590] sm:$0xff]  ;;  %v445_v49 = vld [vmem:[%s11839_s6 + $0x598] sm:$0xff] }
  0x59   :  { %440 = vst [vmem:[#allocation3 + $0x580] sm:$0xff] %v439_v46  ;;  %442 = vst [vmem:[#allocation3 + $0x588] sm:$0xff] %v441_v47  ;;  %v447_v50 = vld [vmem:[%s11839_s6 + $0x5a0] sm:$0xff]  ;;  %v449_v51 = vld [vmem:[%s11839_s6 + $0x5a8] sm:$0xff] }
  0x5a   :  { %444 = vst [vmem:[#allocation3 + $0x590] sm:$0xff] %v443_v48  ;;  %446 = vst [vmem:[#allocation3 + $0x598] sm:$0xff] %v445_v49  ;;  %v451_v52 = vld [vmem:[%s11839_s6 + $0x5b0] sm:$0xff]  ;;  %v453_v53 = vld [vmem:[%s11839_s6 + $0x5c0] sm:$0xff] }
  0x5b   :  { %448 = vst [vmem:[#allocation3 + $0x5a0] sm:$0xff] %v447_v50  ;;  %450 = vst [vmem:[#allocation3 + $0x5a8] sm:$0xff] %v449_v51  ;;  %v455_v54 = vld [vmem:[%s11839_s6 + $0x5c8] sm:$0xff]  ;;  %v457_v55 = vld [vmem:[%s11839_s6 + $0x5d0] sm:$0xff] }
  0x5c   :  { %452 = vst [vmem:[#allocation3 + $0x5b0] sm:$0xff] %v451_v52  ;;  %454 = vst [vmem:[#allocation3 + $0x5c0] sm:$0xff] %v453_v53  ;;  %v459_v56 = vld [vmem:[%s11839_s6 + $0x5d8] sm:$0xff]  ;;  %v461_v57 = vld [vmem:[%s11839_s6 + $0x5e0] sm:$0xff] }
  0x5d   :  { %456 = vst [vmem:[#allocation3 + $0x5c8] sm:$0xff] %v455_v54  ;;  %458 = vst [vmem:[#allocation3 + $0x5d0] sm:$0xff] %v457_v55  ;;  %v463_v58 = vld [vmem:[%s11839_s6 + $0x5e8] sm:$0xff]  ;;  %v465_v59 = vld [vmem:[%s11839_s6 + $0x5f0] sm:$0xff] }
  0x5e   :  { %460 = vst [vmem:[#allocation3 + $0x5d8] sm:$0xff] %v459_v56  ;;  %462 = vst [vmem:[#allocation3 + $0x5e0] sm:$0xff] %v461_v57  ;;  %v467_v60 = vld [vmem:[%s11839_s6 + $0x5f8] sm:$0xff]  ;;  %v469_v61 = vld [vmem:[%s11839_s6 + $0x600] sm:$0xff] }
  0x5f   :  { %464 = vst [vmem:[#allocation3 + $0x5e8] sm:$0xff] %v463_v58  ;;  %466 = vst [vmem:[#allocation3 + $0x5f0] sm:$0xff] %v465_v59  ;;  %v471_v62 = vld [vmem:[%s11839_s6 + $0x608] sm:$0xff]  ;;  %v473_v63 = vld [vmem:[%s11839_s6 + $0x610] sm:$0xff] }
  0x60   :  { %468 = vst [vmem:[#allocation3 + $0x5f8] sm:$0xff] %v467_v60  ;;  %470 = vst [vmem:[#allocation3 + $0x600] sm:$0xff] %v469_v61  ;;  %v475_v0 = vld [vmem:[%s11839_s6 + $0x618] sm:$0xff]  ;;  %v477_v1 = vld [vmem:[%s11839_s6 + $0x620] sm:$0xff] }
  0x61   :  { %472 = vst [vmem:[#allocation3 + $0x608] sm:$0xff] %v471_v62  ;;  %474 = vst [vmem:[#allocation3 + $0x610] sm:$0xff] %v473_v63  ;;  %v479_v2 = vld [vmem:[%s11839_s6 + $0x628] sm:$0xff]  ;;  %v481_v3 = vld [vmem:[%s11839_s6 + $0x630] sm:$0xff] }
  0x62   :  { %476 = vst [vmem:[#allocation3 + $0x618] sm:$0xff] %v475_v0  ;;  %478 = vst [vmem:[#allocation3 + $0x620] sm:$0xff] %v477_v1  ;;  %v483_v4 = vld [vmem:[%s11839_s6 + $0x638] sm:$0xff]  ;;  %v485_v5 = vld [vmem:[%s11839_s6 + $0x640] sm:$0xff] }
  0x63   :  { %480 = vst [vmem:[#allocation3 + $0x628] sm:$0xff] %v479_v2  ;;  %482 = vst [vmem:[#allocation3 + $0x630] sm:$0xff] %v481_v3  ;;  %v487_v6 = vld [vmem:[%s11839_s6 + $0x648] sm:$0xff]  ;;  %v489_v7 = vld [vmem:[%s11839_s6 + $0x650] sm:$0xff] }
  0x64   :  { %484 = vst [vmem:[#allocation3 + $0x638] sm:$0xff] %v483_v4  ;;  %486 = vst [vmem:[#allocation3 + $0x640] sm:$0xff] %v485_v5  ;;  %v491_v8 = vld [vmem:[%s11839_s6 + $0x658] sm:$0xff]  ;;  %v493_v9 = vld [vmem:[%s11839_s6 + $0x660] sm:$0xff] }
  0x65   :  { %488 = vst [vmem:[#allocation3 + $0x648] sm:$0xff] %v487_v6  ;;  %490 = vst [vmem:[#allocation3 + $0x650] sm:$0xff] %v489_v7  ;;  %v495_v10 = vld [vmem:[%s11839_s6 + $0x668] sm:$0xff]  ;;  %v497_v11 = vld [vmem:[%s11839_s6 + $0x670] sm:$0xff] }
  0x66   :  { %492 = vst [vmem:[#allocation3 + $0x658] sm:$0xff] %v491_v8  ;;  %494 = vst [vmem:[#allocation3 + $0x660] sm:$0xff] %v493_v9  ;;  %v499_v12 = vld [vmem:[%s11839_s6 + $0x678] sm:$0xff]  ;;  %v501_v13 = vld [vmem:[%s11839_s6 + $0x680] sm:$0xff] }
  0x67   :  { %496 = vst [vmem:[#allocation3 + $0x668] sm:$0xff] %v495_v10  ;;  %498 = vst [vmem:[#allocation3 + $0x670] sm:$0xff] %v497_v11  ;;  %v503_v14 = vld [vmem:[%s11839_s6 + $0x688] sm:$0xff]  ;;  %v505_v15 = vld [vmem:[%s11839_s6 + $0x690] sm:$0xff] }
  0x68   :  { %500 = vst [vmem:[#allocation3 + $0x678] sm:$0xff] %v499_v12  ;;  %502 = vst [vmem:[#allocation3 + $0x680] sm:$0xff] %v501_v13  ;;  %v507_v16 = vld [vmem:[%s11839_s6 + $0x698] sm:$0xff]  ;;  %v509_v17 = vld [vmem:[%s11839_s6 + $0x6a0] sm:$0xff] }
  0x69   :  { %504 = vst [vmem:[#allocation3 + $0x688] sm:$0xff] %v503_v14  ;;  %506 = vst [vmem:[#allocation3 + $0x690] sm:$0xff] %v505_v15  ;;  %v511_v18 = vld [vmem:[%s11839_s6 + $0x6a8] sm:$0xff]  ;;  %v513_v19 = vld [vmem:[%s11839_s6 + $0x6b0] sm:$0xff] }
  0x6a   :  { %508 = vst [vmem:[#allocation3 + $0x698] sm:$0xff] %v507_v16  ;;  %510 = vst [vmem:[#allocation3 + $0x6a0] sm:$0xff] %v509_v17  ;;  %v515_v20 = vld [vmem:[%s11839_s6 + $0x6b8] sm:$0xff]  ;;  %v517_v21 = vld [vmem:[%s11839_s6 + $0x6c0] sm:$0xff] }
  0x6b   :  { %512 = vst [vmem:[#allocation3 + $0x6a8] sm:$0xff] %v511_v18  ;;  %514 = vst [vmem:[#allocation3 + $0x6b0] sm:$0xff] %v513_v19  ;;  %v519_v22 = vld [vmem:[%s11839_s6 + $0x6c8] sm:$0xff]  ;;  %v521_v23 = vld [vmem:[%s11839_s6 + $0x6d0] sm:$0xff] }
  0x6c   :  { %516 = vst [vmem:[#allocation3 + $0x6b8] sm:$0xff] %v515_v20  ;;  %518 = vst [vmem:[#allocation3 + $0x6c0] sm:$0xff] %v517_v21  ;;  %v523_v24 = vld [vmem:[%s11839_s6 + $0x6d8] sm:$0xff]  ;;  %v525_v25 = vld [vmem:[%s11839_s6 + $0x6e0] sm:$0xff] }
  0x6d   :  { %520 = vst [vmem:[#allocation3 + $0x6c8] sm:$0xff] %v519_v22  ;;  %522 = vst [vmem:[#allocation3 + $0x6d0] sm:$0xff] %v521_v23  ;;  %v527_v26 = vld [vmem:[%s11839_s6 + $0x6e8] sm:$0xff]  ;;  %v529_v27 = vld [vmem:[%s11839_s6 + $0x6f0] sm:$0xff] }
  0x6e   :  { %524 = vst [vmem:[#allocation3 + $0x6d8] sm:$0xff] %v523_v24  ;;  %526 = vst [vmem:[#allocation3 + $0x6e0] sm:$0xff] %v525_v25  ;;  %v531_v28 = vld [vmem:[%s11839_s6 + $0x6f8] sm:$0xff]  ;;  %v533_v29 = vld [vmem:[%s11839_s6 + $0x700] sm:$0xff] }
  0x6f   :  { %528 = vst [vmem:[#allocation3 + $0x6e8] sm:$0xff] %v527_v26  ;;  %530 = vst [vmem:[#allocation3 + $0x6f0] sm:$0xff] %v529_v27  ;;  %v535_v30 = vld [vmem:[%s11839_s6 + $0x708] sm:$0xff]  ;;  %v537_v31 = vld [vmem:[%s11839_s6 + $0x710] sm:$0xff] }
  0x70   :  { %532 = vst [vmem:[#allocation3 + $0x6f8] sm:$0xff] %v531_v28  ;;  %534 = vst [vmem:[#allocation3 + $0x700] sm:$0xff] %v533_v29  ;;  %v539_v32 = vld [vmem:[%s11839_s6 + $0x718] sm:$0xff]  ;;  %v541_v33 = vld [vmem:[%s11839_s6 + $0x720] sm:$0xff] }
  0x71   :  { %536 = vst [vmem:[#allocation3 + $0x708] sm:$0xff] %v535_v30  ;;  %538 = vst [vmem:[#allocation3 + $0x710] sm:$0xff] %v537_v31  ;;  %v543_v34 = vld [vmem:[%s11839_s6 + $0x730] sm:$0xff]  ;;  %v545_v35 = vld [vmem:[%s11839_s6 + $0x738] sm:$0xff] }
  0x72   :  { %540 = vst [vmem:[#allocation3 + $0x718] sm:$0xff] %v539_v32  ;;  %542 = vst [vmem:[#allocation3 + $0x720] sm:$0xff] %v541_v33  ;;  %v547_v36 = vld [vmem:[%s11839_s6 + $0x740] sm:$0xff]  ;;  %v549_v37 = vld [vmem:[%s11839_s6 + $0x748] sm:$0xff] }
  0x73   :  { %544 = vst [vmem:[#allocation3 + $0x730] sm:$0xff] %v543_v34  ;;  %546 = vst [vmem:[#allocation3 + $0x738] sm:$0xff] %v545_v35  ;;  %v551_v38 = vld [vmem:[%s11839_s6 + $0x750] sm:$0xff]  ;;  %v553_v39 = vld [vmem:[%s11839_s6 + $0x758] sm:$0xff] }
  0x74   :  { %548 = vst [vmem:[#allocation3 + $0x740] sm:$0xff] %v547_v36  ;;  %550 = vst [vmem:[#allocation3 + $0x748] sm:$0xff] %v549_v37  ;;  %v555_v40 = vld [vmem:[%s11839_s6 + $0x760] sm:$0xff]  ;;  %v557_v41 = vld [vmem:[%s11839_s6 + $0x768] sm:$0xff] }
  0x75   :  { %552 = vst [vmem:[#allocation3 + $0x750] sm:$0xff] %v551_v38  ;;  %554 = vst [vmem:[#allocation3 + $0x758] sm:$0xff] %v553_v39  ;;  %v559_v42 = vld [vmem:[%s11839_s6 + $0x770] sm:$0xff]  ;;  %v561_v43 = vld [vmem:[%s11839_s6 + $0x778] sm:$0xff] }
  0x76   :  { %556 = vst [vmem:[#allocation3 + $0x760] sm:$0xff] %v555_v40  ;;  %558 = vst [vmem:[#allocation3 + $0x768] sm:$0xff] %v557_v41  ;;  %v563_v44 = vld [vmem:[%s11839_s6 + $0x780] sm:$0xff]  ;;  %v565_v45 = vld [vmem:[%s11839_s6 + $0x788] sm:$0xff] }
  0x77   :  { %560 = vst [vmem:[#allocation3 + $0x770] sm:$0xff] %v559_v42  ;;  %562 = vst [vmem:[#allocation3 + $0x778] sm:$0xff] %v561_v43  ;;  %v567_v46 = vld [vmem:[%s11839_s6 + $0x790] sm:$0xff]  ;;  %v569_v47 = vld [vmem:[%s11839_s6 + $0x798] sm:$0xff] }
  0x78   :  { %564 = vst [vmem:[#allocation3 + $0x780] sm:$0xff] %v563_v44  ;;  %566 = vst [vmem:[#allocation3 + $0x788] sm:$0xff] %v565_v45  ;;  %v571_v48 = vld [vmem:[%s11839_s6 + $0x7a0] sm:$0xff]  ;;  %v573_v49 = vld [vmem:[%s11839_s6 + $0x7a8] sm:$0xff] }
  0x79   :  { %568 = vst [vmem:[#allocation3 + $0x790] sm:$0xff] %v567_v46  ;;  %570 = vst [vmem:[#allocation3 + $0x798] sm:$0xff] %v569_v47  ;;  %v575_v50 = vld [vmem:[%s11839_s6 + $0x7b0] sm:$0xff]  ;;  %v577_v51 = vld [vmem:[%s11839_s6 + $0x7b8] sm:$0xff] }
  0x7a   :  { %572 = vst [vmem:[#allocation3 + $0x7a0] sm:$0xff] %v571_v48  ;;  %574 = vst [vmem:[#allocation3 + $0x7a8] sm:$0xff] %v573_v49  ;;  %v579_v52 = vld [vmem:[%s11839_s6 + $0x7c0] sm:$0xff]  ;;  %v581_v53 = vld [vmem:[%s11839_s6 + $0x7c8] sm:$0xff] }
  0x7b   :  { %576 = vst [vmem:[#allocation3 + $0x7b0] sm:$0xff] %v575_v50  ;;  %578 = vst [vmem:[#allocation3 + $0x7b8] sm:$0xff] %v577_v51  ;;  %v583_v54 = vld [vmem:[%s11839_s6 + $0x7d0] sm:$0xff]  ;;  %v585_v55 = vld [vmem:[%s11839_s6 + $0x7d8] sm:$0xff] }
  0x7c   :  { %580 = vst [vmem:[#allocation3 + $0x7c0] sm:$0xff] %v579_v52  ;;  %582 = vst [vmem:[#allocation3 + $0x7c8] sm:$0xff] %v581_v53  ;;  %v587_v56 = vld [vmem:[%s11839_s6 + $0x7e0] sm:$0xff]  ;;  %v589_v57 = vld [vmem:[%s11839_s6 + $0x7e8] sm:$0xff] }
  0x7d   :  { %584 = vst [vmem:[#allocation3 + $0x7d0] sm:$0xff] %v583_v54  ;;  %586 = vst [vmem:[#allocation3 + $0x7d8] sm:$0xff] %v585_v55  ;;  %v591_v58 = vld [vmem:[%s11839_s6 + $0x7f0] sm:$0xff]  ;;  %v593_v59 = vld [vmem:[%s11839_s6 + $0x7f8] sm:$0xff] }
  0x7e   :  { %588 = vst [vmem:[#allocation3 + $0x7e0] sm:$0xff] %v587_v56  ;;  %590 = vst [vmem:[#allocation3 + $0x7e8] sm:$0xff] %v589_v57  ;;  %v595_v60 = vld [vmem:[%s11839_s6 + $0x800] sm:$0xff]  ;;  %v597_v61 = vld [vmem:[%s11839_s6 + $0x808] sm:$0xff] }
  0x7f   :  { %592 = vst [vmem:[#allocation3 + $0x7f0] sm:$0xff] %v591_v58  ;;  %594 = vst [vmem:[#allocation3 + $0x7f8] sm:$0xff] %v593_v59  ;;  %v599_v62 = vld [vmem:[%s11839_s6 + $0x810] sm:$0xff]  ;;  %v601_v63 = vld [vmem:[%s11839_s6 + $0x818] sm:$0xff] }
  0x80   :  { %596 = vst [vmem:[#allocation3 + $0x800] sm:$0xff] %v595_v60  ;;  %598 = vst [vmem:[#allocation3 + $0x808] sm:$0xff] %v597_v61  ;;  %v603_v0 = vld [vmem:[%s11839_s6 + $0x820] sm:$0xff]  ;;  %v605_v1 = vld [vmem:[%s11839_s6 + $0x828] sm:$0xff] }
  0x81   :  { %600 = vst [vmem:[#allocation3 + $0x810] sm:$0xff] %v599_v62  ;;  %602 = vst [vmem:[#allocation3 + $0x818] sm:$0xff] %v601_v63  ;;  %v607_v2 = vld [vmem:[%s11839_s6 + $0x830] sm:$0xff]  ;;  %v609_v3 = vld [vmem:[%s11839_s6 + $0x838] sm:$0xff] }
  0x82   :  { %604 = vst [vmem:[#allocation3 + $0x820] sm:$0xff] %v603_v0  ;;  %606 = vst [vmem:[#allocation3 + $0x828] sm:$0xff] %v605_v1  ;;  %v611_v4 = vld [vmem:[%s11839_s6 + $0x840] sm:$0xff]  ;;  %v613_v5 = vld [vmem:[%s11839_s6 + $0x848] sm:$0xff] }
  0x83   :  { %608 = vst [vmem:[#allocation3 + $0x830] sm:$0xff] %v607_v2  ;;  %610 = vst [vmem:[#allocation3 + $0x838] sm:$0xff] %v609_v3  ;;  %v615_v6 = vld [vmem:[%s11839_s6 + $0x850] sm:$0xff]  ;;  %v617_v7 = vld [vmem:[%s11839_s6 + $0x858] sm:$0xff] }
  0x84   :  { %612 = vst [vmem:[#allocation3 + $0x840] sm:$0xff] %v611_v4  ;;  %614 = vst [vmem:[#allocation3 + $0x848] sm:$0xff] %v613_v5  ;;  %v619_v8 = vld [vmem:[%s11839_s6 + $0x860] sm:$0xff]  ;;  %v621_v9 = vld [vmem:[%s11839_s6 + $0x868] sm:$0xff] }
  0x85   :  { %616 = vst [vmem:[#allocation3 + $0x850] sm:$0xff] %v615_v6  ;;  %618 = vst [vmem:[#allocation3 + $0x858] sm:$0xff] %v617_v7  ;;  %v623_v10 = vld [vmem:[%s11839_s6 + $0x870] sm:$0xff]  ;;  %v625_v11 = vld [vmem:[%s11839_s6 + $0x878] sm:$0xff] }
  0x86   :  { %620 = vst [vmem:[#allocation3 + $0x860] sm:$0xff] %v619_v8  ;;  %622 = vst [vmem:[#allocation3 + $0x868] sm:$0xff] %v621_v9  ;;  %v627_v12 = vld [vmem:[%s11839_s6 + $0x880] sm:$0xff]  ;;  %v629_v13 = vld [vmem:[%s11839_s6 + $0x888] sm:$0xff] }
  0x87   :  { %624 = vst [vmem:[#allocation3 + $0x870] sm:$0xff] %v623_v10  ;;  %626 = vst [vmem:[#allocation3 + $0x878] sm:$0xff] %v625_v11  ;;  %v631_v14 = vld [vmem:[%s11839_s6 + $0x890] sm:$0xff]  ;;  %v633_v15 = vld [vmem:[%s11839_s6 + $0x8a0] sm:$0xff] }
  0x88   :  { %628 = vst [vmem:[#allocation3 + $0x880] sm:$0xff] %v627_v12  ;;  %630 = vst [vmem:[#allocation3 + $0x888] sm:$0xff] %v629_v13  ;;  %v635_v16 = vld [vmem:[%s11839_s6 + $0x8a8] sm:$0xff]  ;;  %v637_v17 = vld [vmem:[%s11839_s6 + $0x8b0] sm:$0xff] }
  0x89   :  { %632 = vst [vmem:[#allocation3 + $0x890] sm:$0xff] %v631_v14  ;;  %634 = vst [vmem:[#allocation3 + $0x8a0] sm:$0xff] %v633_v15  ;;  %v639_v18 = vld [vmem:[%s11839_s6 + $0x8b8] sm:$0xff]  ;;  %v641_v19 = vld [vmem:[%s11839_s6 + $0x8c0] sm:$0xff] }
  0x8a   :  { %636 = vst [vmem:[#allocation3 + $0x8a8] sm:$0xff] %v635_v16  ;;  %638 = vst [vmem:[#allocation3 + $0x8b0] sm:$0xff] %v637_v17  ;;  %v643_v20 = vld [vmem:[%s11839_s6 + $0x8c8] sm:$0xff]  ;;  %v645_v21 = vld [vmem:[%s11839_s6 + $0x8d0] sm:$0xff] }
  0x8b   :  { %640 = vst [vmem:[#allocation3 + $0x8b8] sm:$0xff] %v639_v18  ;;  %642 = vst [vmem:[#allocation3 + $0x8c0] sm:$0xff] %v641_v19  ;;  %v647_v22 = vld [vmem:[%s11839_s6 + $0x8d8] sm:$0xff]  ;;  %v649_v23 = vld [vmem:[%s11839_s6 + $0x8e0] sm:$0xff] }
  0x8c   :  { %644 = vst [vmem:[#allocation3 + $0x8c8] sm:$0xff] %v643_v20  ;;  %646 = vst [vmem:[#allocation3 + $0x8d0] sm:$0xff] %v645_v21  ;;  %v651_v24 = vld [vmem:[%s11839_s6 + $0x8e8] sm:$0xff]  ;;  %v653_v25 = vld [vmem:[%s11839_s6 + $0x8f0] sm:$0xff] }
  0x8d   :  { %648 = vst [vmem:[#allocation3 + $0x8d8] sm:$0xff] %v647_v22  ;;  %650 = vst [vmem:[#allocation3 + $0x8e0] sm:$0xff] %v649_v23  ;;  %v655_v26 = vld [vmem:[%s11839_s6 + $0x8f8] sm:$0xff]  ;;  %v657_v27 = vld [vmem:[%s11839_s6 + $0x900] sm:$0xff] }
  0x8e   :  { %652 = vst [vmem:[#allocation3 + $0x8e8] sm:$0xff] %v651_v24  ;;  %654 = vst [vmem:[#allocation3 + $0x8f0] sm:$0xff] %v653_v25  ;;  %v659_v28 = vld [vmem:[%s11839_s6 + $0x908] sm:$0xff]  ;;  %v661_v29 = vld [vmem:[%s11839_s6 + $0x910] sm:$0xff] }
  0x8f   :  { %656 = vst [vmem:[#allocation3 + $0x8f8] sm:$0xff] %v655_v26  ;;  %658 = vst [vmem:[#allocation3 + $0x900] sm:$0xff] %v657_v27  ;;  %v663_v30 = vld [vmem:[%s11839_s6 + $0x918] sm:$0xff]  ;;  %v665_v31 = vld [vmem:[%s11839_s6 + $0x920] sm:$0xff] }
  0x90   :  { %660 = vst [vmem:[#allocation3 + $0x908] sm:$0xff] %v659_v28  ;;  %662 = vst [vmem:[#allocation3 + $0x910] sm:$0xff] %v661_v29  ;;  %v667_v32 = vld [vmem:[%s11839_s6 + $0x928] sm:$0xff]  ;;  %v669_v33 = vld [vmem:[%s11839_s6 + $0x930] sm:$0xff] }
  0x91   :  { %664 = vst [vmem:[#allocation3 + $0x918] sm:$0xff] %v663_v30  ;;  %666 = vst [vmem:[#allocation3 + $0x920] sm:$0xff] %v665_v31  ;;  %v671_v34 = vld [vmem:[%s11839_s6 + $0x938] sm:$0xff]  ;;  %v673_v35 = vld [vmem:[%s11839_s6 + $0x940] sm:$0xff] }
  0x92   :  { %668 = vst [vmem:[#allocation3 + $0x928] sm:$0xff] %v667_v32  ;;  %670 = vst [vmem:[#allocation3 + $0x930] sm:$0xff] %v669_v33  ;;  %v675_v36 = vld [vmem:[%s11839_s6 + $0x948] sm:$0xff]  ;;  %v677_v37 = vld [vmem:[%s11839_s6 + $0x950] sm:$0xff] }
  0x93   :  { %672 = vst [vmem:[#allocation3 + $0x938] sm:$0xff] %v671_v34  ;;  %674 = vst [vmem:[#allocation3 + $0x940] sm:$0xff] %v673_v35  ;;  %v679_v38 = vld [vmem:[%s11839_s6 + $0x958] sm:$0xff]  ;;  %v681_v39 = vld [vmem:[%s11839_s6 + $0x960] sm:$0xff] }
  0x94   :  { %676 = vst [vmem:[#allocation3 + $0x948] sm:$0xff] %v675_v36  ;;  %678 = vst [vmem:[#allocation3 + $0x950] sm:$0xff] %v677_v37  ;;  %v683_v40 = vld [vmem:[%s11839_s6 + $0x968] sm:$0xff]  ;;  %v685_v41 = vld [vmem:[%s11839_s6 + $0x970] sm:$0xff] }
  0x95   :  { %680 = vst [vmem:[#allocation3 + $0x958] sm:$0xff] %v679_v38  ;;  %682 = vst [vmem:[#allocation3 + $0x960] sm:$0xff] %v681_v39  ;;  %v687_v42 = vld [vmem:[%s11839_s6 + $0x978] sm:$0xff]  ;;  %v689_v43 = vld [vmem:[%s11839_s6 + $0x980] sm:$0xff] }
  0x96   :  { %684 = vst [vmem:[#allocation3 + $0x968] sm:$0xff] %v683_v40  ;;  %686 = vst [vmem:[#allocation3 + $0x970] sm:$0xff] %v685_v41  ;;  %v691_v44 = vld [vmem:[%s11839_s6 + $0x988] sm:$0xff]  ;;  %v693_v45 = vld [vmem:[%s11839_s6 + $0x990] sm:$0xff] }
  0x97   :  { %688 = vst [vmem:[#allocation3 + $0x978] sm:$0xff] %v687_v42  ;;  %690 = vst [vmem:[#allocation3 + $0x980] sm:$0xff] %v689_v43  ;;  %v695_v46 = vld [vmem:[%s11839_s6 + $0x998] sm:$0xff]  ;;  %v697_v47 = vld [vmem:[%s11839_s6 + $0x9a0] sm:$0xff] }
  0x98   :  { %692 = vst [vmem:[#allocation3 + $0x988] sm:$0xff] %v691_v44  ;;  %694 = vst [vmem:[#allocation3 + $0x990] sm:$0xff] %v693_v45  ;;  %v699_v48 = vld [vmem:[%s11839_s6 + $0x9a8] sm:$0xff]  ;;  %v701_v49 = vld [vmem:[%s11839_s6 + $0x9b0] sm:$0xff] }
  0x99   :  { %696 = vst [vmem:[#allocation3 + $0x998] sm:$0xff] %v695_v46  ;;  %698 = vst [vmem:[#allocation3 + $0x9a0] sm:$0xff] %v697_v47  ;;  %v703_v50 = vld [vmem:[%s11839_s6 + $0x9b8] sm:$0xff]  ;;  %v705_v51 = vld [vmem:[%s11839_s6 + $0x9c0] sm:$0xff] }
  0x9a   :  { %700 = vst [vmem:[#allocation3 + $0x9a8] sm:$0xff] %v699_v48  ;;  %702 = vst [vmem:[#allocation3 + $0x9b0] sm:$0xff] %v701_v49  ;;  %v707_v52 = vld [vmem:[%s11839_s6 + $0x9c8] sm:$0xff]  ;;  %v709_v53 = vld [vmem:[%s11839_s6 + $0x9d0] sm:$0xff] }
  0x9b   :  { %704 = vst [vmem:[#allocation3 + $0x9b8] sm:$0xff] %v703_v50  ;;  %706 = vst [vmem:[#allocation3 + $0x9c0] sm:$0xff] %v705_v51  ;;  %v711_v54 = vld [vmem:[%s11839_s6 + $0x9d8] sm:$0xff]  ;;  %v713_v55 = vld [vmem:[%s11839_s6 + $0x9e0] sm:$0xff] }
  0x9c   :  { %708 = vst [vmem:[#allocation3 + $0x9c8] sm:$0xff] %v707_v52  ;;  %710 = vst [vmem:[#allocation3 + $0x9d0] sm:$0xff] %v709_v53  ;;  %v715_v56 = vld [vmem:[%s11839_s6 + $0x9e8] sm:$0xff]  ;;  %v717_v57 = vld [vmem:[%s11839_s6 + $0x9f0] sm:$0xff] }
  0x9d   :  { %712 = vst [vmem:[#allocation3 + $0x9d8] sm:$0xff] %v711_v54  ;;  %714 = vst [vmem:[#allocation3 + $0x9e0] sm:$0xff] %v713_v55  ;;  %v719_v58 = vld [vmem:[%s11839_s6 + $0x9f8] sm:$0xff]  ;;  %v721_v59 = vld [vmem:[%s11839_s6 + $0xa00] sm:$0xff] }
  0x9e   :  { %716 = vst [vmem:[#allocation3 + $0x9e8] sm:$0xff] %v715_v56  ;;  %718 = vst [vmem:[#allocation3 + $0x9f0] sm:$0xff] %v717_v57  ;;  %v723_v60 = vld [vmem:[%s11839_s6 + $0xa10] sm:$0xff]  ;;  %v725_v61 = vld [vmem:[%s11839_s6 + $0xa18] sm:$0xff] }
  0x9f   :  { %720 = vst [vmem:[#allocation3 + $0x9f8] sm:$0xff] %v719_v58  ;;  %722 = vst [vmem:[#allocation3 + $0xa00] sm:$0xff] %v721_v59  ;;  %v727_v62 = vld [vmem:[%s11839_s6 + $0xa20] sm:$0xff]  ;;  %v729_v63 = vld [vmem:[%s11839_s6 + $0xa28] sm:$0xff] }
  0xa0   :  { %724 = vst [vmem:[#allocation3 + $0xa10] sm:$0xff] %v723_v60  ;;  %726 = vst [vmem:[#allocation3 + $0xa18] sm:$0xff] %v725_v61  ;;  %v731_v0 = vld [vmem:[%s11839_s6 + $0xa30] sm:$0xff]  ;;  %v733_v1 = vld [vmem:[%s11839_s6 + $0xa38] sm:$0xff] }
  0xa1   :  { %728 = vst [vmem:[#allocation3 + $0xa20] sm:$0xff] %v727_v62  ;;  %730 = vst [vmem:[#allocation3 + $0xa28] sm:$0xff] %v729_v63  ;;  %v735_v2 = vld [vmem:[%s11839_s6 + $0xa40] sm:$0xff]  ;;  %v737_v3 = vld [vmem:[%s11839_s6 + $0xa48] sm:$0xff] }
  0xa2   :  { %732 = vst [vmem:[#allocation3 + $0xa30] sm:$0xff] %v731_v0  ;;  %734 = vst [vmem:[#allocation3 + $0xa38] sm:$0xff] %v733_v1  ;;  %v739_v4 = vld [vmem:[%s11839_s6 + $0xa50] sm:$0xff]  ;;  %v741_v5 = vld [vmem:[%s11839_s6 + $0xa58] sm:$0xff] }
  0xa3   :  { %736 = vst [vmem:[#allocation3 + $0xa40] sm:$0xff] %v735_v2  ;;  %738 = vst [vmem:[#allocation3 + $0xa48] sm:$0xff] %v737_v3  ;;  %v743_v6 = vld [vmem:[%s11839_s6 + $0xa60] sm:$0xff]  ;;  %v745_v7 = vld [vmem:[%s11839_s6 + $0xa68] sm:$0xff] }
  0xa4   :  { %740 = vst [vmem:[#allocation3 + $0xa50] sm:$0xff] %v739_v4  ;;  %742 = vst [vmem:[#allocation3 + $0xa58] sm:$0xff] %v741_v5  ;;  %v747_v8 = vld [vmem:[%s11839_s6 + $0xa70] sm:$0xff]  ;;  %v749_v9 = vld [vmem:[%s11839_s6 + $0xa78] sm:$0xff] }
  0xa5   :  { %744 = vst [vmem:[#allocation3 + $0xa60] sm:$0xff] %v743_v6  ;;  %746 = vst [vmem:[#allocation3 + $0xa68] sm:$0xff] %v745_v7  ;;  %v751_v10 = vld [vmem:[%s11839_s6 + $0xa80] sm:$0xff]  ;;  %v753_v11 = vld [vmem:[%s11839_s6 + $0xa88] sm:$0xff] }
  0xa6   :  { %748 = vst [vmem:[#allocation3 + $0xa70] sm:$0xff] %v747_v8  ;;  %750 = vst [vmem:[#allocation3 + $0xa78] sm:$0xff] %v749_v9  ;;  %v755_v12 = vld [vmem:[%s11839_s6 + $0xa90] sm:$0xff]  ;;  %v757_v13 = vld [vmem:[%s11839_s6 + $0xa98] sm:$0xff] }
  0xa7   :  { %752 = vst [vmem:[#allocation3 + $0xa80] sm:$0xff] %v751_v10  ;;  %754 = vst [vmem:[#allocation3 + $0xa88] sm:$0xff] %v753_v11  ;;  %v759_v14 = vld [vmem:[%s11839_s6 + $0xaa0] sm:$0xff]  ;;  %v761_v15 = vld [vmem:[%s11839_s6 + $0xaa8] sm:$0xff] }
  0xa8   :  { %756 = vst [vmem:[#allocation3 + $0xa90] sm:$0xff] %v755_v12  ;;  %758 = vst [vmem:[#allocation3 + $0xa98] sm:$0xff] %v757_v13  ;;  %v763_v16 = vld [vmem:[%s11839_s6 + $0xab0] sm:$0xff]  ;;  %v765_v17 = vld [vmem:[%s11839_s6 + $0xab8] sm:$0xff] }
  0xa9   :  { %760 = vst [vmem:[#allocation3 + $0xaa0] sm:$0xff] %v759_v14  ;;  %762 = vst [vmem:[#allocation3 + $0xaa8] sm:$0xff] %v761_v15  ;;  %v767_v18 = vld [vmem:[%s11839_s6 + $0xac0] sm:$0xff]  ;;  %v769_v19 = vld [vmem:[%s11839_s6 + $0xac8] sm:$0xff] }
  0xaa   :  { %764 = vst [vmem:[#allocation3 + $0xab0] sm:$0xff] %v763_v16  ;;  %766 = vst [vmem:[#allocation3 + $0xab8] sm:$0xff] %v765_v17  ;;  %v771_v20 = vld [vmem:[%s11839_s6 + $0xad0] sm:$0xff]  ;;  %v773_v21 = vld [vmem:[%s11839_s6 + $0xad8] sm:$0xff] }
  0xab   :  { %768 = vst [vmem:[#allocation3 + $0xac0] sm:$0xff] %v767_v18  ;;  %770 = vst [vmem:[#allocation3 + $0xac8] sm:$0xff] %v769_v19  ;;  %v775_v22 = vld [vmem:[%s11839_s6 + $0xae0] sm:$0xff]  ;;  %v777_v23 = vld [vmem:[%s11839_s6 + $0xae8] sm:$0xff] }
  0xac   :  { %772 = vst [vmem:[#allocation3 + $0xad0] sm:$0xff] %v771_v20  ;;  %774 = vst [vmem:[#allocation3 + $0xad8] sm:$0xff] %v773_v21  ;;  %v779_v24 = vld [vmem:[%s11839_s6 + $0xaf0] sm:$0xff]  ;;  %v781_v25 = vld [vmem:[%s11839_s6 + $0xaf8] sm:$0xff] }
  0xad   :  { %776 = vst [vmem:[#allocation3 + $0xae0] sm:$0xff] %v775_v22  ;;  %778 = vst [vmem:[#allocation3 + $0xae8] sm:$0xff] %v777_v23  ;;  %v783_v26 = vld [vmem:[%s11839_s6 + $0xb00] sm:$0xff]  ;;  %v785_v27 = vld [vmem:[%s11839_s6 + $0xb08] sm:$0xff] }
  0xae   :  { %780 = vst [vmem:[#allocation3 + $0xaf0] sm:$0xff] %v779_v24  ;;  %782 = vst [vmem:[#allocation3 + $0xaf8] sm:$0xff] %v781_v25  ;;  %v787_v28 = vld [vmem:[%s11839_s6 + $0xb10] sm:$0xff]  ;;  %v789_v29 = vld [vmem:[%s11839_s6 + $0xb18] sm:$0xff] }
  0xaf   :  { %784 = vst [vmem:[#allocation3 + $0xb00] sm:$0xff] %v783_v26  ;;  %786 = vst [vmem:[#allocation3 + $0xb08] sm:$0xff] %v785_v27  ;;  %v791_v30 = vld [vmem:[%s11839_s6 + $0xb20] sm:$0xff]  ;;  %v793_v31 = vld [vmem:[%s11839_s6 + $0xb28] sm:$0xff] }
  0xb0   :  { %788 = vst [vmem:[#allocation3 + $0xb10] sm:$0xff] %v787_v28  ;;  %790 = vst [vmem:[#allocation3 + $0xb18] sm:$0xff] %v789_v29  ;;  %v795_v32 = vld [vmem:[%s11839_s6 + $0xb30] sm:$0xff]  ;;  %v797_v33 = vld [vmem:[%s11839_s6 + $0xb38] sm:$0xff] }
  0xb1   :  { %792 = vst [vmem:[#allocation3 + $0xb20] sm:$0xff] %v791_v30  ;;  %794 = vst [vmem:[#allocation3 + $0xb28] sm:$0xff] %v793_v31  ;;  %v799_v34 = vld [vmem:[%s11839_s6 + $0xb40] sm:$0xff]  ;;  %v801_v35 = vld [vmem:[%s11839_s6 + $0xb48] sm:$0xff] }
  0xb2   :  { %796 = vst [vmem:[#allocation3 + $0xb30] sm:$0xff] %v795_v32  ;;  %798 = vst [vmem:[#allocation3 + $0xb38] sm:$0xff] %v797_v33  ;;  %v803_v36 = vld [vmem:[%s11839_s6 + $0xb50] sm:$0xff]  ;;  %v805_v37 = vld [vmem:[%s11839_s6 + $0xb58] sm:$0xff] }
  0xb3   :  { %800 = vst [vmem:[#allocation3 + $0xb40] sm:$0xff] %v799_v34  ;;  %802 = vst [vmem:[#allocation3 + $0xb48] sm:$0xff] %v801_v35  ;;  %v807_v38 = vld [vmem:[%s11839_s6 + $0xb60] sm:$0xff]  ;;  %v809_v39 = vld [vmem:[%s11839_s6 + $0xb68] sm:$0xff] }
  0xb4   :  { %804 = vst [vmem:[#allocation3 + $0xb50] sm:$0xff] %v803_v36  ;;  %806 = vst [vmem:[#allocation3 + $0xb58] sm:$0xff] %v805_v37  ;;  %v811_v40 = vld [vmem:[%s11839_s6 + $0xb70] sm:$0xff]  ;;  %v813_v41 = vld [vmem:[%s11839_s6 + $0xb80] sm:$0xff] }
  0xb5   :  { %808 = vst [vmem:[#allocation3 + $0xb60] sm:$0xff] %v807_v38  ;;  %810 = vst [vmem:[#allocation3 + $0xb68] sm:$0xff] %v809_v39  ;;  %v815_v42 = vld [vmem:[%s11839_s6 + $0xb88] sm:$0xff]  ;;  %v817_v43 = vld [vmem:[%s11839_s6 + $0xb90] sm:$0xff] }
  0xb6   :  { %812 = vst [vmem:[#allocation3 + $0xb70] sm:$0xff] %v811_v40  ;;  %814 = vst [vmem:[#allocation3 + $0xb80] sm:$0xff] %v813_v41  ;;  %v819_v44 = vld [vmem:[%s11839_s6 + $0xb98] sm:$0xff]  ;;  %v821_v45 = vld [vmem:[%s11839_s6 + $0xba0] sm:$0xff] }
  0xb7   :  { %816 = vst [vmem:[#allocation3 + $0xb88] sm:$0xff] %v815_v42  ;;  %818 = vst [vmem:[#allocation3 + $0xb90] sm:$0xff] %v817_v43  ;;  %v823_v46 = vld [vmem:[%s11839_s6 + $0xba8] sm:$0xff]  ;;  %v825_v47 = vld [vmem:[%s11839_s6 + $0xbb0] sm:$0xff] }
  0xb8   :  { %820 = vst [vmem:[#allocation3 + $0xb98] sm:$0xff] %v819_v44  ;;  %822 = vst [vmem:[#allocation3 + $0xba0] sm:$0xff] %v821_v45  ;;  %v827_v48 = vld [vmem:[%s11839_s6 + $0xbb8] sm:$0xff]  ;;  %v829_v49 = vld [vmem:[%s11839_s6 + $0xbc0] sm:$0xff] }
  0xb9   :  { %824 = vst [vmem:[#allocation3 + $0xba8] sm:$0xff] %v823_v46  ;;  %826 = vst [vmem:[#allocation3 + $0xbb0] sm:$0xff] %v825_v47  ;;  %v831_v50 = vld [vmem:[%s11839_s6 + $0xbc8] sm:$0xff]  ;;  %v833_v51 = vld [vmem:[%s11839_s6 + $0xbd0] sm:$0xff] }
  0xba   :  { %828 = vst [vmem:[#allocation3 + $0xbb8] sm:$0xff] %v827_v48  ;;  %830 = vst [vmem:[#allocation3 + $0xbc0] sm:$0xff] %v829_v49  ;;  %v835_v52 = vld [vmem:[%s11839_s6 + $0xbd8] sm:$0xff]  ;;  %v837_v53 = vld [vmem:[%s11839_s6 + $0xbe0] sm:$0xff] }
  0xbb   :  { %832 = vst [vmem:[#allocation3 + $0xbc8] sm:$0xff] %v831_v50  ;;  %834 = vst [vmem:[#allocation3 + $0xbd0] sm:$0xff] %v833_v51  ;;  %v839_v54 = vld [vmem:[%s11839_s6 + $0xbe8] sm:$0xff]  ;;  %v841_v55 = vld [vmem:[%s11839_s6 + $0xbf0] sm:$0xff] }
  0xbc   :  { %836 = vst [vmem:[#allocation3 + $0xbd8] sm:$0xff] %v835_v52  ;;  %838 = vst [vmem:[#allocation3 + $0xbe0] sm:$0xff] %v837_v53  ;;  %v843_v56 = vld [vmem:[%s11839_s6 + $0xbf8] sm:$0xff]  ;;  %v845_v57 = vld [vmem:[%s11839_s6 + $0xc00] sm:$0xff] }
  0xbd   :  { %840 = vst [vmem:[#allocation3 + $0xbe8] sm:$0xff] %v839_v54  ;;  %842 = vst [vmem:[#allocation3 + $0xbf0] sm:$0xff] %v841_v55  ;;  %v847_v58 = vld [vmem:[%s11839_s6 + $0xc08] sm:$0xff]  ;;  %v849_v59 = vld [vmem:[%s11839_s6 + $0xc10] sm:$0xff] }
  0xbe   :  { %844 = vst [vmem:[#allocation3 + $0xbf8] sm:$0xff] %v843_v56  ;;  %846 = vst [vmem:[#allocation3 + $0xc00] sm:$0xff] %v845_v57  ;;  %v851_v60 = vld [vmem:[%s11839_s6 + $0xc18] sm:$0xff]  ;;  %v853_v61 = vld [vmem:[%s11839_s6 + $0xc20] sm:$0xff] }
  0xbf   :  { %848 = vst [vmem:[#allocation3 + $0xc08] sm:$0xff] %v847_v58  ;;  %850 = vst [vmem:[#allocation3 + $0xc10] sm:$0xff] %v849_v59  ;;  %v855_v62 = vld [vmem:[%s11839_s6 + $0xc28] sm:$0xff]  ;;  %v857_v63 = vld [vmem:[%s11839_s6 + $0xc30] sm:$0xff] }
  0xc0   :  { %852 = vst [vmem:[#allocation3 + $0xc18] sm:$0xff] %v851_v60  ;;  %854 = vst [vmem:[#allocation3 + $0xc20] sm:$0xff] %v853_v61  ;;  %v859_v0 = vld [vmem:[%s11839_s6 + $0xc38] sm:$0xff]  ;;  %v861_v1 = vld [vmem:[%s11839_s6 + $0xc40] sm:$0xff] }
  0xc1   :  { %856 = vst [vmem:[#allocation3 + $0xc28] sm:$0xff] %v855_v62  ;;  %858 = vst [vmem:[#allocation3 + $0xc30] sm:$0xff] %v857_v63  ;;  %v863_v2 = vld [vmem:[%s11839_s6 + $0xc48] sm:$0xff]  ;;  %v865_v3 = vld [vmem:[%s11839_s6 + $0xc50] sm:$0xff] }
  0xc2   :  { %860 = vst [vmem:[#allocation3 + $0xc38] sm:$0xff] %v859_v0  ;;  %862 = vst [vmem:[#allocation3 + $0xc40] sm:$0xff] %v861_v1  ;;  %v867_v4 = vld [vmem:[%s11839_s6 + $0xc58] sm:$0xff]  ;;  %v869_v5 = vld [vmem:[%s11839_s6 + $0xc60] sm:$0xff] }
  0xc3   :  { %864 = vst [vmem:[#allocation3 + $0xc48] sm:$0xff] %v863_v2  ;;  %866 = vst [vmem:[#allocation3 + $0xc50] sm:$0xff] %v865_v3  ;;  %v871_v6 = vld [vmem:[%s11839_s6 + $0xc68] sm:$0xff]  ;;  %v873_v7 = vld [vmem:[%s11839_s6 + $0xc70] sm:$0xff] }
  0xc4   :  { %868 = vst [vmem:[#allocation3 + $0xc58] sm:$0xff] %v867_v4  ;;  %870 = vst [vmem:[#allocation3 + $0xc60] sm:$0xff] %v869_v5  ;;  %v875_v8 = vld [vmem:[%s11839_s6 + $0xc78] sm:$0xff]  ;;  %v877_v9 = vld [vmem:[%s11839_s6 + $0xc80] sm:$0xff] }
  0xc5   :  { %872 = vst [vmem:[#allocation3 + $0xc68] sm:$0xff] %v871_v6  ;;  %874 = vst [vmem:[#allocation3 + $0xc70] sm:$0xff] %v873_v7  ;;  %v879_v10 = vld [vmem:[%s11839_s6 + $0xc88] sm:$0xff]  ;;  %v881_v11 = vld [vmem:[%s11839_s6 + $0xc90] sm:$0xff] }
  0xc6   :  { %876 = vst [vmem:[#allocation3 + $0xc78] sm:$0xff] %v875_v8  ;;  %878 = vst [vmem:[#allocation3 + $0xc80] sm:$0xff] %v877_v9  ;;  %v883_v12 = vld [vmem:[%s11839_s6 + $0xc98] sm:$0xff]  ;;  %v885_v13 = vld [vmem:[%s11839_s6 + $0xca0] sm:$0xff] }
  0xc7   :  { %880 = vst [vmem:[#allocation3 + $0xc88] sm:$0xff] %v879_v10  ;;  %882 = vst [vmem:[#allocation3 + $0xc90] sm:$0xff] %v881_v11  ;;  %v887_v14 = vld [vmem:[%s11839_s6 + $0xca8] sm:$0xff]  ;;  %v889_v15 = vld [vmem:[%s11839_s6 + $0xcb0] sm:$0xff] }
  0xc8   :  { %884 = vst [vmem:[#allocation3 + $0xc98] sm:$0xff] %v883_v12  ;;  %886 = vst [vmem:[#allocation3 + $0xca0] sm:$0xff] %v885_v13  ;;  %v891_v16 = vld [vmem:[%s11839_s6 + $0xcb8] sm:$0xff]  ;;  %v893_v17 = vld [vmem:[%s11839_s6 + $0xcc0] sm:$0xff] }
  0xc9   :  { %888 = vst [vmem:[#allocation3 + $0xca8] sm:$0xff] %v887_v14  ;;  %890 = vst [vmem:[#allocation3 + $0xcb0] sm:$0xff] %v889_v15  ;;  %v895_v18 = vld [vmem:[%s11839_s6 + $0xcc8] sm:$0xff]  ;;  %v897_v19 = vld [vmem:[%s11839_s6 + $0xcd0] sm:$0xff] }
  0xca   :  { %892 = vst [vmem:[#allocation3 + $0xcb8] sm:$0xff] %v891_v16  ;;  %894 = vst [vmem:[#allocation3 + $0xcc0] sm:$0xff] %v893_v17  ;;  %v899_v20 = vld [vmem:[%s11839_s6 + $0xcd8] sm:$0xff]  ;;  %v901_v21 = vld [vmem:[%s11839_s6 + $0xce0] sm:$0xff] }
  0xcb   :  { %896 = vst [vmem:[#allocation3 + $0xcc8] sm:$0xff] %v895_v18  ;;  %898 = vst [vmem:[#allocation3 + $0xcd0] sm:$0xff] %v897_v19  ;;  %v903_v22 = vld [vmem:[%s11839_s6 + $0xcf0] sm:$0xff]  ;;  %v905_v23 = vld [vmem:[%s11839_s6 + $0xcf8] sm:$0xff] }
  0xcc   :  { %900 = vst [vmem:[#allocation3 + $0xcd8] sm:$0xff] %v899_v20  ;;  %902 = vst [vmem:[#allocation3 + $0xce0] sm:$0xff] %v901_v21  ;;  %v907_v24 = vld [vmem:[%s11839_s6 + $0xd00] sm:$0xff]  ;;  %v909_v25 = vld [vmem:[%s11839_s6 + $0xd08] sm:$0xff] }
  0xcd   :  { %904 = vst [vmem:[#allocation3 + $0xcf0] sm:$0xff] %v903_v22  ;;  %906 = vst [vmem:[#allocation3 + $0xcf8] sm:$0xff] %v905_v23  ;;  %v911_v26 = vld [vmem:[%s11839_s6 + $0xd10] sm:$0xff]  ;;  %v913_v27 = vld [vmem:[%s11839_s6 + $0xd18] sm:$0xff] }
  0xce   :  { %908 = vst [vmem:[#allocation3 + $0xd00] sm:$0xff] %v907_v24  ;;  %910 = vst [vmem:[#allocation3 + $0xd08] sm:$0xff] %v909_v25  ;;  %v915_v28 = vld [vmem:[%s11839_s6 + $0xd20] sm:$0xff]  ;;  %v917_v29 = vld [vmem:[%s11839_s6 + $0xd28] sm:$0xff] }
  0xcf   :  { %912 = vst [vmem:[#allocation3 + $0xd10] sm:$0xff] %v911_v26  ;;  %914 = vst [vmem:[#allocation3 + $0xd18] sm:$0xff] %v913_v27  ;;  %v919_v30 = vld [vmem:[%s11839_s6 + $0xd30] sm:$0xff]  ;;  %v921_v31 = vld [vmem:[%s11839_s6 + $0xd38] sm:$0xff] }
  0xd0   :  { %916 = vst [vmem:[#allocation3 + $0xd20] sm:$0xff] %v915_v28  ;;  %918 = vst [vmem:[#allocation3 + $0xd28] sm:$0xff] %v917_v29  ;;  %v923_v32 = vld [vmem:[%s11839_s6 + $0xd40] sm:$0xff]  ;;  %v925_v33 = vld [vmem:[%s11839_s6 + $0xd48] sm:$0xff] }
  0xd1   :  { %920 = vst [vmem:[#allocation3 + $0xd30] sm:$0xff] %v919_v30  ;;  %922 = vst [vmem:[#allocation3 + $0xd38] sm:$0xff] %v921_v31  ;;  %v927_v34 = vld [vmem:[%s11839_s6 + $0xd50] sm:$0xff]  ;;  %v929_v35 = vld [vmem:[%s11839_s6 + $0xd58] sm:$0xff] }
  0xd2   :  { %924 = vst [vmem:[#allocation3 + $0xd40] sm:$0xff] %v923_v32  ;;  %926 = vst [vmem:[#allocation3 + $0xd48] sm:$0xff] %v925_v33  ;;  %v931_v36 = vld [vmem:[%s11839_s6 + $0xd60] sm:$0xff]  ;;  %v933_v37 = vld [vmem:[%s11839_s6 + $0xd68] sm:$0xff] }
  0xd3   :  { %928 = vst [vmem:[#allocation3 + $0xd50] sm:$0xff] %v927_v34  ;;  %930 = vst [vmem:[#allocation3 + $0xd58] sm:$0xff] %v929_v35  ;;  %v935_v38 = vld [vmem:[%s11839_s6 + $0xd70] sm:$0xff]  ;;  %v937_v39 = vld [vmem:[%s11839_s6 + $0xd78] sm:$0xff] }
  0xd4   :  { %932 = vst [vmem:[#allocation3 + $0xd60] sm:$0xff] %v931_v36  ;;  %934 = vst [vmem:[#allocation3 + $0xd68] sm:$0xff] %v933_v37  ;;  %v939_v40 = vld [vmem:[%s11839_s6 + $0xd80] sm:$0xff]  ;;  %v941_v41 = vld [vmem:[%s11839_s6 + $0xd88] sm:$0xff] }
  0xd5   :  { %936 = vst [vmem:[#allocation3 + $0xd70] sm:$0xff] %v935_v38  ;;  %938 = vst [vmem:[#allocation3 + $0xd78] sm:$0xff] %v937_v39  ;;  %v943_v42 = vld [vmem:[%s11839_s6 + $0xd90] sm:$0xff]  ;;  %v945_v43 = vld [vmem:[%s11839_s6 + $0xd98] sm:$0xff] }
  0xd6   :  { %940 = vst [vmem:[#allocation3 + $0xd80] sm:$0xff] %v939_v40  ;;  %942 = vst [vmem:[#allocation3 + $0xd88] sm:$0xff] %v941_v41  ;;  %v947_v44 = vld [vmem:[%s11839_s6 + $0xda0] sm:$0xff]  ;;  %v949_v45 = vld [vmem:[%s11839_s6 + $0xda8] sm:$0xff] }
  0xd7   :  { %944 = vst [vmem:[#allocation3 + $0xd90] sm:$0xff] %v943_v42  ;;  %946 = vst [vmem:[#allocation3 + $0xd98] sm:$0xff] %v945_v43  ;;  %v951_v46 = vld [vmem:[%s11839_s6 + $0xdb0] sm:$0xff]  ;;  %v953_v47 = vld [vmem:[%s11839_s6 + $0xdb8] sm:$0xff] }
  0xd8   :  { %948 = vst [vmem:[#allocation3 + $0xda0] sm:$0xff] %v947_v44  ;;  %950 = vst [vmem:[#allocation3 + $0xda8] sm:$0xff] %v949_v45  ;;  %v955_v48 = vld [vmem:[%s11839_s6 + $0xdc0] sm:$0xff]  ;;  %v957_v49 = vld [vmem:[%s11839_s6 + $0xdc8] sm:$0xff] }
  0xd9   :  { %952 = vst [vmem:[#allocation3 + $0xdb0] sm:$0xff] %v951_v46  ;;  %954 = vst [vmem:[#allocation3 + $0xdb8] sm:$0xff] %v953_v47  ;;  %v959_v50 = vld [vmem:[%s11839_s6 + $0xdd0] sm:$0xff]  ;;  %v961_v51 = vld [vmem:[%s11839_s6 + $0xdd8] sm:$0xff] }
  0xda   :  { %956 = vst [vmem:[#allocation3 + $0xdc0] sm:$0xff] %v955_v48  ;;  %958 = vst [vmem:[#allocation3 + $0xdc8] sm:$0xff] %v957_v49  ;;  %v963_v52 = vld [vmem:[%s11839_s6 + $0xde0] sm:$0xff]  ;;  %v965_v53 = vld [vmem:[%s11839_s6 + $0xde8] sm:$0xff] }
  0xdb   :  { %960 = vst [vmem:[#allocation3 + $0xdd0] sm:$0xff] %v959_v50  ;;  %962 = vst [vmem:[#allocation3 + $0xdd8] sm:$0xff] %v961_v51  ;;  %v967_v54 = vld [vmem:[%s11839_s6 + $0xdf0] sm:$0xff]  ;;  %v969_v55 = vld [vmem:[%s11839_s6 + $0xdf8] sm:$0xff] }
  0xdc   :  { %964 = vst [vmem:[#allocation3 + $0xde0] sm:$0xff] %v963_v52  ;;  %966 = vst [vmem:[#allocation3 + $0xde8] sm:$0xff] %v965_v53  ;;  %v971_v56 = vld [vmem:[%s11839_s6 + $0xe00] sm:$0xff]  ;;  %v973_v57 = vld [vmem:[%s11839_s6 + $0xe08] sm:$0xff] }
  0xdd   :  { %968 = vst [vmem:[#allocation3 + $0xdf0] sm:$0xff] %v967_v54  ;;  %970 = vst [vmem:[#allocation3 + $0xdf8] sm:$0xff] %v969_v55  ;;  %v975_v58 = vld [vmem:[%s11839_s6 + $0xe10] sm:$0xff]  ;;  %v977_v59 = vld [vmem:[%s11839_s6 + $0xe18] sm:$0xff] }
  0xde   :  { %972 = vst [vmem:[#allocation3 + $0xe00] sm:$0xff] %v971_v56  ;;  %974 = vst [vmem:[#allocation3 + $0xe08] sm:$0xff] %v973_v57  ;;  %v979_v60 = vld [vmem:[%s11839_s6 + $0xe20] sm:$0xff]  ;;  %v981_v61 = vld [vmem:[%s11839_s6 + $0xe28] sm:$0xff] }
  0xdf   :  { %976 = vst [vmem:[#allocation3 + $0xe10] sm:$0xff] %v975_v58  ;;  %978 = vst [vmem:[#allocation3 + $0xe18] sm:$0xff] %v977_v59  ;;  %v983_v62 = vld [vmem:[%s11839_s6 + $0xe30] sm:$0xff]  ;;  %v985_v63 = vld [vmem:[%s11839_s6 + $0xe38] sm:$0xff] }
  0xe0   :  { %980 = vst [vmem:[#allocation3 + $0xe20] sm:$0xff] %v979_v60  ;;  %982 = vst [vmem:[#allocation3 + $0xe28] sm:$0xff] %v981_v61  ;;  %v987_v0 = vld [vmem:[%s11839_s6 + $0xe40] sm:$0xff]  ;;  %v989_v1 = vld [vmem:[%s11839_s6 + $0xe48] sm:$0xff] }
  0xe1   :  { %984 = vst [vmem:[#allocation3 + $0xe30] sm:$0xff] %v983_v62  ;;  %986 = vst [vmem:[#allocation3 + $0xe38] sm:$0xff] %v985_v63  ;;  %v991_v2 = vld [vmem:[%s11839_s6 + $0xe50] sm:$0xff]  ;;  %v993_v3 = vld [vmem:[%s11839_s6 + $0xe60] sm:$0xff] }
  0xe2   :  { %988 = vst [vmem:[#allocation3 + $0xe40] sm:$0xff] %v987_v0  ;;  %990 = vst [vmem:[#allocation3 + $0xe48] sm:$0xff] %v989_v1  ;;  %v995_v4 = vld [vmem:[%s11839_s6 + $0xe68] sm:$0xff]  ;;  %v997_v5 = vld [vmem:[%s11839_s6 + $0xe70] sm:$0xff] }
  0xe3   :  { %992 = vst [vmem:[#allocation3 + $0xe50] sm:$0xff] %v991_v2  ;;  %994 = vst [vmem:[#allocation3 + $0xe60] sm:$0xff] %v993_v3  ;;  %v999_v6 = vld [vmem:[%s11839_s6 + $0xe78] sm:$0xff]  ;;  %v1001_v7 = vld [vmem:[%s11839_s6 + $0xe80] sm:$0xff] }
  0xe4   :  { %996 = vst [vmem:[#allocation3 + $0xe68] sm:$0xff] %v995_v4  ;;  %998 = vst [vmem:[#allocation3 + $0xe70] sm:$0xff] %v997_v5  ;;  %v1003_v8 = vld [vmem:[%s11839_s6 + $0xe88] sm:$0xff]  ;;  %v1005_v9 = vld [vmem:[%s11839_s6 + $0xe90] sm:$0xff] }
  0xe5   :  { %1000 = vst [vmem:[#allocation3 + $0xe78] sm:$0xff] %v999_v6  ;;  %1002 = vst [vmem:[#allocation3 + $0xe80] sm:$0xff] %v1001_v7  ;;  %v1007_v10 = vld [vmem:[%s11839_s6 + $0xe98] sm:$0xff]  ;;  %v1009_v11 = vld [vmem:[%s11839_s6 + $0xea0] sm:$0xff] }
  0xe6   :  { %1004 = vst [vmem:[#allocation3 + $0xe88] sm:$0xff] %v1003_v8  ;;  %1006 = vst [vmem:[#allocation3 + $0xe90] sm:$0xff] %v1005_v9  ;;  %v1011_v12 = vld [vmem:[%s11839_s6 + $0xea8] sm:$0xff]  ;;  %v1013_v13 = vld [vmem:[%s11839_s6 + $0xeb0] sm:$0xff] }
  0xe7   :  { %1008 = vst [vmem:[#allocation3 + $0xe98] sm:$0xff] %v1007_v10  ;;  %1010 = vst [vmem:[#allocation3 + $0xea0] sm:$0xff] %v1009_v11  ;;  %v1015_v14 = vld [vmem:[%s11839_s6 + $0xeb8] sm:$0xff]  ;;  %v1017_v15 = vld [vmem:[%s11839_s6 + $0xec0] sm:$0xff] }
  0xe8   :  { %1012 = vst [vmem:[#allocation3 + $0xea8] sm:$0xff] %v1011_v12  ;;  %1014 = vst [vmem:[#allocation3 + $0xeb0] sm:$0xff] %v1013_v13  ;;  %v1019_v16 = vld [vmem:[%s11839_s6 + $0xec8] sm:$0xff]  ;;  %v1021_v17 = vld [vmem:[%s11839_s6 + $0xed0] sm:$0xff] }
  0xe9   :  { %1016 = vst [vmem:[#allocation3 + $0xeb8] sm:$0xff] %v1015_v14  ;;  %1018 = vst [vmem:[#allocation3 + $0xec0] sm:$0xff] %v1017_v15  ;;  %v1023_v18 = vld [vmem:[%s11839_s6 + $0xed8] sm:$0xff]  ;;  %v1025_v19 = vld [vmem:[%s11839_s6 + $0xee0] sm:$0xff] }
  0xea   :  { %1020 = vst [vmem:[#allocation3 + $0xec8] sm:$0xff] %v1019_v16  ;;  %1022 = vst [vmem:[#allocation3 + $0xed0] sm:$0xff] %v1021_v17  ;;  %v1027_v20 = vld [vmem:[%s11839_s6 + $0xee8] sm:$0xff]  ;;  %v1029_v21 = vld [vmem:[%s11839_s6 + $0xef0] sm:$0xff] }
  0xeb   :  { %1024 = vst [vmem:[#allocation3 + $0xed8] sm:$0xff] %v1023_v18  ;;  %1026 = vst [vmem:[#allocation3 + $0xee0] sm:$0xff] %v1025_v19  ;;  %v1031_v22 = vld [vmem:[%s11839_s6 + $0xef8] sm:$0xff]  ;;  %v1033_v23 = vld [vmem:[%s11839_s6 + $0xf00] sm:$0xff] }
  0xec   :  { %1028 = vst [vmem:[#allocation3 + $0xee8] sm:$0xff] %v1027_v20  ;;  %1030 = vst [vmem:[#allocation3 + $0xef0] sm:$0xff] %v1029_v21  ;;  %v1035_v24 = vld [vmem:[%s11839_s6 + $0xf08] sm:$0xff]  ;;  %v1037_v25 = vld [vmem:[%s11839_s6 + $0xf10] sm:$0xff] }
  0xed   :  { %1032 = vst [vmem:[#allocation3 + $0xef8] sm:$0xff] %v1031_v22  ;;  %1034 = vst [vmem:[#allocation3 + $0xf00] sm:$0xff] %v1033_v23  ;;  %v1039_v26 = vld [vmem:[%s11839_s6 + $0xf18] sm:$0xff]  ;;  %v1041_v27 = vld [vmem:[%s11839_s6 + $0xf20] sm:$0xff] }
  0xee   :  { %1036 = vst [vmem:[#allocation3 + $0xf08] sm:$0xff] %v1035_v24  ;;  %1038 = vst [vmem:[#allocation3 + $0xf10] sm:$0xff] %v1037_v25  ;;  %v1043_v28 = vld [vmem:[%s11839_s6 + $0xf28] sm:$0xff]  ;;  %v1045_v29 = vld [vmem:[%s11839_s6 + $0xf30] sm:$0xff] }
  0xef   :  { %1040 = vst [vmem:[#allocation3 + $0xf18] sm:$0xff] %v1039_v26  ;;  %1042 = vst [vmem:[#allocation3 + $0xf20] sm:$0xff] %v1041_v27  ;;  %v1047_v30 = vld [vmem:[%s11839_s6 + $0xf38] sm:$0xff]  ;;  %v1049_v31 = vld [vmem:[%s11839_s6 + $0xf40] sm:$0xff] }
  0xf0   :  { %1044 = vst [vmem:[#allocation3 + $0xf28] sm:$0xff] %v1043_v28  ;;  %1046 = vst [vmem:[#allocation3 + $0xf30] sm:$0xff] %v1045_v29  ;;  %v1051_v32 = vld [vmem:[%s11839_s6 + $0xf48] sm:$0xff]  ;;  %v1053_v33 = vld [vmem:[%s11839_s6 + $0xf50] sm:$0xff] }
  0xf1   :  { %1048 = vst [vmem:[#allocation3 + $0xf38] sm:$0xff] %v1047_v30  ;;  %1050 = vst [vmem:[#allocation3 + $0xf40] sm:$0xff] %v1049_v31  ;;  %v1055_v34 = vld [vmem:[%s11839_s6 + $0xf58] sm:$0xff]  ;;  %v1057_v35 = vld [vmem:[%s11839_s6 + $0xf60] sm:$0xff] }
  0xf2   :  { %1052 = vst [vmem:[#allocation3 + $0xf48] sm:$0xff] %v1051_v32  ;;  %1054 = vst [vmem:[#allocation3 + $0xf50] sm:$0xff] %v1053_v33  ;;  %v1059_v36 = vld [vmem:[%s11839_s6 + $0xf68] sm:$0xff]  ;;  %v1061_v37 = vld [vmem:[%s11839_s6 + $0xf70] sm:$0xff] }
  0xf3   :  { %1056 = vst [vmem:[#allocation3 + $0xf58] sm:$0xff] %v1055_v34  ;;  %1058 = vst [vmem:[#allocation3 + $0xf60] sm:$0xff] %v1057_v35  ;;  %v1063_v38 = vld [vmem:[%s11839_s6 + $0xf78] sm:$0xff]  ;;  %v1065_v39 = vld [vmem:[%s11839_s6 + $0xf80] sm:$0xff] }
  0xf4   :  { %1060 = vst [vmem:[#allocation3 + $0xf68] sm:$0xff] %v1059_v36  ;;  %1062 = vst [vmem:[#allocation3 + $0xf70] sm:$0xff] %v1061_v37  ;;  %v1067_v40 = vld [vmem:[%s11839_s6 + $0xf88] sm:$0xff]  ;;  %v1069_v41 = vld [vmem:[%s11839_s6 + $0xf90] sm:$0xff] }
  0xf5   :  { %1064 = vst [vmem:[#allocation3 + $0xf78] sm:$0xff] %v1063_v38  ;;  %1066 = vst [vmem:[#allocation3 + $0xf80] sm:$0xff] %v1065_v39  ;;  %v1071_v42 = vld [vmem:[%s11839_s6 + $0xf98] sm:$0xff]  ;;  %v1073_v43 = vld [vmem:[%s11839_s6 + $0xfa0] sm:$0xff] }
  0xf6   :  { %1068 = vst [vmem:[#allocation3 + $0xf88] sm:$0xff] %v1067_v40  ;;  %1070 = vst [vmem:[#allocation3 + $0xf90] sm:$0xff] %v1069_v41  ;;  %v1075_v44 = vld [vmem:[%s11839_s6 + $0xfa8] sm:$0xff]  ;;  %v1077_v45 = vld [vmem:[%s11839_s6 + $0xfb0] sm:$0xff] }
  0xf7   :  { %1072 = vst [vmem:[#allocation3 + $0xf98] sm:$0xff] %v1071_v42  ;;  %1074 = vst [vmem:[#allocation3 + $0xfa0] sm:$0xff] %v1073_v43  ;;  %v1079_v46 = vld [vmem:[%s11839_s6 + $0xfb8] sm:$0xff]  ;;  %v1081_v47 = vld [vmem:[%s11839_s6 + $0xfc0] sm:$0xff] }
  0xf8   :  { %1076 = vst [vmem:[#allocation3 + $0xfa8] sm:$0xff] %v1075_v44  ;;  %1078 = vst [vmem:[#allocation3 + $0xfb0] sm:$0xff] %v1077_v45  ;;  %v1083_v48 = vld [vmem:[%s11839_s6 + $0xfd0] sm:$0xff]  ;;  %v1085_v49 = vld [vmem:[%s11839_s6 + $0xfd8] sm:$0xff] }
  0xf9   :  { %1080 = vst [vmem:[#allocation3 + $0xfb8] sm:$0xff] %v1079_v46  ;;  %1082 = vst [vmem:[#allocation3 + $0xfc0] sm:$0xff] %v1081_v47  ;;  %v1087_v50 = vld [vmem:[%s11839_s6 + $0xfe0] sm:$0xff]  ;;  %v1089_v51 = vld [vmem:[%s11839_s6 + $0xfe8] sm:$0xff] }
  0xfa   :  { %1084 = vst [vmem:[#allocation3 + $0xfd0] sm:$0xff] %v1083_v48  ;;  %1086 = vst [vmem:[#allocation3 + $0xfd8] sm:$0xff] %v1085_v49  ;;  %v1091_v52 = vld [vmem:[%s11839_s6 + $0xff0] sm:$0xff]  ;;  %v1093_v53 = vld [vmem:[%s11839_s6 + $0xff8] sm:$0xff] }
  0xfb   :  { %1088 = vst [vmem:[#allocation3 + $0xfe0] sm:$0xff] %v1087_v50  ;;  %1090 = vst [vmem:[#allocation3 + $0xfe8] sm:$0xff] %v1089_v51  ;;  %v1095_v54 = vld [vmem:[%s11839_s6 + $0x1000] sm:$0xff]  ;;  %v1097_v55 = vld [vmem:[%s11839_s6 + $0x1008] sm:$0xff] }
  0xfc   :  { %1092 = vst [vmem:[#allocation3 + $0xff0] sm:$0xff] %v1091_v52  ;;  %1094 = vst [vmem:[#allocation3 + $0xff8] sm:$0xff] %v1093_v53  ;;  %v1099_v56 = vld [vmem:[%s11839_s6 + $0x1010] sm:$0xff]  ;;  %v1101_v57 = vld [vmem:[%s11839_s6 + $0x1018] sm:$0xff] }
  0xfd   :  { %1096 = vst [vmem:[#allocation3 + $0x1000] sm:$0xff] %v1095_v54  ;;  %1098 = vst [vmem:[#allocation3 + $0x1008] sm:$0xff] %v1097_v55  ;;  %v1103_v58 = vld [vmem:[%s11839_s6 + $0x1020] sm:$0xff]  ;;  %v1105_v59 = vld [vmem:[%s11839_s6 + $0x1028] sm:$0xff] }
  0xfe   :  { %1100 = vst [vmem:[#allocation3 + $0x1010] sm:$0xff] %v1099_v56  ;;  %1102 = vst [vmem:[#allocation3 + $0x1018] sm:$0xff] %v1101_v57  ;;  %v1107_v60 = vld [vmem:[%s11839_s6 + $0x1030] sm:$0xff]  ;;  %v1109_v61 = vld [vmem:[%s11839_s6 + $0x1038] sm:$0xff] }
  0xff   :  { %1104 = vst [vmem:[#allocation3 + $0x1020] sm:$0xff] %v1103_v58  ;;  %1106 = vst [vmem:[#allocation3 + $0x1028] sm:$0xff] %v1105_v59  ;;  %v1111_v62 = vld [vmem:[%s11839_s6 + $0x1040] sm:$0xff]  ;;  %v1113_v63 = vld [vmem:[%s11839_s6 + $0x1048] sm:$0xff] }
 0x100   :  { %1108 = vst [vmem:[#allocation3 + $0x1030] sm:$0xff] %v1107_v60  ;;  %1110 = vst [vmem:[#allocation3 + $0x1038] sm:$0xff] %v1109_v61  ;;  %v1115_v0 = vld [vmem:[%s11839_s6 + $0x1050] sm:$0xff]  ;;  %v1117_v1 = vld [vmem:[%s11839_s6 + $0x1058] sm:$0xff] }
 0x101   :  { %1112 = vst [vmem:[#allocation3 + $0x1040] sm:$0xff] %v1111_v62  ;;  %1114 = vst [vmem:[#allocation3 + $0x1048] sm:$0xff] %v1113_v63  ;;  %v1119_v2 = vld [vmem:[%s11839_s6 + $0x1060] sm:$0xff]  ;;  %v1121_v3 = vld [vmem:[%s11839_s6 + $0x1068] sm:$0xff] }
 0x102   :  { %1116 = vst [vmem:[#allocation3 + $0x1050] sm:$0xff] %v1115_v0  ;;  %1118 = vst [vmem:[#allocation3 + $0x1058] sm:$0xff] %v1117_v1  ;;  %v1123_v4 = vld [vmem:[%s11839_s6 + $0x1070] sm:$0xff]  ;;  %v1125_v5 = vld [vmem:[%s11839_s6 + $0x1078] sm:$0xff] }
 0x103   :  { %1120 = vst [vmem:[#allocation3 + $0x1060] sm:$0xff] %v1119_v2  ;;  %1122 = vst [vmem:[#allocation3 + $0x1068] sm:$0xff] %v1121_v3  ;;  %v1127_v6 = vld [vmem:[%s11839_s6 + $0x1080] sm:$0xff]  ;;  %v1129_v7 = vld [vmem:[%s11839_s6 + $0x1088] sm:$0xff] }
 0x104   :  { %1124 = vst [vmem:[#allocation3 + $0x1070] sm:$0xff] %v1123_v4  ;;  %1126 = vst [vmem:[#allocation3 + $0x1078] sm:$0xff] %v1125_v5  ;;  %v1131_v8 = vld [vmem:[%s11839_s6 + $0x1090] sm:$0xff]  ;;  %v1133_v9 = vld [vmem:[%s11839_s6 + $0x1098] sm:$0xff] }
 0x105   :  { %1128 = vst [vmem:[#allocation3 + $0x1080] sm:$0xff] %v1127_v6  ;;  %1130 = vst [vmem:[#allocation3 + $0x1088] sm:$0xff] %v1129_v7  ;;  %v1135_v10 = vld [vmem:[%s11839_s6 + $0x10a0] sm:$0xff]  ;;  %v1137_v11 = vld [vmem:[%s11839_s6 + $0x10a8] sm:$0xff] }
 0x106   :  { %1132 = vst [vmem:[#allocation3 + $0x1090] sm:$0xff] %v1131_v8  ;;  %1134 = vst [vmem:[#allocation3 + $0x1098] sm:$0xff] %v1133_v9  ;;  %v1139_v12 = vld [vmem:[%s11839_s6 + $0x10b0] sm:$0xff]  ;;  %v1141_v13 = vld [vmem:[%s11839_s6 + $0x10b8] sm:$0xff] }
 0x107   :  { %1136 = vst [vmem:[#allocation3 + $0x10a0] sm:$0xff] %v1135_v10  ;;  %1138 = vst [vmem:[#allocation3 + $0x10a8] sm:$0xff] %v1137_v11  ;;  %v1143_v14 = vld [vmem:[%s11839_s6 + $0x10c0] sm:$0xff]  ;;  %v1145_v15 = vld [vmem:[%s11839_s6 + $0x10c8] sm:$0xff] }
 0x108   :  { %1140 = vst [vmem:[#allocation3 + $0x10b0] sm:$0xff] %v1139_v12  ;;  %1142 = vst [vmem:[#allocation3 + $0x10b8] sm:$0xff] %v1141_v13  ;;  %v1147_v16 = vld [vmem:[%s11839_s6 + $0x10d0] sm:$0xff]  ;;  %v1149_v17 = vld [vmem:[%s11839_s6 + $0x10d8] sm:$0xff] }
 0x109   :  { %1144 = vst [vmem:[#allocation3 + $0x10c0] sm:$0xff] %v1143_v14  ;;  %1146 = vst [vmem:[#allocation3 + $0x10c8] sm:$0xff] %v1145_v15  ;;  %v1151_v18 = vld [vmem:[%s11839_s6 + $0x10e0] sm:$0xff]  ;;  %v1153_v19 = vld [vmem:[%s11839_s6 + $0x10e8] sm:$0xff] }
 0x10a   :  { %1148 = vst [vmem:[#allocation3 + $0x10d0] sm:$0xff] %v1147_v16  ;;  %1150 = vst [vmem:[#allocation3 + $0x10d8] sm:$0xff] %v1149_v17  ;;  %v1155_v20 = vld [vmem:[%s11839_s6 + $0x10f0] sm:$0xff]  ;;  %v1157_v21 = vld [vmem:[%s11839_s6 + $0x10f8] sm:$0xff] }
 0x10b   :  { %1152 = vst [vmem:[#allocation3 + $0x10e0] sm:$0xff] %v1151_v18  ;;  %1154 = vst [vmem:[#allocation3 + $0x10e8] sm:$0xff] %v1153_v19  ;;  %v1159_v22 = vld [vmem:[%s11839_s6 + $0x1100] sm:$0xff]  ;;  %v1161_v23 = vld [vmem:[%s11839_s6 + $0x1108] sm:$0xff] }
 0x10c   :  { %1156 = vst [vmem:[#allocation3 + $0x10f0] sm:$0xff] %v1155_v20  ;;  %1158 = vst [vmem:[#allocation3 + $0x10f8] sm:$0xff] %v1157_v21  ;;  %v1163_v24 = vld [vmem:[%s11839_s6 + $0x1110] sm:$0xff]  ;;  %v1165_v25 = vld [vmem:[%s11839_s6 + $0x1118] sm:$0xff] }
 0x10d   :  { %1160 = vst [vmem:[#allocation3 + $0x1100] sm:$0xff] %v1159_v22  ;;  %1162 = vst [vmem:[#allocation3 + $0x1108] sm:$0xff] %v1161_v23  ;;  %v1167_v26 = vld [vmem:[%s11839_s6 + $0x1120] sm:$0xff]  ;;  %v1169_v27 = vld [vmem:[%s11839_s6 + $0x1128] sm:$0xff] }
 0x10e   :  { %1164 = vst [vmem:[#allocation3 + $0x1110] sm:$0xff] %v1163_v24  ;;  %1166 = vst [vmem:[#allocation3 + $0x1118] sm:$0xff] %v1165_v25  ;;  %v1171_v28 = vld [vmem:[%s11839_s6 + $0x1130] sm:$0xff]  ;;  %v1173_v29 = vld [vmem:[%s11839_s6 + $0x1140] sm:$0xff] }
 0x10f   :  { %1168 = vst [vmem:[#allocation3 + $0x1120] sm:$0xff] %v1167_v26  ;;  %1170 = vst [vmem:[#allocation3 + $0x1128] sm:$0xff] %v1169_v27  ;;  %v1175_v30 = vld [vmem:[%s11839_s6 + $0x1148] sm:$0xff]  ;;  %v1177_v31 = vld [vmem:[%s11839_s6 + $0x1150] sm:$0xff] }
 0x110   :  { %1172 = vst [vmem:[#allocation3 + $0x1130] sm:$0xff] %v1171_v28  ;;  %1174 = vst [vmem:[#allocation3 + $0x1140] sm:$0xff] %v1173_v29  ;;  %v1179_v32 = vld [vmem:[%s11839_s6 + $0x1158] sm:$0xff]  ;;  %v1181_v33 = vld [vmem:[%s11839_s6 + $0x1160] sm:$0xff] }
 0x111   :  { %1176 = vst [vmem:[#allocation3 + $0x1148] sm:$0xff] %v1175_v30  ;;  %1178 = vst [vmem:[#allocation3 + $0x1150] sm:$0xff] %v1177_v31  ;;  %v1183_v34 = vld [vmem:[%s11839_s6 + $0x1168] sm:$0xff]  ;;  %v1185_v35 = vld [vmem:[%s11839_s6 + $0x1170] sm:$0xff] }
 0x112   :  { %1180 = vst [vmem:[#allocation3 + $0x1158] sm:$0xff] %v1179_v32  ;;  %1182 = vst [vmem:[#allocation3 + $0x1160] sm:$0xff] %v1181_v33  ;;  %v1187_v36 = vld [vmem:[%s11839_s6 + $0x1178] sm:$0xff]  ;;  %v1189_v37 = vld [vmem:[%s11839_s6 + $0x1180] sm:$0xff] }
 0x113   :  { %1184 = vst [vmem:[#allocation3 + $0x1168] sm:$0xff] %v1183_v34  ;;  %1186 = vst [vmem:[#allocation3 + $0x1170] sm:$0xff] %v1185_v35  ;;  %v1191_v38 = vld [vmem:[%s11839_s6 + $0x1188] sm:$0xff]  ;;  %v1193_v39 = vld [vmem:[%s11839_s6 + $0x1190] sm:$0xff] }
 0x114   :  { %1188 = vst [vmem:[#allocation3 + $0x1178] sm:$0xff] %v1187_v36  ;;  %1190 = vst [vmem:[#allocation3 + $0x1180] sm:$0xff] %v1189_v37  ;;  %v1195_v40 = vld [vmem:[%s11839_s6 + $0x1198] sm:$0xff]  ;;  %v1197_v41 = vld [vmem:[%s11839_s6 + $0x11a0] sm:$0xff] }
 0x115   :  { %1192 = vst [vmem:[#allocation3 + $0x1188] sm:$0xff] %v1191_v38  ;;  %1194 = vst [vmem:[#allocation3 + $0x1190] sm:$0xff] %v1193_v39  ;;  %v1199_v42 = vld [vmem:[%s11839_s6 + $0x11a8] sm:$0xff]  ;;  %v1201_v43 = vld [vmem:[%s11839_s6 + $0x11b0] sm:$0xff] }
 0x116   :  { %1196 = vst [vmem:[#allocation3 + $0x1198] sm:$0xff] %v1195_v40  ;;  %1198 = vst [vmem:[#allocation3 + $0x11a0] sm:$0xff] %v1197_v41  ;;  %v1203_v44 = vld [vmem:[%s11839_s6 + $0x11b8] sm:$0xff]  ;;  %v1205_v45 = vld [vmem:[%s11839_s6 + $0x11c0] sm:$0xff] }
 0x117   :  { %1200 = vst [vmem:[#allocation3 + $0x11a8] sm:$0xff] %v1199_v42  ;;  %1202 = vst [vmem:[#allocation3 + $0x11b0] sm:$0xff] %v1201_v43  ;;  %v1207_v46 = vld [vmem:[%s11839_s6 + $0x11c8] sm:$0xff]  ;;  %v1209_v47 = vld [vmem:[%s11839_s6 + $0x11d0] sm:$0xff] }
 0x118   :  { %1204 = vst [vmem:[#allocation3 + $0x11b8] sm:$0xff] %v1203_v44  ;;  %1206 = vst [vmem:[#allocation3 + $0x11c0] sm:$0xff] %v1205_v45  ;;  %v1211_v48 = vld [vmem:[%s11839_s6 + $0x11d8] sm:$0xff]  ;;  %v1213_v49 = vld [vmem:[%s11839_s6 + $0x11e0] sm:$0xff] }
 0x119   :  { %1208 = vst [vmem:[#allocation3 + $0x11c8] sm:$0xff] %v1207_v46  ;;  %1210 = vst [vmem:[#allocation3 + $0x11d0] sm:$0xff] %v1209_v47  ;;  %v1215_v50 = vld [vmem:[%s11839_s6 + $0x11e8] sm:$0xff]  ;;  %v1217_v51 = vld [vmem:[%s11839_s6 + $0x11f0] sm:$0xff] }
 0x11a   :  { %1212 = vst [vmem:[#allocation3 + $0x11d8] sm:$0xff] %v1211_v48  ;;  %1214 = vst [vmem:[#allocation3 + $0x11e0] sm:$0xff] %v1213_v49  ;;  %v1219_v52 = vld [vmem:[%s11839_s6 + $0x11f8] sm:$0xff]  ;;  %v1221_v53 = vld [vmem:[%s11839_s6 + $0x1200] sm:$0xff] }
 0x11b   :  { %1216 = vst [vmem:[#allocation3 + $0x11e8] sm:$0xff] %v1215_v50  ;;  %1218 = vst [vmem:[#allocation3 + $0x11f0] sm:$0xff] %v1217_v51  ;;  %v1223_v54 = vld [vmem:[%s11839_s6 + $0x1208] sm:$0xff]  ;;  %v1225_v55 = vld [vmem:[%s11839_s6 + $0x1210] sm:$0xff] }
 0x11c   :  { %1220 = vst [vmem:[#allocation3 + $0x11f8] sm:$0xff] %v1219_v52  ;;  %1222 = vst [vmem:[#allocation3 + $0x1200] sm:$0xff] %v1221_v53  ;;  %v1227_v56 = vld [vmem:[%s11839_s6 + $0x1218] sm:$0xff]  ;;  %v1229_v57 = vld [vmem:[%s11839_s6 + $0x1220] sm:$0xff] }
 0x11d   :  { %1224 = vst [vmem:[#allocation3 + $0x1208] sm:$0xff] %v1223_v54  ;;  %1226 = vst [vmem:[#allocation3 + $0x1210] sm:$0xff] %v1225_v55  ;;  %v1231_v58 = vld [vmem:[%s11839_s6 + $0x1228] sm:$0xff]  ;;  %v1233_v59 = vld [vmem:[%s11839_s6 + $0x1230] sm:$0xff] }
 0x11e   :  { %1228 = vst [vmem:[#allocation3 + $0x1218] sm:$0xff] %v1227_v56  ;;  %1230 = vst [vmem:[#allocation3 + $0x1220] sm:$0xff] %v1229_v57  ;;  %v1235_v60 = vld [vmem:[%s11839_s6 + $0x1238] sm:$0xff]  ;;  %v1237_v61 = vld [vmem:[%s11839_s6 + $0x1240] sm:$0xff] }
 0x11f   :  { %1232 = vst [vmem:[#allocation3 + $0x1228] sm:$0xff] %v1231_v58  ;;  %1234 = vst [vmem:[#allocation3 + $0x1230] sm:$0xff] %v1233_v59  ;;  %v1239_v62 = vld [vmem:[%s11839_s6 + $0x1248] sm:$0xff]  ;;  %v1241_v63 = vld [vmem:[%s11839_s6 + $0x1250] sm:$0xff] }
 0x120   :  { %1236 = vst [vmem:[#allocation3 + $0x1238] sm:$0xff] %v1235_v60  ;;  %1238 = vst [vmem:[#allocation3 + $0x1240] sm:$0xff] %v1237_v61  ;;  %v1243_v0 = vld [vmem:[%s11839_s6 + $0x1258] sm:$0xff]  ;;  %v1245_v1 = vld [vmem:[%s11839_s6 + $0x1260] sm:$0xff] }
 0x121   :  { %1240 = vst [vmem:[#allocation3 + $0x1248] sm:$0xff] %v1239_v62  ;;  %1242 = vst [vmem:[#allocation3 + $0x1250] sm:$0xff] %v1241_v63  ;;  %v1247_v2 = vld [vmem:[%s11839_s6 + $0x1268] sm:$0xff]  ;;  %v1249_v3 = vld [vmem:[%s11839_s6 + $0x1270] sm:$0xff] }
 0x122   :  { %1244 = vst [vmem:[#allocation3 + $0x1258] sm:$0xff] %v1243_v0  ;;  %1246 = vst [vmem:[#allocation3 + $0x1260] sm:$0xff] %v1245_v1  ;;  %v1251_v4 = vld [vmem:[%s11839_s6 + $0x1278] sm:$0xff]  ;;  %v1253_v5 = vld [vmem:[%s11839_s6 + $0x1280] sm:$0xff] }
 0x123   :  { %1248 = vst [vmem:[#allocation3 + $0x1268] sm:$0xff] %v1247_v2  ;;  %1250 = vst [vmem:[#allocation3 + $0x1270] sm:$0xff] %v1249_v3  ;;  %v1255_v6 = vld [vmem:[%s11839_s6 + $0x1288] sm:$0xff]  ;;  %v1257_v7 = vld [vmem:[%s11839_s6 + $0x1290] sm:$0xff] }
 0x124   :  { %1252 = vst [vmem:[#allocation3 + $0x1278] sm:$0xff] %v1251_v4  ;;  %1254 = vst [vmem:[#allocation3 + $0x1280] sm:$0xff] %v1253_v5  ;;  %v1259_v8 = vld [vmem:[%s11839_s6 + $0x1298] sm:$0xff]  ;;  %v1261_v9 = vld [vmem:[%s11839_s6 + $0x12a0] sm:$0xff] }
 0x125   :  { %1256 = vst [vmem:[#allocation3 + $0x1288] sm:$0xff] %v1255_v6  ;;  %1258 = vst [vmem:[#allocation3 + $0x1290] sm:$0xff] %v1257_v7  ;;  %v1263_v10 = vld [vmem:[%s11839_s6 + $0x12b0] sm:$0xff]  ;;  %v1265_v11 = vld [vmem:[%s11839_s6 + $0x12b8] sm:$0xff] }
 0x126   :  { %1260 = vst [vmem:[#allocation3 + $0x1298] sm:$0xff] %v1259_v8  ;;  %1262 = vst [vmem:[#allocation3 + $0x12a0] sm:$0xff] %v1261_v9  ;;  %v1267_v12 = vld [vmem:[%s11839_s6 + $0x12c0] sm:$0xff]  ;;  %v1269_v13 = vld [vmem:[%s11839_s6 + $0x12c8] sm:$0xff] }
 0x127   :  { %1264 = vst [vmem:[#allocation3 + $0x12b0] sm:$0xff] %v1263_v10  ;;  %1266 = vst [vmem:[#allocation3 + $0x12b8] sm:$0xff] %v1265_v11  ;;  %v1271_v14 = vld [vmem:[%s11839_s6 + $0x12d0] sm:$0xff]  ;;  %v1273_v15 = vld [vmem:[%s11839_s6 + $0x12d8] sm:$0xff] }
 0x128   :  { %1268 = vst [vmem:[#allocation3 + $0x12c0] sm:$0xff] %v1267_v12  ;;  %1270 = vst [vmem:[#allocation3 + $0x12c8] sm:$0xff] %v1269_v13  ;;  %v1275_v16 = vld [vmem:[%s11839_s6 + $0x12e0] sm:$0xff]  ;;  %v1277_v17 = vld [vmem:[%s11839_s6 + $0x12e8] sm:$0xff] }
 0x129   :  { %1272 = vst [vmem:[#allocation3 + $0x12d0] sm:$0xff] %v1271_v14  ;;  %1274 = vst [vmem:[#allocation3 + $0x12d8] sm:$0xff] %v1273_v15  ;;  %v1279_v18 = vld [vmem:[%s11839_s6 + $0x12f0] sm:$0xff]  ;;  %v1281_v19 = vld [vmem:[%s11839_s6 + $0x12f8] sm:$0xff] }
 0x12a   :  { %1276 = vst [vmem:[#allocation3 + $0x12e0] sm:$0xff] %v1275_v16  ;;  %1278 = vst [vmem:[#allocation3 + $0x12e8] sm:$0xff] %v1277_v17  ;;  %v1283_v20 = vld [vmem:[%s11839_s6 + $0x1300] sm:$0xff]  ;;  %v1285_v21 = vld [vmem:[%s11839_s6 + $0x1308] sm:$0xff] }
 0x12b   :  { %1280 = vst [vmem:[#allocation3 + $0x12f0] sm:$0xff] %v1279_v18  ;;  %1282 = vst [vmem:[#allocation3 + $0x12f8] sm:$0xff] %v1281_v19  ;;  %v1287_v22 = vld [vmem:[%s11839_s6 + $0x1310] sm:$0xff]  ;;  %v1289_v23 = vld [vmem:[%s11839_s6 + $0x1318] sm:$0xff] }
 0x12c   :  { %1284 = vst [vmem:[#allocation3 + $0x1300] sm:$0xff] %v1283_v20  ;;  %1286 = vst [vmem:[#allocation3 + $0x1308] sm:$0xff] %v1285_v21  ;;  %v1291_v24 = vld [vmem:[%s11839_s6 + $0x1320] sm:$0xff]  ;;  %v1293_v25 = vld [vmem:[%s11839_s6 + $0x1328] sm:$0xff] }
 0x12d   :  { %1288 = vst [vmem:[#allocation3 + $0x1310] sm:$0xff] %v1287_v22  ;;  %1290 = vst [vmem:[#allocation3 + $0x1318] sm:$0xff] %v1289_v23  ;;  %v1295_v26 = vld [vmem:[%s11839_s6 + $0x1330] sm:$0xff]  ;;  %v1297_v27 = vld [vmem:[%s11839_s6 + $0x1338] sm:$0xff] }
 0x12e   :  { %1292 = vst [vmem:[#allocation3 + $0x1320] sm:$0xff] %v1291_v24  ;;  %1294 = vst [vmem:[#allocation3 + $0x1328] sm:$0xff] %v1293_v25  ;;  %v1299_v28 = vld [vmem:[%s11839_s6 + $0x1340] sm:$0xff]  ;;  %v1301_v29 = vld [vmem:[%s11839_s6 + $0x1348] sm:$0xff] }
 0x12f   :  { %1296 = vst [vmem:[#allocation3 + $0x1330] sm:$0xff] %v1295_v26  ;;  %1298 = vst [vmem:[#allocation3 + $0x1338] sm:$0xff] %v1297_v27  ;;  %v1303_v30 = vld [vmem:[%s11839_s6 + $0x1350] sm:$0xff]  ;;  %v1305_v31 = vld [vmem:[%s11839_s6 + $0x1358] sm:$0xff] }
 0x130   :  { %1300 = vst [vmem:[#allocation3 + $0x1340] sm:$0xff] %v1299_v28  ;;  %1302 = vst [vmem:[#allocation3 + $0x1348] sm:$0xff] %v1301_v29  ;;  %v1307_v32 = vld [vmem:[%s11839_s6 + $0x1360] sm:$0xff]  ;;  %v1309_v33 = vld [vmem:[%s11839_s6 + $0x1368] sm:$0xff] }
 0x131   :  { %1304 = vst [vmem:[#allocation3 + $0x1350] sm:$0xff] %v1303_v30  ;;  %1306 = vst [vmem:[#allocation3 + $0x1358] sm:$0xff] %v1305_v31  ;;  %v1311_v34 = vld [vmem:[%s11839_s6 + $0x1370] sm:$0xff]  ;;  %v1313_v35 = vld [vmem:[%s11839_s6 + $0x1378] sm:$0xff] }
 0x132   :  { %1308 = vst [vmem:[#allocation3 + $0x1360] sm:$0xff] %v1307_v32  ;;  %1310 = vst [vmem:[#allocation3 + $0x1368] sm:$0xff] %v1309_v33  ;;  %v1315_v36 = vld [vmem:[%s11839_s6 + $0x1380] sm:$0xff]  ;;  %v1317_v37 = vld [vmem:[%s11839_s6 + $0x1388] sm:$0xff] }
 0x133   :  { %1312 = vst [vmem:[#allocation3 + $0x1370] sm:$0xff] %v1311_v34  ;;  %1314 = vst [vmem:[#allocation3 + $0x1378] sm:$0xff] %v1313_v35  ;;  %v1319_v38 = vld [vmem:[%s11839_s6 + $0x1390] sm:$0xff]  ;;  %v1321_v39 = vld [vmem:[%s11839_s6 + $0x1398] sm:$0xff] }
 0x134   :  { %1316 = vst [vmem:[#allocation3 + $0x1380] sm:$0xff] %v1315_v36  ;;  %1318 = vst [vmem:[#allocation3 + $0x1388] sm:$0xff] %v1317_v37  ;;  %v1323_v40 = vld [vmem:[%s11839_s6 + $0x13a0] sm:$0xff]  ;;  %v1325_v41 = vld [vmem:[%s11839_s6 + $0x13a8] sm:$0xff] }
 0x135   :  { %1320 = vst [vmem:[#allocation3 + $0x1390] sm:$0xff] %v1319_v38  ;;  %1322 = vst [vmem:[#allocation3 + $0x1398] sm:$0xff] %v1321_v39  ;;  %v1327_v42 = vld [vmem:[%s11839_s6 + $0x13b0] sm:$0xff]  ;;  %v1329_v43 = vld [vmem:[%s11839_s6 + $0x13b8] sm:$0xff] }
 0x136   :  { %1324 = vst [vmem:[#allocation3 + $0x13a0] sm:$0xff] %v1323_v40  ;;  %1326 = vst [vmem:[#allocation3 + $0x13a8] sm:$0xff] %v1325_v41  ;;  %v1331_v44 = vld [vmem:[%s11839_s6 + $0x13c0] sm:$0xff]  ;;  %v1333_v45 = vld [vmem:[%s11839_s6 + $0x13c8] sm:$0xff] }
 0x137   :  { %1328 = vst [vmem:[#allocation3 + $0x13b0] sm:$0xff] %v1327_v42  ;;  %1330 = vst [vmem:[#allocation3 + $0x13b8] sm:$0xff] %v1329_v43  ;;  %v1335_v46 = vld [vmem:[%s11839_s6 + $0x13d0] sm:$0xff]  ;;  %v1337_v47 = vld [vmem:[%s11839_s6 + $0x13d8] sm:$0xff] }
 0x138   :  { %1332 = vst [vmem:[#allocation3 + $0x13c0] sm:$0xff] %v1331_v44  ;;  %1334 = vst [vmem:[#allocation3 + $0x13c8] sm:$0xff] %v1333_v45  ;;  %v1339_v48 = vld [vmem:[%s11839_s6 + $0x13e0] sm:$0xff]  ;;  %v1341_v49 = vld [vmem:[%s11839_s6 + $0x13e8] sm:$0xff] }
 0x139   :  { %1336 = vst [vmem:[#allocation3 + $0x13d0] sm:$0xff] %v1335_v46  ;;  %1338 = vst [vmem:[#allocation3 + $0x13d8] sm:$0xff] %v1337_v47  ;;  %v1343_v50 = vld [vmem:[%s11839_s6 + $0x13f0] sm:$0xff]  ;;  %v1345_v51 = vld [vmem:[%s11839_s6 + $0x13f8] sm:$0xff] }
 0x13a   :  { %1340 = vst [vmem:[#allocation3 + $0x13e0] sm:$0xff] %v1339_v48  ;;  %1342 = vst [vmem:[#allocation3 + $0x13e8] sm:$0xff] %v1341_v49  ;;  %v1347_v52 = vld [vmem:[%s11839_s6 + $0x1400] sm:$0xff]  ;;  %v1349_v53 = vld [vmem:[%s11839_s6 + $0x1408] sm:$0xff] }
 0x13b   :  { %1344 = vst [vmem:[#allocation3 + $0x13f0] sm:$0xff] %v1343_v50  ;;  %1346 = vst [vmem:[#allocation3 + $0x13f8] sm:$0xff] %v1345_v51  ;;  %v1351_v54 = vld [vmem:[%s11839_s6 + $0x1410] sm:$0xff]  ;;  %v1353_v55 = vld [vmem:[%s11839_s6 + $0x1420] sm:$0xff] }
 0x13c   :  { %1348 = vst [vmem:[#allocation3 + $0x1400] sm:$0xff] %v1347_v52  ;;  %1350 = vst [vmem:[#allocation3 + $0x1408] sm:$0xff] %v1349_v53  ;;  %v1355_v56 = vld [vmem:[%s11839_s6 + $0x1428] sm:$0xff]  ;;  %v1357_v57 = vld [vmem:[%s11839_s6 + $0x1430] sm:$0xff] }
 0x13d   :  { %1352 = vst [vmem:[#allocation3 + $0x1410] sm:$0xff] %v1351_v54  ;;  %1354 = vst [vmem:[#allocation3 + $0x1420] sm:$0xff] %v1353_v55  ;;  %v1359_v58 = vld [vmem:[%s11839_s6 + $0x1438] sm:$0xff]  ;;  %v1361_v59 = vld [vmem:[%s11839_s6 + $0x1440] sm:$0xff] }
 0x13e   :  { %1356 = vst [vmem:[#allocation3 + $0x1428] sm:$0xff] %v1355_v56  ;;  %1358 = vst [vmem:[#allocation3 + $0x1430] sm:$0xff] %v1357_v57  ;;  %v1363_v60 = vld [vmem:[%s11839_s6 + $0x1448] sm:$0xff]  ;;  %v1365_v61 = vld [vmem:[%s11839_s6 + $0x1450] sm:$0xff] }
 0x13f   :  { %1360 = vst [vmem:[#allocation3 + $0x1438] sm:$0xff] %v1359_v58  ;;  %1362 = vst [vmem:[#allocation3 + $0x1440] sm:$0xff] %v1361_v59  ;;  %v1367_v62 = vld [vmem:[%s11839_s6 + $0x1458] sm:$0xff]  ;;  %v1369_v63 = vld [vmem:[%s11839_s6 + $0x1460] sm:$0xff] }
 0x140   :  { %1364 = vst [vmem:[#allocation3 + $0x1448] sm:$0xff] %v1363_v60  ;;  %1366 = vst [vmem:[#allocation3 + $0x1450] sm:$0xff] %v1365_v61  ;;  %v1371_v0 = vld [vmem:[%s11839_s6 + $0x1468] sm:$0xff]  ;;  %v1373_v1 = vld [vmem:[%s11839_s6 + $0x1470] sm:$0xff] }
 0x141   :  { %1368 = vst [vmem:[#allocation3 + $0x1458] sm:$0xff] %v1367_v62  ;;  %1370 = vst [vmem:[#allocation3 + $0x1460] sm:$0xff] %v1369_v63  ;;  %v1375_v2 = vld [vmem:[%s11839_s6 + $0x1478] sm:$0xff]  ;;  %v1377_v3 = vld [vmem:[%s11839_s6 + $0x1480] sm:$0xff] }
 0x142   :  { %1372 = vst [vmem:[#allocation3 + $0x1468] sm:$0xff] %v1371_v0  ;;  %1374 = vst [vmem:[#allocation3 + $0x1470] sm:$0xff] %v1373_v1  ;;  %v1379_v4 = vld [vmem:[%s11839_s6 + $0x1488] sm:$0xff]  ;;  %v1381_v5 = vld [vmem:[%s11839_s6 + $0x1490] sm:$0xff] }
 0x143   :  { %1376 = vst [vmem:[#allocation3 + $0x1478] sm:$0xff] %v1375_v2  ;;  %1378 = vst [vmem:[#allocation3 + $0x1480] sm:$0xff] %v1377_v3  ;;  %v1383_v6 = vld [vmem:[%s11839_s6 + $0x1498] sm:$0xff]  ;;  %v1385_v7 = vld [vmem:[%s11839_s6 + $0x14a0] sm:$0xff] }
 0x144   :  { %1380 = vst [vmem:[#allocation3 + $0x1488] sm:$0xff] %v1379_v4  ;;  %1382 = vst [vmem:[#allocation3 + $0x1490] sm:$0xff] %v1381_v5  ;;  %v1387_v8 = vld [vmem:[%s11839_s6 + $0x14a8] sm:$0xff]  ;;  %v1389_v9 = vld [vmem:[%s11839_s6 + $0x14b0] sm:$0xff] }
 0x145   :  { %1384 = vst [vmem:[#allocation3 + $0x1498] sm:$0xff] %v1383_v6  ;;  %1386 = vst [vmem:[#allocation3 + $0x14a0] sm:$0xff] %v1385_v7  ;;  %v1391_v10 = vld [vmem:[%s11839_s6 + $0x14b8] sm:$0xff]  ;;  %v1393_v11 = vld [vmem:[%s11839_s6 + $0x14c0] sm:$0xff] }
 0x146   :  { %1388 = vst [vmem:[#allocation3 + $0x14a8] sm:$0xff] %v1387_v8  ;;  %1390 = vst [vmem:[#allocation3 + $0x14b0] sm:$0xff] %v1389_v9  ;;  %v1395_v12 = vld [vmem:[%s11839_s6 + $0x14c8] sm:$0xff]  ;;  %v1397_v13 = vld [vmem:[%s11839_s6 + $0x14d0] sm:$0xff] }
 0x147   :  { %1392 = vst [vmem:[#allocation3 + $0x14b8] sm:$0xff] %v1391_v10  ;;  %1394 = vst [vmem:[#allocation3 + $0x14c0] sm:$0xff] %v1393_v11  ;;  %v1399_v14 = vld [vmem:[%s11839_s6 + $0x14d8] sm:$0xff]  ;;  %v1401_v15 = vld [vmem:[%s11839_s6 + $0x14e0] sm:$0xff] }
 0x148   :  { %1396 = vst [vmem:[#allocation3 + $0x14c8] sm:$0xff] %v1395_v12  ;;  %1398 = vst [vmem:[#allocation3 + $0x14d0] sm:$0xff] %v1397_v13  ;;  %v1403_v16 = vld [vmem:[%s11839_s6 + $0x14e8] sm:$0xff]  ;;  %v1405_v17 = vld [vmem:[%s11839_s6 + $0x14f0] sm:$0xff] }
 0x149   :  { %1400 = vst [vmem:[#allocation3 + $0x14d8] sm:$0xff] %v1399_v14  ;;  %1402 = vst [vmem:[#allocation3 + $0x14e0] sm:$0xff] %v1401_v15  ;;  %v1407_v18 = vld [vmem:[%s11839_s6 + $0x14f8] sm:$0xff]  ;;  %v1409_v19 = vld [vmem:[%s11839_s6 + $0x1500] sm:$0xff] }
 0x14a   :  { %1404 = vst [vmem:[#allocation3 + $0x14e8] sm:$0xff] %v1403_v16  ;;  %1406 = vst [vmem:[#allocation3 + $0x14f0] sm:$0xff] %v1405_v17  ;;  %v1411_v20 = vld [vmem:[%s11839_s6 + $0x1508] sm:$0xff]  ;;  %v1413_v21 = vld [vmem:[%s11839_s6 + $0x1510] sm:$0xff] }
 0x14b   :  { %1408 = vst [vmem:[#allocation3 + $0x14f8] sm:$0xff] %v1407_v18  ;;  %1410 = vst [vmem:[#allocation3 + $0x1500] sm:$0xff] %v1409_v19  ;;  %v1415_v22 = vld [vmem:[%s11839_s6 + $0x1518] sm:$0xff]  ;;  %v1417_v23 = vld [vmem:[%s11839_s6 + $0x1520] sm:$0xff] }
 0x14c   :  { %1412 = vst [vmem:[#allocation3 + $0x1508] sm:$0xff] %v1411_v20  ;;  %1414 = vst [vmem:[#allocation3 + $0x1510] sm:$0xff] %v1413_v21  ;;  %v1419_v24 = vld [vmem:[%s11839_s6 + $0x1528] sm:$0xff]  ;;  %v1421_v25 = vld [vmem:[%s11839_s6 + $0x1530] sm:$0xff] }
 0x14d   :  { %1416 = vst [vmem:[#allocation3 + $0x1518] sm:$0xff] %v1415_v22  ;;  %1418 = vst [vmem:[#allocation3 + $0x1520] sm:$0xff] %v1417_v23  ;;  %v1423_v26 = vld [vmem:[%s11839_s6 + $0x1538] sm:$0xff]  ;;  %v1425_v27 = vld [vmem:[%s11839_s6 + $0x1540] sm:$0xff] }
 0x14e   :  { %1420 = vst [vmem:[#allocation3 + $0x1528] sm:$0xff] %v1419_v24  ;;  %1422 = vst [vmem:[#allocation3 + $0x1530] sm:$0xff] %v1421_v25  ;;  %v1427_v28 = vld [vmem:[%s11839_s6 + $0x1548] sm:$0xff]  ;;  %v1429_v29 = vld [vmem:[%s11839_s6 + $0x1550] sm:$0xff] }
 0x14f   :  { %1424 = vst [vmem:[#allocation3 + $0x1538] sm:$0xff] %v1423_v26  ;;  %1426 = vst [vmem:[#allocation3 + $0x1540] sm:$0xff] %v1425_v27  ;;  %v1431_v30 = vld [vmem:[%s11839_s6 + $0x1558] sm:$0xff]  ;;  %v1433_v31 = vld [vmem:[%s11839_s6 + $0x1560] sm:$0xff] }
 0x150   :  { %1428 = vst [vmem:[#allocation3 + $0x1548] sm:$0xff] %v1427_v28  ;;  %1430 = vst [vmem:[#allocation3 + $0x1550] sm:$0xff] %v1429_v29  ;;  %v1435_v32 = vld [vmem:[%s11839_s6 + $0x1568] sm:$0xff]  ;;  %v1437_v33 = vld [vmem:[%s11839_s6 + $0x1570] sm:$0xff] }
 0x151   :  { %1432 = vst [vmem:[#allocation3 + $0x1558] sm:$0xff] %v1431_v30  ;;  %1434 = vst [vmem:[#allocation3 + $0x1560] sm:$0xff] %v1433_v31  ;;  %v1439_v34 = vld [vmem:[%s11839_s6 + $0x1578] sm:$0xff]  ;;  %v1441_v35 = vld [vmem:[%s11839_s6 + $0x1580] sm:$0xff] }
 0x152   :  { %1436 = vst [vmem:[#allocation3 + $0x1568] sm:$0xff] %v1435_v32  ;;  %1438 = vst [vmem:[#allocation3 + $0x1570] sm:$0xff] %v1437_v33  ;;  %v1443_v36 = vld [vmem:[%s11839_s6 + $0x1590] sm:$0xff]  ;;  %v1445_v37 = vld [vmem:[%s11839_s6 + $0x1598] sm:$0xff] }
 0x153   :  { %1440 = vst [vmem:[#allocation3 + $0x1578] sm:$0xff] %v1439_v34  ;;  %1442 = vst [vmem:[#allocation3 + $0x1580] sm:$0xff] %v1441_v35  ;;  %v1447_v38 = vld [vmem:[%s11839_s6 + $0x15a0] sm:$0xff]  ;;  %v1449_v39 = vld [vmem:[%s11839_s6 + $0x15a8] sm:$0xff] }
 0x154   :  { %1444 = vst [vmem:[#allocation3 + $0x1590] sm:$0xff] %v1443_v36  ;;  %1446 = vst [vmem:[#allocation3 + $0x1598] sm:$0xff] %v1445_v37  ;;  %v1451_v40 = vld [vmem:[%s11839_s6 + $0x15b0] sm:$0xff]  ;;  %v1453_v41 = vld [vmem:[%s11839_s6 + $0x15b8] sm:$0xff] }
 0x155   :  { %1448 = vst [vmem:[#allocation3 + $0x15a0] sm:$0xff] %v1447_v38  ;;  %1450 = vst [vmem:[#allocation3 + $0x15a8] sm:$0xff] %v1449_v39  ;;  %v1455_v42 = vld [vmem:[%s11839_s6 + $0x15c0] sm:$0xff]  ;;  %v1457_v43 = vld [vmem:[%s11839_s6 + $0x15c8] sm:$0xff] }
 0x156   :  { %1452 = vst [vmem:[#allocation3 + $0x15b0] sm:$0xff] %v1451_v40  ;;  %1454 = vst [vmem:[#allocation3 + $0x15b8] sm:$0xff] %v1453_v41  ;;  %v1459_v44 = vld [vmem:[%s11839_s6 + $0x15d0] sm:$0xff]  ;;  %v1461_v45 = vld [vmem:[%s11839_s6 + $0x15d8] sm:$0xff] }
 0x157   :  { %1456 = vst [vmem:[#allocation3 + $0x15c0] sm:$0xff] %v1455_v42  ;;  %1458 = vst [vmem:[#allocation3 + $0x15c8] sm:$0xff] %v1457_v43  ;;  %v1463_v46 = vld [vmem:[%s11839_s6 + $0x15e0] sm:$0xff]  ;;  %v1465_v47 = vld [vmem:[%s11839_s6 + $0x15e8] sm:$0xff] }
 0x158   :  { %1460 = vst [vmem:[#allocation3 + $0x15d0] sm:$0xff] %v1459_v44  ;;  %1462 = vst [vmem:[#allocation3 + $0x15d8] sm:$0xff] %v1461_v45  ;;  %v1467_v48 = vld [vmem:[%s11839_s6 + $0x15f0] sm:$0xff]  ;;  %v1469_v49 = vld [vmem:[%s11839_s6 + $0x15f8] sm:$0xff] }
 0x159   :  { %1464 = vst [vmem:[#allocation3 + $0x15e0] sm:$0xff] %v1463_v46  ;;  %1466 = vst [vmem:[#allocation3 + $0x15e8] sm:$0xff] %v1465_v47  ;;  %v1471_v50 = vld [vmem:[%s11839_s6 + $0x1600] sm:$0xff]  ;;  %v1473_v51 = vld [vmem:[%s11839_s6 + $0x1608] sm:$0xff] }
 0x15a   :  { %1468 = vst [vmem:[#allocation3 + $0x15f0] sm:$0xff] %v1467_v48  ;;  %1470 = vst [vmem:[#allocation3 + $0x15f8] sm:$0xff] %v1469_v49  ;;  %v1475_v52 = vld [vmem:[%s11839_s6 + $0x1610] sm:$0xff]  ;;  %v1477_v53 = vld [vmem:[%s11839_s6 + $0x1618] sm:$0xff] }
 0x15b   :  { %1472 = vst [vmem:[#allocation3 + $0x1600] sm:$0xff] %v1471_v50  ;;  %1474 = vst [vmem:[#allocation3 + $0x1608] sm:$0xff] %v1473_v51  ;;  %v1479_v54 = vld [vmem:[%s11839_s6 + $0x1620] sm:$0xff]  ;;  %v1481_v55 = vld [vmem:[%s11839_s6 + $0x1628] sm:$0xff] }
 0x15c   :  { %1476 = vst [vmem:[#allocation3 + $0x1610] sm:$0xff] %v1475_v52  ;;  %1478 = vst [vmem:[#allocation3 + $0x1618] sm:$0xff] %v1477_v53  ;;  %v1483_v56 = vld [vmem:[%s11839_s6 + $0x1630] sm:$0xff]  ;;  %v1485_v57 = vld [vmem:[%s11839_s6 + $0x1638] sm:$0xff] }
 0x15d   :  { %1480 = vst [vmem:[#allocation3 + $0x1620] sm:$0xff] %v1479_v54  ;;  %1482 = vst [vmem:[#allocation3 + $0x1628] sm:$0xff] %v1481_v55  ;;  %v1487_v58 = vld [vmem:[%s11839_s6 + $0x1640] sm:$0xff]  ;;  %v1489_v59 = vld [vmem:[%s11839_s6 + $0x1648] sm:$0xff] }
 0x15e   :  { %1484 = vst [vmem:[#allocation3 + $0x1630] sm:$0xff] %v1483_v56  ;;  %1486 = vst [vmem:[#allocation3 + $0x1638] sm:$0xff] %v1485_v57  ;;  %v1491_v60 = vld [vmem:[%s11839_s6 + $0x1650] sm:$0xff]  ;;  %v1493_v61 = vld [vmem:[%s11839_s6 + $0x1658] sm:$0xff] }
 0x15f   :  { %1488 = vst [vmem:[#allocation3 + $0x1640] sm:$0xff] %v1487_v58  ;;  %1490 = vst [vmem:[#allocation3 + $0x1648] sm:$0xff] %v1489_v59  ;;  %v1495_v62 = vld [vmem:[%s11839_s6 + $0x1660] sm:$0xff]  ;;  %v1497_v63 = vld [vmem:[%s11839_s6 + $0x1668] sm:$0xff] }
 0x160   :  { %1492 = vst [vmem:[#allocation3 + $0x1650] sm:$0xff] %v1491_v60  ;;  %1494 = vst [vmem:[#allocation3 + $0x1658] sm:$0xff] %v1493_v61  ;;  %v1499_v0 = vld [vmem:[%s11839_s6 + $0x1670] sm:$0xff]  ;;  %v1501_v1 = vld [vmem:[%s11839_s6 + $0x1678] sm:$0xff] }
 0x161   :  { %1496 = vst [vmem:[#allocation3 + $0x1660] sm:$0xff] %v1495_v62  ;;  %1498 = vst [vmem:[#allocation3 + $0x1668] sm:$0xff] %v1497_v63  ;;  %v1503_v2 = vld [vmem:[%s11839_s6 + $0x1680] sm:$0xff]  ;;  %v1505_v3 = vld [vmem:[%s11839_s6 + $0x1688] sm:$0xff] }
 0x162   :  { %1500 = vst [vmem:[#allocation3 + $0x1670] sm:$0xff] %v1499_v0  ;;  %1502 = vst [vmem:[#allocation3 + $0x1678] sm:$0xff] %v1501_v1  ;;  %v1507_v4 = vld [vmem:[%s11839_s6 + $0x1690] sm:$0xff]  ;;  %v1509_v5 = vld [vmem:[%s11839_s6 + $0x1698] sm:$0xff] }
 0x163   :  { %1504 = vst [vmem:[#allocation3 + $0x1680] sm:$0xff] %v1503_v2  ;;  %1506 = vst [vmem:[#allocation3 + $0x1688] sm:$0xff] %v1505_v3  ;;  %v1511_v6 = vld [vmem:[%s11839_s6 + $0x16a0] sm:$0xff]  ;;  %v1513_v7 = vld [vmem:[%s11839_s6 + $0x16a8] sm:$0xff] }
 0x164   :  { %1508 = vst [vmem:[#allocation3 + $0x1690] sm:$0xff] %v1507_v4  ;;  %1510 = vst [vmem:[#allocation3 + $0x1698] sm:$0xff] %v1509_v5  ;;  %v1515_v8 = vld [vmem:[%s11839_s6 + $0x16b0] sm:$0xff]  ;;  %v1517_v9 = vld [vmem:[%s11839_s6 + $0x16b8] sm:$0xff] }
 0x165   :  { %1512 = vst [vmem:[#allocation3 + $0x16a0] sm:$0xff] %v1511_v6  ;;  %1514 = vst [vmem:[#allocation3 + $0x16a8] sm:$0xff] %v1513_v7  ;;  %v1519_v10 = vld [vmem:[%s11839_s6 + $0x16c0] sm:$0xff]  ;;  %v1521_v11 = vld [vmem:[%s11839_s6 + $0x16c8] sm:$0xff] }
 0x166   :  { %1516 = vst [vmem:[#allocation3 + $0x16b0] sm:$0xff] %v1515_v8  ;;  %1518 = vst [vmem:[#allocation3 + $0x16b8] sm:$0xff] %v1517_v9  ;;  %v1523_v12 = vld [vmem:[%s11839_s6 + $0x16d0] sm:$0xff]  ;;  %v1525_v13 = vld [vmem:[%s11839_s6 + $0x16d8] sm:$0xff] }
 0x167   :  { %1520 = vst [vmem:[#allocation3 + $0x16c0] sm:$0xff] %v1519_v10  ;;  %1522 = vst [vmem:[#allocation3 + $0x16c8] sm:$0xff] %v1521_v11  ;;  %v1527_v14 = vld [vmem:[%s11839_s6 + $0x16e0] sm:$0xff]  ;;  %v1529_v15 = vld [vmem:[%s11839_s6 + $0x16e8] sm:$0xff] }
 0x168   :  { %1524 = vst [vmem:[#allocation3 + $0x16d0] sm:$0xff] %v1523_v12  ;;  %1526 = vst [vmem:[#allocation3 + $0x16d8] sm:$0xff] %v1525_v13  ;;  %v1531_v16 = vld [vmem:[%s11839_s6 + $0x16f0] sm:$0xff]  ;;  %v6262_v17 = vld [vmem:[%s11839_s6 + $0x168] sm:$0x1] }
 0x169   :  { %1528 = vst [vmem:[#allocation3 + $0x16e0] sm:$0xff] %v1527_v14  ;;  %1530 = vst [vmem:[#allocation3 + $0x16e8] sm:$0xff] %v1529_v15  ;;  %v6263_v18 = vld [vmem:[%s11839_s6 + $0x2d8] sm:$0x1]  ;;  %v6264_v19 = vld [vmem:[%s11839_s6 + $0x448] sm:$0x1] }
 0x16a   :  { %1532 = vst [vmem:[#allocation3 + $0x16f0] sm:$0xff] %v1531_v16  ;;  %1543 = vst [vmem:[#allocation3 + $0x168] sm:$0x1] %v6262_v17  ;;  %v6265_v20 = vld [vmem:[%s11839_s6 + $0x5b8] sm:$0x1] }
 0x16b   :  { %1545 = vst [vmem:[#allocation3 + $0x2d8] sm:$0x1] %v6263_v18  ;;  %1547 = vst [vmem:[#allocation3 + $0x448] sm:$0x1] %v6264_v19  ;;  %v6266_v21 = vld [vmem:[%s11839_s6 + $0x728] sm:$0x1] }
 0x16c   :  { %v6267_v22 = vld [vmem:[%s11839_s6 + $0x898] sm:$0x1]  ;;  %1549 = vst [vmem:[#allocation3 + $0x5b8] sm:$0x1] %v6265_v20  ;;  %1551 = vst [vmem:[#allocation3 + $0x728] sm:$0x1] %v6266_v21 }
 0x16d   :  { %1553 = vst [vmem:[#allocation3 + $0x898] sm:$0x1] %v6267_v22  ;;  %v6268_v23 = vld [vmem:[%s11839_s6 + $0xa08] sm:$0x1]  ;;  %v6269_v24 = vld [vmem:[%s11839_s6 + $0xb78] sm:$0x1] }
 0x16e   :  { %v6270_v25 = vld [vmem:[%s11839_s6 + $0xce8] sm:$0x1]  ;;  %1555 = vst [vmem:[#allocation3 + $0xa08] sm:$0x1] %v6268_v23  ;;  %1557 = vst [vmem:[#allocation3 + $0xb78] sm:$0x1] %v6269_v24 }
 0x16f   :  { %1559 = vst [vmem:[#allocation3 + $0xce8] sm:$0x1] %v6270_v25  ;;  %v6271_v26 = vld [vmem:[%s11839_s6 + $0xe58] sm:$0x1]  ;;  %v6272_v27 = vld [vmem:[%s11839_s6 + $0xfc8] sm:$0x1] }
 0x170   :  { %v6273_v28 = vld [vmem:[%s11839_s6 + $0x1138] sm:$0x1]  ;;  %1561 = vst [vmem:[#allocation3 + $0xe58] sm:$0x1] %v6271_v26  ;;  %1563 = vst [vmem:[#allocation3 + $0xfc8] sm:$0x1] %v6272_v27 }
 0x171   :  { %1565 = vst [vmem:[#allocation3 + $0x1138] sm:$0x1] %v6273_v28  ;;  %v6274_v29 = vld [vmem:[%s11839_s6 + $0x12a8] sm:$0x1]  ;;  %v6275_v30 = vld [vmem:[%s11839_s6 + $0x1418] sm:$0x1] }
 0x172   :  { %v6276_v31 = vld [vmem:[%s11839_s6 + $0x1588] sm:$0x1]  ;;  %1567 = vst [vmem:[#allocation3 + $0x12a8] sm:$0x1] %v6274_v29  ;;  %1569 = vst [vmem:[#allocation3 + $0x1418] sm:$0x1] %v6275_v30 }
 0x173   :  { %1571 = vst [vmem:[#allocation3 + $0x1588] sm:$0x1] %v6276_v31  ;;  %v6277_v32 = vld [vmem:[%s11839_s6 + $0x16f8] sm:$0x1] }
 0x174   :  { %1573 = vst [vmem:[#allocation3 + $0x16f8] sm:$0x1] %v6277_v32 }
 0x175   :  { %1577 = vsyncadd [#allocation4], 92416  ;;  %v1581_v33 = vld [vmem:[%s11832_s0 + $0x8] sm:$0xff]  ;;  %vm1695_vm0 = vcmask 1042432   ;;  %v1583_v36 = vld [vmem:[%s11832_s0 + $0x18] sm:$0xff]  ;;  %v8650_v43 = vmov 0.0  }
 0x176   :  { %v1605_v34 = vld [vmem:[%s11832_s0 + $0xc8] sm:$0xff]  ;;  %v1607_v37 = vld [vmem:[%s11832_s0 + $0xd8] sm:$0xff]  ;;  %v1580_v38 = vld [vmem:[%s11832_s0] sm:$0xff]  ;;  %1832 = vmatprep.mubr.f32.mxu0 %v8650_v43  ;;  %1909 = vmatprep.mubr.f32.mxu1 %v8650_v43  ;;  %vm8651_vm1 = vmmov 1   ;;  %v8652_v49 = vmov 0   ;;  %vm1688_vm3 = vcmask 220160  }
 0x177   :  { %v7658_v35 = vpack.c.bf16 %v1605_v34, %v1581_v33  ;;  %v7668_v39 = vpack.c.bf16 %v1607_v37, %v1583_v36  ;;  %v1604_v40 = vld [vmem:[%s11832_s0 + $0xc0] sm:$0xff]  ;;  %v1582_v41 = vld [vmem:[%s11832_s0 + $0x10] sm:$0xff]  ;;  %v1629_v46 = vld [vmem:[%s11832_s0 + $0x188] sm:$0xff]  ;;  %8647 = vset.pattern.permute.xlu0 %v8652_v49 }
 0x178   :  { %v1606_v42 = vld [vmem:[%s11832_s0 + $0xd0] sm:$0xff]  ;;  %v7660_v44 = vpack.c.bf16 %v1604_v40, %v1580_v38  ;;  %v1653_v47 = vld [vmem:[%s11832_s0 + $0x248] sm:$0x7]  ;;  %vm10940_vm2 = vmpackc.low %vm1695_vm0, %vm8651_vm1 }
 0x179   :  { %7659 = vmatprep.subr.bf16.mxu0 %v7658_v35  ;;  %v7670_v45 = vpack.c.bf16 %v1606_v42, %v1582_v41  ;;  %7669 = vmatprep.subr.bf16.mxu1 %v7668_v39  ;;  %v7662_v50 = vpack.c.bf16 %v1653_v47, %v1629_v46  ;;  %v1631_v51 = vld [vmem:[%s11832_s0 + $0x198] sm:$0xff]  ;;  %v1628_v53 = vld [vmem:[%s11832_s0 + $0x180] sm:$0xff]  ;;  %v1630_v56 = vld [vmem:[%s11832_s0 + $0x190] sm:$0xff] }
 0x17a   :  { %v1655_v52 = vld [vmem:[%s11832_s0 + $0x258] sm:$0x7]  ;;  %7661 = vmatpush1.bf16.msra.mxu0 %v7660_v44  ;;  %v1652_v55 = vld [vmem:[%s11832_s0 + $0x240] sm:$0x7]  ;;  %v1654_v57 = vld [vmem:[%s11832_s0 + $0x250] sm:$0x7] }
 0x17b   :  { %7671 = vmatpush1.bf16.msra.mxu1 %v7670_v45  ;;  %v7672_v54 = vpack.c.bf16 %v1655_v52, %v1631_v51  ;;  %7664 = vmatprep.subr.msk.bf16.mxu0 %vm10940_vm2, %v7662_v50  ;;  %v7665_v58 = vpack.c.bf16 %v1652_v55, %v1628_v53  ;;  %v7675_v59 = vpack.c.bf16 %v1654_v57, %v1630_v56  ;;  %v1585_v60 = vld [vmem:[%s11832_s0 + $0x28] sm:$0xff]  ;;  %v1587_v63 = vld [vmem:[%s11832_s0 + $0x38] sm:$0xff]  ;;  %v1584_v1 = vld [vmem:[%s11832_s0 + $0x20] sm:$0xff] }
 0x17c   :  { %v1609_v61 = vld [vmem:[%s11832_s0 + $0xe8] sm:$0xff]  ;;  %v1611_v0 = vld [vmem:[%s11832_s0 + $0xf8] sm:$0xff]  ;;  %v1608_v3 = vld [vmem:[%s11832_s0 + $0xe0] sm:$0xff] }
 0x17d   :  { %7674 = vmatprep.subr.msk.bf16.mxu1 %vm10940_vm2, %v7672_v54  ;;  %v7678_v62 = vpack.c.bf16 %v1609_v61, %v1585_v60  ;;  %v7688_v2 = vpack.c.bf16 %v1611_v0, %v1587_v63  ;;  %v1586_v4 = vld [vmem:[%s11832_s0 + $0x30] sm:$0xff]  ;;  %v10997_v6 = vld [vmem:[%s11833_s1] sm:$0xff]  ;;  %v7680_v7 = vpack.c.bf16 %v1608_v3, %v1584_v1  ;;  %v1633_v9 = vld [vmem:[%s11832_s0 + $0x1a8] sm:$0xff] }
 0x17e   :  { %v1610_v5 = vld [vmem:[%s11832_s0 + $0xf0] sm:$0xff]  ;;  %7667 = vmatpush1.bf16.msk.msra.mxu0 %vm10940_vm2, %v7665_v58  ;;  %v1657_v10 = vld [vmem:[%s11832_s0 + $0x268] sm:$0x7]  ;;  %v1635_v11 = vld [vmem:[%s11832_s0 + $0x1b8] sm:$0xff] }
 0x17f   :  { %7677 = vmatpush1.bf16.msk.msra.mxu1 %vm10940_vm2, %v7675_v59  ;;  %v7690_v8 = vpack.c.bf16 %v1610_v5, %v1586_v4  ;;  %7679 = vmatprep.subr.bf16.mxu0 %v7678_v62  ;;  %v1659_v12 = vld [vmem:[%s11832_s0 + $0x278] sm:$0x7]  ;;  %v1632_v13 = vld [vmem:[%s11832_s0 + $0x1a0] sm:$0xff]  ;;  %v7682_v14 = vpack.c.bf16 %v1657_v10, %v1633_v9  ;;  %v1634_v17 = vld [vmem:[%s11832_s0 + $0x1b0] sm:$0xff] }
 0x180   :  { %7689 = vmatprep.subr.bf16.mxu1 %v7688_v2  ;;  %v7692_v15 = vpack.c.bf16 %v1659_v12, %v1635_v11  ;;  %v1656_v16 = vld [vmem:[%s11832_s0 + $0x260] sm:$0x7]  ;;  %v1658_v18 = vld [vmem:[%s11832_s0 + $0x270] sm:$0x7]  ;;  %v1589_v19 = vld [vmem:[%s11832_s0 + $0x48] sm:$0xff] }
 0x181   :  { %6280 = vmatmul.mubr.msk.f32.vlgmr.msra.gmra.mrb[0].mxu0 %vm1688_vm3, %v10997_v6  ;;  %v1613_v20 = vld [vmem:[%s11832_s0 + $0x108] sm:$0xff]  ;;  %v1591_v21 = vld [vmem:[%s11832_s0 + $0x58] sm:$0xff]  ;;  %v7685_v23 = vpack.c.bf16 %v1656_v16, %v1632_v13  ;;  %v7695_v24 = vpack.c.bf16 %v1658_v18, %v1634_v17  ;;  %v1588_v26 = vld [vmem:[%s11832_s0 + $0x40] sm:$0xff] }
 0x182   :  { %6284 = vmatmul.mubr.msk.f32.vlgmr.msra.gmra.mrb[0].mxu1 %vm1688_vm3, %v10997_v6  ;;  %7681 = vmatpush1.bf16.msra.mxu0 %v7680_v7  ;;  %v11039_v22 = vld [vmem:[%s11833_s1 + $0x8] sm:$0xff]  ;;  %v1615_v25 = vld [vmem:[%s11832_s0 + $0x118] sm:$0xff]  ;;  %v1612_v27 = vld [vmem:[%s11832_s0 + $0x100] sm:$0xff]  ;;  %v7698_v30 = vpack.c.bf16 %v1613_v20, %v1589_v19 }
 0x183   :  { %7691 = vmatpush1.bf16.msra.mxu1 %v7690_v8  ;;  %1838 = vmatprep.mubr.f32.mxu0 %v8650_v43  ;;  %v1590_v28 = vld [vmem:[%s11832_s0 + $0x50] sm:$0xff]  ;;  %v7708_v31 = vpack.c.bf16 %v1615_v25, %v1591_v21  ;;  %v1637_v32 = vld [vmem:[%s11832_s0 + $0x1c8] sm:$0xff]  ;;  %v1639_v34 = vld [vmem:[%s11832_s0 + $0x1d8] sm:$0xff]  ;;  %v7700_v36 = vpack.c.bf16 %v1612_v27, %v1588_v26 }
 0x184   :  { %1915 = vmatprep.mubr.f32.mxu1 %v8650_v43  ;;  %v1614_v29 = vld [vmem:[%s11832_s0 + $0x110] sm:$0xff]  ;;  %7684 = vmatprep.subr.msk.bf16.mxu0 %vm10940_vm2, %v7682_v14  ;;  %v1661_v33 = vld [vmem:[%s11832_s0 + $0x288] sm:$0x7]  ;;  %v1663_v35 = vld [vmem:[%s11832_s0 + $0x298] sm:$0x7] }
 0x185   :  { %7694 = vmatprep.subr.msk.bf16.mxu1 %vm10940_vm2, %v7692_v15  ;;  %6281 = vmatmul.mubr.msk.f32.gmra.mrb[2].mxu0 %vm1688_vm3, %v11039_v22  ;;  %v7710_v37 = vpack.c.bf16 %v1614_v29, %v1590_v28  ;;  %v1636_v38 = vld [vmem:[%s11832_s0 + $0x1c0] sm:$0xff]  ;;  %v1638_v40 = vld [vmem:[%s11832_s0 + $0x1d0] sm:$0xff]  ;;  %v7702_v42 = vpack.c.bf16 %v1661_v33, %v1637_v32  ;;  %v7712_v44 = vpack.c.bf16 %v1663_v35, %v1639_v34  ;;  %v1593_v45 = vld [vmem:[%s11832_s0 + $0x68] sm:$0xff] }
 0x186   :  { %6285 = vmatmul.mubr.msk.f32.gmra.mrb[2].mxu1 %vm1688_vm3, %v11039_v22  ;;  %7687 = vmatpush1.bf16.msk.msra.mxu0 %vm10940_vm2, %v7685_v23  ;;  %v1660_v39 = vld [vmem:[%s11832_s0 + $0x280] sm:$0x7]  ;;  %v1662_v41 = vld [vmem:[%s11832_s0 + $0x290] sm:$0x7]  ;;  %v1617_v46 = vld [vmem:[%s11832_s0 + $0x128] sm:$0xff] }
 0x187   :  { %7697 = vmatpush1.bf16.msk.msra.mxu1 %vm10940_vm2, %v7695_v24  ;;  %1986 = vmatprep.mubr.f32.mxu0 %v8650_v43  ;;  %v1595_v47 = vld [vmem:[%s11832_s0 + $0x78] sm:$0xff]  ;;  %v7705_v50 = vpack.c.bf16 %v1660_v39, %v1636_v38  ;;  %v7715_v51 = vpack.c.bf16 %v1662_v41, %v1638_v40  ;;  %v1592_v52 = vld [vmem:[%s11832_s0 + $0x60] sm:$0xff]  ;;  %v1594_v54 = vld [vmem:[%s11832_s0 + $0x70] sm:$0xff]  ;;  %v7718_v56 = vpack.c.bf16 %v1617_v46, %v1593_v45 }
 0x188   :  { %2063 = vmatprep.mubr.f32.mxu1 %v8650_v43  ;;  %7699 = vmatprep.subr.bf16.mxu0 %v7698_v30  ;;  %v1619_v49 = vld [vmem:[%s11832_s0 + $0x138] sm:$0xff]  ;;  %v1616_v53 = vld [vmem:[%s11832_s0 + $0x120] sm:$0xff]  ;;  %v1618_v55 = vld [vmem:[%s11832_s0 + $0x130] sm:$0xff] }
 0x189   :  { %7709 = vmatprep.subr.bf16.mxu1 %v7708_v31  ;;  %6288 = vmatmul.mubr.msk.f32.vlgmr.msra.gmra.mrb[4].mxu0 %vm1688_vm3, %v10997_v6  ;;  %v7728_v57 = vpack.c.bf16 %v1619_v49, %v1595_v47  ;;  %v1641_v58 = vld [vmem:[%s11832_s0 + $0x1e8] sm:$0xff]  ;;  %v1643_v60 = vld [vmem:[%s11832_s0 + $0x1f8] sm:$0xff]  ;;  %v7720_v62 = vpack.c.bf16 %v1616_v53, %v1592_v52  ;;  %v7730_v63 = vpack.c.bf16 %v1618_v55, %v1594_v54  ;;  %v1640_v0 = vld [vmem:[%s11832_s0 + $0x1e0] sm:$0xff] }
 0x18a   :  { %6292 = vmatmul.mubr.msk.f32.vlgmr.msra.gmra.mrb[4].mxu1 %vm1688_vm3, %v10997_v6  ;;  %7701 = vmatpush1.bf16.msra.mxu0 %v7700_v36  ;;  %v1665_v59 = vld [vmem:[%s11832_s0 + $0x2a8] sm:$0x7]  ;;  %v1667_v61 = vld [vmem:[%s11832_s0 + $0x2b8] sm:$0x7]  ;;  %v1664_v1 = vld [vmem:[%s11832_s0 + $0x2a0] sm:$0x7] }
 0x18b   :  { %7711 = vmatpush1.bf16.msra.mxu1 %v7710_v37  ;;  %1992 = vmatprep.mubr.f32.mxu0 %v8650_v43  ;;  %v1642_v2 = vld [vmem:[%s11832_s0 + $0x1f0] sm:$0xff]  ;;  %v7722_v4 = vpack.c.bf16 %v1665_v59, %v1641_v58  ;;  %v7732_v5 = vpack.c.bf16 %v1667_v61, %v1643_v60  ;;  %v1597_v7 = vld [vmem:[%s11832_s0 + $0x88] sm:$0xff]  ;;  %v1599_v9 = vld [vmem:[%s11832_s0 + $0x98] sm:$0xff]  ;;  %v7725_v11 = vpack.c.bf16 %v1664_v1, %v1640_v0 }
 0x18c   :  { %2069 = vmatprep.mubr.f32.mxu1 %v8650_v43  ;;  %7704 = vmatprep.subr.msk.bf16.mxu0 %vm10940_vm2, %v7702_v42  ;;  %v1666_v3 = vld [vmem:[%s11832_s0 + $0x2b0] sm:$0x7]  ;;  %v1621_v8 = vld [vmem:[%s11832_s0 + $0x148] sm:$0xff]  ;;  %v1623_v10 = vld [vmem:[%s11832_s0 + $0x158] sm:$0xff] }
 0x18d   :  { %7714 = vmatprep.subr.msk.bf16.mxu1 %vm10940_vm2, %v7712_v44  ;;  %6289 = vmatmul.mubr.msk.f32.gmra.mrb[6].mxu0 %vm1688_vm3, %v11039_v22  ;;  %v7735_v12 = vpack.c.bf16 %v1666_v3, %v1642_v2  ;;  %v1596_v13 = vld [vmem:[%s11832_s0 + $0x80] sm:$0xff]  ;;  %v1598_v15 = vld [vmem:[%s11832_s0 + $0x90] sm:$0xff]  ;;  %v7738_v17 = vpack.c.bf16 %v1621_v8, %v1597_v7  ;;  %v7748_v18 = vpack.c.bf16 %v1623_v10, %v1599_v9  ;;  %v1645_v19 = vld [vmem:[%s11832_s0 + $0x208] sm:$0xff] }
 0x18e   :  { %6293 = vmatmul.mubr.msk.f32.gmra.mrb[6].mxu1 %vm1688_vm3, %v11039_v22  ;;  %7707 = vmatpush1.bf16.msk.msra.mxu0 %vm10940_vm2, %v7705_v50  ;;  %v1620_v14 = vld [vmem:[%s11832_s0 + $0x140] sm:$0xff]  ;;  %v1622_v16 = vld [vmem:[%s11832_s0 + $0x150] sm:$0xff]  ;;  %v1669_v20 = vld [vmem:[%s11832_s0 + $0x2c8] sm:$0x7] }
 0x18f   :  { %7717 = vmatpush1.bf16.msk.msra.mxu1 %vm10940_vm2, %v7715_v51  ;;  %2140 = vmatprep.mubr.f32.mxu0 %v8650_v43  ;;  %v1647_v21 = vld [vmem:[%s11832_s0 + $0x218] sm:$0xff]  ;;  %v7740_v24 = vpack.c.bf16 %v1620_v14, %v1596_v13  ;;  %v7750_v25 = vpack.c.bf16 %v1622_v16, %v1598_v15  ;;  %v1644_v26 = vld [vmem:[%s11832_s0 + $0x200] sm:$0xff]  ;;  %v1646_v28 = vld [vmem:[%s11832_s0 + $0x210] sm:$0xff]  ;;  %v7742_v30 = vpack.c.bf16 %v1669_v20, %v1645_v19 }
 0x190   :  { %2217 = vmatprep.mubr.f32.mxu1 %v8650_v43  ;;  %7719 = vmatprep.subr.bf16.mxu0 %v7718_v56  ;;  %v1671_v23 = vld [vmem:[%s11832_s0 + $0x2d8] sm:$0x7]  ;;  %v1668_v27 = vld [vmem:[%s11832_s0 + $0x2c0] sm:$0x7]  ;;  %v1670_v29 = vld [vmem:[%s11832_s0 + $0x2d0] sm:$0x7] }
 0x191   :  { %7729 = vmatprep.subr.bf16.mxu1 %v7728_v57  ;;  %6296 = vmatmul.mubr.msk.f32.vlgmr.msra.gmra.mrb[8].mxu0 %vm1688_vm3, %v10997_v6  ;;  %v7752_v31 = vpack.c.bf16 %v1671_v23, %v1647_v21  ;;  %v1601_v32 = vld [vmem:[%s11832_s0 + $0xa8] sm:$0xff]  ;;  %v1603_v34 = vld [vmem:[%s11832_s0 + $0xb8] sm:$0xff]  ;;  %v7745_v36 = vpack.c.bf16 %v1668_v27, %v1644_v26  ;;  %v7755_v37 = vpack.c.bf16 %v1670_v29, %v1646_v28  ;;  %v1600_v38 = vld [vmem:[%s11832_s0 + $0xa0] sm:$0xff] }
 0x192   :  { %6300 = vmatmul.mubr.msk.f32.vlgmr.msra.gmra.mrb[8].mxu1 %vm1688_vm3, %v10997_v6  ;;  %7721 = vmatpush1.bf16.msra.mxu0 %v7720_v62  ;;  %v1625_v33 = vld [vmem:[%s11832_s0 + $0x168] sm:$0xff]  ;;  %v1627_v35 = vld [vmem:[%s11832_s0 + $0x178] sm:$0xff]  ;;  %v1624_v39 = vld [vmem:[%s11832_s0 + $0x160] sm:$0xff] }
 0x193   :  { %7731 = vmatpush1.bf16.msra.mxu1 %v7730_v63  ;;  %2146 = vmatprep.mubr.f32.mxu0 %v8650_v43  ;;  %v1602_v40 = vld [vmem:[%s11832_s0 + $0xb0] sm:$0xff]  ;;  %v7758_v42 = vpack.c.bf16 %v1625_v33, %v1601_v32  ;;  %v7768_v44 = vpack.c.bf16 %v1627_v35, %v1603_v34  ;;  %v1649_v45 = vld [vmem:[%s11832_s0 + $0x228] sm:$0xff]  ;;  %v1651_v47 = vld [vmem:[%s11832_s0 + $0x238] sm:$0xff]  ;;  %v7760_v50 = vpack.c.bf16 %v1624_v39, %v1600_v38 }
 0x194   :  { %2223 = vmatprep.mubr.f32.mxu1 %v8650_v43  ;;  %7724 = vmatprep.subr.msk.bf16.mxu0 %vm10940_vm2, %v7722_v4  ;;  %v1626_v41 = vld [vmem:[%s11832_s0 + $0x170] sm:$0xff]  ;;  %v1673_v46 = vld [vmem:[%s11832_s0 + $0x2e8] sm:$0x7]  ;;  %v1675_v49 = vld [vmem:[%s11832_s0 + $0x2f8] sm:$0x7] }
 0x195   :  { %7734 = vmatprep.subr.msk.bf16.mxu1 %vm10940_vm2, %v7732_v5  ;;  %6297 = vmatmul.mubr.msk.f32.gmra.mrb[10].mxu0 %vm1688_vm3, %v11039_v22  ;;  %v7770_v51 = vpack.c.bf16 %v1626_v41, %v1602_v40  ;;  %v1648_v52 = vld [vmem:[%s11832_s0 + $0x220] sm:$0xff]  ;;  %v1650_v54 = vld [vmem:[%s11832_s0 + $0x230] sm:$0xff]  ;;  %v7762_v56 = vpack.c.bf16 %v1673_v46, %v1649_v45  ;;  %v7772_v57 = vpack.c.bf16 %v1675_v49, %v1651_v47  ;;  %v1677_v61 = vld [vmem:[%s11834_s2 + $0x8] sm:$0xff] }
 0x196   :  { %6301 = vmatmul.mubr.msk.f32.gmra.mrb[10].mxu1 %vm1688_vm3, %v11039_v22  ;;  %7727 = vmatpush1.bf16.msk.msra.mxu0 %vm10940_vm2, %v7725_v11  ;;  %v1672_v53 = vld [vmem:[%s11832_s0 + $0x2e0] sm:$0x7]  ;;  %v1674_v55 = vld [vmem:[%s11832_s0 + $0x2f0] sm:$0x7] }
 0x197   :  { %7737 = vmatpush1.bf16.msk.msra.mxu1 %vm10940_vm2, %v7735_v12  ;;  %2294 = vmatprep.mubr.f32.mxu0 %v8650_v43  ;;  %v7765_v58 = vpack.c.bf16 %v1672_v53, %v1648_v52  ;;  %v7775_v59 = vpack.c.bf16 %v1674_v55, %v1650_v54  ;;  %v1676_v60 = vld [vmem:[%s11834_s2] sm:$0xff] }
 0x198   :  { %2371 = vmatprep.mubr.f32.mxu1 %v8650_v43  ;;  %7739 = vmatprep.subr.bf16.mxu0 %v7738_v17 }
 0x199   :  { %7749 = vmatprep.subr.bf16.mxu1 %v7748_v18  ;;  %6304 = vmatmul.mubr.msk.f32.vlgmr.msra.gmra.mrb[12].mxu0 %vm1688_vm3, %v10997_v6 }
 0x19a   :  { %6308 = vmatmul.mubr.msk.f32.vlgmr.msra.gmra.mrb[12].mxu1 %vm1688_vm3, %v10997_v6  ;;  %7741 = vmatpush1.bf16.msra.mxu0 %v7740_v24 }
 0x19b   :  { %7751 = vmatpush1.bf16.msra.mxu1 %v7750_v25  ;;  %2300 = vmatprep.mubr.f32.mxu0 %v8650_v43 }
 0x19c   :  { %2377 = vmatprep.mubr.f32.mxu1 %v8650_v43  ;;  %7744 = vmatprep.subr.msk.bf16.mxu0 %vm10940_vm2, %v7742_v30 }
 0x19d   :  { %7754 = vmatprep.subr.msk.bf16.mxu1 %vm10940_vm2, %v7752_v31  ;;  %6305 = vmatmul.mubr.msk.f32.gmra.mrb[14].mxu0 %vm1688_vm3, %v11039_v22 }
 0x19e   :  { %6309 = vmatmul.mubr.msk.f32.gmra.mrb[14].mxu1 %vm1688_vm3, %v11039_v22  ;;  %7747 = vmatpush1.bf16.msk.msra.mxu0 %vm10940_vm2, %v7745_v36 }
 0x19f   :  { %7757 = vmatpush1.bf16.msk.msra.mxu1 %vm10940_vm2, %v7755_v37  ;;  %2448 = vmatprep.mubr.f32.mxu0 %v8650_v43 }
 0x1a0   :  { %2525 = vmatprep.mubr.f32.mxu1 %v8650_v43  ;;  %7759 = vmatprep.subr.bf16.mxu0 %v7758_v42 }
 0x1a1   :  { %7769 = vmatprep.subr.bf16.mxu1 %v7768_v44  ;;  %6312 = vmatmul.mubr.msk.f32.vlgmr.msra.gmra.mrb[16].mxu0 %vm1688_vm3, %v10997_v6 }
 0x1a2   :  { %6316 = vmatmul.mubr.msk.f32.vlgmr.msra.gmra.mrb[16].mxu1 %vm1688_vm3, %v10997_v6  ;;  %7761 = vmatpush1.bf16.msra.mxu0 %v7760_v50 }
 0x1a3   :  { %7771 = vmatpush1.bf16.msra.mxu1 %v7770_v51  ;;  %2454 = vmatprep.mubr.f32.mxu0 %v8650_v43 }
 0x1a4   :  { %2531 = vmatprep.mubr.f32.mxu1 %v8650_v43  ;;  %7764 = vmatprep.subr.msk.bf16.mxu0 %vm10940_vm2, %v7762_v56 }
 0x1a5   :  { %7774 = vmatprep.subr.msk.bf16.mxu1 %vm10940_vm2, %v7772_v57  ;;  %6313 = vmatmul.mubr.msk.f32.gmra.mrb[18].mxu0 %vm1688_vm3, %v11039_v22 }
 0x1a6   :  { %6317 = vmatmul.mubr.msk.f32.gmra.mrb[18].mxu1 %vm1688_vm3, %v11039_v22  ;;  %7767 = vmatpush1.bf16.msk.msra.mxu0 %vm10940_vm2, %v7765_v58 }
 0x1a7   :  { %7777 = vmatpush1.bf16.msk.msra.mxu1 %vm10940_vm2, %v7775_v59  ;;  %2602 = vmatprep.mubr.f32.mxu0 %v8650_v43 }
 0x1a8   :  { %2679 = vmatprep.mubr.f32.mxu1 %v8650_v43  ;;  %1680 = vperm.xlu0 %8647, %v1676_v60  }
 0x1a9   :  { %6320 = vmatmul.mubr.msk.f32.vlgmr.msra.gmra.mrb[20].mxu0 %vm1688_vm3, %v10997_v6 }
 0x1aa   :  { %6324 = vmatmul.mubr.msk.f32.vlgmr.msra.gmra.mrb[20].mxu1 %vm1688_vm3, %v10997_v6  ;;  %2608 = vmatprep.mubr.f32.mxu0 %v8650_v43 }
 0x1ab   :  { %2685 = vmatprep.mubr.f32.mxu1 %v8650_v43 }
 0x1ac   :  { %1685 = vperm.xlu0 %8647, %v1677_v61  }
 0x1ad   :  { %6321 = vmatmul.mubr.msk.f32.gmra.mrb[22].mxu0 %vm1688_vm3, %v11039_v22 }
 0x1ae   :  { %6325 = vmatmul.mubr.msk.f32.gmra.mrb[22].mxu1 %vm1688_vm3, %v11039_v22 }
 0x227   :  { %v11336_v48 = vpop.permute.xlu0 %1680 }
 0x22b   :  { %v11338_v5 = vpop.permute.xlu0 %1685 }
 0x254   :  { %v1834_v62 = vpop.f32.mrb[0].mxu0 }
 0x255   :  { %v1911_v63 = vpop.f32.mrb[0].mxu1  ;;  %v1836_v6 = vpop.f32.mrb[1].mxu0  ;;  %v1835_v7 = vadd.f32 %v1834_v62, %v11336_v48 }
 0x256   :  { %v1913_v0 = vpop.f32.mrb[1].mxu1  ;;  %v1837_v8 = vadd.f32 %v1836_v6, %v11336_v48  ;;  %v1912_v17 = vadd.f32 %v1911_v63, %v11336_v48 }
 0x257   :  { %v2692_v14 = vmax.f32 %v1835_v7, 0.0  ;;  %v1914_v19 = vadd.f32 %v1913_v0, %v11336_v48 }
 0x258   :  { %v1840_v1 = vpop.f32.mrb[2].mxu0  ;;  %v2693_v18 = vmax.f32 %v1837_v8, 0.0  ;;  %v2694_v34 = vmax.f32 %v1912_v17, 0.0 }
 0x259   :  { %v1917_v2 = vpop.f32.mrb[2].mxu1  ;;  %v1842_v3 = vpop.f32.mrb[3].mxu0  ;;  %v1841_v16 = vadd.f32 %v1840_v1, %v11338_v5  ;;  %v2695_v35 = vmax.f32 %v1914_v19, 0.0 }
 0x25a   :  { %v1919_v4 = vpop.f32.mrb[3].mxu1  ;;  %v1843_v20 = vadd.f32 %v1842_v3, %v11338_v5  ;;  %v1918_v47 = vadd.f32 %v1917_v2, %v11338_v5 }
 0x25b   :  { %v2716_v32 = vmax.f32 %v1841_v16, 0.0  ;;  %v1920_v49 = vadd.f32 %v1919_v4, %v11338_v5 }
 0x25c   :  { %v1988_v9 = vpop.f32.mrb[4].mxu0  ;;  %v2717_v36 = vmax.f32 %v1843_v20, 0.0 }
 0x25d   :  { %v2065_v10 = vpop.f32.mrb[4].mxu1  ;;  %v1990_v11 = vpop.f32.mrb[5].mxu0  ;;  %v1989_v31 = vadd.f32 %v1988_v9, %v11336_v48 }
 0x25e   :  { %v2066_v22 = vadd.f32 %v2065_v10, %v11336_v48  ;;  %v2067_v12 = vpop.f32.mrb[5].mxu1  ;;  %v1991_v37 = vadd.f32 %v1990_v11, %v11336_v48 }
 0x25f   :  { %v2068_v13 = vadd.f32 %v2067_v12, %v11336_v48  ;;  %v2696_v53 = vmax.f32 %v1989_v31, 0.0 }
 0x260   :  { %v2698_v15 = vmax.f32 %v2066_v22, 0.0  ;;  %v1994_v23 = vpop.f32.mrb[6].mxu0  ;;  %v2697_v57 = vmax.f32 %v1991_v37, 0.0  ;;  %v2718_v22 = vmax.f32 %v1918_v47, 0.0 }
 0x261   :  { %v2699_v21 = vmax.f32 %v2068_v13, 0.0  ;;  %v2071_v24 = vpop.f32.mrb[6].mxu1  ;;  %v1996_v27 = vpop.f32.mrb[7].mxu0  ;;  %v1995_v54 = vadd.f32 %v1994_v23, %v11338_v5  ;;  %v2719_v13 = vmax.f32 %v1920_v49, 0.0 }
 0x262   :  { %v11348_v25 = vmax.f32 %v2692_v14, %v2698_v15  ;;  %v2072_v26 = vadd.f32 %v2071_v24, %v11338_v5  ;;  %v2073_v28 = vpop.f32.mrb[7].mxu1  ;;  %v1997_v58 = vadd.f32 %v1996_v27, %v11338_v5 }
 0x263   :  { %v11351_v29 = vmax.f32 %v2693_v18, %v2699_v21  ;;  %v2074_v30 = vadd.f32 %v2073_v28, %v11338_v5  ;;  %v2720_v10 = vmax.f32 %v1995_v54, 0.0 }
 0x264   :  { %v2722_v33 = vmax.f32 %v2072_v26, 0.0  ;;  %v2142_v39 = vpop.f32.mrb[8].mxu0  ;;  %v2721_v14 = vmax.f32 %v1997_v58, 0.0 }
 0x265   :  { %v2723_v38 = vmax.f32 %v2074_v30, 0.0  ;;  %v2219_v40 = vpop.f32.mrb[8].mxu1  ;;  %v2143_v42 = vadd.f32 %v2142_v39, %v11336_v48  ;;  %v2144_v45 = vpop.f32.mrb[9].mxu0 }
 0x266   :  { %v11356_v41 = vmax.f32 %v2716_v32, %v2722_v33  ;;  %v2220_v44 = vadd.f32 %v2219_v40, %v11336_v48  ;;  %v2221_v46 = vpop.f32.mrb[9].mxu1  ;;  %v2145_v51 = vadd.f32 %v2144_v45, %v11336_v48 }
 0x267   :  { %v11362_v50 = vmax.f32 %v2717_v36, %v2723_v38  ;;  %v2222_v52 = vadd.f32 %v2221_v46, %v11336_v48  ;;  %v2700_v55 = vmax.f32 %v2143_v42, 0.0 }
 0x268   :  { %v2702_v56 = vmax.f32 %v2220_v44, 0.0  ;;  %v2701_v59 = vmax.f32 %v2145_v51, 0.0  ;;  %v2148_v61 = vpop.f32.mrb[10].mxu0 }
 0x269   :  { %v2703_v60 = vmax.f32 %v2222_v52, 0.0  ;;  %v2225_v62 = vpop.f32.mrb[10].mxu1  ;;  %v11368_v63 = vmax.f32 %v2694_v34, %v2700_v55  ;;  %v2149_v0 = vadd.f32 %v2148_v61, %v11338_v5  ;;  %v2150_v2 = vpop.f32.mrb[11].mxu0 }
 0x26a   :  { %v11370_v6 = vmax.f32 %v2696_v53, %v2702_v56  ;;  %v2226_v1 = vadd.f32 %v2225_v62, %v11338_v5  ;;  %v2227_v3 = vpop.f32.mrb[11].mxu1  ;;  %v11374_v4 = vmax.f32 %v2695_v35, %v2701_v59  ;;  %v2151_v8 = vadd.f32 %v2150_v2, %v11338_v5 }
 0x26b   :  { %v11376_v7 = vmax.f32 %v2697_v57, %v2703_v60  ;;  %v2228_v9 = vadd.f32 %v2227_v3, %v11338_v5  ;;  %v2724_v11 = vmax.f32 %v2149_v0, 0.0 }
 0x26c   :  { %v2726_v12 = vmax.f32 %v2226_v1, 0.0  ;;  %v2725_v15 = vmax.f32 %v2151_v8, 0.0  ;;  %v2296_v17 = vpop.f32.mrb[12].mxu0 }
 0x26d   :  { %v2727_v16 = vmax.f32 %v2228_v9, 0.0  ;;  %v2373_v18 = vpop.f32.mrb[12].mxu1  ;;  %v11380_v19 = vmax.f32 %v2718_v22, %v2724_v11  ;;  %v2298_v21 = vpop.f32.mrb[13].mxu0  ;;  %v2297_v32 = vadd.f32 %v2296_v17, %v11336_v48 }
 0x26e   :  { %v11382_v20 = vmax.f32 %v2720_v10, %v2726_v12  ;;  %v2375_v23 = vpop.f32.mrb[13].mxu1  ;;  %v11384_v24 = vmax.f32 %v2719_v13, %v2725_v15  ;;  %v2374_v33 = vadd.f32 %v2373_v18, %v11336_v48  ;;  %v2299_v34 = vadd.f32 %v2298_v21, %v11336_v48 }
 0x26f   :  { %v11386_v26 = vmax.f32 %v2721_v14, %v2727_v16  ;;  %v11392_v35 = vadd.f32 %v2375_v23, %v11336_v48  ;;  %v2704_v46 = vmax.f32 %v2297_v32, 0.0 }
 0x270   :  { %v2302_v27 = vpop.f32.mrb[14].mxu0  ;;  %v2706_v47 = vmax.f32 %v2374_v33, 0.0  ;;  %v2705_v52 = vmax.f32 %v2299_v34, 0.0 }
 0x271   :  { %v2379_v28 = vpop.f32.mrb[14].mxu1  ;;  %v2304_v30 = vpop.f32.mrb[15].mxu0  ;;  %v2303_v38 = vadd.f32 %v2302_v27, %v11338_v5  ;;  %v2707_v53 = vmax.f32 %v11392_v35, 0.0 }
 0x272   :  { %v2381_v31 = vpop.f32.mrb[15].mxu1  ;;  %v11397_v44 = vadd.f32 %v2379_v28, %v11338_v5  ;;  %v2305_v49 = vadd.f32 %v2304_v30, %v11338_v5 }
 0x273   :  { %v11403_v54 = vadd.f32 %v2381_v31, %v11338_v5  ;;  %v2728_v58 = vmax.f32 %v2303_v38, 0.0 }
 0x274   :  { %v2450_v36 = vpop.f32.mrb[16].mxu0  ;;  %v2730_v1 = vmax.f32 %v11397_v44, 0.0  ;;  %v2729_v9 = vmax.f32 %v2305_v49, 0.0 }
 0x275   :  { %v2527_v37 = vpop.f32.mrb[16].mxu1  ;;  %v2452_v40 = vpop.f32.mrb[17].mxu0  ;;  %v2451_v59 = vadd.f32 %v2450_v36, %v11336_v48  ;;  %v2731_v12 = vmax.f32 %v11403_v54, 0.0 }
 0x276   :  { %v2528_v39 = vadd.f32 %v2527_v37, %v11336_v48  ;;  %v2529_v42 = vpop.f32.mrb[17].mxu1  ;;  %v2453_v2 = vadd.f32 %v2452_v40, %v11336_v48 }
 0x277   :  { %v2530_v45 = vadd.f32 %v2529_v42, %v11336_v48  ;;  %v2708_v18 = vmax.f32 %v2451_v59, 0.0 }
 0x278   :  { %v2710_v51 = vmax.f32 %v2528_v39, 0.0  ;;  %v2456_v56 = vpop.f32.mrb[18].mxu0  ;;  %v2709_v30 = vmax.f32 %v2453_v2, 0.0 }
 0x279   :  { %v2711_v55 = vmax.f32 %v2530_v45, 0.0  ;;  %v2533_v57 = vpop.f32.mrb[18].mxu1  ;;  %v2458_v62 = vpop.f32.mrb[19].mxu0  ;;  %v2457_v22 = vadd.f32 %v2456_v56, %v11338_v5 }
 0x27a   :  { %v2848_v60 = vmax.f32 %v2704_v46, %v2710_v51  ;;  %v2534_v61 = vadd.f32 %v2533_v57, %v11338_v5  ;;  %v2535_v0 = vpop.f32.mrb[19].mxu1  ;;  %v2459_v14 = vadd.f32 %v2458_v62, %v11338_v5 }
 0x27b   :  { %v2849_v3 = vmax.f32 %v2705_v52, %v2711_v55  ;;  %v2536_v8 = vadd.f32 %v2535_v0, %v11338_v5  ;;  %v2732_v33 = vmax.f32 %v2457_v22, 0.0 }
 0x27c   :  { %v11411_v10 = vmax.f32 %v11348_v25, %v2848_v60  ;;  %v2734_v11 = vmax.f32 %v2534_v61, 0.0  ;;  %v2604_v16 = vpop.f32.mrb[20].mxu0  ;;  %v2733_v37 = vmax.f32 %v2459_v14, 0.0 }
 0x27d   :  { %v11416_v13 = vmax.f32 %v11351_v29, %v2849_v3  ;;  %v2735_v15 = vmax.f32 %v2536_v8, 0.0  ;;  %v2681_v17 = vpop.f32.mrb[20].mxu1  ;;  %v2605_v23 = vadd.f32 %v2604_v16, %v11336_v48  ;;  %v2606_v27 = vpop.f32.mrb[21].mxu0 }
 0x27e   :  { %v2854_v21 = vmax.f32 %v2728_v58, %v2734_v11  ;;  %v2682_v25 = vadd.f32 %v2681_v17, %v11336_v48  ;;  %v2683_v28 = vpop.f32.mrb[21].mxu1  ;;  %v2607_v32 = vadd.f32 %v2606_v27, %v11336_v48 }
 0x27f   :  { %v2855_v31 = vmax.f32 %v2729_v9, %v2735_v15  ;;  %v2684_v29 = vadd.f32 %v2683_v28, %v11336_v48  ;;  %v2712_v35 = vmax.f32 %v2605_v23, 0.0 }
 0x280   :  { %v11424_v34 = vmax.f32 %v11356_v41, %v2854_v21  ;;  %v2714_v36 = vmax.f32 %v2682_v25, 0.0  ;;  %v2713_v39 = vmax.f32 %v2607_v32, 0.0  ;;  %v2610_v42 = vpop.f32.mrb[22].mxu0 }
 0x281   :  { %v11427_v38 = vmax.f32 %v11362_v50, %v2855_v31  ;;  %v2715_v40 = vmax.f32 %v2684_v29, 0.0  ;;  %v2687_v44 = vpop.f32.mrb[22].mxu1  ;;  %v2850_v45 = vmax.f32 %v2706_v47, %v2712_v35  ;;  %v2611_v49 = vadd.f32 %v2610_v42, %v11338_v5  ;;  %v2612_v51 = vpop.f32.mrb[23].mxu0 }
 0x282   :  { %v2852_v46 = vmax.f32 %v2708_v18, %v2714_v36  ;;  %v2688_v48 = vadd.f32 %v2687_v44, %v11338_v5  ;;  %v2689_v52 = vpop.f32.mrb[23].mxu1  ;;  %v2851_v41 = vmax.f32 %v2707_v53, %v2713_v39  ;;  %v2613_v55 = vadd.f32 %v2612_v51, %v11338_v5 }
 0x283   :  { %v2853_v54 = vmax.f32 %v2709_v30, %v2715_v40  ;;  %v2690_v56 = vadd.f32 %v2689_v52, %v11338_v5  ;;  %v11434_v50 = vmax.f32 %v11368_v63, %v2850_v45  ;;  %v2736_v47 = vmax.f32 %v2611_v49, 0.0 }
 0x284   :  { %v11437_v57 = vmax.f32 %v11370_v6, %v2852_v46  ;;  %v2738_v58 = vmax.f32 %v2688_v48, 0.0  ;;  %v11440_v59 = vmax.f32 %v11374_v4, %v2851_v41  ;;  %v2737_v53 = vmax.f32 %v2613_v55, 0.0 }
 0x285   :  { %v11443_v60 = vmax.f32 %v11376_v7, %v2853_v54  ;;  %v2739_v61 = vmax.f32 %v2690_v56, 0.0  ;;  %v2856_v62 = vmax.f32 %v2730_v1, %v2736_v47 }
 0x286   :  { %v2858_v0 = vmax.f32 %v2732_v33, %v2738_v58  ;;  %v2857_v2 = vmax.f32 %v2731_v12, %v2737_v53 }
 0x287   :  { %v2859_v5 = vmax.f32 %v2733_v37, %v2739_v61  ;;  %v11446_v63 = vmax.f32 %v11380_v19, %v2856_v62 }
 0x288   :  { %v11449_v6 = vmax.f32 %v11382_v20, %v2858_v0  ;;  %v11452_v3 = vmax.f32 %v11384_v24, %v2857_v2 }
 0x289   :  { %v11455_v4 = vmax.f32 %v11386_v26, %v2859_v5 }
 0x28a   :  { %8648 = dma.done.wait [#allocation4], 92416 }
 0x28b   :  { %8649 = vsyncadd [#allocation4], 4294874880  ;;  %v8653_v7 = vmov 0.0|0.0   ;;  %vm8654_vm4 = vmmov 0   ;;  %v2939_v19 = vrot.slane %v11416_v13, 1  ;;  %vm2885_vm5 = vcmask 1040384  }
 0x28c   :  { %7810 = vmatprep.subr.bf16.mxu1 %v8653_v7  ;;  %7190 = vmatprep.mubr.msk.f32.mxu1 %vm8654_vm4, %v8650_v43  ;;  %v2964_v24 = vld [vmem:[#allocation3 + $0x1f0] sm:$0xff]  ;;  %v2965_v1 = vld [vmem:[#allocation3 + $0x1f8] sm:$0xff]  ;;  %v2966_v15 = vld [vmem:[#allocation3 + $0x200] sm:$0xff]  ;;  %vm2994_vm7 = vcmask 859136   ;;  %vm6224_vm8 = vcmask 517120   ;;  %vm6236_vm9 = vcmask 1024  }
 0x28d   :  { %v2945_v20 = vsel %vm2885_vm5, %v2939_v19, %v11437_v57  ;;  %v2980_v26 = vld [vmem:[#allocation3 + $0x270] sm:$0xff]  ;;  %v7778_v8 = vpack.c.bf16 %v2965_v1, %v2964_v24  ;;  %v2981_v9 = vld [vmem:[#allocation3 + $0x278] sm:$0xff]  ;;  %v2967_v16 = vld [vmem:[#allocation3 + $0x208] sm:$0xff] }
 0x28e   :  { %3065 = vmatprep.mubr.f32.mxu0 %v2945_v20  ;;  %v2948_v22 = vld [vmem:[#allocation3 + $0x170] sm:$0xff]  ;;  %v2949_v11 = vld [vmem:[#allocation3 + $0x178] sm:$0xff]  ;;  %v7811_v12 = vpack.c.bf16 %v2981_v9, %v2980_v26  ;;  %v2982_v17 = vld [vmem:[#allocation3 + $0x280] sm:$0xff]  ;;  %v7782_v18 = vpack.c.bf16 %v2967_v16, %v2966_v15 }
 0x28f   :  { %v7780_v14 = vpack.c.bf16 %v2949_v11, %v2948_v22  ;;  %7779 = vmatprep.subr.bf16.mxu0 %v7778_v8  ;;  %v2983_v21 = vld [vmem:[#allocation3 + $0x288] sm:$0xff]  ;;  %v2950_v23 = vld [vmem:[#allocation3 + $0x180] sm:$0xff]  ;;  %v2968_v30 = vld [vmem:[#allocation3 + $0x210] sm:$0xff] }
 0x290   :  { %v2951_v25 = vld [vmem:[#allocation3 + $0x188] sm:$0xff]  ;;  %7812 = vmatpush3.bf16.msra.mxu1 %v7811_v12  ;;  %v7814_v27 = vpack.c.bf16 %v2983_v21, %v2982_v17  ;;  %v2969_v31 = vld [vmem:[#allocation3 + $0x218] sm:$0xff]  ;;  %v2984_v32 = vld [vmem:[#allocation3 + $0x290] sm:$0xff] }
 0x291   :  { %7781 = vmatpush3.bf16.msra.mxu0 %v7780_v14  ;;  %v7784_v28 = vpack.c.bf16 %v2951_v25, %v2950_v23  ;;  %7813 = vmatprep.subr.bf16.mxu1 %v8653_v7  ;;  %v7786_v29 = vpack.c.bf16 %v2969_v31, %v2968_v30  ;;  %v2985_v33 = vld [vmem:[#allocation3 + $0x298] sm:$0xff]  ;;  %v2952_v35 = vld [vmem:[#allocation3 + $0x190] sm:$0xff]  ;;  %v2970_v37 = vld [vmem:[#allocation3 + $0x220] sm:$0xff]  ;;  %v2940_v30 = vrot.slane %v11434_v50, 1 }
 0x292   :  { %7783 = vmatprep.subr.bf16.mxu0 %v7782_v18  ;;  %v2953_v36 = vld [vmem:[#allocation3 + $0x198] sm:$0xff]  ;;  %v2971_v39 = vld [vmem:[#allocation3 + $0x228] sm:$0xff]  ;;  %v7817_v40 = vpack.c.bf16 %v2985_v33, %v2984_v32  ;;  %v2986_v44 = vld [vmem:[#allocation3 + $0x2a0] sm:$0xff] }
 0x293   :  { %v7788_v42 = vpack.c.bf16 %v2953_v36, %v2952_v35  ;;  %v7790_v45 = vpack.c.bf16 %v2971_v39, %v2970_v37  ;;  %v2987_v46 = vld [vmem:[#allocation3 + $0x2a8] sm:$0xff]  ;;  %v2954_v49 = vld [vmem:[#allocation3 + $0x1a0] sm:$0xff]  ;;  %v2972_v51 = vld [vmem:[#allocation3 + $0x230] sm:$0xff] }
 0x294   :  { %7815 = vmatpush3.bf16.msra.mxu1 %v7814_v27  ;;  %v2955_v48 = vld [vmem:[#allocation3 + $0x1a8] sm:$0xff]  ;;  %v2973_v52 = vld [vmem:[#allocation3 + $0x238] sm:$0xff]  ;;  %v7820_v41 = vpack.c.bf16 %v2987_v46, %v2986_v44  ;;  %v2988_v55 = vld [vmem:[#allocation3 + $0x2b0] sm:$0xff]  ;;  %v2938_v46 = vrot.slane %v11411_v10, 1 }
 0x295   :  { %7785 = vmatpush3.bf16.msra.mxu0 %v7784_v28  ;;  %7816 = vmatprep.subr.bf16.mxu1 %v8653_v7  ;;  %v7792_v54 = vpack.c.bf16 %v2955_v48, %v2954_v49  ;;  %v7794_v56 = vpack.c.bf16 %v2973_v52, %v2972_v51  ;;  %v2989_v47 = vld [vmem:[#allocation3 + $0x2b8] sm:$0xff]  ;;  %v2956_v58 = vld [vmem:[#allocation3 + $0x1b0] sm:$0xff]  ;;  %v2974_v61 = vld [vmem:[#allocation3 + $0x240] sm:$0xff] }
 0x296   :  { %7787 = vmatprep.subr.bf16.mxu0 %v7786_v29  ;;  %v2957_v53 = vld [vmem:[#allocation3 + $0x1b8] sm:$0xff]  ;;  %v2975_v62 = vld [vmem:[#allocation3 + $0x248] sm:$0xff]  ;;  %v7823_v0 = vpack.c.bf16 %v2989_v47, %v2988_v55  ;;  %v2990_v5 = vld [vmem:[#allocation3 + $0x2c0] sm:$0xff]  ;;  %v2944_v47 = vsel %vm2885_vm5, %v2938_v46, %v11440_v59 }
 0x297   :  { %v7796_v2 = vpack.c.bf16 %v2957_v53, %v2956_v58  ;;  %v7798_v19 = vpack.c.bf16 %v2975_v62, %v2974_v61  ;;  %v2991_v20 = vld [vmem:[#allocation3 + $0x2c8] sm:$0xff]  ;;  %v2958_v24 = vld [vmem:[#allocation3 + $0x1c0] sm:$0xff]  ;;  %v2976_v26 = vld [vmem:[#allocation3 + $0x250] sm:$0xff] }
 0x298   :  { %7818 = vmatpush3.bf16.msra.mxu1 %v7817_v40  ;;  %v2959_v1 = vld [vmem:[#allocation3 + $0x1c8] sm:$0xff]  ;;  %v2977_v8 = vld [vmem:[#allocation3 + $0x258] sm:$0xff]  ;;  %v7826_v9 = vpack.c.bf16 %v2991_v20, %v2990_v5  ;;  %v2992_v11 = vld [vmem:[#allocation3 + $0x2d0] sm:$0xff]  ;;  %v2880_v40 = vrot.slane %v11437_v57, 7 }
 0x299   :  { %7789 = vmatpush3.bf16.msra.mxu0 %v7788_v42  ;;  %7819 = vmatprep.subr.bf16.mxu1 %v8653_v7  ;;  %v7800_v22 = vpack.c.bf16 %v2959_v1, %v2958_v24  ;;  %v2993_v12 = vld [vmem:[#allocation3 + $0x2d8] sm:$0x1]  ;;  %v7802_v14 = vpack.c.bf16 %v2977_v8, %v2976_v26  ;;  %v2960_v15 = vld [vmem:[#allocation3 + $0x1d0] sm:$0xff]  ;;  %v2905_v17 = vld [vmem:[#allocation3 + $0x80] sm:$0xff]  ;;  %v2946_v42 = vsel %vm2885_vm5, %v2940_v30, %v11443_v60 }
 0x29a   :  { %7791 = vmatprep.subr.bf16.mxu0 %v7790_v45  ;;  %v2961_v16 = vld [vmem:[#allocation3 + $0x1d8] sm:$0xff]  ;;  %v2906_v18 = vld [vmem:[#allocation3 + $0x88] sm:$0xff]  ;;  %v2978_v21 = vld [vmem:[#allocation3 + $0x260] sm:$0xff]  ;;  %v7829_v25 = vpack.c.bf16 %v2993_v12, %v2992_v11 }
 0x29b   :  { %v2979_v23 = vld [vmem:[#allocation3 + $0x268] sm:$0xff]  ;;  %vm11470_vm6 = vmpackc.low %vm2885_vm5, %vm8651_vm1  ;;  %v7804_v28 = vpack.c.bf16 %v2961_v16, %v2960_v15  ;;  %v2889_v31 = vld [vmem:[#allocation3] sm:$0xff]  ;;  %v7832_v32 = vpack.c.bf16 %v2906_v18, %v2905_v17 }
 0x29c   :  { %7821 = vmatpush3.bf16.msra.mxu1 %v7820_v41  ;;  %v7806_v29 = vpack.c.bf16 %v2979_v23, %v2978_v21  ;;  %v2890_v33 = vld [vmem:[#allocation3 + $0x8] sm:$0xff]  ;;  %v2962_v35 = vld [vmem:[#allocation3 + $0x1e0] sm:$0xff]  ;;  %v2907_v37 = vld [vmem:[#allocation3 + $0x90] sm:$0xff] }
 0x29d   :  { %7793 = vmatpush3.bf16.msra.mxu0 %v7792_v54  ;;  %7822 = vmatprep.subr.bf16.mxu1 %v8653_v7  ;;  %v2963_v36 = vld [vmem:[#allocation3 + $0x1e8] sm:$0xff]  ;;  %v2908_v39 = vld [vmem:[#allocation3 + $0x98] sm:$0xff]  ;;  %v7834_v44 = vpack.c.bf16 %v2890_v33, %v2889_v31  ;;  %v2891_v49 = vld [vmem:[#allocation3 + $0x10] sm:$0xff] }
 0x29e   :  { %7795 = vmatprep.subr.bf16.mxu0 %v7794_v56  ;;  %v7808_v45 = vpack.c.bf16 %v2963_v36, %v2962_v35  ;;  %v7836_v48 = vpack.c.bf16 %v2908_v39, %v2907_v37  ;;  %v2892_v51 = vld [vmem:[#allocation3 + $0x18] sm:$0xff]  ;;  %v2921_v52 = vld [vmem:[#allocation3 + $0x100] sm:$0xff]  ;;  %v2922_v41 = vld [vmem:[#allocation3 + $0x108] sm:$0xff]  ;;  %v2887_v56 = vsel %vm2885_vm5, %v11416_v13, %v2880_v40 }
 0x29f   :  { %v2909_v54 = vld [vmem:[#allocation3 + $0xa0] sm:$0xff]  ;;  %v2910_v55 = vld [vmem:[#allocation3 + $0xa8] sm:$0xff]  ;;  %v7838_v58 = vpack.c.bf16 %v2892_v51, %v2891_v49  ;;  %v7865_v53 = vpack.c.bf16 %v2922_v41, %v2921_v52  ;;  %v2924_v5 = vld [vmem:[#allocation3 + $0x118] sm:$0xff] }
 0x2a0   :  { %7824 = vmatpush3.bf16.msra.mxu1 %v7823_v0  ;;  %v2893_v61 = vld [vmem:[#allocation3 + $0x20] sm:$0xff]  ;;  %v7840_v62 = vpack.c.bf16 %v2910_v55, %v2909_v54  ;;  %v2894_v0 = vld [vmem:[#allocation3 + $0x28] sm:$0xff]  ;;  %v2912_v20 = vld [vmem:[#allocation3 + $0xb8] sm:$0xff] }
 0x2a1   :  { %7797 = vmatpush3.bf16.msra.mxu0 %v7796_v2  ;;  %7825 = vmatprep.subr.bf16.mxu1 %v8653_v7  ;;  %v2923_v2 = vld [vmem:[#allocation3 + $0x110] sm:$0xff]  ;;  %v7842_v24 = vpack.c.bf16 %v2894_v0, %v2893_v61  ;;  %v2926_v11 = vld [vmem:[#allocation3 + $0x128] sm:$0xff]  ;;  %v2913_v12 = vld [vmem:[#allocation3 + $0xc0] sm:$0xff] }
 0x2a2   :  { %7799 = vmatprep.subr.bf16.mxu0 %v7798_v19  ;;  %v2911_v19 = vld [vmem:[#allocation3 + $0xb0] sm:$0xff]  ;;  %v7868_v1 = vpack.c.bf16 %v2924_v5, %v2923_v2  ;;  %v2897_v17 = vld [vmem:[#allocation3 + $0x40] sm:$0xff]  ;;  %v2898_v21 = vld [vmem:[#allocation3 + $0x48] sm:$0xff]  ;;  %v2879_v2 = vrot.slane %v11440_v59, 7 }
 0x2a3   :  { %v2895_v26 = vld [vmem:[#allocation3 + $0x30] sm:$0xff]  ;;  %v7844_v8 = vpack.c.bf16 %v2912_v20, %v2911_v19  ;;  %v2916_v30 = vld [vmem:[#allocation3 + $0xd8] sm:$0xff]  ;;  %v7850_v31 = vpack.c.bf16 %v2898_v21, %v2897_v17  ;;  %v2929_v36 = vld [vmem:[#allocation3 + $0x140] sm:$0xff] }
 0x2a4   :  { %7827 = vmatpush3.bf16.msra.mxu1 %v7826_v9  ;;  %v2896_v9 = vld [vmem:[#allocation3 + $0x38] sm:$0xff]  ;;  %v2927_v23 = vld [vmem:[#allocation3 + $0x130] sm:$0xff]  ;;  %v2930_v37 = vld [vmem:[#allocation3 + $0x148] sm:$0xff] }
 0x2a5   :  { %7801 = vmatpush3.bf16.msra.mxu0 %v7800_v22  ;;  %7828 = vmatprep.subr.bf16.mxu1 %v8653_v7  ;;  %v2925_v22 = vld [vmem:[#allocation3 + $0x120] sm:$0xff]  ;;  %v7846_v15 = vpack.c.bf16 %v2896_v9, %v2895_v26  ;;  %v2900_v35 = vld [vmem:[#allocation3 + $0x58] sm:$0xff]  ;;  %v2918_v40 = vld [vmem:[#allocation3 + $0xe8] sm:$0xff] }
 0x2a6   :  { %7803 = vmatprep.subr.bf16.mxu0 %v7802_v14  ;;  %v2914_v14 = vld [vmem:[#allocation3 + $0xc8] sm:$0xff]  ;;  %v7871_v16 = vpack.c.bf16 %v2926_v11, %v2925_v22  ;;  %v2917_v39 = vld [vmem:[#allocation3 + $0xe0] sm:$0xff]  ;;  %v2932_v51 = vld [vmem:[#allocation3 + $0x158] sm:$0xff] }
 0x2a7   :  { %v7848_v18 = vpack.c.bf16 %v2914_v14, %v2913_v12  ;;  %v7856_v46 = vpack.c.bf16 %v2918_v40, %v2917_v39  ;;  %v2902_v49 = vld [vmem:[#allocation3 + $0x68] sm:$0xff]  ;;  %v2919_v52 = vld [vmem:[#allocation3 + $0xf0] sm:$0xff]  ;;  %v2920_v41 = vld [vmem:[#allocation3 + $0xf8] sm:$0xff]  ;;  %v2886_v12 = vsel %vm2885_vm5, %v11411_v10, %v2879_v2  ;;  %v3288_v14 = vrot.slane %v11416_v13, 2 }
 0x2a8   :  { %7831 = vmatpush3.bf16.msk.msra.mxu1 %vm11470_vm6, %v7829_v25  ;;  %v2928_v25 = vld [vmem:[#allocation3 + $0x138] sm:$0xff]  ;;  %v2934_v61 = vld [vmem:[#allocation3 + $0x168] sm:$0x1]  ;;  %v3335_v20 = vld [vmem:[#allocation3 + $0x3e0] sm:$0xff] }
 0x2a9   :  { %7805 = vmatpush3.bf16.msra.mxu0 %v7804_v28  ;;  %7833 = vmatprep.subr.bf16.mxu1 %v7832_v32  ;;  %v2915_v28 = vld [vmem:[#allocation3 + $0xd0] sm:$0xff]  ;;  %v7874_v32 = vpack.c.bf16 %v2928_v25, %v2927_v23  ;;  %v3320_v0 = vld [vmem:[#allocation3 + $0x368] sm:$0xff]  ;;  %v3322_v11 = vld [vmem:[#allocation3 + $0x378] sm:$0xff] }
 0x2aa   :  { %7807 = vmatprep.subr.bf16.mxu0 %v7806_v29  ;;  %v2899_v29 = vld [vmem:[#allocation3 + $0x50] sm:$0xff]  ;;  %v7852_v33 = vpack.c.bf16 %v2916_v30, %v2915_v28  ;;  %v3336_v26 = vld [vmem:[#allocation3 + $0x3e8] sm:$0xff]  ;;  %v3338_v25 = vld [vmem:[#allocation3 + $0x3f8] sm:$0xff] }
 0x2ab   :  { %7191 = vmatmul.mubr.msk.f32.vlgmr.msra.gmra.mrb[24].mxu1 %vm2994_vm7, %v2946_v42  ;;  %v7854_v42 = vpack.c.bf16 %v2900_v35, %v2899_v29  ;;  %v3304_v9 = vld [vmem:[#allocation3 + $0x2e8] sm:$0xff]  ;;  %v3321_v22 = vld [vmem:[#allocation3 + $0x370] sm:$0xff]  ;;  %v3306_v30 = vld [vmem:[#allocation3 + $0x2f8] sm:$0xff] }
 0x2ac   :  { %7835 = vmatpush3.bf16.msra.mxu1 %v7834_v44  ;;  %3211 = vmatprep.mubr.f32.mxu1 %v2887_v56  ;;  %v7877_v44 = vpack.c.bf16 %v2930_v37, %v2929_v36  ;;  %v2903_v56 = vld [vmem:[#allocation3 + $0x70] sm:$0xff]  ;;  %v7890_v23 = vpack.c.bf16 %v3322_v11, %v3321_v22  ;;  %v3339_v36 = vld [vmem:[#allocation3 + $0x400] sm:$0xff]  ;;  %v3340_v39 = vld [vmem:[#allocation3 + $0x408] sm:$0xff] }
 0x2ad   :  { %7809 = vmatpush3.bf16.msra.mxu0 %v7808_v45  ;;  %7837 = vmatprep.subr.bf16.mxu1 %v7836_v48  ;;  %v2901_v45 = vld [vmem:[#allocation3 + $0x60] sm:$0xff]  ;;  %v2931_v48 = vld [vmem:[#allocation3 + $0x150] sm:$0xff]  ;;  %v3312_v2 = vld [vmem:[#allocation3 + $0x328] sm:$0xff] }
 0x2ae   :  { %7864 = vmatprep.subr.bf16.mxu0 %v8653_v7  ;;  %v7858_v54 = vpack.c.bf16 %v2902_v49, %v2901_v45  ;;  %v7880_v55 = vpack.c.bf16 %v2932_v51, %v2931_v48  ;;  %v3337_v21 = vld [vmem:[#allocation3 + $0x3f0] sm:$0xff]  ;;  %v3307_v40 = vld [vmem:[#allocation3 + $0x300] sm:$0xff]  ;;  %v3326_v45 = vld [vmem:[#allocation3 + $0x398] sm:$0xff] }
 0x2af   :  { %v3305_v28 = vld [vmem:[#allocation3 + $0x2f0] sm:$0xff]  ;;  %v3314_v22 = vld [vmem:[#allocation3 + $0x338] sm:$0xff]  ;;  %v3331_v11 = vld [vmem:[#allocation3 + $0x3c0] sm:$0xff] }
 0x2b0   :  { %3066 = vmatmul.mubr.f32.vlgmr.msra.gmra.mrb[24].mxu0 %v2944_v47  ;;  %7839 = vmatpush3.bf16.msra.mxu1 %v7838_v58  ;;  %v7860_v47 = vpack.c.bf16 %v2920_v41, %v2919_v52  ;;  %v2904_v58 = vld [vmem:[#allocation3 + $0x78] sm:$0xff]  ;;  %v7892_v35 = vpack.c.bf16 %v3306_v30, %v3305_v28  ;;  %v3341_v48 = vld [vmem:[#allocation3 + $0x410] sm:$0xff] }
 0x2b1   :  { %7866 = vmatpush3.bf16.msra.mxu0 %v7865_v53  ;;  %7841 = vmatprep.subr.bf16.mxu1 %v7840_v62  ;;  %v2933_v53 = vld [vmem:[#allocation3 + $0x160] sm:$0xff]  ;;  %v7862_v5 = vpack.c.bf16 %v2904_v58, %v2903_v56  ;;  %v3342_v52 = vld [vmem:[#allocation3 + $0x418] sm:$0xff]  ;;  %v3309_v41 = vld [vmem:[#allocation3 + $0x310] sm:$0xff] }
 0x2b2   :  { %7867 = vmatprep.subr.bf16.mxu0 %v8653_v7  ;;  %7221 = vmatprep.mubr.msk.f32.mxu0 %vm8654_vm4, %v8650_v43  ;;  %v3319_v62 = vld [vmem:[#allocation3 + $0x360] sm:$0xff]  ;;  %v7883_v19 = vpack.c.bf16 %v2934_v61, %v2933_v53  ;;  %v3328_v56 = vld [vmem:[#allocation3 + $0x3a8] sm:$0xff]  ;;  %v3529_v28 = vld [vmem:[#allocation3 + $0x4d8] sm:$0xff] }
 0x2b3   :  { %v3343_v53 = vld [vmem:[#allocation3 + $0x420] sm:$0xff]  ;;  %v3333_v30 = vld [vmem:[#allocation3 + $0x3d0] sm:$0xff] }
 0x2b4   :  { %7843 = vmatpush3.bf16.msra.mxu1 %v7842_v24  ;;  %v2881_v24 = vrot.slane %v11443_v60, 7 }
 0x2b5   :  { %7869 = vmatpush3.bf16.msra.mxu0 %v7868_v1  ;;  %7845 = vmatprep.subr.bf16.mxu1 %v7844_v8  ;;  %v7886_v1 = vpack.c.bf16 %v3320_v0, %v3319_v62  ;;  %v3303_v8 = vld [vmem:[#allocation3 + $0x2e0] sm:$0xff]  ;;  %v3344_v62 = vld [vmem:[#allocation3 + $0x428] sm:$0xff] }
 0x2b6   :  { %7870 = vmatprep.subr.bf16.mxu0 %v8653_v7  ;;  %v2888_v17 = vsel %vm2885_vm5, %v11434_v50, %v2881_v24  ;;  %v3311_v0 = vld [vmem:[#allocation3 + $0x320] sm:$0xff] }
 0x2b7   :  { %v7904_v24 = vpack.c.bf16 %v3312_v2, %v3311_v0  ;;  %v3533_v0 = vld [vmem:[#allocation3 + $0x4f8] sm:$0xff] }
 0x2b8   :  { %7847 = vmatpush3.bf16.msra.mxu1 %v7846_v15  ;;  %v3294_v15 = vrot.slane %v11437_v57, 1 }
 0x2b9   :  { %7872 = vmatpush3.bf16.msra.mxu0 %v7871_v16  ;;  %7849 = vmatprep.subr.bf16.mxu1 %v7848_v18  ;;  %v7919_v16 = vpack.c.bf16 %v3336_v26, %v3335_v20  ;;  %v7888_v18 = vpack.c.bf16 %v3304_v9, %v3303_v8  ;;  %v7931_v20 = vpack.c.bf16 %v3344_v62, %v3343_v53  ;;  %v3346_v8 = vld [vmem:[#allocation3 + $0x438] sm:$0xff]  ;;  %v3313_v9 = vld [vmem:[#allocation3 + $0x330] sm:$0xff] }
 0x2ba   :  { %7873 = vmatprep.subr.bf16.mxu0 %v8653_v7  ;;  %v3300_v29 = vsel %vm2885_vm5, %v3288_v14, %v3294_v15  ;;  %v7908_v15 = vpack.c.bf16 %v3314_v22, %v3313_v9  ;;  %v3544_v53 = vld [vmem:[#allocation3 + $0x550] sm:$0xff]  ;;  %v3547_v9 = vld [vmem:[#allocation3 + $0x568] sm:$0xff]  ;;  %v3534_v22 = vld [vmem:[#allocation3 + $0x500] sm:$0xff] }
 0x2bb   :  { %v3532_v62 = vld [vmem:[#allocation3 + $0x4f0] sm:$0xff] }
 0x2bc   :  { %7851 = vmatpush3.bf16.msra.mxu1 %v7850_v31  ;;  %v3323_v31 = vld [vmem:[#allocation3 + $0x380] sm:$0xff] }
 0x2bd   :  { %7875 = vmatpush3.bf16.msra.mxu0 %v7874_v32  ;;  %7853 = vmatprep.subr.bf16.mxu1 %v7852_v33  ;;  %v3324_v32 = vld [vmem:[#allocation3 + $0x388] sm:$0xff]  ;;  %v7922_v33 = vpack.c.bf16 %v3338_v25, %v3337_v21  ;;  %v3315_v21 = vld [vmem:[#allocation3 + $0x340] sm:$0xff]  ;;  %v3528_v25 = vld [vmem:[#allocation3 + $0x4d0] sm:$0xff] }
 0x2be   :  { %7876 = vmatprep.subr.bf16.mxu0 %v8653_v7  ;;  %v7894_v37 = vpack.c.bf16 %v3324_v32, %v3323_v31  ;;  %v3334_v31 = vld [vmem:[#allocation3 + $0x3d8] sm:$0xff]  ;;  %v3289_v32 = vrot.slane %v11434_v50, 2 }
 0x2c0   :  { %7855 = vmatpush3.bf16.msra.mxu1 %v7854_v42  ;;  %v3308_v42 = vld [vmem:[#allocation3 + $0x308] sm:$0xff] }
 0x2c1   :  { %7878 = vmatpush3.bf16.msra.mxu0 %v7877_v44  ;;  %7857 = vmatprep.subr.bf16.mxu1 %v7856_v46  ;;  %v3325_v44 = vld [vmem:[#allocation3 + $0x390] sm:$0xff]  ;;  %v7925_v46 = vpack.c.bf16 %v3340_v39, %v3339_v36  ;;  %v7896_v49 = vpack.c.bf16 %v3308_v42, %v3307_v40  ;;  %v7914_v39 = vpack.c.bf16 %v3334_v31, %v3333_v30  ;;  %v3513_v40 = vld [vmem:[#allocation3 + $0x458] sm:$0xff] }
 0x2c2   :  { %7879 = vmatprep.subr.bf16.mxu0 %v8653_v7  ;;  %v7898_v51 = vpack.c.bf16 %v3326_v45, %v3325_v44  ;;  %v3512_v36 = vld [vmem:[#allocation3 + $0x450] sm:$0xff]  ;;  %v3318_v44 = vld [vmem:[#allocation3 + $0x358] sm:$0xff]  ;;  %v3530_v45 = vld [vmem:[#allocation3 + $0x4e0] sm:$0xff] }
 0x2c3   :  { %v3317_v42 = vld [vmem:[#allocation3 + $0x350] sm:$0xff] }
 0x2c4   :  { %7859 = vmatpush3.bf16.msra.mxu1 %v7858_v54  ;;  %v3310_v54 = vld [vmem:[#allocation3 + $0x318] sm:$0xff]  ;;  %v3520_v31 = vld [vmem:[#allocation3 + $0x490] sm:$0xff] }
 0x2c5   :  { %7881 = vmatpush3.bf16.msra.mxu0 %v7880_v55  ;;  %7861 = vmatprep.subr.bf16.mxu1 %v7860_v47  ;;  %v3327_v55 = vld [vmem:[#allocation3 + $0x3a0] sm:$0xff]  ;;  %v7928_v47 = vpack.c.bf16 %v3342_v52, %v3341_v48  ;;  %v7900_v58 = vpack.c.bf16 %v3310_v54, %v3309_v41  ;;  %v3497_v48 = vrot.slane %v11416_v13, 3  ;;  %v7942_v52 = vpack.c.bf16 %v3513_v40, %v3512_v36 }
 0x2c6   :  { %7882 = vmatprep.subr.bf16.mxu0 %v8653_v7  ;;  %v7902_v61 = vpack.c.bf16 %v3328_v56, %v3327_v55  ;;  %v7916_v41 = vpack.c.bf16 %v3318_v44, %v3317_v42  ;;  %v3287_v54 = vrot.slane %v11411_v10, 2  ;;  %v3293_v55 = vrot.slane %v11440_v59, 1  ;;  %v3514_v56 = vld [vmem:[#allocation3 + $0x460] sm:$0xff] }
 0x2c7   :  { %v3538_v36 = vld [vmem:[#allocation3 + $0x520] sm:$0xff] }
 0x2c8   :  { %7863 = vmatpush3.bf16.msra.mxu1 %v7862_v5  ;;  %v3329_v5 = vld [vmem:[#allocation3 + $0x3b0] sm:$0xff]  ;;  %v3522_v42 = vld [vmem:[#allocation3 + $0x4a0] sm:$0xff] }
 0x2c9   :  { %7885 = vmatpush3.bf16.msk.msra.mxu0 %vm11470_vm6, %v7883_v19  ;;  %7918 = vmatprep.subr.bf16.mxu1 %v8653_v7  ;;  %v3330_v19 = vld [vmem:[#allocation3 + $0x3b8] sm:$0xff] }
 0x2ca   :  { %7887 = vmatprep.subr.bf16.mxu0 %v7886_v1  ;;  %v3345_v1 = vld [vmem:[#allocation3 + $0x430] sm:$0xff]  ;;  %v7906_v26 = vpack.c.bf16 %v3330_v19, %v3329_v5  ;;  %v3299_v5 = vsel %vm2885_vm5, %v3287_v54, %v3293_v55 }
 0x2cb   :  { %3212 = vmatmul.mubr.f32.vlgmr.msra.gmra.mrb[26].mxu1 %v2886_v12  ;;  %v3332_v12 = vld [vmem:[#allocation3 + $0x3c8] sm:$0xff]  ;;  %v7934_v14 = vpack.c.bf16 %v3346_v8, %v3345_v1  ;;  %v7948_v1 = vpack.c.bf16 %v3533_v0, %v3532_v62  ;;  %v3546_v8 = vld [vmem:[#allocation3 + $0x560] sm:$0xff]  ;;  %v3524_v54 = vld [vmem:[#allocation3 + $0x4b0] sm:$0xff] }
 0x2cc   :  { %7222 = vmatmul.mubr.msk.f32.vlgmr.msra.gmra.mrb[26].mxu0 %vm2994_vm7, %v2888_v17  ;;  %7920 = vmatpush3.bf16.msra.mxu1 %v7919_v16  ;;  %v3347_v16 = vld [vmem:[#allocation3 + $0x440] sm:$0xff]  ;;  %v3348_v17 = vld [vmem:[#allocation3 + $0x448] sm:$0x1] }
 0x2cd   :  { %7889 = vmatpush3.bf16.msra.mxu0 %v7888_v18  ;;  %7921 = vmatprep.subr.bf16.mxu1 %v8653_v7  ;;  %v7910_v18 = vpack.c.bf16 %v3332_v12, %v3331_v11  ;;  %v3535_v11 = vld [vmem:[#allocation3 + $0x508] sm:$0xff] }
 0x2ce   :  { %7891 = vmatprep.subr.bf16.mxu0 %v7890_v23  ;;  %7252 = vmatprep.mubr.msk.f32.mxu1 %vm8654_vm4, %v8650_v43  ;;  %v3316_v23 = vld [vmem:[#allocation3 + $0x348] sm:$0xff] }
 0x2cf   :  { %3419 = vmatprep.mubr.f32.mxu0 %v3300_v29  ;;  %v3295_v29 = vrot.slane %v11443_v60, 1 }
 0x2d0   :  { %7923 = vmatpush3.bf16.msra.mxu1 %v7922_v33  ;;  %v7937_v33 = vpack.c.bf16 %v3348_v17, %v3347_v16  ;;  %v7952_v16 = vpack.c.bf16 %v3535_v11, %v3534_v22  ;;  %v3519_v17 = vld [vmem:[#allocation3 + $0x488] sm:$0xff] }
 0x2d1   :  { %7893 = vmatpush3.bf16.msra.mxu0 %v7892_v35  ;;  %7924 = vmatprep.subr.bf16.mxu1 %v8653_v7  ;;  %v7912_v35 = vpack.c.bf16 %v3316_v23, %v3315_v21  ;;  %v3549_v21 = vld [vmem:[#allocation3 + $0x578] sm:$0xff]  ;;  %v3536_v23 = vld [vmem:[#allocation3 + $0x510] sm:$0xff] }
 0x2d2   :  { %7895 = vmatprep.subr.bf16.mxu0 %v7894_v37  ;;  %v7940_v37 = vpack.c.bf16 %v3529_v28, %v3528_v25  ;;  %v3537_v25 = vld [vmem:[#allocation3 + $0x518] sm:$0xff] }
 0x2d4   :  { %7926 = vmatpush3.bf16.msra.mxu1 %v7925_v46  ;;  %v3531_v46 = vld [vmem:[#allocation3 + $0x4e8] sm:$0xff] }
 0x2d5   :  { %7897 = vmatpush3.bf16.msra.mxu0 %v7896_v49  ;;  %7927 = vmatprep.subr.bf16.mxu1 %v8653_v7  ;;  %v3301_v49 = vsel %vm2885_vm5, %v3289_v32, %v3295_v29  ;;  %v7956_v32 = vpack.c.bf16 %v3537_v25, %v3536_v23  ;;  %v3521_v29 = vld [vmem:[#allocation3 + $0x498] sm:$0xff]  ;;  %v3739_v23 = vld [vmem:[#allocation3 + $0x650] sm:$0xff] }
 0x2d6   :  { %7899 = vmatprep.subr.bf16.mxu0 %v7898_v51  ;;  %v3503_v51 = vrot.slane %v11437_v57, 2  ;;  %v3740_v25 = vld [vmem:[#allocation3 + $0x658] sm:$0xff] }
 0x2d8   :  { %7929 = vmatpush3.bf16.msra.mxu1 %v7928_v47  ;;  %v7944_v47 = vpack.c.bf16 %v3531_v46, %v3530_v45  ;;  %v3509_v2 = vsel %vm2885_vm5, %v3497_v48, %v3503_v51  ;;  %v3523_v45 = vld [vmem:[#allocation3 + $0x4a8] sm:$0xff]  ;;  %v3552_v46 = vld [vmem:[#allocation3 + $0x590] sm:$0xff]  ;;  %v3541_v51 = vld [vmem:[#allocation3 + $0x538] sm:$0xff] }
 0x2d9   :  { %7901 = vmatpush3.bf16.msra.mxu0 %v7900_v58  ;;  %7930 = vmatprep.subr.bf16.mxu1 %v8653_v7  ;;  %v3515_v58 = vld [vmem:[#allocation3 + $0x468] sm:$0xff]  ;;  %v3540_v48 = vld [vmem:[#allocation3 + $0x530] sm:$0xff] }
 0x2da   :  { %7903 = vmatprep.subr.bf16.mxu0 %v7902_v61  ;;  %v3545_v61 = vld [vmem:[#allocation3 + $0x558] sm:$0xff]  ;;  %v7946_v19 = vpack.c.bf16 %v3515_v58, %v3514_v56  ;;  %v7964_v55 = vpack.c.bf16 %v3541_v51, %v3540_v48  ;;  %v3555_v58 = vld [vmem:[#allocation3 + $0x5a8] sm:$0xff]  ;;  %v3757_v48 = vld [vmem:[#allocation3 + $0x6e0] sm:$0xff] }
 0x2db   :  { %v3525_v56 = vld [vmem:[#allocation3 + $0x4b8] sm:$0xff] }
 0x2dc   :  { %7932 = vmatpush3.bf16.msra.mxu1 %v7931_v20  ;;  %v7973_v20 = vpack.c.bf16 %v3545_v61, %v3544_v53  ;;  %v3542_v53 = vld [vmem:[#allocation3 + $0x540] sm:$0xff]  ;;  %v3543_v61 = vld [vmem:[#allocation3 + $0x548] sm:$0xff]  ;;  %v7966_v62 = vpack.c.bf16 %v3525_v56, %v3524_v54  ;;  %v3744_v56 = vld [vmem:[#allocation3 + $0x678] sm:$0xff] }
 0x2dd   :  { %7905 = vmatpush3.bf16.msra.mxu0 %v7904_v24  ;;  %7933 = vmatprep.subr.bf16.mxu1 %v8653_v7  ;;  %v3516_v24 = vld [vmem:[#allocation3 + $0x470] sm:$0xff]  ;;  %v3726_v54 = vld [vmem:[#allocation3 + $0x5e8] sm:$0xff] }
 0x2de   :  { %7907 = vmatprep.subr.bf16.mxu0 %v7906_v26  ;;  %v3517_v26 = vld [vmem:[#allocation3 + $0x478] sm:$0xff] }
 0x2df   :  { %v7950_v12 = vpack.c.bf16 %v3517_v26, %v3516_v24  ;;  %v3557_v24 = vld [vmem:[#allocation3 + $0x5b8] sm:$0x1]  ;;  %v3738_v26 = vld [vmem:[#allocation3 + $0x648] sm:$0xff] }
 0x2e0   :  { %7935 = vmatpush3.bf16.msra.mxu1 %v7934_v14  ;;  %v7976_v14 = vpack.c.bf16 %v3547_v9, %v3546_v8  ;;  %v3496_v8 = vrot.slane %v11411_v10, 3  ;;  %v3502_v9 = vrot.slane %v11440_v59, 2 }
 0x2e1   :  { %7909 = vmatpush3.bf16.msra.mxu0 %v7908_v15  ;;  %7936 = vmatprep.subr.bf16.mxu1 %v8653_v7  ;;  %v3518_v15 = vld [vmem:[#allocation3 + $0x480] sm:$0xff] }
 0x2e2   :  { %7911 = vmatprep.subr.bf16.mxu0 %v7910_v18  ;;  %v3548_v18 = vld [vmem:[#allocation3 + $0x570] sm:$0xff]  ;;  %v7954_v28 = vpack.c.bf16 %v3519_v17, %v3518_v15  ;;  %v3504_v15 = vrot.slane %v11443_v60, 2  ;;  %v3754_v17 = vld [vmem:[#allocation3 + $0x6c8] sm:$0xff] }
 0x2e3   :  { %v7979_v30 = vpack.c.bf16 %v3549_v21, %v3548_v18  ;;  %v3721_v18 = vld [vmem:[#allocation3 + $0x5c0] sm:$0xff]  ;;  %v3722_v21 = vld [vmem:[#allocation3 + $0x5c8] sm:$0xff] }
 0x2e4   :  { %7939 = vmatpush3.bf16.msk.msra.mxu1 %vm11470_vm6, %v7937_v33  ;;  %v3550_v33 = vld [vmem:[#allocation3 + $0x580] sm:$0xff] }
 0x2e5   :  { %7913 = vmatpush3.bf16.msra.mxu0 %v7912_v35  ;;  %7941 = vmatprep.subr.bf16.mxu1 %v7940_v37  ;;  %v3551_v35 = vld [vmem:[#allocation3 + $0x588] sm:$0xff] }
 0x2e6   :  { %7915 = vmatprep.subr.bf16.mxu0 %v7914_v39  ;;  %v3539_v37 = vld [vmem:[#allocation3 + $0x528] sm:$0xff]  ;;  %v7958_v39 = vpack.c.bf16 %v3521_v29, %v3520_v31  ;;  %v7982_v40 = vpack.c.bf16 %v3551_v35, %v3550_v33  ;;  %v3712_v31 = vrot.slane %v11437_v57, 3  ;;  %v7996_v33 = vpack.c.bf16 %v3722_v21, %v3721_v18  ;;  %v3755_v35 = vld [vmem:[#allocation3 + $0x6d0] sm:$0xff]  ;;  %v3764_v18 = vld [vmem:[#allocation3 + $0x718] sm:$0xff] }
 0x2e7   :  { %7253 = vmatmul.mubr.msk.f32.vlgmr.msra.gmra.mrb[28].mxu1 %vm2994_vm7, %v3301_v49  ;;  %v7960_v44 = vpack.c.bf16 %v3539_v37, %v3538_v36  ;;  %v3553_v49 = vld [vmem:[#allocation3 + $0x598] sm:$0xff]  ;;  %v7998_v36 = vpack.c.bf16 %v3740_v25, %v3739_v23  ;;  %v3731_v21 = vld [vmem:[#allocation3 + $0x610] sm:$0xff]  ;;  %v3749_v25 = vld [vmem:[#allocation3 + $0x6a0] sm:$0xff] }
 0x2e8   :  { %7943 = vmatpush3.bf16.msra.mxu1 %v7942_v52  ;;  %3628 = vmatprep.mubr.f32.mxu1 %v3509_v2  ;;  %v7962_v52 = vpack.c.bf16 %v3523_v45, %v3522_v42  ;;  %v3526_v2 = vld [vmem:[#allocation3 + $0x4c0] sm:$0xff]  ;;  %v3756_v37 = vld [vmem:[#allocation3 + $0x6d8] sm:$0xff] }
 0x2e9   :  { %7917 = vmatpush3.bf16.msra.mxu0 %v7916_v41  ;;  %7945 = vmatprep.subr.bf16.mxu1 %v7944_v47  ;;  %v7985_v41 = vpack.c.bf16 %v3553_v49, %v3552_v46  ;;  %v3554_v47 = vld [vmem:[#allocation3 + $0x5a0] sm:$0xff]  ;;  %v8030_v46 = vpack.c.bf16 %v3756_v37, %v3755_v35  ;;  %v3732_v23 = vld [vmem:[#allocation3 + $0x618] sm:$0xff]  ;;  %v3946_v37 = vld [vmem:[#allocation3 + $0x7b0] sm:$0xff] }
 0x2ea   :  { %7972 = vmatprep.subr.bf16.mxu0 %v8653_v7  ;;  %v7988_v0 = vpack.c.bf16 %v3555_v58, %v3554_v47  ;;  %v3741_v42 = vld [vmem:[#allocation3 + $0x660] sm:$0xff] }
 0x2eb   :  { %v3733_v35 = vld [vmem:[#allocation3 + $0x620] sm:$0xff] }
 0x2ec   :  { %3420 = vmatmul.mubr.f32.vlgmr.msra.gmra.mrb[28].mxu0 %v3299_v5  ;;  %7947 = vmatpush3.bf16.msra.mxu1 %v7946_v19  ;;  %v7968_v5 = vpack.c.bf16 %v3543_v61, %v3542_v53  ;;  %v3527_v19 = vld [vmem:[#allocation3 + $0x4c8] sm:$0xff]  ;;  %v3759_v53 = vld [vmem:[#allocation3 + $0x6f0] sm:$0xff] }
 0x2ed   :  { %7974 = vmatpush3.bf16.msra.mxu0 %v7973_v20  ;;  %7949 = vmatprep.subr.bf16.mxu1 %v7948_v1  ;;  %v3556_v20 = vld [vmem:[#allocation3 + $0x5b0] sm:$0xff]  ;;  %v3737_v1 = vld [vmem:[#allocation3 + $0x640] sm:$0xff]  ;;  %v7970_v22 = vpack.c.bf16 %v3527_v19, %v3526_v2  ;;  %v3728_v2 = vld [vmem:[#allocation3 + $0x5f8] sm:$0xff] }
 0x2ee   :  { %7975 = vmatprep.subr.bf16.mxu0 %v8653_v7  ;;  %7283 = vmatprep.mubr.msk.f32.mxu0 %vm8654_vm4, %v8650_v43  ;;  %v7991_v11 = vpack.c.bf16 %v3557_v24, %v3556_v20  ;;  %v3746_v19 = vld [vmem:[#allocation3 + $0x688] sm:$0xff] }
 0x2f0   :  { %7951 = vmatpush3.bf16.msra.mxu1 %v7950_v12  ;;  %v3753_v12 = vld [vmem:[#allocation3 + $0x6c0] sm:$0xff] }
 0x2f1   :  { %7977 = vmatpush3.bf16.msra.mxu0 %v7976_v14  ;;  %7953 = vmatprep.subr.bf16.mxu1 %v7952_v16  ;;  %v3498_v14 = vrot.slane %v11434_v50, 3  ;;  %v7994_v16 = vpack.c.bf16 %v3738_v26, %v3737_v1  ;;  %v3761_v1 = vld [vmem:[#allocation3 + $0x700] sm:$0xff] }
 0x2f2   :  { %7978 = vmatprep.subr.bf16.mxu0 %v8653_v7 }
 0x2f3   :  { %v3510_v29 = vsel %vm2885_vm5, %v3498_v14, %v3504_v15 }
 0x2f4   :  { %7955 = vmatpush3.bf16.msra.mxu1 %v7954_v28  ;;  %v3508_v28 = vsel %vm2885_vm5, %v3496_v8, %v3502_v9  ;;  %v3762_v8 = vld [vmem:[#allocation3 + $0x708] sm:$0xff]  ;;  %v3729_v9 = vld [vmem:[#allocation3 + $0x600] sm:$0xff] }
 0x2f5   :  { %7980 = vmatpush3.bf16.msra.mxu0 %v7979_v30  ;;  %7957 = vmatprep.subr.bf16.mxu1 %v7956_v32  ;;  %v3706_v30 = vrot.slane %v11416_v13, 4  ;;  %v8027_v32 = vpack.c.bf16 %v3754_v17, %v3753_v12  ;;  %v3748_v12 = vld [vmem:[#allocation3 + $0x698] sm:$0xff]  ;;  %v8039_v14 = vpack.c.bf16 %v3762_v8, %v3761_v1  ;;  %v3962_v1 = vld [vmem:[#allocation3 + $0x830] sm:$0xff] }
 0x2f6   :  { %7981 = vmatprep.subr.bf16.mxu0 %v8653_v7  ;;  %v3950_v8 = vld [vmem:[#allocation3 + $0x7d0] sm:$0xff] }
 0x2f7   :  { %v3718_v45 = vsel %vm2885_vm5, %v3706_v30, %v3712_v31  ;;  %v8016_v31 = vpack.c.bf16 %v3732_v23, %v3731_v21  ;;  %v3965_v21 = vld [vmem:[#allocation3 + $0x848] sm:$0xff]  ;;  %v3952_v23 = vld [vmem:[#allocation3 + $0x7e0] sm:$0xff] }
 0x2f8   :  { %7959 = vmatpush3.bf16.msra.mxu1 %v7958_v39  ;;  %v3723_v39 = vld [vmem:[#allocation3 + $0x5d0] sm:$0xff] }
 0x2f9   :  { %7983 = vmatpush3.bf16.msra.mxu0 %v7982_v40  ;;  %7961 = vmatprep.subr.bf16.mxu1 %v7960_v44  ;;  %v3724_v40 = vld [vmem:[#allocation3 + $0x5d8] sm:$0xff]  ;;  %v3742_v44 = vld [vmem:[#allocation3 + $0x668] sm:$0xff] }
 0x2fa   :  { %7984 = vmatprep.subr.bf16.mxu0 %v8653_v7  ;;  %v8000_v49 = vpack.c.bf16 %v3724_v40, %v3723_v39  ;;  %v8002_v51 = vpack.c.bf16 %v3742_v44, %v3741_v42  ;;  %v3947_v39 = vld [vmem:[#allocation3 + $0x7b8] sm:$0xff]  ;;  %v3751_v40 = vld [vmem:[#allocation3 + $0x6b0] sm:$0xff]  ;;  %v3707_v44 = vrot.slane %v11434_v50, 4 }
 0x2fb   :  { %v3752_v42 = vld [vmem:[#allocation3 + $0x6b8] sm:$0xff] }
 0x2fc   :  { %7963 = vmatpush3.bf16.msra.mxu1 %v7962_v52  ;;  %v3758_v52 = vld [vmem:[#allocation3 + $0x6e8] sm:$0xff] }
 0x2fd   :  { %7986 = vmatpush3.bf16.msra.mxu0 %v7985_v41  ;;  %7965 = vmatprep.subr.bf16.mxu1 %v7964_v55  ;;  %v3725_v41 = vld [vmem:[#allocation3 + $0x5e0] sm:$0xff]  ;;  %v3743_v55 = vld [vmem:[#allocation3 + $0x670] sm:$0xff]  ;;  %v8033_v47 = vpack.c.bf16 %v3758_v52, %v3757_v48  ;;  %v8022_v52 = vpack.c.bf16 %v3752_v42, %v3751_v40 }
 0x2fe   :  { %7987 = vmatprep.subr.bf16.mxu0 %v8653_v7  ;;  %v8004_v58 = vpack.c.bf16 %v3726_v54, %v3725_v41  ;;  %v8006_v61 = vpack.c.bf16 %v3744_v56, %v3743_v55  ;;  %v3930_v48 = vld [vmem:[#allocation3 + $0x730] sm:$0xff]  ;;  %v3931_v41 = vld [vmem:[#allocation3 + $0x738] sm:$0xff]  ;;  %v3948_v56 = vld [vmem:[#allocation3 + $0x7c0] sm:$0xff] }
 0x2ff   :  { %v3735_v54 = vld [vmem:[#allocation3 + $0x630] sm:$0xff]  ;;  %v3736_v55 = vld [vmem:[#allocation3 + $0x638] sm:$0xff] }
 0x300   :  { %7967 = vmatpush3.bf16.msra.mxu1 %v7966_v62  ;;  %v3760_v62 = vld [vmem:[#allocation3 + $0x6f8] sm:$0xff]  ;;  %v3938_v42 = vld [vmem:[#allocation3 + $0x770] sm:$0xff] }
 0x301   :  { %7989 = vmatpush3.bf16.msra.mxu0 %v7988_v0  ;;  %7969 = vmatprep.subr.bf16.mxu1 %v7968_v5  ;;  %v3727_v0 = vld [vmem:[#allocation3 + $0x5f0] sm:$0xff]  ;;  %v3745_v5 = vld [vmem:[#allocation3 + $0x680] sm:$0xff]  ;;  %v8036_v20 = vpack.c.bf16 %v3760_v62, %v3759_v53  ;;  %v3915_v53 = vrot.slane %v11416_v13, 5  ;;  %v8050_v62 = vpack.c.bf16 %v3931_v41, %v3930_v48 }
 0x302   :  { %7990 = vmatprep.subr.bf16.mxu0 %v8653_v7  ;;  %v8008_v24 = vpack.c.bf16 %v3728_v2, %v3727_v0  ;;  %v8010_v26 = vpack.c.bf16 %v3746_v19, %v3745_v5  ;;  %v8024_v0 = vpack.c.bf16 %v3736_v55, %v3735_v54  ;;  %v3705_v2 = vrot.slane %v11411_v10, 4  ;;  %v3932_v19 = vld [vmem:[#allocation3 + $0x740] sm:$0xff] }
 0x303   :  { %v3711_v5 = vrot.slane %v11440_v59, 3  ;;  %v3956_v48 = vld [vmem:[#allocation3 + $0x800] sm:$0xff] }
 0x304   :  { %7971 = vmatpush3.bf16.msra.mxu1 %v7970_v22  ;;  %v3730_v22 = vld [vmem:[#allocation3 + $0x608] sm:$0xff]  ;;  %v3940_v54 = vld [vmem:[#allocation3 + $0x780] sm:$0xff] }
 0x305   :  { %7993 = vmatpush3.bf16.msk.msra.mxu0 %vm11470_vm6, %v7991_v11  ;;  %8026 = vmatprep.subr.bf16.mxu1 %v8653_v7  ;;  %v3747_v11 = vld [vmem:[#allocation3 + $0x690] sm:$0xff]  ;;  %v8012_v15 = vpack.c.bf16 %v3730_v22, %v3729_v9  ;;  %v3951_v9 = vld [vmem:[#allocation3 + $0x7d8] sm:$0xff] }
 0x306   :  { %7995 = vmatprep.subr.bf16.mxu0 %v7994_v16  ;;  %v3763_v16 = vld [vmem:[#allocation3 + $0x710] sm:$0xff]  ;;  %v8014_v17 = vpack.c.bf16 %v3748_v12, %v3747_v11  ;;  %v3717_v11 = vsel %vm2885_vm5, %v3705_v2, %v3711_v5 }
 0x307   :  { %3629 = vmatmul.mubr.f32.vlgmr.msra.gmra.mrb[30].mxu1 %v3508_v28  ;;  %v3750_v28 = vld [vmem:[#allocation3 + $0x6a8] sm:$0xff]  ;;  %v8042_v30 = vpack.c.bf16 %v3764_v18, %v3763_v16  ;;  %v8056_v16 = vpack.c.bf16 %v3951_v9, %v3950_v8  ;;  %v3964_v18 = vld [vmem:[#allocation3 + $0x840] sm:$0xff]  ;;  %v3942_v2 = vld [vmem:[#allocation3 + $0x790] sm:$0xff] }
 0x308   :  { %7284 = vmatmul.mubr.msk.f32.vlgmr.msra.gmra.mrb[30].mxu0 %vm2994_vm7, %v3510_v29  ;;  %8028 = vmatpush3.bf16.msra.mxu1 %v8027_v32  ;;  %v3765_v32 = vld [vmem:[#allocation3 + $0x720] sm:$0xff]  ;;  %v3766_v29 = vld [vmem:[#allocation3 + $0x728] sm:$0x1] }
 0x309   :  { %7997 = vmatpush3.bf16.msra.mxu0 %v7996_v33  ;;  %8029 = vmatprep.subr.bf16.mxu1 %v8653_v7  ;;  %v8018_v33 = vpack.c.bf16 %v3750_v28, %v3749_v25  ;;  %v3953_v25 = vld [vmem:[#allocation3 + $0x7e8] sm:$0xff] }
 0x30a   :  { %7999 = vmatprep.subr.bf16.mxu0 %v7998_v36  ;;  %7314 = vmatprep.mubr.msk.f32.mxu1 %vm8654_vm4, %v8650_v43  ;;  %v3734_v36 = vld [vmem:[#allocation3 + $0x628] sm:$0xff] }
 0x30b   :  { %3837 = vmatprep.mubr.f32.mxu0 %v3718_v45  ;;  %v3713_v45 = vrot.slane %v11443_v60, 3 }
 0x30c   :  { %8031 = vmatpush3.bf16.msra.mxu1 %v8030_v46  ;;  %v8045_v46 = vpack.c.bf16 %v3766_v29, %v3765_v32  ;;  %v8060_v32 = vpack.c.bf16 %v3953_v25, %v3952_v23  ;;  %v3937_v29 = vld [vmem:[#allocation3 + $0x768] sm:$0xff] }
 0x30d   :  { %8001 = vmatpush3.bf16.msra.mxu0 %v8000_v49  ;;  %8032 = vmatprep.subr.bf16.mxu1 %v8653_v7  ;;  %v8020_v49 = vpack.c.bf16 %v3734_v36, %v3733_v35  ;;  %v3967_v35 = vld [vmem:[#allocation3 + $0x858] sm:$0xff]  ;;  %v3954_v36 = vld [vmem:[#allocation3 + $0x7f0] sm:$0xff] }
 0x30e   :  { %8003 = vmatprep.subr.bf16.mxu0 %v8002_v51  ;;  %v8048_v51 = vpack.c.bf16 %v3947_v39, %v3946_v37  ;;  %v3955_v37 = vld [vmem:[#allocation3 + $0x7f8] sm:$0xff] }
 0x310   :  { %8034 = vmatpush3.bf16.msra.mxu1 %v8033_v47  ;;  %v3949_v47 = vld [vmem:[#allocation3 + $0x7c8] sm:$0xff] }
 0x311   :  { %8005 = vmatpush3.bf16.msra.mxu0 %v8004_v58  ;;  %8035 = vmatprep.subr.bf16.mxu1 %v8653_v7  ;;  %v3719_v58 = vsel %vm2885_vm5, %v3707_v44, %v3713_v45  ;;  %v8064_v44 = vpack.c.bf16 %v3955_v37, %v3954_v36  ;;  %v3939_v45 = vld [vmem:[#allocation3 + $0x778] sm:$0xff]  ;;  %v4157_v36 = vld [vmem:[#allocation3 + $0x930] sm:$0xff] }
 0x312   :  { %8007 = vmatprep.subr.bf16.mxu0 %v8006_v61  ;;  %v3921_v61 = vrot.slane %v11437_v57, 4  ;;  %v4158_v37 = vld [vmem:[#allocation3 + $0x938] sm:$0xff] }
 0x314   :  { %8037 = vmatpush3.bf16.msra.mxu1 %v8036_v20  ;;  %v8052_v20 = vpack.c.bf16 %v3949_v47, %v3948_v56  ;;  %v3927_v22 = vsel %vm2885_vm5, %v3915_v53, %v3921_v61  ;;  %v3941_v56 = vld [vmem:[#allocation3 + $0x788] sm:$0xff]  ;;  %v3970_v47 = vld [vmem:[#allocation3 + $0x870] sm:$0xff]  ;;  %v3959_v61 = vld [vmem:[#allocation3 + $0x818] sm:$0xff] }
 0x315   :  { %8009 = vmatpush3.bf16.msra.mxu0 %v8008_v24  ;;  %8038 = vmatprep.subr.bf16.mxu1 %v8653_v7  ;;  %v3933_v24 = vld [vmem:[#allocation3 + $0x748] sm:$0xff]  ;;  %v3958_v53 = vld [vmem:[#allocation3 + $0x810] sm:$0xff] }
 0x316   :  { %8011 = vmatprep.subr.bf16.mxu0 %v8010_v26  ;;  %v3963_v26 = vld [vmem:[#allocation3 + $0x838] sm:$0xff]  ;;  %v8054_v12 = vpack.c.bf16 %v3933_v24, %v3932_v19  ;;  %v8072_v5 = vpack.c.bf16 %v3959_v61, %v3958_v53  ;;  %v3973_v24 = vld [vmem:[#allocation3 + $0x888] sm:$0xff]  ;;  %v4175_v53 = vld [vmem:[#allocation3 + $0x9c0] sm:$0xff] }
 0x317   :  { %v3943_v19 = vld [vmem:[#allocation3 + $0x798] sm:$0xff] }
 0x318   :  { %8040 = vmatpush3.bf16.msra.mxu1 %v8039_v14  ;;  %v8081_v14 = vpack.c.bf16 %v3963_v26, %v3962_v1  ;;  %v3960_v1 = vld [vmem:[#allocation3 + $0x820] sm:$0xff]  ;;  %v3961_v26 = vld [vmem:[#allocation3 + $0x828] sm:$0xff]  ;;  %v8074_v8 = vpack.c.bf16 %v3943_v19, %v3942_v2  ;;  %v4162_v19 = vld [vmem:[#allocation3 + $0x958] sm:$0xff] }
 0x319   :  { %8013 = vmatpush3.bf16.msra.mxu0 %v8012_v15  ;;  %8041 = vmatprep.subr.bf16.mxu1 %v8653_v7  ;;  %v3934_v15 = vld [vmem:[#allocation3 + $0x750] sm:$0xff]  ;;  %v4144_v2 = vld [vmem:[#allocation3 + $0x8c8] sm:$0xff] }
 0x31a   :  { %8015 = vmatprep.subr.bf16.mxu0 %v8014_v17  ;;  %v3935_v17 = vld [vmem:[#allocation3 + $0x758] sm:$0xff] }
 0x31b   :  { %v8058_v28 = vpack.c.bf16 %v3935_v17, %v3934_v15  ;;  %v3975_v15 = vld [vmem:[#allocation3 + $0x898] sm:$0x1]  ;;  %v4156_v17 = vld [vmem:[#allocation3 + $0x928] sm:$0xff] }
 0x31c   :  { %8043 = vmatpush3.bf16.msra.mxu1 %v8042_v30  ;;  %v8084_v30 = vpack.c.bf16 %v3965_v21, %v3964_v18  ;;  %v3914_v18 = vrot.slane %v11411_v10, 5  ;;  %v3920_v21 = vrot.slane %v11440_v59, 4 }
 0x31d   :  { %8017 = vmatpush3.bf16.msra.mxu0 %v8016_v31  ;;  %8044 = vmatprep.subr.bf16.mxu1 %v8653_v7  ;;  %v3936_v31 = vld [vmem:[#allocation3 + $0x760] sm:$0xff] }
 0x31e   :  { %8019 = vmatprep.subr.bf16.mxu0 %v8018_v33  ;;  %v3966_v33 = vld [vmem:[#allocation3 + $0x850] sm:$0xff]  ;;  %v8062_v39 = vpack.c.bf16 %v3937_v29, %v3936_v31  ;;  %v3922_v31 = vrot.slane %v11443_v60, 4  ;;  %v4172_v29 = vld [vmem:[#allocation3 + $0x9a8] sm:$0xff] }
 0x31f   :  { %v8087_v40 = vpack.c.bf16 %v3967_v35, %v3966_v33  ;;  %v4139_v33 = vld [vmem:[#allocation3 + $0x8a0] sm:$0xff]  ;;  %v4140_v35 = vld [vmem:[#allocation3 + $0x8a8] sm:$0xff] }
 0x320   :  { %8047 = vmatpush3.bf16.msk.msra.mxu1 %vm11470_vm6, %v8045_v46  ;;  %v3968_v46 = vld [vmem:[#allocation3 + $0x860] sm:$0xff] }
 0x321   :  { %8021 = vmatpush3.bf16.msra.mxu0 %v8020_v49  ;;  %8049 = vmatprep.subr.bf16.mxu1 %v8048_v51  ;;  %v3969_v49 = vld [vmem:[#allocation3 + $0x868] sm:$0xff] }
 0x322   :  { %8023 = vmatprep.subr.bf16.mxu0 %v8022_v52  ;;  %v3957_v51 = vld [vmem:[#allocation3 + $0x808] sm:$0xff]  ;;  %v8066_v52 = vpack.c.bf16 %v3939_v45, %v3938_v42  ;;  %v8090_v41 = vpack.c.bf16 %v3969_v49, %v3968_v46  ;;  %v4130_v42 = vrot.slane %v11437_v57, 5  ;;  %v8104_v46 = vpack.c.bf16 %v4140_v35, %v4139_v33  ;;  %v4173_v49 = vld [vmem:[#allocation3 + $0x9b0] sm:$0xff]  ;;  %v4182_v33 = vld [vmem:[#allocation3 + $0x9f8] sm:$0xff] }
 0x323   :  { %7315 = vmatmul.mubr.msk.f32.vlgmr.msra.gmra.mrb[32].mxu1 %vm2994_vm7, %v3719_v58  ;;  %v8068_v55 = vpack.c.bf16 %v3957_v51, %v3956_v48  ;;  %v3971_v58 = vld [vmem:[#allocation3 + $0x878] sm:$0xff]  ;;  %v8106_v48 = vpack.c.bf16 %v4158_v37, %v4157_v36  ;;  %v4149_v35 = vld [vmem:[#allocation3 + $0x8f0] sm:$0xff]  ;;  %v4167_v37 = vld [vmem:[#allocation3 + $0x980] sm:$0xff] }
 0x324   :  { %8051 = vmatpush3.bf16.msra.mxu1 %v8050_v62  ;;  %4046 = vmatprep.mubr.f32.mxu1 %v3927_v22  ;;  %v8070_v62 = vpack.c.bf16 %v3941_v56, %v3940_v54  ;;  %v3944_v22 = vld [vmem:[#allocation3 + $0x7a0] sm:$0xff]  ;;  %v4174_v51 = vld [vmem:[#allocation3 + $0x9b8] sm:$0xff] }
 0x325   :  { %8025 = vmatpush3.bf16.msra.mxu0 %v8024_v0  ;;  %8053 = vmatprep.subr.bf16.mxu1 %v8052_v20  ;;  %v8093_v0 = vpack.c.bf16 %v3971_v58, %v3970_v47  ;;  %v3972_v20 = vld [vmem:[#allocation3 + $0x880] sm:$0xff]  ;;  %v8138_v47 = vpack.c.bf16 %v4174_v51, %v4173_v49  ;;  %v4150_v36 = vld [vmem:[#allocation3 + $0x8f8] sm:$0xff]  ;;  %v4364_v51 = vld [vmem:[#allocation3 + $0xa90] sm:$0xff] }
 0x326   :  { %8080 = vmatprep.subr.bf16.mxu0 %v8653_v7  ;;  %v8096_v9 = vpack.c.bf16 %v3973_v24, %v3972_v20  ;;  %v4159_v54 = vld [vmem:[#allocation3 + $0x940] sm:$0xff] }
 0x327   :  { %v4151_v49 = vld [vmem:[#allocation3 + $0x900] sm:$0xff] }
 0x328   :  { %3838 = vmatmul.mubr.f32.vlgmr.msra.gmra.mrb[32].mxu0 %v3717_v11  ;;  %8055 = vmatpush3.bf16.msra.mxu1 %v8054_v12  ;;  %v8076_v11 = vpack.c.bf16 %v3961_v26, %v3960_v1  ;;  %v3945_v12 = vld [vmem:[#allocation3 + $0x7a8] sm:$0xff]  ;;  %v4177_v1 = vld [vmem:[#allocation3 + $0x9d0] sm:$0xff] }
 0x329   :  { %8082 = vmatpush3.bf16.msra.mxu0 %v8081_v14  ;;  %8057 = vmatprep.subr.bf16.mxu1 %v8056_v16  ;;  %v3974_v14 = vld [vmem:[#allocation3 + $0x890] sm:$0xff]  ;;  %v4155_v16 = vld [vmem:[#allocation3 + $0x920] sm:$0xff]  ;;  %v8078_v23 = vpack.c.bf16 %v3945_v12, %v3944_v22  ;;  %v4146_v22 = vld [vmem:[#allocation3 + $0x8d8] sm:$0xff] }
 0x32a   :  { %8083 = vmatprep.subr.bf16.mxu0 %v8653_v7  ;;  %7345 = vmatprep.mubr.msk.f32.mxu0 %vm8654_vm4, %v8650_v43  ;;  %v8099_v25 = vpack.c.bf16 %v3975_v15, %v3974_v14  ;;  %v4164_v12 = vld [vmem:[#allocation3 + $0x968] sm:$0xff] }
 0x32c   :  { %8059 = vmatpush3.bf16.msra.mxu1 %v8058_v28  ;;  %v4171_v28 = vld [vmem:[#allocation3 + $0x9a0] sm:$0xff] }
 0x32d   :  { %8085 = vmatpush3.bf16.msra.mxu0 %v8084_v30  ;;  %8061 = vmatprep.subr.bf16.mxu1 %v8060_v32  ;;  %v3916_v30 = vrot.slane %v11434_v50, 5  ;;  %v8102_v32 = vpack.c.bf16 %v4156_v17, %v4155_v16  ;;  %v4179_v16 = vld [vmem:[#allocation3 + $0x9e0] sm:$0xff] }
 0x32e   :  { %8086 = vmatprep.subr.bf16.mxu0 %v8653_v7 }
 0x32f   :  { %v3928_v45 = vsel %vm2885_vm5, %v3916_v30, %v3922_v31 }
 0x330   :  { %8063 = vmatpush3.bf16.msra.mxu1 %v8062_v39  ;;  %v3926_v39 = vsel %vm2885_vm5, %v3914_v18, %v3920_v21  ;;  %v4180_v18 = vld [vmem:[#allocation3 + $0x9e8] sm:$0xff]  ;;  %v4147_v21 = vld [vmem:[#allocation3 + $0x8e0] sm:$0xff] }
 0x331   :  { %8088 = vmatpush3.bf16.msra.mxu0 %v8087_v40  ;;  %8065 = vmatprep.subr.bf16.mxu1 %v8064_v44  ;;  %v4124_v40 = vrot.slane %v11416_v13, 6  ;;  %v8135_v44 = vpack.c.bf16 %v4172_v29, %v4171_v28  ;;  %v4166_v28 = vld [vmem:[#allocation3 + $0x978] sm:$0xff]  ;;  %v8147_v30 = vpack.c.bf16 %v4180_v18, %v4179_v16  ;;  %v4380_v16 = vld [vmem:[#allocation3 + $0xb10] sm:$0xff] }
 0x332   :  { %8089 = vmatprep.subr.bf16.mxu0 %v8653_v7  ;;  %v4369_v18 = vld [vmem:[#allocation3 + $0xab8] sm:$0xff] }
 0x333   :  { %v4136_v56 = vsel %vm2885_vm5, %v4124_v40, %v4130_v42  ;;  %v8124_v42 = vpack.c.bf16 %v4150_v36, %v4149_v35  ;;  %v4371_v35 = vld [vmem:[#allocation3 + $0xac8] sm:$0xff] }
 0x334   :  { %8067 = vmatpush3.bf16.msra.mxu1 %v8066_v52  ;;  %v4141_v52 = vld [vmem:[#allocation3 + $0x8b0] sm:$0xff] }
 0x335   :  { %8091 = vmatpush3.bf16.msra.mxu0 %v8090_v41  ;;  %8069 = vmatprep.subr.bf16.mxu1 %v8068_v55  ;;  %v4142_v41 = vld [vmem:[#allocation3 + $0x8b8] sm:$0xff]  ;;  %v4160_v55 = vld [vmem:[#allocation3 + $0x948] sm:$0xff] }
 0x336   :  { %8092 = vmatprep.subr.bf16.mxu0 %v8653_v7  ;;  %v8108_v58 = vpack.c.bf16 %v4142_v41, %v4141_v52  ;;  %v8110_v61 = vpack.c.bf16 %v4160_v55, %v4159_v54  ;;  %v4365_v52 = vld [vmem:[#allocation3 + $0xa98] sm:$0xff]  ;;  %v4169_v41 = vld [vmem:[#allocation3 + $0x990] sm:$0xff]  ;;  %v4125_v55 = vrot.slane %v11434_v50, 6 }
 0x337   :  { %v4170_v54 = vld [vmem:[#allocation3 + $0x998] sm:$0xff] }
 0x338   :  { %8071 = vmatpush3.bf16.msra.mxu1 %v8070_v62  ;;  %v4176_v62 = vld [vmem:[#allocation3 + $0x9c8] sm:$0xff] }
 0x339   :  { %8094 = vmatpush3.bf16.msra.mxu0 %v8093_v0  ;;  %8073 = vmatprep.subr.bf16.mxu1 %v8072_v5  ;;  %v4143_v0 = vld [vmem:[#allocation3 + $0x8c0] sm:$0xff]  ;;  %v4161_v5 = vld [vmem:[#allocation3 + $0x950] sm:$0xff]  ;;  %v8141_v20 = vpack.c.bf16 %v4176_v62, %v4175_v53  ;;  %v8130_v62 = vpack.c.bf16 %v4170_v54, %v4169_v41  ;;  %v4357_v54 = vld [vmem:[#allocation3 + $0xa58] sm:$0xff] }
 0x33a   :  { %8095 = vmatprep.subr.bf16.mxu0 %v8653_v7  ;;  %v8112_v24 = vpack.c.bf16 %v4144_v2, %v4143_v0  ;;  %v8114_v26 = vpack.c.bf16 %v4162_v19, %v4161_v5  ;;  %v4348_v53 = vld [vmem:[#allocation3 + $0xa10] sm:$0xff]  ;;  %v4349_v0 = vld [vmem:[#allocation3 + $0xa18] sm:$0xff]  ;;  %v4366_v19 = vld [vmem:[#allocation3 + $0xaa0] sm:$0xff] }
 0x33b   :  { %v4153_v2 = vld [vmem:[#allocation3 + $0x910] sm:$0xff]  ;;  %v4154_v5 = vld [vmem:[#allocation3 + $0x918] sm:$0xff] }
 0x33c   :  { %8075 = vmatpush3.bf16.msra.mxu1 %v8074_v8  ;;  %v4178_v8 = vld [vmem:[#allocation3 + $0x9d8] sm:$0xff] }
 0x33d   :  { %8097 = vmatpush3.bf16.msra.mxu0 %v8096_v9  ;;  %8077 = vmatprep.subr.bf16.mxu1 %v8076_v11  ;;  %v4145_v9 = vld [vmem:[#allocation3 + $0x8d0] sm:$0xff]  ;;  %v4163_v11 = vld [vmem:[#allocation3 + $0x960] sm:$0xff]  ;;  %v8144_v14 = vpack.c.bf16 %v4178_v8, %v4177_v1  ;;  %v4333_v1 = vrot.slane %v11416_v13, 7  ;;  %v8158_v8 = vpack.c.bf16 %v4349_v0, %v4348_v53 }
 0x33e   :  { %8098 = vmatprep.subr.bf16.mxu0 %v8653_v7  ;;  %v8116_v15 = vpack.c.bf16 %v4146_v22, %v4145_v9  ;;  %v8118_v17 = vpack.c.bf16 %v4164_v12, %v4163_v11  ;;  %v8132_v9 = vpack.c.bf16 %v4154_v5, %v4153_v2  ;;  %v4123_v22 = vrot.slane %v11411_v10, 6  ;;  %v4350_v12 = vld [vmem:[#allocation3 + $0xa20] sm:$0xff]  ;;  %v4368_v13 = vld [vmem:[#allocation3 + $0xab0] sm:$0xff]  ;;  %v4359_v2 = vld [vmem:[#allocation3 + $0xa68] sm:$0xff] }
 0x33f   :  { %v4129_v11 = vrot.slane %v11440_v59, 5  ;;  %v4388_v5 = vld [vmem:[#allocation3 + $0xb50] sm:$0xff] }
 0x340   :  { %8079 = vmatpush3.bf16.msra.mxu1 %v8078_v23  ;;  %v4148_v23 = vld [vmem:[#allocation3 + $0x8e8] sm:$0xff] }
 0x341   :  { %8101 = vmatpush3.bf16.msk.msra.mxu0 %vm11470_vm6, %v8099_v25  ;;  %8134 = vmatprep.subr.bf16.mxu1 %v8653_v7  ;;  %v4165_v25 = vld [vmem:[#allocation3 + $0x970] sm:$0xff]  ;;  %v8120_v31 = vpack.c.bf16 %v4148_v23, %v4147_v21  ;;  %v4135_v21 = vsel %vm2885_vm5, %v4123_v22, %v4129_v11  ;;  %v4361_v22 = vld [vmem:[#allocation3 + $0xa78] sm:$0xff]  ;;  %v4390_v11 = vld [vmem:[#allocation3 + $0xb60] sm:$0xff] }
 0x342   :  { %8103 = vmatprep.subr.bf16.mxu0 %v8102_v32  ;;  %v4181_v32 = vld [vmem:[#allocation3 + $0x9f0] sm:$0xff]  ;;  %v8122_v29 = vpack.c.bf16 %v4166_v28, %v4165_v25 }
 0x343   :  { %4047 = vmatmul.mubr.f32.vlgmr.msra.gmra.mrb[34].mxu1 %v3926_v39  ;;  %v4168_v39 = vld [vmem:[#allocation3 + $0x988] sm:$0xff]  ;;  %v8150_v40 = vpack.c.bf16 %v4182_v33, %v4181_v32  ;;  %v4352_v28 = vld [vmem:[#allocation3 + $0xa30] sm:$0xff]  ;;  %v4382_v32 = vld [vmem:[#allocation3 + $0xb20] sm:$0xff] }
 0x344   :  { %7346 = vmatmul.mubr.msk.f32.vlgmr.msra.gmra.mrb[34].mxu0 %vm2994_vm7, %v3928_v45  ;;  %8136 = vmatpush3.bf16.msra.mxu1 %v8135_v44  ;;  %v4183_v44 = vld [vmem:[#allocation3 + $0xa00] sm:$0xff]  ;;  %v4184_v45 = vld [vmem:[#allocation3 + $0xa08] sm:$0x1] }
 0x345   :  { %8105 = vmatpush3.bf16.msra.mxu0 %v8104_v46  ;;  %8137 = vmatprep.subr.bf16.mxu1 %v8653_v7  ;;  %v8126_v46 = vpack.c.bf16 %v4168_v39, %v4167_v37  ;;  %v4370_v33 = vld [vmem:[#allocation3 + $0xac0] sm:$0xff] }
 0x346   :  { %8107 = vmatprep.subr.bf16.mxu0 %v8106_v48  ;;  %7376 = vmatprep.mubr.msk.f32.mxu1 %vm8654_vm4, %v8650_v43  ;;  %v4152_v48 = vld [vmem:[#allocation3 + $0x908] sm:$0xff]  ;;  %v4354_v39 = vld [vmem:[#allocation3 + $0xa40] sm:$0xff] }
 0x347   :  { %4255 = vmatprep.mubr.f32.mxu0 %v4136_v56  ;;  %v4131_v56 = vrot.slane %v11443_v60, 5 }
 0x348   :  { %8139 = vmatpush3.bf16.msra.mxu1 %v8138_v47  ;;  %v8153_v47 = vpack.c.bf16 %v4184_v45, %v4183_v44  ;;  %v4384_v44 = vld [vmem:[#allocation3 + $0xb30] sm:$0xff]  ;;  %v4385_v45 = vld [vmem:[#allocation3 + $0xb38] sm:$0xff] }
 0x349   :  { %8109 = vmatpush3.bf16.msra.mxu0 %v8108_v58  ;;  %8140 = vmatprep.subr.bf16.mxu1 %v8653_v7  ;;  %v8128_v58 = vpack.c.bf16 %v4152_v48, %v4151_v49  ;;  %v4373_v49 = vld [vmem:[#allocation3 + $0xad8] sm:$0xff] }
 0x34a   :  { %8111 = vmatprep.subr.bf16.mxu0 %v8110_v61  ;;  %v8156_v61 = vpack.c.bf16 %v4365_v52, %v4364_v51  ;;  %v8195_v51 = vpack.c.bf16 %v4385_v45, %v4384_v44  ;;  %v4356_v52 = vld [vmem:[#allocation3 + $0xa50] sm:$0xff]  ;;  %v4545_v45 = vrot.slane %v11449_v6, 7 }
 0x34b   :  { %v8174_v53 = vpack.c.bf16 %v4357_v54, %v4356_v52  ;;  %v4572_v44 = vld [vmem:[#allocation3 + $0xc10] sm:$0xff] }
 0x34c   :  { %8142 = vmatpush3.bf16.msra.mxu1 %v8141_v20  ;;  %v4367_v20 = vld [vmem:[#allocation3 + $0xaa8] sm:$0xff]  ;;  %v4556_v52 = vld [vmem:[#allocation3 + $0xb90] sm:$0xff] }
 0x34d   :  { %8113 = vmatpush3.bf16.msra.mxu0 %v8112_v24  ;;  %8143 = vmatprep.subr.bf16.mxu1 %v8653_v7  ;;  %v4137_v24 = vsel %vm2885_vm5, %v4125_v55, %v4131_v56  ;;  %v4386_v55 = vld [vmem:[#allocation3 + $0xb40] sm:$0xff]  ;;  %v4387_v56 = vld [vmem:[#allocation3 + $0xb48] sm:$0xff] }
 0x34e   :  { %8115 = vmatprep.subr.bf16.mxu0 %v8114_v26  ;;  %v4339_v26 = vrot.slane %v11437_v57, 6 }
 0x350   :  { %8145 = vmatpush3.bf16.msra.mxu1 %v8144_v14  ;;  %v8160_v14 = vpack.c.bf16 %v4367_v20, %v4366_v19  ;;  %v4345_v57 = vsel %vm2885_vm5, %v4333_v1, %v4339_v26  ;;  %v4389_v19 = vld [vmem:[#allocation3 + $0xb58] sm:$0xff]  ;;  %v4376_v20 = vld [vmem:[#allocation3 + $0xaf0] sm:$0xff] }
 0x351   :  { %8117 = vmatpush3.bf16.msra.mxu0 %v8116_v15  ;;  %8146 = vmatprep.subr.bf16.mxu1 %v8653_v7  ;;  %v4351_v15 = vld [vmem:[#allocation3 + $0xa28] sm:$0xff]  ;;  %v8201_v26 = vpack.c.bf16 %v4389_v19, %v4388_v5  ;;  %v4558_v5 = vld [vmem:[#allocation3 + $0xba0] sm:$0xff] }
 0x352   :  { %8119 = vmatprep.subr.bf16.mxu0 %v8118_v17  ;;  %v4381_v17 = vld [vmem:[#allocation3 + $0xb18] sm:$0xff]  ;;  %v8162_v23 = vpack.c.bf16 %v4351_v15, %v4350_v12  ;;  %v4391_v12 = vld [vmem:[#allocation3 + $0xb68] sm:$0xff] }
 0x353   :  { %v8189_v25 = vpack.c.bf16 %v4381_v17, %v4380_v16  ;;  %v4379_v15 = vld [vmem:[#allocation3 + $0xb08] sm:$0xff]  ;;  %v8204_v17 = vpack.c.bf16 %v4391_v12, %v4390_v11  ;;  %v4592_v11 = vld [vmem:[#allocation3 + $0xcb0] sm:$0xff] }
 0x354   :  { %8148 = vmatpush3.bf16.msra.mxu1 %v8147_v30  ;;  %v8164_v30 = vpack.c.bf16 %v4369_v18, %v4368_v13  ;;  %v4362_v13 = vld [vmem:[#allocation3 + $0xa80] sm:$0xff]  ;;  %v4559_v19 = vld [vmem:[#allocation3 + $0xba8] sm:$0xff] }
 0x355   :  { %8121 = vmatpush3.bf16.msra.mxu0 %v8120_v31  ;;  %8149 = vmatprep.subr.bf16.mxu1 %v8653_v7  ;;  %v4353_v31 = vld [vmem:[#allocation3 + $0xa38] sm:$0xff] }
 0x356   :  { %8123 = vmatprep.subr.bf16.mxu0 %v8122_v29  ;;  %v4383_v29 = vld [vmem:[#allocation3 + $0xb28] sm:$0xff]  ;;  %v8166_v36 = vpack.c.bf16 %v4353_v31, %v4352_v28  ;;  %v4338_v31 = vrot.slane %v11440_v59, 6 }
 0x357   :  { %v8192_v37 = vpack.c.bf16 %v4383_v29, %v4382_v32  ;;  %v4571_v28 = vld [vmem:[#allocation3 + $0xc08] sm:$0xff] }
 0x358   :  { %8151 = vmatpush3.bf16.msra.mxu1 %v8150_v40  ;;  %v8168_v40 = vpack.c.bf16 %v4371_v35, %v4370_v33  ;;  %v4586_v33 = vld [vmem:[#allocation3 + $0xc80] sm:$0xff]  ;;  %v4334_v35 = vrot.slane %v11434_v50, 7 }
 0x359   :  { %8125 = vmatpush3.bf16.msra.mxu0 %v8124_v42  ;;  %8152 = vmatprep.subr.bf16.mxu1 %v8653_v7  ;;  %v4355_v42 = vld [vmem:[#allocation3 + $0xa48] sm:$0xff] }
 0x35a   :  { %8127 = vmatprep.subr.bf16.mxu0 %v8126_v46  ;;  %v4372_v46 = vld [vmem:[#allocation3 + $0xad0] sm:$0xff]  ;;  %v8170_v48 = vpack.c.bf16 %v4355_v42, %v4354_v39  ;;  %v4587_v39 = vld [vmem:[#allocation3 + $0xc88] sm:$0xff] }
 0x35b   :  { %v8172_v41 = vpack.c.bf16 %v4373_v49, %v4372_v46  ;;  %v4555_v42 = vld [vmem:[#allocation3 + $0xb88] sm:$0xff]  ;;  %v8243_v50 = vpack.c.bf16 %v4587_v39, %v4586_v33  ;;  %v4588_v49 = vld [vmem:[#allocation3 + $0xc90] sm:$0xff]  ;;  %v4597_v39 = vld [vmem:[#allocation3 + $0xcd8] sm:$0xff] }
 0x35c   :  { %8155 = vmatpush3.bf16.msk.msra.mxu1 %vm11470_vm6, %v8153_v47  ;;  %v4374_v47 = vld [vmem:[#allocation3 + $0xae0] sm:$0xff] }
 0x35d   :  { %8129 = vmatpush3.bf16.msra.mxu0 %v8128_v58  ;;  %8157 = vmatprep.subr.bf16.mxu1 %v8156_v61  ;;  %v4375_v58 = vld [vmem:[#allocation3 + $0xae8] sm:$0xff]  ;;  %v8198_v61 = vpack.c.bf16 %v4387_v56, %v4386_v55  ;;  %v4574_v55 = vld [vmem:[#allocation3 + $0xc20] sm:$0xff] }
 0x35e   :  { %8131 = vmatprep.subr.bf16.mxu0 %v8130_v62  ;;  %v4358_v62 = vld [vmem:[#allocation3 + $0xa60] sm:$0xff]  ;;  %v8176_v0 = vpack.c.bf16 %v4375_v58, %v4374_v47  ;;  %v4575_v56 = vld [vmem:[#allocation3 + $0xc28] sm:$0xff]  ;;  %v4551_v58 = vsel %vm2885_vm5, %v11427_v38, %v4545_v45 }
 0x35f   :  { %7377 = vmatmul.mubr.msk.f32.vlgmr.msra.gmra.mrb[36].mxu1 %vm2994_vm7, %v4137_v24  ;;  %v4377_v24 = vld [vmem:[#allocation3 + $0xaf8] sm:$0xff]  ;;  %v8178_v1 = vpack.c.bf16 %v4359_v2, %v4358_v62  ;;  %v4590_v62 = vld [vmem:[#allocation3 + $0xca0] sm:$0xff]  ;;  %v4591_v2 = vld [vmem:[#allocation3 + $0xca8] sm:$0xff] }
 0x360   :  { %8159 = vmatpush3.bf16.msra.mxu1 %v8158_v8  ;;  %4464 = vmatprep.mubr.f32.mxu1 %v4345_v57  ;;  %v4360_v8 = vld [vmem:[#allocation3 + $0xa70] sm:$0xff]  ;;  %v4363_v57 = vld [vmem:[#allocation3 + $0xa88] sm:$0xff] }
 0x361   :  { %8133 = vmatpush3.bf16.msra.mxu0 %v8132_v9  ;;  %8161 = vmatprep.subr.bf16.mxu1 %v8160_v14  ;;  %v8180_v9 = vpack.c.bf16 %v4377_v24, %v4376_v20  ;;  %v4378_v14 = vld [vmem:[#allocation3 + $0xb00] sm:$0xff]  ;;  %v8182_v16 = vpack.c.bf16 %v4361_v22, %v4360_v8  ;;  %v8186_v32 = vpack.c.bf16 %v4363_v57, %v4362_v13  ;;  %v4576_v24 = vld [vmem:[#allocation3 + $0xc30] sm:$0xff] }
 0x362   :  { %8188 = vmatprep.subr.bf16.mxu0 %v8653_v7  ;;  %v8184_v18 = vpack.c.bf16 %v4379_v15, %v4378_v14  ;;  %v8220_v22 = vpack.c.bf16 %v4559_v19, %v4558_v5  ;;  %v4593_v14 = vld [vmem:[#allocation3 + $0xcb8] sm:$0xff]  ;;  %v4560_v15 = vld [vmem:[#allocation3 + $0xbb0] sm:$0xff]  ;;  %v4578_v13 = vld [vmem:[#allocation3 + $0xc40] sm:$0xff] }
 0x363   :  { %v8252_v57 = vpack.c.bf16 %v4593_v14, %v4592_v11  ;;  %v4778_v5 = vld [vmem:[#allocation3 + $0xd80] sm:$0xff]  ;;  %v4779_v19 = vld [vmem:[#allocation3 + $0xd88] sm:$0xff]  ;;  %v4793_v14 = vld [vmem:[#allocation3 + $0xdf8] sm:$0xff] }
 0x364   :  { %4256 = vmatmul.mubr.f32.vlgmr.msra.gmra.mrb[36].mxu0 %v4135_v21  ;;  %8163 = vmatpush3.bf16.msra.mxu1 %v8162_v23  ;;  %v4392_v21 = vld [vmem:[#allocation3 + $0xb70] sm:$0xff]  ;;  %v4393_v23 = vld [vmem:[#allocation3 + $0xb78] sm:$0x1]  ;;  %v4763_v11 = vld [vmem:[#allocation3 + $0xd08] sm:$0xff] }
 0x365   :  { %8190 = vmatpush3.bf16.msra.mxu0 %v8189_v25  ;;  %8165 = vmatprep.subr.bf16.mxu1 %v8164_v30  ;;  %v4570_v25 = vld [vmem:[#allocation3 + $0xc00] sm:$0xff]  ;;  %v4332_v30 = vrot.slane %v11411_v10, 7  ;;  %v8207_v29 = vpack.c.bf16 %v4393_v23, %v4392_v21  ;;  %v4573_v10 = vld [vmem:[#allocation3 + $0xc18] sm:$0xff] }
 0x366   :  { %8191 = vmatprep.subr.bf16.mxu0 %v8653_v7  ;;  %7407 = vmatprep.mubr.msk.f32.mxu0 %vm8654_vm4, %v8650_v43  ;;  %v4594_v23 = vld [vmem:[#allocation3 + $0xcc0] sm:$0xff] }
 0x367   :  { %v4344_v59 = vsel %vm2885_vm5, %v4332_v30, %v4338_v31  ;;  %v4562_v30 = vld [vmem:[#allocation3 + $0xbc0] sm:$0xff]  ;;  %v4563_v31 = vld [vmem:[#allocation3 + $0xbc8] sm:$0xff] }
 0x368   :  { %8167 = vmatpush3.bf16.msra.mxu1 %v8166_v36  ;;  %v4340_v36 = vrot.slane %v11443_v60, 6 }
 0x369   :  { %8193 = vmatpush3.bf16.msra.mxu0 %v8192_v37  ;;  %8169 = vmatprep.subr.bf16.mxu1 %v8168_v40  ;;  %v8210_v37 = vpack.c.bf16 %v4571_v28, %v4570_v25  ;;  %v4554_v40 = vld [vmem:[#allocation3 + $0xb80] sm:$0xff]  ;;  %v4595_v28 = vld [vmem:[#allocation3 + $0xcc8] sm:$0xff] }
 0x36a   :  { %8194 = vmatprep.subr.bf16.mxu0 %v8653_v7  ;;  %v4346_v60 = vsel %vm2885_vm5, %v4334_v35, %v4340_v36  ;;  %v8212_v46 = vpack.c.bf16 %v4555_v42, %v4554_v40  ;;  %v8255_v33 = vpack.c.bf16 %v4595_v28, %v4594_v23  ;;  %v8228_v35 = vpack.c.bf16 %v4563_v31, %v4562_v30  ;;  %v4596_v36 = vld [vmem:[#allocation3 + $0xcd0] sm:$0xff]  ;;  %v4565_v42 = vld [vmem:[#allocation3 + $0xbd8] sm:$0xff]  ;;  %v4794_v30 = vld [vmem:[#allocation3 + $0xe00] sm:$0xff] }
 0x36b   :  { %v4564_v40 = vld [vmem:[#allocation3 + $0xbd0] sm:$0xff]  ;;  %v4765_v28 = vld [vmem:[#allocation3 + $0xd18] sm:$0xff]  ;;  %v4795_v31 = vld [vmem:[#allocation3 + $0xe08] sm:$0xff] }
 0x36c   :  { %8171 = vmatpush3.bf16.msra.mxu1 %v8170_v48  ;;  %v8214_v48 = vpack.c.bf16 %v4573_v10, %v4572_v44  ;;  %v4582_v44 = vld [vmem:[#allocation3 + $0xc60] sm:$0xff]  ;;  %v4583_v10 = vld [vmem:[#allocation3 + $0xc68] sm:$0xff]  ;;  %v8232_v45 = vpack.c.bf16 %v4565_v42, %v4564_v40  ;;  %v4764_v23 = vld [vmem:[#allocation3 + $0xd10] sm:$0xff]  ;;  %v8300_v42 = vpack.c.bf16 %v4795_v31, %v4794_v30  ;;  %v4750_v31 = vrot.slane %v11424_v34, 1 }
 0x36d   :  { %8196 = vmatpush3.bf16.msra.mxu0 %v8195_v51  ;;  %8173 = vmatprep.subr.bf16.mxu1 %v8172_v41  ;;  %v4589_v51 = vld [vmem:[#allocation3 + $0xc98] sm:$0xff]  ;;  %v8274_v40 = vpack.c.bf16 %v4765_v28, %v4764_v23  ;;  %v4804_v23 = vld [vmem:[#allocation3 + $0xe50] sm:$0xff]  ;;  %v4985_v28 = vld [vmem:[#allocation3 + $0xee0] sm:$0xff] }
 0x36e   :  { %8197 = vmatprep.subr.bf16.mxu0 %v8653_v7  ;;  %v4557_v41 = vld [vmem:[#allocation3 + $0xb98] sm:$0xff]  ;;  %v4986_v30 = vld [vmem:[#allocation3 + $0xee8] sm:$0xff] }
 0x370   :  { %8175 = vmatpush3.bf16.msra.mxu1 %v8174_v53  ;;  %v8246_v53 = vpack.c.bf16 %v4589_v51, %v4588_v49  ;;  %v4566_v49 = vld [vmem:[#allocation3 + $0xbe0] sm:$0xff]  ;;  %v4776_v51 = vld [vmem:[#allocation3 + $0xd70] sm:$0xff] }
 0x371   :  { %8199 = vmatpush3.bf16.msra.mxu0 %v8198_v61  ;;  %8177 = vmatprep.subr.bf16.mxu1 %v8176_v0  ;;  %v8216_v61 = vpack.c.bf16 %v4557_v41, %v4556_v52  ;;  %v8218_v0 = vpack.c.bf16 %v4575_v56, %v4574_v55  ;;  %v4777_v52 = vld [vmem:[#allocation3 + $0xd78] sm:$0xff]  ;;  %v4584_v41 = vld [vmem:[#allocation3 + $0xc70] sm:$0xff] }
 0x372   :  { %8200 = vmatprep.subr.bf16.mxu0 %v8653_v7 }
 0x374   :  { %8179 = vmatpush3.bf16.msra.mxu1 %v8178_v1  ;;  %v4577_v1 = vld [vmem:[#allocation3 + $0xc38] sm:$0xff] }
 0x375   :  { %8202 = vmatpush3.bf16.msra.mxu0 %v8201_v26  ;;  %8181 = vmatprep.subr.bf16.mxu1 %v8180_v9  ;;  %v8249_v9 = vpack.c.bf16 %v4591_v2, %v4590_v62  ;;  %v8222_v12 = vpack.c.bf16 %v4577_v1, %v4576_v24  ;;  %v4761_v62 = vld [vmem:[#allocation3 + $0xcf8] sm:$0xff] }
 0x376   :  { %8203 = vmatprep.subr.bf16.mxu0 %v8653_v7  ;;  %v4569_v2 = vld [vmem:[#allocation3 + $0xbf8] sm:$0xff] }
 0x378   :  { %8183 = vmatpush3.bf16.msra.mxu1 %v8182_v16  ;;  %v4561_v16 = vld [vmem:[#allocation3 + $0xbb8] sm:$0xff] }
 0x379   :  { %8205 = vmatpush3.bf16.msra.mxu0 %v8204_v17  ;;  %8185 = vmatprep.subr.bf16.mxu1 %v8184_v18  ;;  %v4579_v18 = vld [vmem:[#allocation3 + $0xc48] sm:$0xff]  ;;  %v8224_v21 = vpack.c.bf16 %v4561_v16, %v4560_v15  ;;  %v4780_v15 = vld [vmem:[#allocation3 + $0xd90] sm:$0xff]  ;;  %v4781_v16 = vld [vmem:[#allocation3 + $0xd98] sm:$0xff] }
 0x37a   :  { %8206 = vmatprep.subr.bf16.mxu0 %v8653_v7  ;;  %v8226_v25 = vpack.c.bf16 %v4579_v18, %v4578_v13 }
 0x37c   :  { %8187 = vmatpush3.bf16.msra.mxu1 %v8186_v32  ;;  %v4580_v32 = vld [vmem:[#allocation3 + $0xc50] sm:$0xff] }
 0x37d   :  { %8209 = vmatpush3.bf16.msk.msra.mxu0 %vm11470_vm6, %v8207_v29  ;;  %8242 = vmatprep.subr.bf16.mxu1 %v8653_v7  ;;  %v4581_v29 = vld [vmem:[#allocation3 + $0xc58] sm:$0xff] }
 0x37e   :  { %8211 = vmatprep.subr.bf16.mxu0 %v8210_v37  ;;  %v3137_v54 = vpop.f32.mrb[24].mxu1  ;;  %v8230_v37 = vpack.c.bf16 %v4581_v29, %v4580_v32 }
 0x37f   :  { %v7192_v47 = vpop.f32.mrb[25].mxu1  ;;  %4465 = vmatmul.mubr.f32.vlgmr.msra.gmra.mrb[38].mxu1 %v4344_v59  ;;  %v8258_v59 = vpack.c.bf16 %v4597_v39, %v4596_v36 }
 0x380   :  { %7408 = vmatmul.mubr.msk.f32.vlgmr.msra.gmra.mrb[38].mxu0 %vm2994_vm7, %v4346_v60  ;;  %8244 = vmatpush3.bf16.msra.mxu1 %v8243_v50  ;;  %v4598_v50 = vld [vmem:[#allocation3 + $0xce0] sm:$0xff]  ;;  %v4599_v60 = vld [vmem:[#allocation3 + $0xce8] sm:$0x1]  ;;  %v4546_v47 = vrot.slane %v11455_v4, 7 }
 0x381   :  { %8213 = vmatpush3.bf16.msra.mxu0 %v8212_v46  ;;  %8245 = vmatprep.subr.bf16.mxu1 %v8653_v7  ;;  %v8234_v46 = vpack.c.bf16 %v4583_v10, %v4582_v44  ;;  %v8261_v55 = vpack.c.bf16 %v4599_v60, %v4598_v50  ;;  %v4766_v44 = vld [vmem:[#allocation3 + $0xd20] sm:$0xff]  ;;  %v4797_v50 = vld [vmem:[#allocation3 + $0xe18] sm:$0xff] }
 0x382   :  { %8215 = vmatprep.subr.bf16.mxu0 %v8214_v48  ;;  %7438 = vmatprep.mubr.msk.f32.mxu1 %vm8654_vm4, %v8650_v43  ;;  %v4567_v48 = vld [vmem:[#allocation3 + $0xbe8] sm:$0xff]  ;;  %v4552_v24 = vsel %vm2885_vm5, %v11446_v63, %v4546_v47 }
 0x383   :  { %v6394_v20 = vpop.f32.mrb[24].mxu0  ;;  %4670 = vmatprep.mubr.f32.mxu0 %v4551_v58  ;;  %v8236_v56 = vpack.c.bf16 %v4567_v48, %v4566_v49  ;;  %v4760_v58 = vld [vmem:[#allocation3 + $0xcf0] sm:$0xff]  ;;  %v4785_v49 = vld [vmem:[#allocation3 + $0xdb8] sm:$0xff]  ;;  %v4799_v47 = vld [vmem:[#allocation3 + $0xe28] sm:$0xff] }
 0x384   :  { %v6395_v26 = vpop.f32.mrb[25].mxu0  ;;  %8247 = vmatpush3.bf16.msra.mxu1 %v8246_v53  ;;  %v8264_v53 = vpack.c.bf16 %v4777_v52, %v4776_v51  ;;  %v8266_v1 = vpack.c.bf16 %v4761_v62, %v4760_v58  ;;  %v4787_v58 = vld [vmem:[#allocation3 + $0xdc8] sm:$0xff]  ;;  %v4770_v62 = vld [vmem:[#allocation3 + $0xd40] sm:$0xff] }
 0x385   :  { %v6396_v8 = vadd.f32 %v6395_v26, %v6394_v20  ;;  %8217 = vmatpush3.bf16.msra.mxu0 %v8216_v61  ;;  %8248 = vmatprep.subr.bf16.mxu1 %v8653_v7  ;;  %v4751_v20 = vrot.slane %v11427_v38, 1 }
 0x386   :  { %8219 = vmatprep.subr.bf16.mxu0 %v8218_v0  ;;  %v4568_v0 = vld [vmem:[#allocation3 + $0xbf0] sm:$0xff] }
 0x387   :  { %v11639_v17 = vadd.f32 %v6396_v8, %v3137_v54  ;;  %v4585_v54 = vld [vmem:[#allocation3 + $0xc78] sm:$0xff]  ;;  %v8240_v26 = vpack.c.bf16 %v4569_v2, %v4568_v0  ;;  %v4544_v8 = vrot.slane %v11452_v3, 7  ;;  %v4757_v13 = vsel %vm2885_vm5, %v4751_v20, %v11449_v6  ;;  %v4771_v2 = vld [vmem:[#allocation3 + $0xd48] sm:$0xff]  ;;  %v4788_v20 = vld [vmem:[#allocation3 + $0xdd0] sm:$0xff] }
 0x388   :  { %8250 = vmatpush3.bf16.msra.mxu1 %v8249_v9  ;;  %v8238_v61 = vpack.c.bf16 %v4585_v54, %v4584_v41  ;;  %v4762_v9 = vld [vmem:[#allocation3 + $0xd00] sm:$0xff]  ;;  %v4768_v41 = vld [vmem:[#allocation3 + $0xd30] sm:$0xff] }
 0x389   :  { %8221 = vmatpush3.bf16.msra.mxu0 %v8220_v22  ;;  %8251 = vmatprep.subr.bf16.mxu1 %v8653_v7  ;;  %v8268_v22 = vpack.c.bf16 %v4779_v19, %v4778_v5  ;;  %v4550_v18 = vsel %vm2885_vm5, %v11424_v34, %v4544_v8  ;;  %v4800_v5 = vld [vmem:[#allocation3 + $0xe30] sm:$0xff]  ;;  %v4801_v19 = vld [vmem:[#allocation3 + $0xe38] sm:$0xff] }
 0x38a   :  { %8223 = vmatprep.subr.bf16.mxu0 %v8222_v12  ;;  %v4792_v12 = vld [vmem:[#allocation3 + $0xdf0] sm:$0xff] }
 0x38b   :  { %v4772_v8 = vld [vmem:[#allocation3 + $0xd50] sm:$0xff] }
 0x38c   :  { %8253 = vmatpush3.bf16.msra.mxu1 %v8252_v57  ;;  %v8270_v57 = vpack.c.bf16 %v4763_v11, %v4762_v9  ;;  %v4802_v11 = vld [vmem:[#allocation3 + $0xe40] sm:$0xff] }
 0x38d   :  { %8225 = vmatpush3.bf16.msra.mxu0 %v8224_v21  ;;  %8254 = vmatprep.subr.bf16.mxu1 %v8653_v7  ;;  %v8297_v21 = vpack.c.bf16 %v4793_v14, %v4792_v12  ;;  %v4803_v12 = vld [vmem:[#allocation3 + $0xe48] sm:$0xff]  ;;  %v4790_v14 = vld [vmem:[#allocation3 + $0xde0] sm:$0xff] }
 0x38e   :  { %8227 = vmatprep.subr.bf16.mxu0 %v8226_v25  ;;  %v8272_v25 = vpack.c.bf16 %v4781_v16, %v4780_v15  ;;  %v4791_v15 = vld [vmem:[#allocation3 + $0xde8] sm:$0xff] }
 0x390   :  { %8256 = vmatpush3.bf16.msra.mxu1 %v8255_v33  ;;  %v4782_v33 = vld [vmem:[#allocation3 + $0xda0] sm:$0xff] }
 0x391   :  { %8229 = vmatpush3.bf16.msra.mxu0 %v8228_v35  ;;  %8257 = vmatprep.subr.bf16.mxu1 %v8653_v7  ;;  %v4783_v35 = vld [vmem:[#allocation3 + $0xda8] sm:$0xff] }
 0x392   :  { %8231 = vmatprep.subr.bf16.mxu0 %v8230_v37  ;;  %v8276_v10 = vpack.c.bf16 %v4783_v35, %v4782_v33  ;;  %v5001_v33 = vld [vmem:[#allocation3 + $0xf60] sm:$0xff]  ;;  %v4752_v35 = vrot.slane %v11446_v63, 1 }
 0x394   :  { %8259 = vmatpush3.bf16.msra.mxu1 %v8258_v59  ;;  %v4767_v59 = vld [vmem:[#allocation3 + $0xd28] sm:$0xff] }
 0x395   :  { %8233 = vmatpush3.bf16.msra.mxu0 %v8232_v45  ;;  %8260 = vmatprep.subr.bf16.mxu1 %v8653_v7  ;;  %v4796_v45 = vld [vmem:[#allocation3 + $0xe10] sm:$0xff]  ;;  %v8278_v51 = vpack.c.bf16 %v4767_v59, %v4766_v44  ;;  %v4988_v44 = vld [vmem:[#allocation3 + $0xef8] sm:$0xff]  ;;  %v4954_v59 = vrot.slane %v11427_v38, 2 }
 0x396   :  { %8235 = vmatprep.subr.bf16.mxu0 %v8234_v46  ;;  %v4784_v46 = vld [vmem:[#allocation3 + $0xdb0] sm:$0xff]  ;;  %v8303_v52 = vpack.c.bf16 %v4797_v50, %v4796_v45  ;;  %v4960_v45 = vrot.slane %v11449_v6, 1 }
 0x397   :  { %v8280_v54 = vpack.c.bf16 %v4785_v49, %v4784_v46  ;;  %v5003_v49 = vld [vmem:[#allocation3 + $0xf70] sm:$0xff] }
 0x398   :  { %8263 = vmatpush3.bf16.msk.msra.mxu1 %vm11470_vm6, %v8261_v55  ;;  %v4769_v55 = vld [vmem:[#allocation3 + $0xd38] sm:$0xff] }
 0x399   :  { %8237 = vmatpush3.bf16.msra.mxu0 %v8236_v56  ;;  %8265 = vmatprep.subr.bf16.mxu1 %v8264_v53  ;;  %v4798_v56 = vld [vmem:[#allocation3 + $0xe20] sm:$0xff]  ;;  %v8282_v53 = vpack.c.bf16 %v4769_v55, %v4768_v41  ;;  %v4971_v41 = vld [vmem:[#allocation3 + $0xe70] sm:$0xff] }
 0x39a   :  { %8239 = vmatprep.subr.bf16.mxu0 %v8238_v61  ;;  %v8306_v61 = vpack.c.bf16 %v4799_v47, %v4798_v56  ;;  %v4989_v56 = vld [vmem:[#allocation3 + $0xf00] sm:$0xff]  ;;  %v4990_v47 = vld [vmem:[#allocation3 + $0xf08] sm:$0xff] }
 0x39b   :  { %7439 = vmatmul.mubr.msk.f32.vlgmr.msra.gmra.mrb[40].mxu1 %vm2994_vm7, %v4552_v24  ;;  %v4789_v24 = vld [vmem:[#allocation3 + $0xdd8] sm:$0xff] }
 0x39c   :  { %8267 = vmatpush3.bf16.msra.mxu1 %v8266_v1  ;;  %4876 = vmatprep.mubr.f32.mxu1 %v4757_v13  ;;  %v8286_v1 = vpack.c.bf16 %v4771_v2, %v4770_v62  ;;  %v8288_v9 = vpack.c.bf16 %v4789_v24, %v4788_v20  ;;  %v8312_v13 = vpack.c.bf16 %v4803_v12, %v4802_v11  ;;  %v5005_v62 = vld [vmem:[#allocation3 + $0xf80] sm:$0xff]  ;;  %v5006_v2 = vld [vmem:[#allocation3 + $0xf88] sm:$0xff]  ;;  %v4991_v24 = vld [vmem:[#allocation3 + $0xf10] sm:$0xff] }
 0x39d   :  { %8241 = vmatpush3.bf16.msra.mxu0 %v8240_v26  ;;  %8269 = vmatprep.subr.bf16.mxu1 %v8268_v22  ;;  %v8309_v26 = vpack.c.bf16 %v4801_v19, %v4800_v5  ;;  %v4773_v22 = vld [vmem:[#allocation3 + $0xd58] sm:$0xff]  ;;  %v4973_v5 = vld [vmem:[#allocation3 + $0xe80] sm:$0xff]  ;;  %v4974_v19 = vld [vmem:[#allocation3 + $0xe88] sm:$0xff] }
 0x39e   :  { %8296 = vmatprep.subr.bf16.mxu0 %v8653_v7  ;;  %v6444_v32 = vpop.f32.mrb[26].mxu1  ;;  %v8290_v16 = vpack.c.bf16 %v4773_v22, %v4772_v8  ;;  %v8328_v22 = vpack.c.bf16 %v4974_v19, %v4973_v5  ;;  %v5007_v11 = vld [vmem:[#allocation3 + $0xf90] sm:$0xff]  ;;  %v4984_v19 = vld [vmem:[#allocation3 + $0xed8] sm:$0xff] }
 0x39f   :  { %v3283_v29 = vpop.f32.mrb[26].mxu0  ;;  %v6445_v36 = vpop.f32.mrb[27].mxu1  ;;  %v4983_v5 = vld [vmem:[#allocation3 + $0xed0] sm:$0xff] }
 0x3a0   :  { %4671 = vmatmul.mubr.f32.vlgmr.msra.gmra.mrb[40].mxu0 %v4550_v18  ;;  %v7223_v37 = vpop.f32.mrb[27].mxu0  ;;  %v6446_v39 = vadd.f32 %v6445_v36, %v6444_v32  ;;  %8271 = vmatpush3.bf16.msra.mxu1 %v8270_v57  ;;  %v4774_v18 = vld [vmem:[#allocation3 + $0xd60] sm:$0xff]  ;;  %v8292_v57 = vpack.c.bf16 %v4791_v15, %v4790_v14  ;;  %v8318_v36 = vpack.c.bf16 %v4986_v30, %v4985_v28  ;;  %v5008_v14 = vld [vmem:[#allocation3 + $0xf98] sm:$0xff]  ;;  %v4975_v15 = vld [vmem:[#allocation3 + $0xe90] sm:$0xff] }
 0x3a1   :  { %8298 = vmatpush3.bf16.msra.mxu0 %v8297_v21  ;;  %8273 = vmatprep.subr.bf16.mxu1 %v8272_v25  ;;  %v4775_v21 = vld [vmem:[#allocation3 + $0xd68] sm:$0xff]  ;;  %v4805_v25 = vld [vmem:[#allocation3 + $0xe58] sm:$0x1] }
 0x3a2   :  { %8299 = vmatprep.subr.bf16.mxu0 %v8653_v7  ;;  %v3214_v60 = vadd.f32 %v6446_v39, %v11639_v17  ;;  %7469 = vmatprep.mubr.msk.f32.mxu0 %vm8654_vm4, %v8650_v43  ;;  %v4786_v17 = vld [vmem:[#allocation3 + $0xdc0] sm:$0xff]  ;;  %v8294_v32 = vpack.c.bf16 %v4775_v21, %v4774_v18  ;;  %v5002_v37 = vld [vmem:[#allocation3 + $0xf68] sm:$0xff]  ;;  %v8360_v21 = vpack.c.bf16 %v5008_v14, %v5007_v11  ;;  %v4953_v11 = vrot.slane %v11424_v34, 2 }
 0x3a3   :  { %v8284_v0 = vpack.c.bf16 %v4787_v58, %v4786_v17  ;;  %v4969_v39 = vld [vmem:[#allocation3 + $0xe60] sm:$0xff]  ;;  %v8351_v50 = vpack.c.bf16 %v5002_v37, %v5001_v33  ;;  %v4966_v58 = vsel %vm2885_vm5, %v4954_v59, %v4960_v45  ;;  %v4995_v33 = vld [vmem:[#allocation3 + $0xf30] sm:$0xff]  ;;  %v4998_v59 = vld [vmem:[#allocation3 + $0xf48] sm:$0xff] }
 0x3a4   :  { %v11662_v48 = vadd.f32 %v3283_v29, %v3214_v60  ;;  %8275 = vmatpush3.bf16.msra.mxu1 %v8274_v40  ;;  %v8315_v29 = vpack.c.bf16 %v4805_v25, %v4804_v23  ;;  %v4970_v40 = vld [vmem:[#allocation3 + $0xe68] sm:$0xff]  ;;  %v4758_v60 = vsel %vm2885_vm5, %v4752_v35, %v11455_v4  ;;  %v4993_v18 = vld [vmem:[#allocation3 + $0xf20] sm:$0xff]  ;;  %v4996_v35 = vld [vmem:[#allocation3 + $0xf38] sm:$0xff] }
 0x3a5   :  { %8301 = vmatpush3.bf16.msra.mxu0 %v8300_v42  ;;  %8277 = vmatprep.subr.bf16.mxu1 %v8276_v10  ;;  %v4987_v42 = vld [vmem:[#allocation3 + $0xef0] sm:$0xff]  ;;  %v4756_v10 = vsel %vm2885_vm5, %v4750_v31, %v11452_v3  ;;  %v8320_v46 = vpack.c.bf16 %v4970_v40, %v4969_v39  ;;  %v5009_v25 = vld [vmem:[#allocation3 + $0xfa0] sm:$0xff]  ;;  %v5010_v31 = vld [vmem:[#allocation3 + $0xfa8] sm:$0xff]  ;;  %v8338_v40 = vpack.c.bf16 %v4996_v35, %v4995_v33 }
 0x3a6   :  { %8302 = vmatprep.subr.bf16.mxu0 %v8653_v7  ;;  %v5011_v39 = vld [vmem:[#allocation3 + $0xfb0] sm:$0xff]  ;;  %v5180_v14 = vld [vmem:[#allocation3 + $0xfe0] sm:$0xff]  ;;  %v5183_v33 = vld [vmem:[#allocation3 + $0xff8] sm:$0xff] }
 0x3a7   :  { %v5212_v35 = vld [vmem:[#allocation3 + $0x10e0] sm:$0xff] }
 0x3a8   :  { %8279 = vmatpush3.bf16.msra.mxu1 %v8278_v51  ;;  %v8322_v51 = vpack.c.bf16 %v4988_v44, %v4987_v42  ;;  %v4979_v42 = vld [vmem:[#allocation3 + $0xeb0] sm:$0xff]  ;;  %v4980_v44 = vld [vmem:[#allocation3 + $0xeb8] sm:$0xff] }
 0x3a9   :  { %8304 = vmatpush3.bf16.msra.mxu0 %v8303_v52  ;;  %8281 = vmatprep.subr.bf16.mxu1 %v8280_v54  ;;  %v5004_v52 = vld [vmem:[#allocation3 + $0xf78] sm:$0xff] }
 0x3aa   :  { %8305 = vmatprep.subr.bf16.mxu0 %v8653_v7  ;;  %v4972_v54 = vld [vmem:[#allocation3 + $0xe78] sm:$0xff] }
 0x3ac   :  { %8283 = vmatpush3.bf16.msra.mxu1 %v8282_v53  ;;  %v8354_v53 = vpack.c.bf16 %v5004_v52, %v5003_v49  ;;  %v4982_v52 = vld [vmem:[#allocation3 + $0xec8] sm:$0xff] }
 0x3ad   :  { %8307 = vmatpush3.bf16.msra.mxu0 %v8306_v61  ;;  %8285 = vmatprep.subr.bf16.mxu1 %v8284_v0  ;;  %v8324_v61 = vpack.c.bf16 %v4972_v54, %v4971_v41  ;;  %v8326_v0 = vpack.c.bf16 %v4990_v47, %v4989_v56  ;;  %v5194_v41 = vld [vmem:[#allocation3 + $0x1050] sm:$0xff]  ;;  %v5195_v54 = vld [vmem:[#allocation3 + $0x1058] sm:$0xff]  ;;  %v4955_v47 = vrot.slane %v11446_v63, 2 }
 0x3ae   :  { %8308 = vmatprep.subr.bf16.mxu0 %v8653_v7  ;;  %v5000_v56 = vld [vmem:[#allocation3 + $0xf58] sm:$0xff] }
 0x3b0   :  { %8287 = vmatpush3.bf16.msra.mxu1 %v8286_v1  ;;  %v4992_v1 = vld [vmem:[#allocation3 + $0xf18] sm:$0xff] }
 0x3b1   :  { %8310 = vmatpush3.bf16.msra.mxu0 %v8309_v26  ;;  %8289 = vmatprep.subr.bf16.mxu1 %v8288_v9  ;;  %v8357_v9 = vpack.c.bf16 %v5006_v2, %v5005_v62  ;;  %v8330_v12 = vpack.c.bf16 %v4992_v1, %v4991_v24  ;;  %v8372_v62 = vpack.c.bf16 %v5195_v54, %v5194_v41  ;;  %v5179_v2 = vld [vmem:[#allocation3 + $0xfd8] sm:$0xff]  ;;  %v5197_v24 = vld [vmem:[#allocation3 + $0x1068] sm:$0xff]  ;;  %v5202_v41 = vld [vmem:[#allocation3 + $0x1090] sm:$0xff] }
 0x3b2   :  { %8311 = vmatprep.subr.bf16.mxu0 %v8653_v7  ;;  %v5203_v54 = vld [vmem:[#allocation3 + $0x1098] sm:$0xff] }
 0x3b4   :  { %8291 = vmatpush3.bf16.msra.mxu1 %v8290_v16  ;;  %v4976_v16 = vld [vmem:[#allocation3 + $0xe98] sm:$0xff] }
 0x3b5   :  { %8313 = vmatpush3.bf16.msra.mxu0 %v8312_v13  ;;  %8293 = vmatprep.subr.bf16.mxu1 %v8292_v57  ;;  %v4994_v57 = vld [vmem:[#allocation3 + $0xf28] sm:$0xff]  ;;  %v8332_v23 = vpack.c.bf16 %v4976_v16, %v4975_v15 }
 0x3b6   :  { %8314 = vmatprep.subr.bf16.mxu0 %v8653_v7  ;;  %v8334_v30 = vpack.c.bf16 %v4994_v57, %v4993_v18  ;;  %v5181_v16 = vld [vmem:[#allocation3 + $0xfe8] sm:$0xff]  ;;  %v5211_v18 = vld [vmem:[#allocation3 + $0x10d8] sm:$0xff]  ;;  %v5198_v57 = vld [vmem:[#allocation3 + $0x1070] sm:$0xff] }
 0x3b8   :  { %8295 = vmatpush3.bf16.msra.mxu1 %v8294_v32  ;;  %v4977_v32 = vld [vmem:[#allocation3 + $0xea0] sm:$0xff] }
 0x3b9   :  { %8317 = vmatpush3.bf16.msk.msra.mxu0 %vm11470_vm6, %v8315_v29  ;;  %8350 = vmatprep.subr.bf16.mxu1 %v8653_v7  ;;  %v4978_v29 = vld [vmem:[#allocation3 + $0xea8] sm:$0xff] }
 0x3ba   :  { %8319 = vmatprep.subr.bf16.mxu0 %v8318_v36  ;;  %v3491_v55 = vpop.f32.mrb[28].mxu1  ;;  %v8363_v36 = vpack.c.bf16 %v5010_v31, %v5009_v25  ;;  %v8336_v37 = vpack.c.bf16 %v4978_v29, %v4977_v32  ;;  %v5182_v32 = vld [vmem:[#allocation3 + $0xff0] sm:$0xff] }
 0x3bb   :  { %v7254_v17 = vpop.f32.mrb[29].mxu1  ;;  %4877 = vmatmul.mubr.f32.vlgmr.msra.gmra.mrb[42].mxu1 %v4756_v10  ;;  %v4997_v10 = vld [vmem:[#allocation3 + $0xf40] sm:$0xff] }
 0x3bc   :  { %7470 = vmatmul.mubr.msk.f32.vlgmr.msra.gmra.mrb[42].mxu0 %vm2994_vm7, %v4758_v60  ;;  %8352 = vmatpush3.bf16.msra.mxu1 %v8351_v50  ;;  %v8340_v50 = vpack.c.bf16 %v4980_v44, %v4979_v42  ;;  %v5013_v60 = vld [vmem:[#allocation3 + $0xfc0] sm:$0xff]  ;;  %v8342_v49 = vpack.c.bf16 %v4998_v59, %v4997_v10  ;;  %v4961_v17 = vrot.slane %v11455_v4, 1  ;;  %v8382_v59 = vpack.c.bf16 %v5183_v33, %v5182_v32  ;;  %v5222_v32 = vld [vmem:[#allocation3 + $0x1130] sm:$0xff] }
 0x3bd   :  { %8321 = vmatpush3.bf16.msra.mxu0 %v8320_v46  ;;  %8353 = vmatprep.subr.bf16.mxu1 %v8653_v7  ;;  %v5014_v46 = vld [vmem:[#allocation3 + $0xfc8] sm:$0x1]  ;;  %v5403_v33 = vld [vmem:[#allocation3 + $0x11c0] sm:$0xff] }
 0x3be   :  { %8323 = vmatprep.subr.bf16.mxu0 %v8322_v51  ;;  %7500 = vmatprep.mubr.msk.f32.mxu1 %vm8654_vm4, %v8650_v43  ;;  %v4981_v51 = vld [vmem:[#allocation3 + $0xec0] sm:$0xff]  ;;  %v4967_v1 = vsel %vm2885_vm5, %v4955_v47, %v4961_v17  ;;  %v5186_v17 = vld [vmem:[#allocation3 + $0x1010] sm:$0xff] }
 0x3bf   :  { %v6494_v20 = vpop.f32.mrb[28].mxu0  ;;  %5085 = vmatprep.mubr.f32.mxu0 %v4966_v58  ;;  %v8369_v58 = vpack.c.bf16 %v5014_v46, %v5013_v60  ;;  %v5185_v46 = vld [vmem:[#allocation3 + $0x1008] sm:$0xff] }
 0x3c0   :  { %v6495_v26 = vpop.f32.mrb[29].mxu0  ;;  %8355 = vmatpush3.bf16.msra.mxu1 %v8354_v53  ;;  %v8344_v53 = vpack.c.bf16 %v4982_v52, %v4981_v51  ;;  %v5215_v51 = vld [vmem:[#allocation3 + $0x10f8] sm:$0xff] }
 0x3c1   :  { %v6496_v8 = vadd.f32 %v6495_v26, %v6494_v20  ;;  %8325 = vmatpush3.bf16.msra.mxu0 %v8324_v61  ;;  %8356 = vmatprep.subr.bf16.mxu1 %v8653_v7  ;;  %v5178_v61 = vld [vmem:[#allocation3 + $0xfd0] sm:$0xff]  ;;  %v5196_v20 = vld [vmem:[#allocation3 + $0x1060] sm:$0xff]  ;;  %v5163_v26 = vrot.slane %v11427_v38, 3 }
 0x3c2   :  { %8327 = vmatprep.subr.bf16.mxu0 %v8326_v0  ;;  %v8376_v15 = vpack.c.bf16 %v5197_v24, %v5196_v20  ;;  %v5189_v24 = vld [vmem:[#allocation3 + $0x1028] sm:$0xff] }
 0x3c3   :  { %v3492_v13 = vadd.f32 %v6496_v8, %v3491_v55  ;;  %v4999_v55 = vld [vmem:[#allocation3 + $0xf50] sm:$0xff]  ;;  %v5169_v8 = vrot.slane %v11449_v6, 2 }
 0x3c4   :  { %8358 = vmatpush3.bf16.msra.mxu1 %v8357_v9  ;;  %v8346_v0 = vpack.c.bf16 %v5000_v56, %v4999_v55  ;;  %v8374_v9 = vpack.c.bf16 %v5179_v2, %v5178_v61  ;;  %v5216_v61 = vld [vmem:[#allocation3 + $0x1100] sm:$0xff]  ;;  %v5205_v2 = vld [vmem:[#allocation3 + $0x10a8] sm:$0xff] }
 0x3c5   :  { %8329 = vmatpush3.bf16.msra.mxu0 %v8328_v22  ;;  %v11687_v28 = vadd.f32 %v3492_v13, %v11662_v48  ;;  %8359 = vmatprep.subr.bf16.mxu1 %v8653_v7  ;;  %v5012_v48 = vld [vmem:[#allocation3 + $0xfb8] sm:$0xff]  ;;  %v8348_v22 = vpack.c.bf16 %v4984_v19, %v4983_v5  ;;  %v5210_v13 = vld [vmem:[#allocation3 + $0x10d0] sm:$0xff] }
 0x3c6   :  { %8331 = vmatprep.subr.bf16.mxu0 %v8330_v12  ;;  %v8366_v45 = vpack.c.bf16 %v5012_v48, %v5011_v39  ;;  %v4959_v12 = vrot.slane %v11452_v3, 1  ;;  %v8405_v31 = vpack.c.bf16 %v5211_v18, %v5210_v13  ;;  %v5201_v48 = vld [vmem:[#allocation3 + $0x1088] sm:$0xff]  ;;  %v5208_v18 = vld [vmem:[#allocation3 + $0x10c0] sm:$0xff] }
 0x3c7   :  { %v5221_v13 = vld [vmem:[#allocation3 + $0x1128] sm:$0xff] }
 0x3c8   :  { %8361 = vmatpush3.bf16.msra.mxu1 %v8360_v21  ;;  %v5199_v21 = vld [vmem:[#allocation3 + $0x1078] sm:$0xff]  ;;  %v4965_v25 = vsel %vm2885_vm5, %v4953_v11, %v4959_v12  ;;  %v5190_v12 = vld [vmem:[#allocation3 + $0x1030] sm:$0xff] }
 0x3c9   :  { %8333 = vmatpush3.bf16.msra.mxu0 %v8332_v23  ;;  %8362 = vmatprep.subr.bf16.mxu1 %v8653_v7  ;;  %v5175_v23 = vsel %vm2885_vm5, %v5163_v26, %v5169_v8  ;;  %v8380_v29 = vpack.c.bf16 %v5199_v21, %v5198_v57  ;;  %v5219_v26 = vld [vmem:[#allocation3 + $0x1118] sm:$0xff]  ;;  %v5206_v8 = vld [vmem:[#allocation3 + $0x10b0] sm:$0xff]  ;;  %v5209_v57 = vld [vmem:[#allocation3 + $0x10c8] sm:$0xff] }
 0x3ca   :  { %8335 = vmatprep.subr.bf16.mxu0 %v8334_v30  ;;  %v8378_v30 = vpack.c.bf16 %v5181_v16, %v5180_v14  ;;  %v5220_v16 = vld [vmem:[#allocation3 + $0x1120] sm:$0xff] }
 0x3cc   :  { %8364 = vmatpush3.bf16.msra.mxu1 %v8363_v36  ;;  %v5213_v36 = vld [vmem:[#allocation3 + $0x10e8] sm:$0xff] }
 0x3cd   :  { %8337 = vmatpush3.bf16.msra.mxu0 %v8336_v37  ;;  %8365 = vmatprep.subr.bf16.mxu1 %v8653_v7 }
 0x3ce   :  { %8339 = vmatprep.subr.bf16.mxu0 %v8338_v40  ;;  %v5200_v40 = vld [vmem:[#allocation3 + $0x1080] sm:$0xff] }
 0x3cf   :  { %v8384_v60 = vpack.c.bf16 %v5201_v48, %v5200_v40  ;;  %v5419_v48 = vld [vmem:[#allocation3 + $0x1240] sm:$0xff] }
 0x3d0   :  { %8367 = vmatpush3.bf16.msra.mxu1 %v8366_v45  ;;  %v8408_v45 = vpack.c.bf16 %v5213_v36, %v5212_v35  ;;  %v5404_v35 = vld [vmem:[#allocation3 + $0x11c8] sm:$0xff]  ;;  %v5162_v36 = vrot.slane %v11424_v34, 3 }
 0x3d1   :  { %8341 = vmatpush3.bf16.msra.mxu0 %v8340_v50  ;;  %8368 = vmatprep.subr.bf16.mxu1 %v8653_v7  ;;  %v5184_v50 = vld [vmem:[#allocation3 + $0x1000] sm:$0xff] }
 0x3d2   :  { %8343 = vmatprep.subr.bf16.mxu0 %v8342_v49  ;;  %v5214_v49 = vld [vmem:[#allocation3 + $0x10f0] sm:$0xff]  ;;  %v8386_v56 = vpack.c.bf16 %v5185_v46, %v5184_v50  ;;  %v5388_v50 = vld [vmem:[#allocation3 + $0x1148] sm:$0xff]  ;;  %v5406_v46 = vld [vmem:[#allocation3 + $0x11d8] sm:$0xff] }
 0x3d3   :  { %v8411_v47 = vpack.c.bf16 %v5215_v51, %v5214_v49  ;;  %v5372_v51 = vrot.slane %v11427_v38, 4 }
 0x3d4   :  { %8371 = vmatpush3.bf16.msk.msra.mxu1 %vm11470_vm6, %v8369_v58  ;;  %v8388_v58 = vpack.c.bf16 %v5203_v54, %v5202_v41 }
 0x3d5   :  { %8345 = vmatpush3.bf16.msra.mxu0 %v8344_v53  ;;  %8373 = vmatprep.subr.bf16.mxu1 %v8372_v62  ;;  %v5187_v53 = vld [vmem:[#allocation3 + $0x1018] sm:$0xff]  ;;  %v5217_v62 = vld [vmem:[#allocation3 + $0x1108] sm:$0xff] }
 0x3d6   :  { %8347 = vmatprep.subr.bf16.mxu0 %v8346_v0  ;;  %v5204_v0 = vld [vmem:[#allocation3 + $0x10a0] sm:$0xff]  ;;  %v8390_v5 = vpack.c.bf16 %v5187_v53, %v5186_v17  ;;  %v8414_v19 = vpack.c.bf16 %v5217_v62, %v5216_v61  ;;  %v5389_v53 = vld [vmem:[#allocation3 + $0x1150] sm:$0xff]  ;;  %v5390_v61 = vld [vmem:[#allocation3 + $0x1158] sm:$0xff] }
 0x3d7   :  { %7501 = vmatmul.mubr.msk.f32.vlgmr.msra.gmra.mrb[44].mxu1 %vm2994_vm7, %v4967_v1  ;;  %v8392_v20 = vpack.c.bf16 %v5205_v2, %v5204_v0  ;;  %v5218_v1 = vld [vmem:[#allocation3 + $0x1110] sm:$0xff]  ;;  %v5407_v0 = vld [vmem:[#allocation3 + $0x11e0] sm:$0xff]  ;;  %v5408_v2 = vld [vmem:[#allocation3 + $0x11e8] sm:$0xff] }
 0x3d8   :  { %8375 = vmatpush3.bf16.msra.mxu1 %v8374_v9  ;;  %5294 = vmatprep.mubr.f32.mxu1 %v5175_v23  ;;  %v5207_v9 = vld [vmem:[#allocation3 + $0x10b8] sm:$0xff]  ;;  %v8417_v11 = vpack.c.bf16 %v5219_v26, %v5218_v1  ;;  %v8420_v23 = vpack.c.bf16 %v5221_v13, %v5220_v16  ;;  %v8434_v1 = vpack.c.bf16 %v5408_v2, %v5407_v0  ;;  %v5424_v26 = vld [vmem:[#allocation3 + $0x1268] sm:$0xff]  ;;  %v5373_v2 = vrot.slane %v11446_v63, 4 }
 0x3d9   :  { %8349 = vmatpush3.bf16.msra.mxu0 %v8348_v22  ;;  %8377 = vmatprep.subr.bf16.mxu1 %v8376_v15  ;;  %v8396_v14 = vpack.c.bf16 %v5207_v9, %v5206_v8  ;;  %v5191_v15 = vld [vmem:[#allocation3 + $0x1038] sm:$0xff]  ;;  %v5391_v8 = vld [vmem:[#allocation3 + $0x1160] sm:$0xff]  ;;  %v5392_v9 = vld [vmem:[#allocation3 + $0x1168] sm:$0xff] }
 0x3da   :  { %8404 = vmatprep.subr.bf16.mxu0 %v8653_v7  ;;  %v6544_v37 = vpop.f32.mrb[30].mxu1  ;;  %v8398_v21 = vpack.c.bf16 %v5191_v15, %v5190_v12  ;;  %v5410_v12 = vld [vmem:[#allocation3 + $0x11f8] sm:$0xff]  ;;  %v8436_v13 = vpack.c.bf16 %v5392_v9, %v5391_v8  ;;  %v5401_v8 = vld [vmem:[#allocation3 + $0x11b0] sm:$0xff] }
 0x3db   :  { %v3700_v39 = vpop.f32.mrb[30].mxu0  ;;  %v6545_v42 = vpop.f32.mrb[31].mxu1  ;;  %v5418_v0 = vld [vmem:[#allocation3 + $0x1238] sm:$0xff] }
 0x3dc   :  { %5086 = vmatmul.mubr.f32.vlgmr.msra.gmra.mrb[44].mxu0 %v4965_v25  ;;  %v7285_v44 = vpop.f32.mrb[31].mxu0  ;;  %v6546_v10 = vadd.f32 %v6545_v42, %v6544_v37  ;;  %8379 = vmatpush3.bf16.msra.mxu1 %v8378_v30  ;;  %v5192_v25 = vld [vmem:[#allocation3 + $0x1040] sm:$0xff]  ;;  %v8400_v30 = vpack.c.bf16 %v5209_v57, %v5208_v18  ;;  %v5168_v37 = vrot.slane %v11452_v3, 2  ;;  %v5164_v42 = vrot.slane %v11446_v63, 3  ;;  %v5425_v18 = vld [vmem:[#allocation3 + $0x1270] sm:$0xff]  ;;  %v5402_v9 = vld [vmem:[#allocation3 + $0x11b8] sm:$0xff] }
 0x3dd   :  { %8406 = vmatpush3.bf16.msra.mxu0 %v8405_v31  ;;  %8381 = vmatprep.subr.bf16.mxu1 %v8380_v29  ;;  %v5193_v31 = vld [vmem:[#allocation3 + $0x1048] sm:$0xff]  ;;  %v5223_v29 = vld [vmem:[#allocation3 + $0x1138] sm:$0x1]  ;;  %v5170_v44 = vrot.slane %v11455_v4, 2 }
 0x3de   :  { %8407 = vmatprep.subr.bf16.mxu0 %v8653_v7  ;;  %v3701_v52 = vadd.f32 %v6546_v10, %v3700_v39  ;;  %7531 = vmatprep.mubr.msk.f32.mxu0 %vm8654_vm4, %v8650_v43  ;;  %v8402_v39 = vpack.c.bf16 %v5193_v31, %v5192_v25  ;;  %v8423_v40 = vpack.c.bf16 %v5223_v29, %v5222_v32  ;;  %v5394_v25 = vld [vmem:[#allocation3 + $0x1178] sm:$0xff]  ;;  %v5411_v31 = vld [vmem:[#allocation3 + $0x1200] sm:$0xff]  ;;  %v5412_v32 = vld [vmem:[#allocation3 + $0x1208] sm:$0xff] }
 0x3df   :  { %v8426_v10 = vpack.c.bf16 %v5404_v35, %v5403_v33  ;;  %v5174_v49 = vsel %vm2885_vm5, %v5162_v36, %v5168_v37  ;;  %v5176_v54 = vsel %vm2885_vm5, %v5164_v42, %v5170_v44  ;;  %v5427_v35 = vld [vmem:[#allocation3 + $0x1280] sm:$0xff]  ;;  %v8442_v37 = vpack.c.bf16 %v5412_v32, %v5411_v31  ;;  %v5413_v42 = vld [vmem:[#allocation3 + $0x1210] sm:$0xff]  ;;  %v5414_v44 = vld [vmem:[#allocation3 + $0x1218] sm:$0xff] }
 0x3e0   :  { %v11710_v55 = vadd.f32 %v3701_v52, %v11687_v28  ;;  %8383 = vmatpush3.bf16.msra.mxu1 %v8382_v59  ;;  %v5188_v28 = vld [vmem:[#allocation3 + $0x1020] sm:$0xff]  ;;  %v5420_v59 = vld [vmem:[#allocation3 + $0x1248] sm:$0xff]  ;;  %v5378_v52 = vrot.slane %v11449_v6, 3  ;;  %v5629_v31 = vld [vmem:[#allocation3 + $0x13b8] sm:$0xff] }
 0x3e1   :  { %8409 = vmatpush3.bf16.msra.mxu0 %v8408_v45  ;;  %8385 = vmatprep.subr.bf16.mxu1 %v8384_v60  ;;  %v8394_v22 = vpack.c.bf16 %v5189_v24, %v5188_v28  ;;  %v5387_v45 = vld [vmem:[#allocation3 + $0x1140] sm:$0xff]  ;;  %v5405_v60 = vld [vmem:[#allocation3 + $0x11d0] sm:$0xff]  ;;  %v8459_v41 = vpack.c.bf16 %v5420_v59, %v5419_v48  ;;  %v5396_v48 = vld [vmem:[#allocation3 + $0x1188] sm:$0xff] }
 0x3e2   :  { %8410 = vmatprep.subr.bf16.mxu0 %v8653_v7  ;;  %v8430_v17 = vpack.c.bf16 %v5406_v46, %v5405_v60  ;;  %v5423_v24 = vld [vmem:[#allocation3 + $0x1260] sm:$0xff]  ;;  %v5397_v60 = vld [vmem:[#allocation3 + $0x1190] sm:$0xff]  ;;  %v5398_v46 = vld [vmem:[#allocation3 + $0x1198] sm:$0xff] }
 0x3e3   :  { %v8465_v16 = vpack.c.bf16 %v5424_v26, %v5423_v24  ;;  %v5597_v26 = vld [vmem:[#allocation3 + $0x12b8] sm:$0xff]  ;;  %v5616_v32 = vld [vmem:[#allocation3 + $0x1350] sm:$0xff] }
 0x3e4   :  { %8387 = vmatpush3.bf16.msra.mxu1 %v8386_v56  ;;  %v8428_v56 = vpack.c.bf16 %v5388_v50, %v5387_v45  ;;  %v5429_v45 = vld [vmem:[#allocation3 + $0x1290] sm:$0xff]  ;;  %v8446_v50 = vpack.c.bf16 %v5414_v44, %v5413_v42  ;;  %v5601_v42 = vld [vmem:[#allocation3 + $0x12d8] sm:$0xff]  ;;  %v5630_v44 = vld [vmem:[#allocation3 + $0x13c0] sm:$0xff] }
 0x3e5   :  { %8412 = vmatpush3.bf16.msra.mxu0 %v8411_v47  ;;  %8389 = vmatprep.subr.bf16.mxu1 %v8388_v58  ;;  %v5421_v47 = vld [vmem:[#allocation3 + $0x1250] sm:$0xff]  ;;  %v5422_v58 = vld [vmem:[#allocation3 + $0x1258] sm:$0xff] }
 0x3e6   :  { %8413 = vmatprep.subr.bf16.mxu0 %v8653_v7  ;;  %v8462_v28 = vpack.c.bf16 %v5422_v58, %v5421_v47  ;;  %v5400_v58 = vld [vmem:[#allocation3 + $0x11a8] sm:$0xff] }
 0x3e8   :  { %8391 = vmatpush3.bf16.msra.mxu1 %v8390_v5 }
 0x3e9   :  { %8415 = vmatpush3.bf16.msra.mxu0 %v8414_v19  ;;  %8393 = vmatprep.subr.bf16.mxu1 %v8392_v20  ;;  %v5384_v19 = vsel %vm2885_vm5, %v5372_v51, %v5378_v52  ;;  %v8432_v20 = vpack.c.bf16 %v5390_v61, %v5389_v53  ;;  %v5416_v51 = vld [vmem:[#allocation3 + $0x1228] sm:$0xff]  ;;  %v5612_v53 = vld [vmem:[#allocation3 + $0x1330] sm:$0xff]  ;;  %v5613_v61 = vld [vmem:[#allocation3 + $0x1338] sm:$0xff] }
 0x3ea   :  { %8416 = vmatprep.subr.bf16.mxu0 %v8653_v7  ;;  %v8480_v24 = vpack.c.bf16 %v5613_v61, %v5612_v53  ;;  %v5620_v53 = vld [vmem:[#allocation3 + $0x1370] sm:$0xff]  ;;  %v5621_v61 = vld [vmem:[#allocation3 + $0x1378] sm:$0xff] }
 0x3ec   :  { %8395 = vmatpush3.bf16.msra.mxu1 %v8394_v22 }
 0x3ed   :  { %8418 = vmatpush3.bf16.msra.mxu0 %v8417_v11  ;;  %8397 = vmatprep.subr.bf16.mxu1 %v8396_v14  ;;  %v5409_v11 = vld [vmem:[#allocation3 + $0x11f0] sm:$0xff] }
 0x3ee   :  { %8419 = vmatprep.subr.bf16.mxu0 %v8653_v7  ;;  %v8438_v57 = vpack.c.bf16 %v5410_v12, %v5409_v11  ;;  %v5615_v11 = vld [vmem:[#allocation3 + $0x1348] sm:$0xff] }
 0x3f0   :  { %8399 = vmatpush3.bf16.msra.mxu1 %v8398_v21  ;;  %v5426_v21 = vld [vmem:[#allocation3 + $0x1278] sm:$0xff] }
 0x3f1   :  { %8421 = vmatpush3.bf16.msra.mxu0 %v8420_v23  ;;  %8401 = vmatprep.subr.bf16.mxu1 %v8400_v30  ;;  %v5393_v23 = vld [vmem:[#allocation3 + $0x1170] sm:$0xff]  ;;  %v8468_v29 = vpack.c.bf16 %v5426_v21, %v5425_v18  ;;  %v5371_v18 = vrot.slane %v11424_v34, 4  ;;  %v5598_v21 = vld [vmem:[#allocation3 + $0x12c0] sm:$0xff] }
 0x3f2   :  { %8422 = vmatprep.subr.bf16.mxu0 %v8653_v7  ;;  %v8440_v33 = vpack.c.bf16 %v5394_v25, %v5393_v23  ;;  %v5599_v25 = vld [vmem:[#allocation3 + $0x12c8] sm:$0xff] }
 0x3f4   :  { %8403 = vmatpush3.bf16.msra.mxu1 %v8402_v39  ;;  %v5428_v39 = vld [vmem:[#allocation3 + $0x1288] sm:$0xff] }
 0x3f5   :  { %8425 = vmatpush3.bf16.msk.msra.mxu0 %vm11470_vm6, %v8423_v40  ;;  %8458 = vmatprep.subr.bf16.mxu1 %v8653_v7  ;;  %v5395_v40 = vld [vmem:[#allocation3 + $0x1180] sm:$0xff] }
 0x3f6   :  { %8427 = vmatprep.subr.bf16.mxu0 %v8426_v10  ;;  %v3909_v62 = vpop.f32.mrb[32].mxu1  ;;  %v8471_v10 = vpack.c.bf16 %v5428_v39, %v5427_v35  ;;  %v8444_v59 = vpack.c.bf16 %v5396_v48, %v5395_v40  ;;  %v5600_v40 = vld [vmem:[#allocation3 + $0x12d0] sm:$0xff] }
 0x3f7   :  { %v7316_v5 = vpop.f32.mrb[33].mxu1  ;;  %5295 = vmatmul.mubr.f32.vlgmr.msra.gmra.mrb[46].mxu1 %v5174_v49  ;;  %v5415_v49 = vld [vmem:[#allocation3 + $0x1220] sm:$0xff] }
 0x3f8   :  { %7532 = vmatmul.mubr.msk.f32.vlgmr.msra.gmra.mrb[46].mxu0 %vm2994_vm7, %v5176_v54  ;;  %8460 = vmatpush3.bf16.msra.mxu1 %v8459_v41  ;;  %v8448_v41 = vpack.c.bf16 %v5398_v46, %v5397_v60  ;;  %v5431_v54 = vld [vmem:[#allocation3 + $0x12a0] sm:$0xff]  ;;  %v8450_v47 = vpack.c.bf16 %v5416_v51, %v5415_v49  ;;  %v5379_v5 = vrot.slane %v11455_v4, 3  ;;  %v8490_v51 = vpack.c.bf16 %v5601_v42, %v5600_v40  ;;  %v5640_v40 = vld [vmem:[#allocation3 + $0x1410] sm:$0xff] }
 0x3f9   :  { %8429 = vmatpush3.bf16.msra.mxu0 %v8428_v56  ;;  %8461 = vmatprep.subr.bf16.mxu1 %v8653_v7  ;;  %v5432_v56 = vld [vmem:[#allocation3 + $0x12a8] sm:$0x1]  ;;  %v5821_v42 = vld [vmem:[#allocation3 + $0x14a0] sm:$0xff] }
 0x3fa   :  { %8431 = vmatprep.subr.bf16.mxu0 %v8430_v17  ;;  %7562 = vmatprep.mubr.msk.f32.mxu1 %vm8654_vm4, %v8650_v43  ;;  %v5399_v17 = vld [vmem:[#allocation3 + $0x11a0] sm:$0xff]  ;;  %v5385_v12 = vsel %vm2885_vm5, %v5373_v2, %v5379_v5  ;;  %v5604_v5 = vld [vmem:[#allocation3 + $0x12f0] sm:$0xff] }
 0x3fb   :  { %v6594_v22 = vpop.f32.mrb[32].mxu0  ;;  %5503 = vmatprep.mubr.f32.mxu0 %v5384_v19  ;;  %v8477_v19 = vpack.c.bf16 %v5432_v56, %v5431_v54  ;;  %v5603_v56 = vld [vmem:[#allocation3 + $0x12e8] sm:$0xff] }
 0x3fc   :  { %v6595_v14 = vpop.f32.mrb[33].mxu0  ;;  %8463 = vmatpush3.bf16.msra.mxu1 %v8462_v28  ;;  %v8452_v28 = vpack.c.bf16 %v5400_v58, %v5399_v17  ;;  %v5633_v17 = vld [vmem:[#allocation3 + $0x13d8] sm:$0xff] }
 0x3fd   :  { %v6596_v15 = vadd.f32 %v6595_v14, %v6594_v22  ;;  %8433 = vmatpush3.bf16.msra.mxu0 %v8432_v20  ;;  %8464 = vmatprep.subr.bf16.mxu1 %v8653_v7  ;;  %v5596_v20 = vld [vmem:[#allocation3 + $0x12b0] sm:$0xff]  ;;  %v5614_v22 = vld [vmem:[#allocation3 + $0x1340] sm:$0xff]  ;;  %v5581_v14 = vrot.slane %v11427_v38, 5 }
 0x3fe   :  { %8435 = vmatprep.subr.bf16.mxu0 %v8434_v1  ;;  %v8484_v23 = vpack.c.bf16 %v5615_v11, %v5614_v22  ;;  %v5607_v11 = vld [vmem:[#allocation3 + $0x1308] sm:$0xff] }
 0x3ff   :  { %v3910_v30 = vadd.f32 %v6596_v15, %v3909_v62  ;;  %v5417_v62 = vld [vmem:[#allocation3 + $0x1230] sm:$0xff]  ;;  %v5587_v15 = vrot.slane %v11449_v6, 4 }
 0x400   :  { %8466 = vmatpush3.bf16.msra.mxu1 %v8465_v16  ;;  %v8454_v1 = vpack.c.bf16 %v5418_v0, %v5417_v62  ;;  %v8482_v16 = vpack.c.bf16 %v5597_v26, %v5596_v20  ;;  %v5634_v20 = vld [vmem:[#allocation3 + $0x13e0] sm:$0xff]  ;;  %v5623_v26 = vld [vmem:[#allocation3 + $0x1388] sm:$0xff] }
 0x401   :  { %8437 = vmatpush3.bf16.msra.mxu0 %v8436_v13  ;;  %v11735_v36 = vadd.f32 %v3910_v30, %v11710_v55  ;;  %8467 = vmatprep.subr.bf16.mxu1 %v8653_v7  ;;  %v5430_v55 = vld [vmem:[#allocation3 + $0x1298] sm:$0xff]  ;;  %v8456_v13 = vpack.c.bf16 %v5402_v9, %v5401_v8  ;;  %v5628_v30 = vld [vmem:[#allocation3 + $0x13b0] sm:$0xff] }
 0x402   :  { %8439 = vmatprep.subr.bf16.mxu0 %v8438_v57  ;;  %v8474_v52 = vpack.c.bf16 %v5430_v55, %v5429_v45  ;;  %v5377_v57 = vrot.slane %v11452_v3, 3  ;;  %v8513_v39 = vpack.c.bf16 %v5629_v31, %v5628_v30  ;;  %v5619_v55 = vld [vmem:[#allocation3 + $0x1368] sm:$0xff]  ;;  %v5626_v31 = vld [vmem:[#allocation3 + $0x13a0] sm:$0xff] }
 0x403   :  { %v5639_v30 = vld [vmem:[#allocation3 + $0x1408] sm:$0xff] }
 0x404   :  { %8469 = vmatpush3.bf16.msra.mxu1 %v8468_v29  ;;  %v5617_v29 = vld [vmem:[#allocation3 + $0x1358] sm:$0xff]  ;;  %v5383_v35 = vsel %vm2885_vm5, %v5371_v18, %v5377_v57  ;;  %v5608_v57 = vld [vmem:[#allocation3 + $0x1310] sm:$0xff] }
 0x405   :  { %8441 = vmatpush3.bf16.msra.mxu0 %v8440_v33  ;;  %8470 = vmatprep.subr.bf16.mxu1 %v8653_v7  ;;  %v5593_v33 = vsel %vm2885_vm5, %v5581_v14, %v5587_v15  ;;  %v8488_v48 = vpack.c.bf16 %v5617_v29, %v5616_v32  ;;  %v5637_v14 = vld [vmem:[#allocation3 + $0x13f8] sm:$0xff]  ;;  %v5624_v15 = vld [vmem:[#allocation3 + $0x1390] sm:$0xff]  ;;  %v5627_v32 = vld [vmem:[#allocation3 + $0x13a8] sm:$0xff] }
 0x406   :  { %8443 = vmatprep.subr.bf16.mxu0 %v8442_v37  ;;  %v8486_v37 = vpack.c.bf16 %v5599_v25, %v5598_v21  ;;  %v5638_v25 = vld [vmem:[#allocation3 + $0x1400] sm:$0xff] }
 0x408   :  { %8472 = vmatpush3.bf16.msra.mxu1 %v8471_v10  ;;  %v5631_v10 = vld [vmem:[#allocation3 + $0x13c8] sm:$0xff] }
 0x409   :  { %8445 = vmatpush3.bf16.msra.mxu0 %v8444_v59  ;;  %8473 = vmatprep.subr.bf16.mxu1 %v8653_v7 }
 0x40a   :  { %8447 = vmatprep.subr.bf16.mxu0 %v8446_v50  ;;  %v5618_v50 = vld [vmem:[#allocation3 + $0x1360] sm:$0xff] }
 0x40b   :  { %v8492_v54 = vpack.c.bf16 %v5619_v55, %v5618_v50  ;;  %v5837_v55 = vld [vmem:[#allocation3 + $0x1520] sm:$0xff] }
 0x40c   :  { %8475 = vmatpush3.bf16.msra.mxu1 %v8474_v52  ;;  %v8516_v52 = vpack.c.bf16 %v5631_v10, %v5630_v44  ;;  %v5822_v44 = vld [vmem:[#allocation3 + $0x14a8] sm:$0xff]  ;;  %v5580_v10 = vrot.slane %v11424_v34, 5 }
 0x40d   :  { %8449 = vmatpush3.bf16.msra.mxu0 %v8448_v41  ;;  %8476 = vmatprep.subr.bf16.mxu1 %v8653_v7  ;;  %v5602_v41 = vld [vmem:[#allocation3 + $0x12e0] sm:$0xff] }
 0x40e   :  { %8451 = vmatprep.subr.bf16.mxu0 %v8450_v47  ;;  %v5632_v47 = vld [vmem:[#allocation3 + $0x13d0] sm:$0xff]  ;;  %v8494_v0 = vpack.c.bf16 %v5603_v56, %v5602_v41  ;;  %v5806_v41 = vld [vmem:[#allocation3 + $0x1428] sm:$0xff]  ;;  %v5824_v56 = vld [vmem:[#allocation3 + $0x14b8] sm:$0xff] }
 0x40f   :  { %v8519_v2 = vpack.c.bf16 %v5633_v17, %v5632_v47  ;;  %v5790_v17 = vrot.slane %v11427_v38, 6 }
 0x410   :  { %8479 = vmatpush3.bf16.msk.msra.mxu1 %vm11470_vm6, %v8477_v19  ;;  %v8496_v19 = vpack.c.bf16 %v5621_v61, %v5620_v53 }
 0x411   :  { %8453 = vmatpush3.bf16.msra.mxu0 %v8452_v28  ;;  %8481 = vmatprep.subr.bf16.mxu1 %v8480_v24  ;;  %v5605_v28 = vld [vmem:[#allocation3 + $0x12f8] sm:$0xff]  ;;  %v5635_v24 = vld [vmem:[#allocation3 + $0x13e8] sm:$0xff] }
 0x412   :  { %8455 = vmatprep.subr.bf16.mxu0 %v8454_v1  ;;  %v5622_v1 = vld [vmem:[#allocation3 + $0x1380] sm:$0xff]  ;;  %v8498_v8 = vpack.c.bf16 %v5605_v28, %v5604_v5  ;;  %v8522_v9 = vpack.c.bf16 %v5635_v24, %v5634_v20  ;;  %v5807_v28 = vld [vmem:[#allocation3 + $0x1430] sm:$0xff]  ;;  %v5808_v20 = vld [vmem:[#allocation3 + $0x1438] sm:$0xff] }
 0x413   :  { %7563 = vmatmul.mubr.msk.f32.vlgmr.msra.gmra.mrb[48].mxu1 %vm2994_vm7, %v5385_v12  ;;  %v8500_v22 = vpack.c.bf16 %v5623_v26, %v5622_v1  ;;  %v5636_v12 = vld [vmem:[#allocation3 + $0x13f0] sm:$0xff]  ;;  %v5825_v1 = vld [vmem:[#allocation3 + $0x14c0] sm:$0xff]  ;;  %v5826_v26 = vld [vmem:[#allocation3 + $0x14c8] sm:$0xff] }
 0x414   :  { %8483 = vmatpush3.bf16.msra.mxu1 %v8482_v16  ;;  %5712 = vmatprep.mubr.f32.mxu1 %v5593_v33  ;;  %v5625_v16 = vld [vmem:[#allocation3 + $0x1398] sm:$0xff]  ;;  %v8525_v18 = vpack.c.bf16 %v5637_v14, %v5636_v12  ;;  %v8528_v33 = vpack.c.bf16 %v5639_v30, %v5638_v25  ;;  %v8542_v12 = vpack.c.bf16 %v5826_v26, %v5825_v1  ;;  %v5842_v14 = vld [vmem:[#allocation3 + $0x1548] sm:$0xff]  ;;  %v5791_v26 = vrot.slane %v11446_v63, 6 }
 0x415   :  { %8457 = vmatpush3.bf16.msra.mxu0 %v8456_v13  ;;  %8485 = vmatprep.subr.bf16.mxu1 %v8484_v23  ;;  %v8504_v21 = vpack.c.bf16 %v5625_v16, %v5624_v15  ;;  %v5609_v23 = vld [vmem:[#allocation3 + $0x1318] sm:$0xff]  ;;  %v5809_v15 = vld [vmem:[#allocation3 + $0x1440] sm:$0xff]  ;;  %v5810_v16 = vld [vmem:[#allocation3 + $0x1448] sm:$0xff] }
 0x416   :  { %8512 = vmatprep.subr.bf16.mxu0 %v8653_v7  ;;  %v6644_v59 = vpop.f32.mrb[34].mxu1  ;;  %v8506_v29 = vpack.c.bf16 %v5609_v23, %v5608_v57  ;;  %v5828_v57 = vld [vmem:[#allocation3 + $0x14d8] sm:$0xff]  ;;  %v8544_v30 = vpack.c.bf16 %v5810_v16, %v5809_v15  ;;  %v5819_v15 = vld [vmem:[#allocation3 + $0x1490] sm:$0xff] }
 0x417   :  { %v4118_v45 = vpop.f32.mrb[34].mxu0  ;;  %v6645_v60 = vpop.f32.mrb[35].mxu1  ;;  %v5836_v1 = vld [vmem:[#allocation3 + $0x1518] sm:$0xff] }
 0x418   :  { %5504 = vmatmul.mubr.f32.vlgmr.msra.gmra.mrb[48].mxu0 %v5383_v35  ;;  %v7347_v46 = vpop.f32.mrb[35].mxu0  ;;  %v6646_v49 = vadd.f32 %v6645_v60, %v6644_v59  ;;  %8487 = vmatpush3.bf16.msra.mxu1 %v8486_v37  ;;  %v5610_v35 = vld [vmem:[#allocation3 + $0x1320] sm:$0xff]  ;;  %v8508_v37 = vpack.c.bf16 %v5627_v32, %v5626_v31  ;;  %v5586_v59 = vrot.slane %v11452_v3, 4  ;;  %v5582_v60 = vrot.slane %v11446_v63, 5  ;;  %v5843_v31 = vld [vmem:[#allocation3 + $0x1550] sm:$0xff]  ;;  %v5820_v16 = vld [vmem:[#allocation3 + $0x1498] sm:$0xff] }
 0x419   :  { %8514 = vmatpush3.bf16.msra.mxu0 %v8513_v39  ;;  %8489 = vmatprep.subr.bf16.mxu1 %v8488_v48  ;;  %v5611_v39 = vld [vmem:[#allocation3 + $0x1328] sm:$0xff]  ;;  %v5641_v48 = vld [vmem:[#allocation3 + $0x1418] sm:$0x1]  ;;  %v5588_v46 = vrot.slane %v11455_v4, 4 }
 0x41a   :  { %8515 = vmatprep.subr.bf16.mxu0 %v8653_v7  ;;  %v4119_v58 = vadd.f32 %v6646_v49, %v4118_v45  ;;  %7593 = vmatprep.mubr.msk.f32.mxu0 %vm8654_vm4, %v8650_v43  ;;  %v8510_v45 = vpack.c.bf16 %v5611_v39, %v5610_v35  ;;  %v8531_v50 = vpack.c.bf16 %v5641_v48, %v5640_v40  ;;  %v5812_v35 = vld [vmem:[#allocation3 + $0x1458] sm:$0xff]  ;;  %v5829_v39 = vld [vmem:[#allocation3 + $0x14e0] sm:$0xff]  ;;  %v5830_v40 = vld [vmem:[#allocation3 + $0x14e8] sm:$0xff] }
 0x41b   :  { %v8534_v49 = vpack.c.bf16 %v5822_v44, %v5821_v42  ;;  %v5592_v47 = vsel %vm2885_vm5, %v5580_v10, %v5586_v59  ;;  %v5594_v61 = vsel %vm2885_vm5, %v5582_v60, %v5588_v46  ;;  %v5845_v44 = vld [vmem:[#allocation3 + $0x1560] sm:$0xff]  ;;  %v8550_v59 = vpack.c.bf16 %v5830_v40, %v5829_v39  ;;  %v5831_v60 = vld [vmem:[#allocation3 + $0x14f0] sm:$0xff]  ;;  %v5832_v46 = vld [vmem:[#allocation3 + $0x14f8] sm:$0xff] }
 0x41c   :  { %v11758_v62 = vadd.f32 %v4119_v58, %v11735_v36  ;;  %8491 = vmatpush3.bf16.msra.mxu1 %v8490_v51  ;;  %v5606_v36 = vld [vmem:[#allocation3 + $0x1300] sm:$0xff]  ;;  %v5838_v51 = vld [vmem:[#allocation3 + $0x1528] sm:$0xff]  ;;  %v5796_v58 = vrot.slane %v11449_v6, 5  ;;  %v6047_v39 = vld [vmem:[#allocation3 + $0x1698] sm:$0xff] }
 0x41d   :  { %8517 = vmatpush3.bf16.msra.mxu0 %v8516_v52  ;;  %8493 = vmatprep.subr.bf16.mxu1 %v8492_v54  ;;  %v8502_v13 = vpack.c.bf16 %v5607_v11, %v5606_v36  ;;  %v5805_v52 = vld [vmem:[#allocation3 + $0x1420] sm:$0xff]  ;;  %v5823_v54 = vld [vmem:[#allocation3 + $0x14b0] sm:$0xff]  ;;  %v8567_v53 = vpack.c.bf16 %v5838_v51, %v5837_v55  ;;  %v5814_v55 = vld [vmem:[#allocation3 + $0x1468] sm:$0xff] }
 0x41e   :  { %8518 = vmatprep.subr.bf16.mxu0 %v8653_v7  ;;  %v8538_v5 = vpack.c.bf16 %v5824_v56, %v5823_v54  ;;  %v5841_v11 = vld [vmem:[#allocation3 + $0x1540] sm:$0xff]  ;;  %v5815_v54 = vld [vmem:[#allocation3 + $0x1470] sm:$0xff]  ;;  %v5816_v56 = vld [vmem:[#allocation3 + $0x1478] sm:$0xff] }
 0x41f   :  { %v8573_v25 = vpack.c.bf16 %v5842_v14, %v5841_v11  ;;  %v6015_v14 = vld [vmem:[#allocation3 + $0x1598] sm:$0xff] }
 0x420   :  { %8495 = vmatpush3.bf16.msra.mxu1 %v8494_v0  ;;  %v8536_v0 = vpack.c.bf16 %v5806_v41, %v5805_v52  ;;  %v5847_v52 = vld [vmem:[#allocation3 + $0x1570] sm:$0xff]  ;;  %v8554_v41 = vpack.c.bf16 %v5832_v46, %v5831_v60  ;;  %v6035_v40 = vld [vmem:[#allocation3 + $0x1638] sm:$0xff]  ;;  %v6049_v60 = vld [vmem:[#allocation3 + $0x16a8] sm:$0xff] }
 0x421   :  { %8520 = vmatpush3.bf16.msra.mxu0 %v8519_v2  ;;  %8497 = vmatprep.subr.bf16.mxu1 %v8496_v19  ;;  %v5839_v2 = vld [vmem:[#allocation3 + $0x1530] sm:$0xff]  ;;  %v5840_v19 = vld [vmem:[#allocation3 + $0x1538] sm:$0xff] }
 0x422   :  { %8521 = vmatprep.subr.bf16.mxu0 %v8653_v7  ;;  %v8570_v36 = vpack.c.bf16 %v5840_v19, %v5839_v2  ;;  %v5818_v19 = vld [vmem:[#allocation3 + $0x1488] sm:$0xff] }
 0x424   :  { %8499 = vmatpush3.bf16.msra.mxu1 %v8498_v8 }
 0x425   :  { %8523 = vmatpush3.bf16.msra.mxu0 %v8522_v9  ;;  %8501 = vmatprep.subr.bf16.mxu1 %v8500_v22  ;;  %v5802_v9 = vsel %vm2885_vm5, %v5790_v17, %v5796_v58  ;;  %v8540_v22 = vpack.c.bf16 %v5808_v20, %v5807_v28  ;;  %v5834_v17 = vld [vmem:[#allocation3 + $0x1508] sm:$0xff]  ;;  %v6030_v28 = vld [vmem:[#allocation3 + $0x1610] sm:$0xff]  ;;  %v6031_v20 = vld [vmem:[#allocation3 + $0x1618] sm:$0xff] }
 0x426   :  { %8524 = vmatprep.subr.bf16.mxu0 %v8653_v7  ;;  %v8588_v11 = vpack.c.bf16 %v6031_v20, %v6030_v28 }
 0x428   :  { %8503 = vmatpush3.bf16.msra.mxu1 %v8502_v13 }
 0x429   :  { %8526 = vmatpush3.bf16.msra.mxu0 %v8525_v18  ;;  %8505 = vmatprep.subr.bf16.mxu1 %v8504_v21  ;;  %v5827_v18 = vld [vmem:[#allocation3 + $0x14d0] sm:$0xff] }
 0x42a   :  { %8527 = vmatprep.subr.bf16.mxu0 %v8653_v7  ;;  %v8546_v32 = vpack.c.bf16 %v5828_v57, %v5827_v18  ;;  %v6033_v18 = vld [vmem:[#allocation3 + $0x1628] sm:$0xff] }
 0x42c   :  { %8507 = vmatpush3.bf16.msra.mxu1 %v8506_v29  ;;  %v5844_v29 = vld [vmem:[#allocation3 + $0x1558] sm:$0xff] }
 0x42d   :  { %8529 = vmatpush3.bf16.msra.mxu0 %v8528_v33  ;;  %8509 = vmatprep.subr.bf16.mxu1 %v8508_v37  ;;  %v5811_v33 = vld [vmem:[#allocation3 + $0x1450] sm:$0xff]  ;;  %v8576_v48 = vpack.c.bf16 %v5844_v29, %v5843_v31  ;;  %v5789_v31 = vrot.slane %v11424_v34, 6  ;;  %v6016_v29 = vld [vmem:[#allocation3 + $0x15a0] sm:$0xff] }
 0x42e   :  { %8530 = vmatprep.subr.bf16.mxu0 %v8653_v7  ;;  %v8548_v42 = vpack.c.bf16 %v5812_v35, %v5811_v33  ;;  %v6017_v35 = vld [vmem:[#allocation3 + $0x15a8] sm:$0xff] }
 0x430   :  { %8511 = vmatpush3.bf16.msra.mxu1 %v8510_v45  ;;  %v5846_v45 = vld [vmem:[#allocation3 + $0x1568] sm:$0xff] }
 0x431   :  { %8533 = vmatpush3.bf16.msk.msra.mxu0 %vm11470_vm6, %v8531_v50  ;;  %8566 = vmatprep.subr.bf16.mxu1 %v8653_v7  ;;  %v5813_v50 = vld [vmem:[#allocation3 + $0x1460] sm:$0xff] }
 0x432   :  { %8535 = vmatprep.subr.bf16.mxu0 %v8534_v49  ;;  %v4327_v24 = vpop.f32.mrb[36].mxu1  ;;  %v8579_v49 = vpack.c.bf16 %v5846_v45, %v5845_v44  ;;  %v8552_v51 = vpack.c.bf16 %v5814_v55, %v5813_v50  ;;  %v6019_v50 = vld [vmem:[#allocation3 + $0x15b8] sm:$0xff]  ;;  %v6048_v55 = vld [vmem:[#allocation3 + $0x16a0] sm:$0xff] }
 0x433   :  { %v7378_v8 = vpop.f32.mrb[37].mxu1  ;;  %5713 = vmatmul.mubr.f32.vlgmr.msra.gmra.mrb[50].mxu1 %v5592_v47  ;;  %v5833_v47 = vld [vmem:[#allocation3 + $0x1500] sm:$0xff] }
 0x434   :  { %7594 = vmatmul.mubr.msk.f32.vlgmr.msra.gmra.mrb[50].mxu0 %vm2994_vm7, %v5594_v61  ;;  %8568 = vmatpush3.bf16.msra.mxu1 %v8567_v53  ;;  %v8556_v53 = vpack.c.bf16 %v5816_v56, %v5815_v54  ;;  %v5849_v61 = vld [vmem:[#allocation3 + $0x1580] sm:$0xff]  ;;  %v8558_v2 = vpack.c.bf16 %v5834_v17, %v5833_v47  ;;  %v5797_v8 = vrot.slane %v11455_v4, 5  ;;  %v8624_v47 = vpack.c.bf16 %v6049_v60, %v6048_v55 }
 0x435   :  { %8537 = vmatpush3.bf16.msra.mxu0 %v8536_v0  ;;  %8569 = vmatprep.subr.bf16.mxu1 %v8653_v7  ;;  %v5850_v0 = vld [vmem:[#allocation3 + $0x1588] sm:$0x1]  ;;  %v6020_v17 = vld [vmem:[#allocation3 + $0x15c0] sm:$0xff]  ;;  %v6000_v55 = vrot.slane %v11446_v63, 7  ;;  %v6006_v60 = vrot.slane %v11455_v4, 6 }
 0x436   :  { %8539 = vmatprep.subr.bf16.mxu0 %v8538_v5  ;;  %7624 = vmatprep.mubr.msk.f32.mxu1 %vm8654_vm4, %v8650_v43  ;;  %v5817_v5 = vld [vmem:[#allocation3 + $0x1480] sm:$0xff]  ;;  %v5803_v57 = vsel %vm2885_vm5, %v5791_v26, %v5797_v8  ;;  %v6023_v8 = vld [vmem:[#allocation3 + $0x15d8] sm:$0xff] }
 0x437   :  { %v6694_v13 = vpop.f32.mrb[36].mxu0  ;;  %5921 = vmatprep.mubr.f32.mxu0 %v5802_v9  ;;  %v8585_v9 = vpack.c.bf16 %v5850_v0, %v5849_v61  ;;  %v6050_v61 = vld [vmem:[#allocation3 + $0x16b0] sm:$0xff]  ;;  %v6051_v0 = vld [vmem:[#allocation3 + $0x16b8] sm:$0xff] }
 0x438   :  { %v6695_v21 = vpop.f32.mrb[37].mxu0  ;;  %8571 = vmatpush3.bf16.msra.mxu1 %v8570_v36  ;;  %v8560_v36 = vpack.c.bf16 %v5818_v19, %v5817_v5  ;;  %v6038_v5 = vld [vmem:[#allocation3 + $0x1650] sm:$0xff]  ;;  %v6039_v19 = vld [vmem:[#allocation3 + $0x1658] sm:$0xff] }
 0x439   :  { %v6696_v23 = vadd.f32 %v6695_v21, %v6694_v13  ;;  %8541 = vmatpush3.bf16.msra.mxu0 %v8540_v22  ;;  %8572 = vmatprep.subr.bf16.mxu1 %v8653_v7  ;;  %v6014_v22 = vld [vmem:[#allocation3 + $0x1590] sm:$0xff]  ;;  %v6032_v13 = vld [vmem:[#allocation3 + $0x1620] sm:$0xff]  ;;  %v5999_v21 = vrot.slane %v11427_v38, 7  ;;  %v8604_v26 = vpack.c.bf16 %v6039_v19, %v6038_v5 }
 0x43a   :  { %8543 = vmatprep.subr.bf16.mxu0 %v8542_v12  ;;  %v8592_v33 = vpack.c.bf16 %v6033_v18, %v6032_v13  ;;  %v6034_v38 = vld [vmem:[#allocation3 + $0x1630] sm:$0xff]  ;;  %v6055_v13 = vld [vmem:[#allocation3 + $0x16d8] sm:$0xff] }
 0x43b   :  { %v4328_v37 = vadd.f32 %v6696_v23, %v4327_v24  ;;  %v5835_v24 = vld [vmem:[#allocation3 + $0x1510] sm:$0xff]  ;;  %v6005_v23 = vrot.slane %v11449_v6, 6  ;;  %v8596_v45 = vpack.c.bf16 %v6035_v40, %v6034_v38  ;;  %v6029_v40 = vld [vmem:[#allocation3 + $0x1608] sm:$0xff] }
 0x43c   :  { %8574 = vmatpush3.bf16.msra.mxu1 %v8573_v25  ;;  %v8562_v12 = vpack.c.bf16 %v5836_v1, %v5835_v24  ;;  %v8590_v25 = vpack.c.bf16 %v6015_v14, %v6014_v22  ;;  %v8627_v24 = vpack.c.bf16 %v6051_v0, %v6050_v61  ;;  %v6022_v1 = vld [vmem:[#allocation3 + $0x15d0] sm:$0xff]  ;;  %v6040_v22 = vld [vmem:[#allocation3 + $0x1660] sm:$0xff] }
 0x43d   :  { %8545 = vmatpush3.bf16.msra.mxu0 %v8544_v30  ;;  %v11783_v10 = vadd.f32 %v4328_v37, %v11758_v62  ;;  %8575 = vmatprep.subr.bf16.mxu1 %v8653_v7  ;;  %v5848_v62 = vld [vmem:[#allocation3 + $0x1578] sm:$0xff]  ;;  %v8564_v30 = vpack.c.bf16 %v5820_v16, %v5819_v15  ;;  %v6046_v37 = vld [vmem:[#allocation3 + $0x1690] sm:$0xff]  ;;  %v6011_v6 = vsel %vm2885_vm5, %v5999_v21, %v6005_v23  ;;  %v6025_v15 = vld [vmem:[#allocation3 + $0x15e8] sm:$0xff] }
 0x43e   :  { %8547 = vmatprep.subr.bf16.mxu0 %v8546_v32  ;;  %v8582_v58 = vpack.c.bf16 %v5848_v62, %v5847_v52  ;;  %v5795_v32 = vrot.slane %v11452_v3, 5  ;;  %v8621_v44 = vpack.c.bf16 %v6047_v39, %v6046_v37  ;;  %v6037_v52 = vld [vmem:[#allocation3 + $0x1648] sm:$0xff]  ;;  %v6054_v16 = vld [vmem:[#allocation3 + $0x16d0] sm:$0xff]  ;;  %v6028_v37 = vld [vmem:[#allocation3 + $0x1600] sm:$0xff] }
 0x43f   :  { %v6042_v18 = vld [vmem:[#allocation3 + $0x1670] sm:$0xff]  ;;  %v8633_v23 = vpack.c.bf16 %v6055_v13, %v6054_v16 }
 0x440   :  { %8577 = vmatpush3.bf16.msra.mxu1 %v8576_v48  ;;  %v5801_v48 = vsel %vm2885_vm5, %v5789_v31, %v5795_v32  ;;  %v6027_v31 = vld [vmem:[#allocation3 + $0x15f8] sm:$0xff]  ;;  %v6056_v32 = vld [vmem:[#allocation3 + $0x16e0] sm:$0xff] }
 0x441   :  { %8549 = vmatpush3.bf16.msra.mxu0 %v8548_v42  ;;  %8578 = vmatprep.subr.bf16.mxu1 %v8653_v7  ;;  %v8594_v42 = vpack.c.bf16 %v6017_v35, %v6016_v29  ;;  %v6057_v29 = vld [vmem:[#allocation3 + $0x16e8] sm:$0xff] }
 0x442   :  { %8551 = vmatprep.subr.bf16.mxu0 %v8550_v59  ;;  %v6018_v59 = vld [vmem:[#allocation3 + $0x15b0] sm:$0xff]  ;;  %v6045_v35 = vld [vmem:[#allocation3 + $0x1688] sm:$0xff]  ;;  %v8636_v38 = vpack.c.bf16 %v6057_v29, %v6056_v32 }
 0x443   :  { %v8598_v56 = vpack.c.bf16 %v6019_v50, %v6018_v59  ;;  %v6004_v50 = vrot.slane %v11452_v3, 6 }
 0x444   :  { %8580 = vmatpush3.bf16.msra.mxu1 %v8579_v49 }
 0x445   :  { %8553 = vmatpush3.bf16.msra.mxu0 %v8552_v51  ;;  %8581 = vmatprep.subr.bf16.mxu1 %v8653_v7  ;;  %v6036_v51 = vld [vmem:[#allocation3 + $0x1640] sm:$0xff] }
 0x446   :  { %8555 = vmatprep.subr.bf16.mxu0 %v8554_v41 }
 0x448   :  { %8583 = vmatpush3.bf16.msra.mxu1 %v8582_v58  ;;  %v8600_v58 = vpack.c.bf16 %v6037_v52, %v6036_v51 }
 0x449   :  { %8557 = vmatpush3.bf16.msra.mxu0 %v8556_v53  ;;  %8584 = vmatprep.subr.bf16.mxu1 %v8653_v7  ;;  %v6021_v53 = vld [vmem:[#allocation3 + $0x15c8] sm:$0xff] }
 0x44a   :  { %8559 = vmatprep.subr.bf16.mxu0 %v8558_v2  ;;  %v8602_v20 = vpack.c.bf16 %v6021_v53, %v6020_v17 }
 0x44c   :  { %8587 = vmatpush3.bf16.msk.msra.mxu1 %vm11470_vm6, %v8585_v9  ;;  %v6052_v9 = vld [vmem:[#allocation3 + $0x16c0] sm:$0xff] }
 0x44d   :  { %8561 = vmatpush3.bf16.msra.mxu0 %v8560_v36  ;;  %8589 = vmatprep.subr.bf16.mxu1 %v8588_v11  ;;  %v6053_v36 = vld [vmem:[#allocation3 + $0x16c8] sm:$0xff] }
 0x44e   :  { %8563 = vmatprep.subr.bf16.mxu0 %v8562_v12  ;;  %v6041_v11 = vld [vmem:[#allocation3 + $0x1668] sm:$0xff]  ;;  %v8630_v12 = vpack.c.bf16 %v6053_v36, %v6052_v9 }
 0x44f   :  { %7625 = vmatmul.mubr.msk.f32.vlgmr.msra.gmra.mrb[52].mxu1 %vm2994_vm7, %v5803_v57  ;;  %v8608_v14 = vpack.c.bf16 %v6041_v11, %v6040_v22  ;;  %v6043_v57 = vld [vmem:[#allocation3 + $0x1678] sm:$0xff] }
 0x450   :  { %8591 = vmatpush3.bf16.msra.mxu1 %v8590_v25  ;;  %6130 = vmatprep.mubr.f32.mxu1 %v6011_v6  ;;  %v6026_v25 = vld [vmem:[#allocation3 + $0x15f0] sm:$0xff] }
 0x451   :  { %8565 = vmatpush3.bf16.msra.mxu0 %v8564_v30  ;;  %8593 = vmatprep.subr.bf16.mxu1 %v8592_v33  ;;  %v8612_v30 = vpack.c.bf16 %v6043_v57, %v6042_v18  ;;  %v6044_v33 = vld [vmem:[#allocation3 + $0x1680] sm:$0xff]  ;;  %v8614_v39 = vpack.c.bf16 %v6027_v31, %v6026_v25  ;;  %v6058_v6 = vld [vmem:[#allocation3 + $0x16f0] sm:$0xff] }
 0x452   :  { %8620 = vmatprep.subr.bf16.mxu0 %v8653_v7  ;;  %v6744_v46 = vpop.f32.mrb[38].mxu1 }
 0x453   :  { %v4536_v49 = vpop.f32.mrb[38].mxu0  ;;  %v6745_v41 = vpop.f32.mrb[39].mxu1 }
 0x454   :  { %5922 = vmatmul.mubr.f32.vlgmr.msra.gmra.mrb[52].mxu0 %v5801_v48  ;;  %v7409_v62 = vpop.f32.mrb[39].mxu0  ;;  %v6746_v54 = vadd.f32 %v6745_v41, %v6744_v46  ;;  %8595 = vmatpush3.bf16.msra.mxu1 %v8594_v42  ;;  %v6059_v48 = vld [vmem:[#allocation3 + $0x16f8] sm:$0x1]  ;;  %v8616_v42 = vpack.c.bf16 %v6045_v35, %v6044_v33 }
 0x455   :  { %8622 = vmatpush3.bf16.msra.mxu0 %v8621_v44  ;;  %8597 = vmatprep.subr.bf16.mxu1 %v8596_v45  ;;  %v8618_v44 = vpack.c.bf16 %v6029_v40, %v6028_v37  ;;  %v8639_v59 = vpack.c.bf16 %v6059_v48, %v6058_v6  ;;  %v5998_v45 = vrot.slane %v11424_v34, 7 }
 0x456   :  { %8623 = vmatprep.subr.bf16.mxu0 %v8653_v7  ;;  %v4537_v2 = vadd.f32 %v6746_v54, %v4536_v49  ;;  %7655 = vmatprep.mubr.msk.f32.mxu0 %vm8654_vm4, %v8650_v43  ;;  %v8606_v43 = vpack.c.bf16 %v6023_v8, %v6022_v1  ;;  %v6012_v49 = vsel %vm2885_vm5, %v6000_v55, %v6006_v60 }
 0x457   :  { %v6010_v46 = vsel %vm2885_vm5, %v5998_v45, %v6004_v50  ;;  %v6359_v45 = vld [vmem:[%s11836_s4] ss:$0 sm:$0xff] }
 0x458   :  { %v11806_v28 = vadd.f32 %v4537_v2, %v11783_v10  ;;  %8599 = vmatpush3.bf16.msra.mxu1 %v8598_v56  ;;  %v6024_v10 = vld [vmem:[#allocation3 + $0x15e0] sm:$0xff] }
 0x459   :  { %8625 = vmatpush3.bf16.msra.mxu0 %v8624_v47  ;;  %8601 = vmatprep.subr.bf16.mxu1 %v8600_v58  ;;  %v8610_v21 = vpack.c.bf16 %v6025_v15, %v6024_v10 }
 0x45a   :  { %8626 = vmatprep.subr.bf16.mxu0 %v8653_v7 }
 0x45c   :  { %8603 = vmatpush3.bf16.msra.mxu1 %v8602_v20 }
 0x45d   :  { %8628 = vmatpush3.bf16.msra.mxu0 %v8627_v24  ;;  %8605 = vmatprep.subr.bf16.mxu1 %v8604_v26 }
 0x45e   :  { %8629 = vmatprep.subr.bf16.mxu0 %v8653_v7 }
 0x460   :  { %8607 = vmatpush3.bf16.msra.mxu1 %v8606_v43 }
 0x461   :  { %8631 = vmatpush3.bf16.msra.mxu0 %v8630_v12  ;;  %8609 = vmatprep.subr.bf16.mxu1 %v8608_v14 }
 0x462   :  { %8632 = vmatprep.subr.bf16.mxu0 %v8653_v7 }
 0x464   :  { %8611 = vmatpush3.bf16.msra.mxu1 %v8610_v21 }
 0x465   :  { %8634 = vmatpush3.bf16.msra.mxu0 %v8633_v23  ;;  %8613 = vmatprep.subr.bf16.mxu1 %v8612_v30 }
 0x466   :  { %8635 = vmatprep.subr.bf16.mxu0 %v8653_v7 }
 0x468   :  { %8615 = vmatpush3.bf16.msra.mxu1 %v8614_v39 }
 0x469   :  { %8637 = vmatpush3.bf16.msra.mxu0 %v8636_v38  ;;  %8617 = vmatprep.subr.bf16.mxu1 %v8616_v42  ;;  %v6358_v42 = vld [vmem:[%s11835_s3] ss:$0 sm:$0xff] }
 0x46a   :  { %8638 = vmatprep.subr.bf16.mxu0 %v8653_v7 }
 0x46c   :  { %8619 = vmatpush3.bf16.msra.mxu1 %v8618_v44 }
 0x46d   :  { %8641 = vmatpush3.bf16.msk.msra.mxu0 %vm11470_vm6, %v8639_v59 }
 0x46e   :  { %v4742_v51 = vpop.f32.mrb[40].mxu1 }
 0x46f   :  { %v7440_v52 = vpop.f32.mrb[41].mxu1  ;;  %6131 = vmatmul.mubr.f32.vlgmr.msra.gmra.mrb[54].mxu1 %v6010_v46  ;;  %v6360_v46 = vld [vmem:[#allocation5] ss:$0 sm:$0xff] }
 0x470   :  { %7656 = vmatmul.mubr.msk.f32.vlgmr.msra.gmra.mrb[54].mxu0 %vm2994_vm7, %v6012_v49 }
 0x473   :  { %v6794_v34 = vpop.f32.mrb[40].mxu0 }
 0x474   :  { %v6795_v63 = vpop.f32.mrb[41].mxu0 }
 0x475   :  { %v6796_v3 = vadd.f32 %v6795_v63, %v6794_v34 }
 0x477   :  { %v4743_v4 = vadd.f32 %v6796_v3, %v4742_v51 }
 0x479   :  { %v4746_v41 = vadd.f32 %v4743_v4, %v11806_v28 }
 0x48e   :  { %v6844_v7 = vpop.f32.mrb[42].mxu1 }
 0x48f   :  { %v4948_v62 = vpop.f32.mrb[42].mxu0  ;;  %v6845_v54 = vpop.f32.mrb[43].mxu1 }
 0x490   :  { %v7471_v27 = vpop.f32.mrb[43].mxu0  ;;  %v6846_v56 = vadd.f32 %v6845_v54, %v6844_v7 }
 0x492   :  { %v4949_v47 = vadd.f32 %v6846_v56, %v4948_v62 }
 0x494   :  { %v4952_v17 = vadd.f32 %v4949_v47, %v4746_v41 }
 0x4aa   :  { %v5157_v58 = vpop.f32.mrb[44].mxu1 }
 0x4ab   :  { %v7502_v53 = vpop.f32.mrb[45].mxu1 }
 0x4af   :  { %v6894_v61 = vpop.f32.mrb[44].mxu0 }
 0x4b0   :  { %v6895_v0 = vpop.f32.mrb[45].mxu0 }
 0x4b1   :  { %v6896_v2 = vadd.f32 %v6895_v0, %v6894_v61 }
 0x4b3   :  { %v5158_v5 = vadd.f32 %v6896_v2, %v5157_v58 }
 0x4b5   :  { %v5161_v19 = vadd.f32 %v5158_v5, %v4952_v17 }
 0x4ca   :  { %v6944_v20 = vpop.f32.mrb[46].mxu1 }
 0x4cb   :  { %v5366_v24 = vpop.f32.mrb[46].mxu0  ;;  %v6945_v1 = vpop.f32.mrb[47].mxu1 }
 0x4cc   :  { %v7533_v26 = vpop.f32.mrb[47].mxu0  ;;  %v6946_v8 = vadd.f32 %v6945_v1, %v6944_v20 }
 0x4ce   :  { %v5367_v28 = vadd.f32 %v6946_v8, %v5366_v24 }
 0x4d0   :  { %v5370_v9 = vadd.f32 %v5367_v28, %v5161_v19 }
 0x4e6   :  { %v5575_v36 = vpop.f32.mrb[48].mxu1 }
 0x4e7   :  { %v7564_v22 = vpop.f32.mrb[49].mxu1 }
 0x4eb   :  { %v6994_v11 = vpop.f32.mrb[48].mxu0 }
 0x4ec   :  { %v6995_v43 = vpop.f32.mrb[49].mxu0 }
 0x4ed   :  { %v6996_v12 = vadd.f32 %v6995_v43, %v6994_v11 }
 0x4ef   :  { %v5576_v10 = vadd.f32 %v6996_v12, %v5575_v36 }
 0x4f1   :  { %v5579_v14 = vadd.f32 %v5576_v10, %v5370_v9 }
 0x506   :  { %v7044_v15 = vpop.f32.mrb[50].mxu1 }
 0x507   :  { %v5784_v16 = vpop.f32.mrb[50].mxu0  ;;  %v7045_v13 = vpop.f32.mrb[51].mxu1 }
 0x508   :  { %v7595_v18 = vpop.f32.mrb[51].mxu0  ;;  %v7046_v57 = vadd.f32 %v7045_v13, %v7044_v15 }
 0x50a   :  { %v5785_v21 = vadd.f32 %v7046_v57, %v5784_v16 }
 0x50c   :  { %v5788_v23 = vadd.f32 %v5785_v21, %v5579_v14 }
 0x522   :  { %v5993_v25 = vpop.f32.mrb[52].mxu1 }
 0x523   :  { %v7626_v30 = vpop.f32.mrb[53].mxu1 }
 0x527   :  { %v7094_v31 = vpop.f32.mrb[52].mxu0 }
 0x528   :  { %v7095_v32 = vpop.f32.mrb[53].mxu0 }
 0x529   :  { %v7096_v29 = vadd.f32 %v7095_v32, %v7094_v31 }
 0x52b   :  { %v5994_v33 = vadd.f32 %v7096_v29, %v5993_v25 }
 0x52d   :  { %v5997_v35 = vadd.f32 %v5994_v33, %v5788_v23 }
 0x542   :  { %v7144_v37 = vpop.f32.mrb[54].mxu1 }
 0x543   :  { %v6202_v39 = vpop.f32.mrb[54].mxu0  ;;  %v7145_v38 = vpop.f32.mrb[55].mxu1 }
 0x544   :  { %v7657_v40 = vpop.f32.mrb[55].mxu0  ;;  %v7146_v6 = vadd.f32 %v7145_v38, %v7144_v37 }
 0x546   :  { %v6203_v48 = vadd.f32 %v7146_v6, %v6202_v39 }
 0x548   :  { %v6206_v44 = vadd.f32 %v6203_v48, %v5997_v35 }
 0x54a   :  { %v6214_v59 = vadd.f32 %v6358_v42, %v6206_v44 }
 0x54c   :  { %v6215_v50 = vmax.f32 %v6214_v59, 0.0 }
 0x54e   :  { %v6223_v55 = vmul.f32 %v6359_v45, %v6215_v50 }
 0x550   :  { %v6225_v60 = vsel %vm6224_vm8, %v6223_v55, 0.0 }
 0x551   :  { %6226 = vadd.xlane.f32.xlu0 %v6225_v60 }
 0x5de   :  { %v6227_v49 = vpop.xlane.xlu0 %6226 }
 0x5df   :  { %v6235_v51 = vadd.f32 %v6360_v46, %v6227_v49 }
 0x5e1   :  { %6237 = vst.msk [vmem:[%s11838_s7] sm:$0x3] %vm6236_vm9, %v6235_v51 }
 0x5e2   :  { %6242 = vsyncmov [#allocation4] }
 0x5e5   :  { %s6243_s3 = vpop.sfrf %6242 }
 0x5e6   :  { %p6361_p0 = scmp.ne.s32.totalorder %s6243_s3, 0 }
 0x5e8   :  { %6247 = shalt.err (%p6361_p0)  }

</bundles_post_ra>
